<compile_context>
chip_gen: v7x
topology: tpu7x:2x2x1
jax: 0.10.0
libtpu: 0.0.40
codegen_flags: <defaults>
</compile_context>

<pallas_src>
import numpy as np
import jax
import jax.numpy as jnp
from jax import lax
from jax.experimental import pallas as pl
from jax.experimental.pallas import tpu as pltpu

SELU_ALPHA = 1.6732632423543772
SELU_SCALE = 1.0507009873554805
BN_EPS = 1e-5


# ------------------------------ Pallas kernel -------------------------------

def _conv_bn_selu_pool(a, b_ref, scale_ref, bias_ref, sh_ref, sw_ref, k):
    """conv(k, stride 1, VALID) + folded-BN + SELU + MaxPool2d(3, 2), one image.

    a        : (H, W*Cin)            f32 packed activations A[h, w*Cin+ci].
    b_ref    : (k, W*Cin, Wo*Cout)   bf16 banded conv weights (one band per dh).
    scale_ref: (1, Wo*Cout)          f32 folded BN scale, tiled over wo.
    bias_ref : (1, Wo*Cout)          f32 folded BN bias (incl. conv bias), tiled.
    sh_ref   : (Hp, Ho-2)            f32 0/1 stride-2 row-subsample matrix.
    sw_ref   : ((Wo-2)*Cout, Wp*Cout) f32 0/1 stride-2 column-subsample matrix.
    returns  : (Hp, Wp*Cout)         f32 packed activations for the next layer.
    """
    ho = a.shape[0] - k + 1

    # Convolution: sum of k row-shifted banded matmuls (bf16 MXU, f32 accumulate).
    y = jnp.dot(a[0:ho, :].astype(jnp.bfloat16), b_ref[0],
                preferred_element_type=jnp.float32)
    for dh in range(1, k):
        y = y + jnp.dot(a[dh:dh + ho, :].astype(jnp.bfloat16), b_ref[dh],
                        preferred_element_type=jnp.float32)

    # Folded inference-mode BatchNorm + SELU (f32; exp rides the EUP slot).
    y = y * scale_ref[...] + bias_ref[...]
    y = SELU_SCALE * jnp.where(
        y > 0.0, y, SELU_ALPHA * (jnp.exp(jnp.minimum(y, 0.0)) - 1.0))

    # MaxPool2d(kernel=3, stride=2):
    #   3-tap running maxima along H then along W (contiguous slices only),
    #   then exact 0/1 selection matmuls do the stride-2 subsampling.
    r = jnp.maximum(jnp.maximum(y[0:ho - 2, :], y[1:ho - 1, :]), y[2:ho, :])
    cw = sw_ref.shape[0]                  # (Wo-2)*Cout
    cout = (y.shape[1] - cw) // 2         # Wo*Cout - (Wo-2)*Cout = 2*Cout
    c = jnp.maximum(jnp.maximum(r[:, 0:cw], r[:, cout:cout + cw]),
                    r[:, 2 * cout:2 * cout + cw])
    if sw_ref.shape[0] != sw_ref.shape[1]:     # square => identity => skip
        c = jnp.dot(c, sw_ref[...], preferred_element_type=jnp.float32)
    if sh_ref.shape[0] != sh_ref.shape[1]:     # square => identity => skip
        c = jnp.dot(sh_ref[...], c, preferred_element_type=jnp.float32)
    return c


def _encoder_kernel(x_ref,
                    b1_ref, s1_ref, t1_ref, sh1_ref, sw1_ref,
                    b2_ref, s2_ref, t2_ref, sh2_ref, sw2_ref,
                    b3_ref, s3_ref, t3_ref, sh3_ref, sw3_ref,
                    fcw_ref, fcb_ref, o_ref):
    a = x_ref[0]                                       # (H, W*3) f32, one image
    a = _conv_bn_selu_pool(a, b1_ref, s1_ref, t1_ref, sh1_ref, sw1_ref, k=7)
    a = _conv_bn_selu_pool(a, b2_ref, s2_ref, t2_ref, sh2_ref, sw2_ref, k=5)
    a = _conv_bn_selu_pool(a, b3_ref, s3_ref, t3_ref, sh3_ref, sw3_ref, k=5)

    # FC + ReLU, fused.  fcw_ref is (Hf, Wf*64, R) with rows pre-permuted to the
    # packed (h, w, c) order, so row-wise matmuls reproduce the PyTorch NCHW
    # flatten + nn.Linear without any in-kernel reshape/transpose.
    y = jnp.dot(a[0:1, :].astype(jnp.bfloat16), fcw_ref[0],
                preferred_element_type=jnp.float32)
    for h in range(1, a.shape[0]):
        y = y + jnp.dot(a[h:h + 1, :].astype(jnp.bfloat16), fcw_ref[h],
                        preferred_element_type=jnp.float32)
    o_ref[0] = jnp.maximum(y + fcb_ref[...], 0.0)


# ----------------------------- Pallas wrapper --------------------------------

def encoder_v1_forward(packed, x_nchw):
    """Equivalent of EncoderV1.forward(x1); x_nchw: (N, 3, H, W)."""
    n, cin, h, w = x_nchw.shape
    # NCHW -> packed (N, H, W*Cin) with A[n, h, w*Cin + c] = x[n, c, h, w].
    x_p = jnp.transpose(x_nchw, (0, 2, 3, 1)).reshape(n, h, w * cin)
    x_p = x_p.astype(jnp.float32)
    r = packed["fc_b"].shape[1]

    ins = (x_p,
           packed["B1"], packed["scale1"], packed["bias1"], packed["Sh1"], packed["Sw1"],
           packed["B2"], packed["scale2"], packed["bias2"], packed["Sh2"], packed["Sw2"],
           packed["B3"], packed["scale3"], packed["bias3"], packed["Sh3"], packed["Sw3"],
           packed["fc_w"], packed["fc_b"])

    def _whole(a):
        nd = a.ndim
        return pl.BlockSpec(a.shape, lambda *_: (0,) * nd)

    in_specs = [pl.BlockSpec((1, h, w * cin), lambda i: (i, 0, 0))]
    in_specs += [_whole(a) for a in ins[1:]]

    out = pl.pallas_call(
        _encoder_kernel,
        out_shape=jax.ShapeDtypeStruct((n, 1, r), jnp.float32),
        grid=(n,),
        in_specs=in_specs,
        out_specs=pl.BlockSpec((1, 1, r), lambda i: (i, 0, 0)),
        compiler_params=pltpu.CompilerParams(
            dimension_semantics=("parallel",),
            vmem_limit_bytes=32 * 1024 * 1024),
    )(*ins)
    return out.reshape(n, r)


# ----------------------- Parameter init & host packing -----------------------

def conv2d_size_out(s, k, stride):
    return (s - k) // stride + 1


def pool2d_size_out(s, k, stride):
    return (s - k) // stride + 1


def init_params(key, img_h, img_w, img_repr_size):
    """Random params with PyTorch semantics: HWIO conv weights + conv bias and
    inference-mode BatchNorm (gamma/beta/running stats) folded to scale/bias."""
    conv_defs = [(3, 16, 7), (16, 32, 5), (32, 64, 5)]      # (Cin, Cout, k)
    params = {}
    keys = jax.random.split(key, 6 * len(conv_defs) + 2)
    ki = 0
    for i, (cin, cout, k) in enumerate(conv_defs, start=1):
        fan_in = cin * k * k
        w = jax.random.normal(keys[ki], (k, k, cin, cout), jnp.float32)
        params[f"conv{i}_w"] = w / jnp.sqrt(float(fan_in)); ki += 1
        conv_b = 0.1 * jax.random.normal(keys[ki], (cout,), jnp.float32); ki += 1
        gamma = 1.0 + 0.1 * jax.random.normal(keys[ki], (cout,), jnp.float32); ki += 1
        beta = 0.1 * jax.random.normal(keys[ki], (cout,), jnp.float32); ki += 1
        mean = 0.1 * jax.random.normal(keys[ki], (cout,), jnp.float32); ki += 1
        var = 0.5 + jax.random.uniform(keys[ki], (cout,), jnp.float32); ki += 1
        scale = gamma / jnp.sqrt(var + BN_EPS)           # fold conv bias + BN
        bias = beta + (conv_b - mean) * scale
        params[f"scale{i}"] = scale
        params[f"bias{i}"] = bias
    h, w = img_h, img_w
    for k in (7, 5, 5):
        h = pool2d_size_out(conv2d_size_out(h, k, 1), 3, 2)
        w = pool2d_size_out(conv2d_size_out(w, k, 1), 3, 2)
    feat = h * w * 64
    params["fc_w"] = (jax.random.normal(keys[ki], (feat, img_repr_size), jnp.float32)
                      / jnp.sqrt(float(feat))); ki += 1
    params["fc_b"] = 0.1 * jax.random.normal(keys[ki], (1, img_repr_size), jnp.float32)
    return params


def pack_params(params, img_h, img_w):
    """One-off host repack into the layouts the fused kernel consumes: banded
    conv matrices (bf16), wo-tiled BN scale/bias, 0/1 pool-subsample matrices
    and an NCHW-flatten-permuted, per-row-split FC weight."""
    packed = {}
    h, w, cin = img_h, img_w, 3
    for i, k in enumerate((7, 5, 5), start=1):
        w_hwio = np.asarray(params[f"conv{i}_w"], np.float32)    # (k, k, cin, cout)
        cout = w_hwio.shape[-1]
        ho, wo = h - k + 1, w - k + 1
        # Banded matrices: B[dh, col*cin+ci, o*cout+co] = W[dh, col-o, ci, co].
        band = np.zeros((k, w * cin, wo * cout), np.float32)
        for dh in range(k):
            for dw in range(k):
                for o in range(wo):
                    col = o + dw
                    band[dh, col * cin:(col + 1) * cin,
                         o * cout:(o + 1) * cout] = w_hwio[dh, dw]
        packed[f"B{i}"] = jnp.asarray(band, jnp.bfloat16)
        scale = np.asarray(params[f"scale{i}"], np.float32).reshape(-1)
        bias = np.asarray(params[f"bias{i}"], np.float32).reshape(-1)
        packed[f"scale{i}"] = jnp.asarray(np.tile(scale, wo)[None, :])
        packed[f"bias{i}"] = jnp.asarray(np.tile(bias, wo)[None, :])
        # MaxPool(3, 2) stride-2 subsample selection matrices (exact 0/1, f32).
        hp, wp = (ho - 3) // 2 + 1, (wo - 3) // 2 + 1
        sh = np.zeros((hp, ho - 2), np.float32)
        sh[np.arange(hp), 2 * np.arange(hp)] = 1.0
        sw = np.zeros(((wo - 2) * cout, wp * cout), np.float32)
        for q in range(wp):
            idx = np.arange(cout)
            sw[2 * q * cout + idx, q * cout + idx] = 1.0
        packed[f"Sh{i}"] = jnp.asarray(sh)
        packed[f"Sw{i}"] = jnp.asarray(sw)
        h, w, cin = hp, wp, cout
    # FC weight: rows permuted from PyTorch NCHW flatten order (c, h, w) to the
    # kernel's packed order (h, w, c), split per output row h.
    hf, wf, cf = h, w, cin
    fc_w = np.asarray(params["fc_w"], np.float32)                # (hf*wf*cf, R)
    r = fc_w.shape[1]
    fc_p = np.zeros((hf, wf * cf, r), np.float32)
    for hh in range(hf):
        for ww in range(wf):
            for cc in range(cf):
                fc_p[hh, ww * cf + cc, :] = fc_w[cc * hf * wf + hh * wf + ww, :]
    packed["fc_w"] = jnp.asarray(fc_p, jnp.bfloat16)
    packed["fc_b"] = jnp.asarray(params["fc_b"], jnp.float32)
    return packed


# ------------------------------ Pure-JAX reference ---------------------------

def reference_forward(params, x_nchw):
    """XLA reference (lax.conv + reduce_window).  Matmul/conv inputs are cast to
    bf16 exactly like the kernel's MXU path so the two pipelines are numerically
    comparable; accumulation and epilogues stay in f32."""
    x = jnp.transpose(x_nchw, (0, 2, 3, 1)).astype(jnp.float32)   # NHWC
    for i in (1, 2, 3):
        wt = params[f"conv{i}_w"]
        y = lax.conv_general_dilated(
            x.astype(jnp.bfloat16), wt.astype(jnp.bfloat16), (1, 1), "VALID",
            dimension_numbers=("NHWC", "HWIO", "NHWC"),
            preferred_element_type=jnp.float32)
        y = (y * params[f"scale{i}"].reshape(1, 1, 1, -1)
             + params[f"bias{i}"].reshape(1, 1, 1, -1))
        y = jax.nn.selu(y)
        x = lax.reduce_window(y, -jnp.inf, lax.max,
                              (1, 3, 3, 1), (1, 2, 2, 1), "VALID")
    xf = jnp.transpose(x, (0, 3, 1, 2)).reshape(x.shape[0], -1)   # NCHW flatten
    y = jnp.dot(xf.astype(jnp.bfloat16), params["fc_w"].astype(jnp.bfloat16),
                preferred_element_type=jnp.float32) + params["fc_b"]
    return jnp.maximum(y, 0.0)


if __name__ == "__main__":
    IMG_H = IMG_W = 48          # smallest size keeping every conv/pool valid
    IMG_REPR = 32
    N = 2

    key = jax.random.PRNGKey(0)
    pkey, xkey = jax.random.split(key)
    params = init_params(pkey, IMG_H, IMG_W, IMG_REPR)
    packed = pack_params(params, IMG_H, IMG_W)
    x = jax.random.normal(xkey, (N, 3, IMG_H, IMG_W), jnp.float32)

    out = jax.jit(encoder_v1_forward)(packed, x)
    out = jax.block_until_ready(out)
    assert out.shape == (N, IMG_REPR), out.shape

    ref = jax.block_until_ready(reference_forward(params, x))
    max_err = float(jnp.max(jnp.abs(out - ref)))
    assert jnp.allclose(out, ref, rtol=1e-2, atol=1e-2), max_err

    print("KERNEL_OK")
</pallas_src>

<mosaic_0001>
module attributes {stable_mosaic.version = 11 : i64} {
  func.func @_encoder_kernel(%arg0: i32, %arg1: memref<1x48x144xf32, #tpu.memory_space<vmem>>, %arg2: memref<7x144x672xbf16, #tpu.memory_space<vmem>>, %arg3: memref<1x672xf32, #tpu.memory_space<vmem>>, %arg4: memref<1x672xf32, #tpu.memory_space<vmem>>, %arg5: memref<20x40xf32, #tpu.memory_space<vmem>>, %arg6: memref<640x320xf32, #tpu.memory_space<vmem>>, %arg7: memref<5x320x512xbf16, #tpu.memory_space<vmem>>, %arg8: memref<1x512xf32, #tpu.memory_space<vmem>>, %arg9: memref<1x512xf32, #tpu.memory_space<vmem>>, %arg10: memref<7x14xf32, #tpu.memory_space<vmem>>, %arg11: memref<448x224xf32, #tpu.memory_space<vmem>>, %arg12: memref<5x224x192xbf16, #tpu.memory_space<vmem>>, %arg13: memref<1x192xf32, #tpu.memory_space<vmem>>, %arg14: memref<1x192xf32, #tpu.memory_space<vmem>>, %arg15: memref<1x1xf32, #tpu.memory_space<vmem>>, %arg16: memref<64x64xf32, #tpu.memory_space<vmem>>, %arg17: memref<1x64x32xbf16, #tpu.memory_space<vmem>>, %arg18: memref<1x32xf32, #tpu.memory_space<vmem>>, %arg19: memref<1x1x32xf32, #tpu.memory_space<vmem>>) attributes {dimension_semantics = [#tpu.dimension_semantics<parallel>], iteration_bounds = array<i64: 2>, scalar_prefetch = 0 : i64, scratch_operands = 0 : i64, tpu.core_type = #tpu.core_type<tc>, window_params = [{transform_indices = @transform_0, window_bounds = array<i64: 1, 48, 144>}, {pipeline_mode = #tpu.pipeline_mode<synchronous>, transform_indices = @transform_1, window_bounds = array<i64: 7, 144, 672>}, {pipeline_mode = #tpu.pipeline_mode<synchronous>, transform_indices = @transform_2, window_bounds = array<i64: 1, 672>}, {pipeline_mode = #tpu.pipeline_mode<synchronous>, transform_indices = @transform_3, window_bounds = array<i64: 1, 672>}, {pipeline_mode = #tpu.pipeline_mode<synchronous>, transform_indices = @transform_4, window_bounds = array<i64: 20, 40>}, {pipeline_mode = #tpu.pipeline_mode<synchronous>, transform_indices = @transform_5, window_bounds = array<i64: 640, 320>}, {pipeline_mode = #tpu.pipeline_mode<synchronous>, transform_indices = @transform_6, window_bounds = array<i64: 5, 320, 512>}, {pipeline_mode = #tpu.pipeline_mode<synchronous>, transform_indices = @transform_7, window_bounds = array<i64: 1, 512>}, {pipeline_mode = #tpu.pipeline_mode<synchronous>, transform_indices = @transform_8, window_bounds = array<i64: 1, 512>}, {pipeline_mode = #tpu.pipeline_mode<synchronous>, transform_indices = @transform_9, window_bounds = array<i64: 7, 14>}, {pipeline_mode = #tpu.pipeline_mode<synchronous>, transform_indices = @transform_10, window_bounds = array<i64: 448, 224>}, {pipeline_mode = #tpu.pipeline_mode<synchronous>, transform_indices = @transform_11, window_bounds = array<i64: 5, 224, 192>}, {pipeline_mode = #tpu.pipeline_mode<synchronous>, transform_indices = @transform_12, window_bounds = array<i64: 1, 192>}, {pipeline_mode = #tpu.pipeline_mode<synchronous>, transform_indices = @transform_13, window_bounds = array<i64: 1, 192>}, {pipeline_mode = #tpu.pipeline_mode<synchronous>, transform_indices = @transform_14, window_bounds = array<i64: 1, 1>}, {pipeline_mode = #tpu.pipeline_mode<synchronous>, transform_indices = @transform_15, window_bounds = array<i64: 64, 64>}, {pipeline_mode = #tpu.pipeline_mode<synchronous>, transform_indices = @transform_16, window_bounds = array<i64: 1, 64, 32>}, {pipeline_mode = #tpu.pipeline_mode<synchronous>, transform_indices = @transform_17, window_bounds = array<i64: 1, 32>}, {transform_indices = @transform_18, window_bounds = array<i64: 1, 1, 32>}]} {
    %c0 = arith.constant 0 : index
    %c0_0 = arith.constant 0 : index
    %c0_1 = arith.constant 0 : index
    %0 = vector.load %arg1[%c0, %c0_0, %c0_1] : memref<1x48x144xf32, #tpu.memory_space<vmem>>, vector<1x48x144xf32>
    %1 = vector.shape_cast %0 : vector<1x48x144xf32> to vector<48x144xf32>
    %2 = vector.extract_strided_slice %1 {offsets = [0, 0], sizes = [42, 144], strides = [1, 1]} : vector<48x144xf32> to vector<42x144xf32>
    %3 = arith.truncf %2 : vector<42x144xf32> to vector<42x144xbf16>
    %c0_2 = arith.constant 0 : index
    %c0_3 = arith.constant 0 : index
    %c0_4 = arith.constant 0 : index
    %4 = vector.load %arg2[%c0_2, %c0_3, %c0_4] : memref<7x144x672xbf16, #tpu.memory_space<vmem>>, vector<1x144x672xbf16>
    %5 = vector.shape_cast %4 : vector<1x144x672xbf16> to vector<144x672xbf16>
    %cst = arith.constant dense<0.000000e+00> : vector<42x672xf32>
    %6 = tpu.matmul %3, %5, %cst {dimension_numbers = #tpu.dot_dimension_numbers<[1], [0], [0], [1], [0, 0, 1, 1], [], []>} : vector<42x144xbf16>, vector<144x672xbf16>, vector<42x672xf32> -> vector<42x672xf32>
    %7 = vector.extract_strided_slice %1 {offsets = [1, 0], sizes = [42, 144], strides = [1, 1]} : vector<48x144xf32> to vector<42x144xf32>
    %8 = arith.truncf %7 : vector<42x144xf32> to vector<42x144xbf16>
    %c1 = arith.constant 1 : index
    %c0_5 = arith.constant 0 : index
    %c0_6 = arith.constant 0 : index
    %9 = vector.load %arg2[%c1, %c0_5, %c0_6] : memref<7x144x672xbf16, #tpu.memory_space<vmem>>, vector<1x144x672xbf16>
    %10 = vector.shape_cast %9 : vector<1x144x672xbf16> to vector<144x672xbf16>
    %cst_7 = arith.constant dense<0.000000e+00> : vector<42x672xf32>
    %11 = tpu.matmul %8, %10, %cst_7 {dimension_numbers = #tpu.dot_dimension_numbers<[1], [0], [0], [1], [0, 0, 1, 1], [], []>} : vector<42x144xbf16>, vector<144x672xbf16>, vector<42x672xf32> -> vector<42x672xf32>
    %12 = arith.addf %6, %11 : vector<42x672xf32>
    %13 = vector.extract_strided_slice %1 {offsets = [2, 0], sizes = [42, 144], strides = [1, 1]} : vector<48x144xf32> to vector<42x144xf32>
    %14 = arith.truncf %13 : vector<42x144xf32> to vector<42x144xbf16>
    %c2 = arith.constant 2 : index
    %c0_8 = arith.constant 0 : index
    %c0_9 = arith.constant 0 : index
    %15 = vector.load %arg2[%c2, %c0_8, %c0_9] : memref<7x144x672xbf16, #tpu.memory_space<vmem>>, vector<1x144x672xbf16>
    %16 = vector.shape_cast %15 : vector<1x144x672xbf16> to vector<144x672xbf16>
    %cst_10 = arith.constant dense<0.000000e+00> : vector<42x672xf32>
    %17 = tpu.matmul %14, %16, %cst_10 {dimension_numbers = #tpu.dot_dimension_numbers<[1], [0], [0], [1], [0, 0, 1, 1], [], []>} : vector<42x144xbf16>, vector<144x672xbf16>, vector<42x672xf32> -> vector<42x672xf32>
    %18 = arith.addf %12, %17 : vector<42x672xf32>
    %19 = vector.extract_strided_slice %1 {offsets = [3, 0], sizes = [42, 144], strides = [1, 1]} : vector<48x144xf32> to vector<42x144xf32>
    %20 = arith.truncf %19 : vector<42x144xf32> to vector<42x144xbf16>
    %c3 = arith.constant 3 : index
    %c0_11 = arith.constant 0 : index
    %c0_12 = arith.constant 0 : index
    %21 = vector.load %arg2[%c3, %c0_11, %c0_12] : memref<7x144x672xbf16, #tpu.memory_space<vmem>>, vector<1x144x672xbf16>
    %22 = vector.shape_cast %21 : vector<1x144x672xbf16> to vector<144x672xbf16>
    %cst_13 = arith.constant dense<0.000000e+00> : vector<42x672xf32>
    %23 = tpu.matmul %20, %22, %cst_13 {dimension_numbers = #tpu.dot_dimension_numbers<[1], [0], [0], [1], [0, 0, 1, 1], [], []>} : vector<42x144xbf16>, vector<144x672xbf16>, vector<42x672xf32> -> vector<42x672xf32>
    %24 = arith.addf %18, %23 : vector<42x672xf32>
    %25 = vector.extract_strided_slice %1 {offsets = [4, 0], sizes = [42, 144], strides = [1, 1]} : vector<48x144xf32> to vector<42x144xf32>
    %26 = arith.truncf %25 : vector<42x144xf32> to vector<42x144xbf16>
    %c4 = arith.constant 4 : index
    %c0_14 = arith.constant 0 : index
    %c0_15 = arith.constant 0 : index
    %27 = vector.load %arg2[%c4, %c0_14, %c0_15] : memref<7x144x672xbf16, #tpu.memory_space<vmem>>, vector<1x144x672xbf16>
    %28 = vector.shape_cast %27 : vector<1x144x672xbf16> to vector<144x672xbf16>
    %cst_16 = arith.constant dense<0.000000e+00> : vector<42x672xf32>
    %29 = tpu.matmul %26, %28, %cst_16 {dimension_numbers = #tpu.dot_dimension_numbers<[1], [0], [0], [1], [0, 0, 1, 1], [], []>} : vector<42x144xbf16>, vector<144x672xbf16>, vector<42x672xf32> -> vector<42x672xf32>
    %30 = arith.addf %24, %29 : vector<42x672xf32>
    %31 = vector.extract_strided_slice %1 {offsets = [5, 0], sizes = [42, 144], strides = [1, 1]} : vector<48x144xf32> to vector<42x144xf32>
    %32 = arith.truncf %31 : vector<42x144xf32> to vector<42x144xbf16>
    %c5 = arith.constant 5 : index
    %c0_17 = arith.constant 0 : index
    %c0_18 = arith.constant 0 : index
    %33 = vector.load %arg2[%c5, %c0_17, %c0_18] : memref<7x144x672xbf16, #tpu.memory_space<vmem>>, vector<1x144x672xbf16>
    %34 = vector.shape_cast %33 : vector<1x144x672xbf16> to vector<144x672xbf16>
    %cst_19 = arith.constant dense<0.000000e+00> : vector<42x672xf32>
    %35 = tpu.matmul %32, %34, %cst_19 {dimension_numbers = #tpu.dot_dimension_numbers<[1], [0], [0], [1], [0, 0, 1, 1], [], []>} : vector<42x144xbf16>, vector<144x672xbf16>, vector<42x672xf32> -> vector<42x672xf32>
    %36 = arith.addf %30, %35 : vector<42x672xf32>
    %37 = vector.extract_strided_slice %1 {offsets = [6, 0], sizes = [42, 144], strides = [1, 1]} : vector<48x144xf32> to vector<42x144xf32>
    %38 = arith.truncf %37 : vector<42x144xf32> to vector<42x144xbf16>
    %c6 = arith.constant 6 : index
    %c0_20 = arith.constant 0 : index
    %c0_21 = arith.constant 0 : index
    %39 = vector.load %arg2[%c6, %c0_20, %c0_21] : memref<7x144x672xbf16, #tpu.memory_space<vmem>>, vector<1x144x672xbf16>
    %40 = vector.shape_cast %39 : vector<1x144x672xbf16> to vector<144x672xbf16>
    %cst_22 = arith.constant dense<0.000000e+00> : vector<42x672xf32>
    %41 = tpu.matmul %38, %40, %cst_22 {dimension_numbers = #tpu.dot_dimension_numbers<[1], [0], [0], [1], [0, 0, 1, 1], [], []>} : vector<42x144xbf16>, vector<144x672xbf16>, vector<42x672xf32> -> vector<42x672xf32>
    %42 = arith.addf %36, %41 : vector<42x672xf32>
    %c0_23 = arith.constant 0 : index
    %c0_24 = arith.constant 0 : index
    %43 = vector.load %arg3[%c0_23, %c0_24] : memref<1x672xf32, #tpu.memory_space<vmem>>, vector<1x672xf32>
    %44 = vector.broadcast %43 : vector<1x672xf32> to vector<42x672xf32>
    %45 = arith.mulf %42, %44 : vector<42x672xf32>
    %c0_25 = arith.constant 0 : index
    %c0_26 = arith.constant 0 : index
    %46 = vector.load %arg4[%c0_25, %c0_26] : memref<1x672xf32, #tpu.memory_space<vmem>>, vector<1x672xf32>
    %47 = vector.broadcast %46 : vector<1x672xf32> to vector<42x672xf32>
    %48 = arith.addf %45, %47 : vector<42x672xf32>
    %cst_27 = arith.constant 0.000000e+00 : f32
    %49 = vector.broadcast %cst_27 : f32 to vector<42x672xf32>
    %50 = arith.cmpf ogt, %48, %49 : vector<42x672xf32>
    %cst_28 = arith.constant 0.000000e+00 : f32
    %51 = vector.broadcast %cst_28 : f32 to vector<42x672xf32>
    %52 = arith.minimumf %48, %51 : vector<42x672xf32>
    %53 = math.exp %52 : vector<42x672xf32>
    %cst_29 = arith.constant 1.000000e+00 : f32
    %54 = vector.broadcast %cst_29 : f32 to vector<42x672xf32>
    %55 = arith.subf %53, %54 : vector<42x672xf32>
    %cst_30 = arith.constant 1.67326319 : f32
    %56 = vector.broadcast %cst_30 : f32 to vector<42x672xf32>
    %57 = arith.mulf %56, %55 : vector<42x672xf32>
    %58 = arith.select %50, %48, %57 : vector<42x672xi1>, vector<42x672xf32>
    %cst_31 = arith.constant 1.05070102 : f32
    %59 = vector.broadcast %cst_31 : f32 to vector<42x672xf32>
    %60 = arith.mulf %59, %58 : vector<42x672xf32>
    %61 = vector.extract_strided_slice %60 {offsets = [0, 0], sizes = [40, 672], strides = [1, 1]} : vector<42x672xf32> to vector<40x672xf32>
    %62 = vector.extract_strided_slice %60 {offsets = [1, 0], sizes = [40, 672], strides = [1, 1]} : vector<42x672xf32> to vector<40x672xf32>
    %63 = arith.maximumf %61, %62 : vector<40x672xf32>
    %64 = vector.extract_strided_slice %60 {offsets = [2, 0], sizes = [40, 672], strides = [1, 1]} : vector<42x672xf32> to vector<40x672xf32>
    %65 = arith.maximumf %63, %64 : vector<40x672xf32>
    %66 = vector.extract_strided_slice %65 {offsets = [0, 0], sizes = [40, 640], strides = [1, 1]} : vector<40x672xf32> to vector<40x640xf32>
    %67 = vector.extract_strided_slice %65 {offsets = [0, 16], sizes = [40, 640], strides = [1, 1]} : vector<40x672xf32> to vector<40x640xf32>
    %68 = arith.maximumf %66, %67 : vector<40x640xf32>
    %69 = vector.extract_strided_slice %65 {offsets = [0, 32], sizes = [40, 640], strides = [1, 1]} : vector<40x672xf32> to vector<40x640xf32>
    %70 = arith.maximumf %68, %69 : vector<40x640xf32>
    %c0_32 = arith.constant 0 : index
    %c0_33 = arith.constant 0 : index
    %71 = vector.load %arg6[%c0_32, %c0_33] : memref<640x320xf32, #tpu.memory_space<vmem>>, vector<640x320xf32>
    %cst_34 = arith.constant dense<0.000000e+00> : vector<40x320xf32>
    %72 = tpu.matmul %70, %71, %cst_34 {dimension_numbers = #tpu.dot_dimension_numbers<[1], [0], [0], [1], [0, 0, 1, 1], [], []>} : vector<40x640xf32>, vector<640x320xf32>, vector<40x320xf32> -> vector<40x320xf32>
    %c0_35 = arith.constant 0 : index
    %c0_36 = arith.constant 0 : index
    %73 = vector.load %arg5[%c0_35, %c0_36] : memref<20x40xf32, #tpu.memory_space<vmem>>, vector<20x40xf32>
    %cst_37 = arith.constant dense<0.000000e+00> : vector<20x320xf32>
    %74 = tpu.matmul %73, %72, %cst_37 {dimension_numbers = #tpu.dot_dimension_numbers<[1], [0], [0], [1], [0, 0, 1, 1], [], []>} : vector<20x40xf32>, vector<40x320xf32>, vector<20x320xf32> -> vector<20x320xf32>
    %75 = vector.extract_strided_slice %74 {offsets = [0, 0], sizes = [16, 320], strides = [1, 1]} : vector<20x320xf32> to vector<16x320xf32>
    %76 = arith.truncf %75 : vector<16x320xf32> to vector<16x320xbf16>
    %c0_38 = arith.constant 0 : index
    %c0_39 = arith.constant 0 : index
    %c0_40 = arith.constant 0 : index
    %77 = vector.load %arg7[%c0_38, %c0_39, %c0_40] : memref<5x320x512xbf16, #tpu.memory_space<vmem>>, vector<1x320x512xbf16>
    %78 = vector.shape_cast %77 : vector<1x320x512xbf16> to vector<320x512xbf16>
    %cst_41 = arith.constant dense<0.000000e+00> : vector<16x512xf32>
    %79 = tpu.matmul %76, %78, %cst_41 {dimension_numbers = #tpu.dot_dimension_numbers<[1], [0], [0], [1], [0, 0, 1, 1], [], []>} : vector<16x320xbf16>, vector<320x512xbf16>, vector<16x512xf32> -> vector<16x512xf32>
    %80 = vector.extract_strided_slice %74 {offsets = [1, 0], sizes = [16, 320], strides = [1, 1]} : vector<20x320xf32> to vector<16x320xf32>
    %81 = arith.truncf %80 : vector<16x320xf32> to vector<16x320xbf16>
    %c1_42 = arith.constant 1 : index
    %c0_43 = arith.constant 0 : index
    %c0_44 = arith.constant 0 : index
    %82 = vector.load %arg7[%c1_42, %c0_43, %c0_44] : memref<5x320x512xbf16, #tpu.memory_space<vmem>>, vector<1x320x512xbf16>
    %83 = vector.shape_cast %82 : vector<1x320x512xbf16> to vector<320x512xbf16>
    %cst_45 = arith.constant dense<0.000000e+00> : vector<16x512xf32>
    %84 = tpu.matmul %81, %83, %cst_45 {dimension_numbers = #tpu.dot_dimension_numbers<[1], [0], [0], [1], [0, 0, 1, 1], [], []>} : vector<16x320xbf16>, vector<320x512xbf16>, vector<16x512xf32> -> vector<16x512xf32>
    %85 = arith.addf %79, %84 : vector<16x512xf32>
    %86 = vector.extract_strided_slice %74 {offsets = [2, 0], sizes = [16, 320], strides = [1, 1]} : vector<20x320xf32> to vector<16x320xf32>
    %87 = arith.truncf %86 : vector<16x320xf32> to vector<16x320xbf16>
    %c2_46 = arith.constant 2 : index
    %c0_47 = arith.constant 0 : index
    %c0_48 = arith.constant 0 : index
    %88 = vector.load %arg7[%c2_46, %c0_47, %c0_48] : memref<5x320x512xbf16, #tpu.memory_space<vmem>>, vector<1x320x512xbf16>
    %89 = vector.shape_cast %88 : vector<1x320x512xbf16> to vector<320x512xbf16>
    %cst_49 = arith.constant dense<0.000000e+00> : vector<16x512xf32>
    %90 = tpu.matmul %87, %89, %cst_49 {dimension_numbers = #tpu.dot_dimension_numbers<[1], [0], [0], [1], [0, 0, 1, 1], [], []>} : vector<16x320xbf16>, vector<320x512xbf16>, vector<16x512xf32> -> vector<16x512xf32>
    %91 = arith.addf %85, %90 : vector<16x512xf32>
    %92 = vector.extract_strided_slice %74 {offsets = [3, 0], sizes = [16, 320], strides = [1, 1]} : vector<20x320xf32> to vector<16x320xf32>
    %93 = arith.truncf %92 : vector<16x320xf32> to vector<16x320xbf16>
    %c3_50 = arith.constant 3 : index
    %c0_51 = arith.constant 0 : index
    %c0_52 = arith.constant 0 : index
    %94 = vector.load %arg7[%c3_50, %c0_51, %c0_52] : memref<5x320x512xbf16, #tpu.memory_space<vmem>>, vector<1x320x512xbf16>
    %95 = vector.shape_cast %94 : vector<1x320x512xbf16> to vector<320x512xbf16>
    %cst_53 = arith.constant dense<0.000000e+00> : vector<16x512xf32>
    %96 = tpu.matmul %93, %95, %cst_53 {dimension_numbers = #tpu.dot_dimension_numbers<[1], [0], [0], [1], [0, 0, 1, 1], [], []>} : vector<16x320xbf16>, vector<320x512xbf16>, vector<16x512xf32> -> vector<16x512xf32>
    %97 = arith.addf %91, %96 : vector<16x512xf32>
    %98 = vector.extract_strided_slice %74 {offsets = [4, 0], sizes = [16, 320], strides = [1, 1]} : vector<20x320xf32> to vector<16x320xf32>
    %99 = arith.truncf %98 : vector<16x320xf32> to vector<16x320xbf16>
    %c4_54 = arith.constant 4 : index
    %c0_55 = arith.constant 0 : index
    %c0_56 = arith.constant 0 : index
    %100 = vector.load %arg7[%c4_54, %c0_55, %c0_56] : memref<5x320x512xbf16, #tpu.memory_space<vmem>>, vector<1x320x512xbf16>
    %101 = vector.shape_cast %100 : vector<1x320x512xbf16> to vector<320x512xbf16>
    %cst_57 = arith.constant dense<0.000000e+00> : vector<16x512xf32>
    %102 = tpu.matmul %99, %101, %cst_57 {dimension_numbers = #tpu.dot_dimension_numbers<[1], [0], [0], [1], [0, 0, 1, 1], [], []>} : vector<16x320xbf16>, vector<320x512xbf16>, vector<16x512xf32> -> vector<16x512xf32>
    %103 = arith.addf %97, %102 : vector<16x512xf32>
    %c0_58 = arith.constant 0 : index
    %c0_59 = arith.constant 0 : index
    %104 = vector.load %arg8[%c0_58, %c0_59] : memref<1x512xf32, #tpu.memory_space<vmem>>, vector<1x512xf32>
    %105 = vector.broadcast %104 : vector<1x512xf32> to vector<16x512xf32>
    %106 = arith.mulf %103, %105 : vector<16x512xf32>
    %c0_60 = arith.constant 0 : index
    %c0_61 = arith.constant 0 : index
    %107 = vector.load %arg9[%c0_60, %c0_61] : memref<1x512xf32, #tpu.memory_space<vmem>>, vector<1x512xf32>
    %108 = vector.broadcast %107 : vector<1x512xf32> to vector<16x512xf32>
    %109 = arith.addf %106, %108 : vector<16x512xf32>
    %cst_62 = arith.constant 0.000000e+00 : f32
    %110 = vector.broadcast %cst_62 : f32 to vector<16x512xf32>
    %111 = arith.cmpf ogt, %109, %110 : vector<16x512xf32>
    %cst_63 = arith.constant 0.000000e+00 : f32
    %112 = vector.broadcast %cst_63 : f32 to vector<16x512xf32>
    %113 = arith.minimumf %109, %112 : vector<16x512xf32>
    %114 = math.exp %113 : vector<16x512xf32>
    %cst_64 = arith.constant 1.000000e+00 : f32
    %115 = vector.broadcast %cst_64 : f32 to vector<16x512xf32>
    %116 = arith.subf %114, %115 : vector<16x512xf32>
    %cst_65 = arith.constant 1.67326319 : f32
    %117 = vector.broadcast %cst_65 : f32 to vector<16x512xf32>
    %118 = arith.mulf %117, %116 : vector<16x512xf32>
    %119 = arith.select %111, %109, %118 : vector<16x512xi1>, vector<16x512xf32>
    %cst_66 = arith.constant 1.05070102 : f32
    %120 = vector.broadcast %cst_66 : f32 to vector<16x512xf32>
    %121 = arith.mulf %120, %119 : vector<16x512xf32>
    %122 = vector.extract_strided_slice %121 {offsets = [0, 0], sizes = [14, 512], strides = [1, 1]} : vector<16x512xf32> to vector<14x512xf32>
    %123 = vector.extract_strided_slice %121 {offsets = [1, 0], sizes = [14, 512], strides = [1, 1]} : vector<16x512xf32> to vector<14x512xf32>
    %124 = arith.maximumf %122, %123 : vector<14x512xf32>
    %125 = vector.extract_strided_slice %121 {offsets = [2, 0], sizes = [14, 512], strides = [1, 1]} : vector<16x512xf32> to vector<14x512xf32>
    %126 = arith.maximumf %124, %125 : vector<14x512xf32>
    %127 = vector.extract_strided_slice %126 {offsets = [0, 0], sizes = [14, 448], strides = [1, 1]} : vector<14x512xf32> to vector<14x448xf32>
    %128 = vector.extract_strided_slice %126 {offsets = [0, 32], sizes = [14, 448], strides = [1, 1]} : vector<14x512xf32> to vector<14x448xf32>
    %129 = arith.maximumf %127, %128 : vector<14x448xf32>
    %130 = vector.extract_strided_slice %126 {offsets = [0, 64], sizes = [14, 448], strides = [1, 1]} : vector<14x512xf32> to vector<14x448xf32>
    %131 = arith.maximumf %129, %130 : vector<14x448xf32>
    %c0_67 = arith.constant 0 : index
    %c0_68 = arith.constant 0 : index
    %132 = vector.load %arg11[%c0_67, %c0_68] : memref<448x224xf32, #tpu.memory_space<vmem>>, vector<448x224xf32>
    %cst_69 = arith.constant dense<0.000000e+00> : vector<14x224xf32>
    %133 = tpu.matmul %131, %132, %cst_69 {dimension_numbers = #tpu.dot_dimension_numbers<[1], [0], [0], [1], [0, 0, 1, 1], [], []>} : vector<14x448xf32>, vector<448x224xf32>, vector<14x224xf32> -> vector<14x224xf32>
    %c0_70 = arith.constant 0 : index
    %c0_71 = arith.constant 0 : index
    %134 = vector.load %arg10[%c0_70, %c0_71] : memref<7x14xf32, #tpu.memory_space<vmem>>, vector<7x14xf32>
    %cst_72 = arith.constant dense<0.000000e+00> : vector<7x224xf32>
    %135 = tpu.matmul %134, %133, %cst_72 {dimension_numbers = #tpu.dot_dimension_numbers<[1], [0], [0], [1], [0, 0, 1, 1], [], []>} : vector<7x14xf32>, vector<14x224xf32>, vector<7x224xf32> -> vector<7x224xf32>
    %136 = vector.extract_strided_slice %135 {offsets = [0, 0], sizes = [3, 224], strides = [1, 1]} : vector<7x224xf32> to vector<3x224xf32>
    %137 = arith.truncf %136 : vector<3x224xf32> to vector<3x224xbf16>
    %c0_73 = arith.constant 0 : index
    %c0_74 = arith.constant 0 : index
    %c0_75 = arith.constant 0 : index
    %138 = vector.load %arg12[%c0_73, %c0_74, %c0_75] : memref<5x224x192xbf16, #tpu.memory_space<vmem>>, vector<1x224x192xbf16>
    %139 = vector.shape_cast %138 : vector<1x224x192xbf16> to vector<224x192xbf16>
    %cst_76 = arith.constant dense<0.000000e+00> : vector<3x192xf32>
    %140 = tpu.matmul %137, %139, %cst_76 {dimension_numbers = #tpu.dot_dimension_numbers<[1], [0], [0], [1], [0, 0, 1, 1], [], []>} : vector<3x224xbf16>, vector<224x192xbf16>, vector<3x192xf32> -> vector<3x192xf32>
    %141 = vector.extract_strided_slice %135 {offsets = [1, 0], sizes = [3, 224], strides = [1, 1]} : vector<7x224xf32> to vector<3x224xf32>
    %142 = arith.truncf %141 : vector<3x224xf32> to vector<3x224xbf16>
    %c1_77 = arith.constant 1 : index
    %c0_78 = arith.constant 0 : index
    %c0_79 = arith.constant 0 : index
    %143 = vector.load %arg12[%c1_77, %c0_78, %c0_79] : memref<5x224x192xbf16, #tpu.memory_space<vmem>>, vector<1x224x192xbf16>
    %144 = vector.shape_cast %143 : vector<1x224x192xbf16> to vector<224x192xbf16>
    %cst_80 = arith.constant dense<0.000000e+00> : vector<3x192xf32>
    %145 = tpu.matmul %142, %144, %cst_80 {dimension_numbers = #tpu.dot_dimension_numbers<[1], [0], [0], [1], [0, 0, 1, 1], [], []>} : vector<3x224xbf16>, vector<224x192xbf16>, vector<3x192xf32> -> vector<3x192xf32>
    %146 = arith.addf %140, %145 : vector<3x192xf32>
    %147 = vector.extract_strided_slice %135 {offsets = [2, 0], sizes = [3, 224], strides = [1, 1]} : vector<7x224xf32> to vector<3x224xf32>
    %148 = arith.truncf %147 : vector<3x224xf32> to vector<3x224xbf16>
    %c2_81 = arith.constant 2 : index
    %c0_82 = arith.constant 0 : index
    %c0_83 = arith.constant 0 : index
    %149 = vector.load %arg12[%c2_81, %c0_82, %c0_83] : memref<5x224x192xbf16, #tpu.memory_space<vmem>>, vector<1x224x192xbf16>
    %150 = vector.shape_cast %149 : vector<1x224x192xbf16> to vector<224x192xbf16>
    %cst_84 = arith.constant dense<0.000000e+00> : vector<3x192xf32>
    %151 = tpu.matmul %148, %150, %cst_84 {dimension_numbers = #tpu.dot_dimension_numbers<[1], [0], [0], [1], [0, 0, 1, 1], [], []>} : vector<3x224xbf16>, vector<224x192xbf16>, vector<3x192xf32> -> vector<3x192xf32>
    %152 = arith.addf %146, %151 : vector<3x192xf32>
    %153 = vector.extract_strided_slice %135 {offsets = [3, 0], sizes = [3, 224], strides = [1, 1]} : vector<7x224xf32> to vector<3x224xf32>
    %154 = arith.truncf %153 : vector<3x224xf32> to vector<3x224xbf16>
    %c3_85 = arith.constant 3 : index
    %c0_86 = arith.constant 0 : index
    %c0_87 = arith.constant 0 : index
    %155 = vector.load %arg12[%c3_85, %c0_86, %c0_87] : memref<5x224x192xbf16, #tpu.memory_space<vmem>>, vector<1x224x192xbf16>
    %156 = vector.shape_cast %155 : vector<1x224x192xbf16> to vector<224x192xbf16>
    %cst_88 = arith.constant dense<0.000000e+00> : vector<3x192xf32>
    %157 = tpu.matmul %154, %156, %cst_88 {dimension_numbers = #tpu.dot_dimension_numbers<[1], [0], [0], [1], [0, 0, 1, 1], [], []>} : vector<3x224xbf16>, vector<224x192xbf16>, vector<3x192xf32> -> vector<3x192xf32>
    %158 = arith.addf %152, %157 : vector<3x192xf32>
    %159 = vector.extract_strided_slice %135 {offsets = [4, 0], sizes = [3, 224], strides = [1, 1]} : vector<7x224xf32> to vector<3x224xf32>
    %160 = arith.truncf %159 : vector<3x224xf32> to vector<3x224xbf16>
    %c4_89 = arith.constant 4 : index
    %c0_90 = arith.constant 0 : index
    %c0_91 = arith.constant 0 : index
    %161 = vector.load %arg12[%c4_89, %c0_90, %c0_91] : memref<5x224x192xbf16, #tpu.memory_space<vmem>>, vector<1x224x192xbf16>
    %162 = vector.shape_cast %161 : vector<1x224x192xbf16> to vector<224x192xbf16>
    %cst_92 = arith.constant dense<0.000000e+00> : vector<3x192xf32>
    %163 = tpu.matmul %160, %162, %cst_92 {dimension_numbers = #tpu.dot_dimension_numbers<[1], [0], [0], [1], [0, 0, 1, 1], [], []>} : vector<3x224xbf16>, vector<224x192xbf16>, vector<3x192xf32> -> vector<3x192xf32>
    %164 = arith.addf %158, %163 : vector<3x192xf32>
    %c0_93 = arith.constant 0 : index
    %c0_94 = arith.constant 0 : index
    %165 = vector.load %arg13[%c0_93, %c0_94] : memref<1x192xf32, #tpu.memory_space<vmem>>, vector<1x192xf32>
    %166 = vector.broadcast %165 : vector<1x192xf32> to vector<3x192xf32>
    %167 = arith.mulf %164, %166 : vector<3x192xf32>
    %c0_95 = arith.constant 0 : index
    %c0_96 = arith.constant 0 : index
    %168 = vector.load %arg14[%c0_95, %c0_96] : memref<1x192xf32, #tpu.memory_space<vmem>>, vector<1x192xf32>
    %169 = vector.broadcast %168 : vector<1x192xf32> to vector<3x192xf32>
    %170 = arith.addf %167, %169 : vector<3x192xf32>
    %cst_97 = arith.constant 0.000000e+00 : f32
    %171 = vector.broadcast %cst_97 : f32 to vector<3x192xf32>
    %172 = arith.cmpf ogt, %170, %171 : vector<3x192xf32>
    %cst_98 = arith.constant 0.000000e+00 : f32
    %173 = vector.broadcast %cst_98 : f32 to vector<3x192xf32>
    %174 = arith.minimumf %170, %173 : vector<3x192xf32>
    %175 = math.exp %174 : vector<3x192xf32>
    %cst_99 = arith.constant 1.000000e+00 : f32
    %176 = vector.broadcast %cst_99 : f32 to vector<3x192xf32>
    %177 = arith.subf %175, %176 : vector<3x192xf32>
    %cst_100 = arith.constant 1.67326319 : f32
    %178 = vector.broadcast %cst_100 : f32 to vector<3x192xf32>
    %179 = arith.mulf %178, %177 : vector<3x192xf32>
    %180 = arith.select %172, %170, %179 : vector<3x192xi1>, vector<3x192xf32>
    %cst_101 = arith.constant 1.05070102 : f32
    %181 = vector.broadcast %cst_101 : f32 to vector<3x192xf32>
    %182 = arith.mulf %181, %180 : vector<3x192xf32>
    %183 = vector.extract_strided_slice %182 {offsets = [0, 0], sizes = [1, 192], strides = [1, 1]} : vector<3x192xf32> to vector<1x192xf32>
    %184 = vector.extract_strided_slice %182 {offsets = [1, 0], sizes = [1, 192], strides = [1, 1]} : vector<3x192xf32> to vector<1x192xf32>
    %185 = arith.maximumf %183, %184 : vector<1x192xf32>
    %186 = vector.extract_strided_slice %182 {offsets = [2, 0], sizes = [1, 192], strides = [1, 1]} : vector<3x192xf32> to vector<1x192xf32>
    %187 = arith.maximumf %185, %186 : vector<1x192xf32>
    %188 = vector.extract_strided_slice %187 {offsets = [0, 0], sizes = [1, 64], strides = [1, 1]} : vector<1x192xf32> to vector<1x64xf32>
    %189 = vector.extract_strided_slice %187 {offsets = [0, 64], sizes = [1, 64], strides = [1, 1]} : vector<1x192xf32> to vector<1x64xf32>
    %190 = arith.maximumf %188, %189 : vector<1x64xf32>
    %191 = vector.extract_strided_slice %187 {offsets = [0, 128], sizes = [1, 64], strides = [1, 1]} : vector<1x192xf32> to vector<1x64xf32>
    %192 = arith.maximumf %190, %191 : vector<1x64xf32>
    %193 = arith.truncf %192 : vector<1x64xf32> to vector<1x64xbf16>
    %c0_102 = arith.constant 0 : index
    %c0_103 = arith.constant 0 : index
    %c0_104 = arith.constant 0 : index
    %194 = vector.load %arg17[%c0_102, %c0_103, %c0_104] : memref<1x64x32xbf16, #tpu.memory_space<vmem>>, vector<1x64x32xbf16>
    %195 = vector.shape_cast %194 : vector<1x64x32xbf16> to vector<64x32xbf16>
    %cst_105 = arith.constant dense<0.000000e+00> : vector<1x32xf32>
    %196 = tpu.matmul %193, %195, %cst_105 {dimension_numbers = #tpu.dot_dimension_numbers<[1], [0], [0], [1], [0, 0, 1, 1], [], []>} : vector<1x64xbf16>, vector<64x32xbf16>, vector<1x32xf32> -> vector<1x32xf32>
    %c0_106 = arith.constant 0 : index
    %c0_107 = arith.constant 0 : index
    %197 = vector.load %arg18[%c0_106, %c0_107] : memref<1x32xf32, #tpu.memory_space<vmem>>, vector<1x32xf32>
    %198 = arith.addf %196, %197 : vector<1x32xf32>
    %cst_108 = arith.constant 0.000000e+00 : f32
    %199 = vector.broadcast %cst_108 : f32 to vector<1x32xf32>
    %200 = arith.maximumf %198, %199 : vector<1x32xf32>
    %c0_109 = arith.constant 0 : index
    %c0_110 = arith.constant 0 : index
    %c0_111 = arith.constant 0 : index
    %201 = vector.load %arg19[%c0_109, %c0_110, %c0_111] : memref<1x1x32xf32, #tpu.memory_space<vmem>>, vector<1x1x32xf32>
    %202 = vector.shape_cast %201 : vector<1x1x32xf32> to vector<1x32xf32>
    %203 = vector.shape_cast %200 : vector<1x32xf32> to vector<1x1x32xf32>
    tpu.vector_store %arg19[%c0_109, %c0_110, %c0_111], %203 {strides = array<i32>} : memref<1x1x32xf32, #tpu.memory_space<vmem>>, vector<1x1x32xf32>,
    return
  }
  func.func @transform_0(%arg0: i32) -> (i32, i32, i32) {
    %c0_i32 = arith.constant 0 : i32
    %c0_i32_0 = arith.constant 0 : i32
    %c0_i32_1 = arith.constant 0 : i32
    return %arg0, %c0_i32, %c0_i32_0 : i32, i32, i32
  }
  func.func @transform_1(%arg0: i32) -> (i32, i32, i32) {
    %c0_i32 = arith.constant 0 : i32
    %c0_i32_0 = arith.constant 0 : i32
    %c0_i32_1 = arith.constant 0 : i32
    %c0_i32_2 = arith.constant 0 : i32
    return %c0_i32, %c0_i32_0, %c0_i32_1 : i32, i32, i32
  }
  func.func @transform_2(%arg0: i32) -> (i32, i32) {
    %c0_i32 = arith.constant 0 : i32
    %c0_i32_0 = arith.constant 0 : i32
    %c0_i32_1 = arith.constant 0 : i32
    return %c0_i32, %c0_i32_0 : i32, i32
  }
  func.func @transform_3(%arg0: i32) -> (i32, i32) {
    %c0_i32 = arith.constant 0 : i32
    %c0_i32_0 = arith.constant 0 : i32
    %c0_i32_1 = arith.constant 0 : i32
    return %c0_i32, %c0_i32_0 : i32, i32
  }
  func.func @transform_4(%arg0: i32) -> (i32, i32) {
    %c0_i32 = arith.constant 0 : i32
    %c0_i32_0 = arith.constant 0 : i32
    %c0_i32_1 = arith.constant 0 : i32
    return %c0_i32, %c0_i32_0 : i32, i32
  }
  func.func @transform_5(%arg0: i32) -> (i32, i32) {
    %c0_i32 = arith.constant 0 : i32
    %c0_i32_0 = arith.constant 0 : i32
    %c0_i32_1 = arith.constant 0 : i32
    return %c0_i32, %c0_i32_0 : i32, i32
  }
  func.func @transform_6(%arg0: i32) -> (i32, i32, i32) {
    %c0_i32 = arith.constant 0 : i32
    %c0_i32_0 = arith.constant 0 : i32
    %c0_i32_1 = arith.constant 0 : i32
    %c0_i32_2 = arith.constant 0 : i32
    return %c0_i32, %c0_i32_0, %c0_i32_1 : i32, i32, i32
  }
  func.func @transform_7(%arg0: i32) -> (i32, i32) {
    %c0_i32 = arith.constant 0 : i32
    %c0_i32_0 = arith.constant 0 : i32
    %c0_i32_1 = arith.constant 0 : i32
    return %c0_i32, %c0_i32_0 : i32, i32
  }
  func.func @transform_8(%arg0: i32) -> (i32, i32) {
    %c0_i32 = arith.constant 0 : i32
    %c0_i32_0 = arith.constant 0 : i32
    %c0_i32_1 = arith.constant 0 : i32
    return %c0_i32, %c0_i32_0 : i32, i32
  }
  func.func @transform_9(%arg0: i32) -> (i32, i32) {
    %c0_i32 = arith.constant 0 : i32
    %c0_i32_0 = arith.constant 0 : i32
    %c0_i32_1 = arith.constant 0 : i32
    return %c0_i32, %c0_i32_0 : i32, i32
  }
  func.func @transform_10(%arg0: i32) -> (i32, i32) {
    %c0_i32 = arith.constant 0 : i32
    %c0_i32_0 = arith.constant 0 : i32
    %c0_i32_1 = arith.constant 0 : i32
    return %c0_i32, %c0_i32_0 : i32, i32
  }
  func.func @transform_11(%arg0: i32) -> (i32, i32, i32) {
    %c0_i32 = arith.constant 0 : i32
    %c0_i32_0 = arith.constant 0 : i32
    %c0_i32_1 = arith.constant 0 : i32
    %c0_i32_2 = arith.constant 0 : i32
    return %c0_i32, %c0_i32_0, %c0_i32_1 : i32, i32, i32
  }
  func.func @transform_12(%arg0: i32) -> (i32, i32) {
    %c0_i32 = arith.constant 0 : i32
    %c0_i32_0 = arith.constant 0 : i32
    %c0_i32_1 = arith.constant 0 : i32
    return %c0_i32, %c0_i32_0 : i32, i32
  }
  func.func @transform_13(%arg0: i32) -> (i32, i32) {
    %c0_i32 = arith.constant 0 : i32
    %c0_i32_0 = arith.constant 0 : i32
    %c0_i32_1 = arith.constant 0 : i32
    return %c0_i32, %c0_i32_0 : i32, i32
  }
  func.func @transform_14(%arg0: i32) -> (i32, i32) {
    %c0_i32 = arith.constant 0 : i32
    %c0_i32_0 = arith.constant 0 : i32
    %c0_i32_1 = arith.constant 0 : i32
    return %c0_i32, %c0_i32_0 : i32, i32
  }
  func.func @transform_15(%arg0: i32) -> (i32, i32) {
    %c0_i32 = arith.constant 0 : i32
    %c0_i32_0 = arith.constant 0 : i32
    %c0_i32_1 = arith.constant 0 : i32
    return %c0_i32, %c0_i32_0 : i32, i32
  }
  func.func @transform_16(%arg0: i32) -> (i32, i32, i32) {
    %c0_i32 = arith.constant 0 : i32
    %c0_i32_0 = arith.constant 0 : i32
    %c0_i32_1 = arith.constant 0 : i32
    %c0_i32_2 = arith.constant 0 : i32
    return %c0_i32, %c0_i32_0, %c0_i32_1 : i32, i32, i32
  }
  func.func @transform_17(%arg0: i32) -> (i32, i32) {
    %c0_i32 = arith.constant 0 : i32
    %c0_i32_0 = arith.constant 0 : i32
    %c0_i32_1 = arith.constant 0 : i32
    return %c0_i32, %c0_i32_0 : i32, i32
  }
  func.func @transform_18(%arg0: i32) -> (i32, i32, i32) {
    %c0_i32 = arith.constant 0 : i32
    %c0_i32_0 = arith.constant 0 : i32
    %c0_i32_1 = arith.constant 0 : i32
    return %arg0, %c0_i32, %c0_i32_0 : i32, i32, i32
  }
}

</mosaic_0001>

<bundles_post_ra>
// kernel: encoder_v1_forward.1
= control target key start
LH: loop header
LB: loop body
LE: loop exit
PB: predicated region body
PF: predicated region fallthrough
CT: control target
= control target key end

     0   :  { %s22171_s0 = inlined_call_operand.vmem [shape: f32[2,48,144], index: 0, kind: input, shape index: {}]   ;;  %s22172_s1 = inlined_call_operand.vmem [shape: bf16[7,144,672], index: 1, kind: input, shape index: {}]   ;;  %s22173_s2 = inlined_call_operand.vmem [shape: f32[1,672], index: 2, kind: input, shape index: {}]   ;;  %s22174_s3 = inlined_call_operand.vmem [shape: f32[1,672], index: 3, kind: input, shape index: {}]   ;;  %s22175_s4 = inlined_call_operand.vmem [shape: f32[20,40], index: 4, kind: input, shape index: {}]   ;;  %s22176_s5 = inlined_call_operand.vmem [shape: f32[640,320], index: 5, kind: input, shape index: {}]   ;;  %s22177_s6 = inlined_call_operand.vmem [shape: bf16[5,320,512], index: 6, kind: input, shape index: {}]   ;;  %s22178_s7 = inlined_call_operand.vmem [shape: f32[1,512], index: 7, kind: input, shape index: {}]   ;;  %s22179_s8 = inlined_call_operand.vmem [shape: f32[1,512], index: 8, kind: input, shape index: {}]   ;;  %s22180_s9 = inlined_call_operand.vmem [shape: f32[7,14], index: 9, kind: input, shape index: {}]   ;;  %s22181_s10 = inlined_call_operand.hbm [shape: f32[448,224], index: 10, kind: input, shape index: {}]   ;;  %s22182_s11 = inlined_call_operand.vmem [shape: bf16[5,224,192], index: 11, kind: input, shape index: {}]   ;;  %s22183_s12 = inlined_call_operand.vmem [shape: f32[1,192], index: 12, kind: input, shape index: {}]   ;;  %s22184_s13 = inlined_call_operand.vmem [shape: f32[1,192], index: 13, kind: input, shape index: {}]   ;;  %s22185_s14 = inlined_call_operand.<no memory space> [shape: f32[1,1], index: 14, kind: input, shape index: {}]   ;;  %s22186_s15 = inlined_call_operand.vmem [shape: f32[64,64], index: 15, kind: input, shape index: {}]   ;;  %s22187_s16 = inlined_call_operand.vmem [shape: bf16[1,64,32], index: 16, kind: input, shape index: {}]   ;;  %s22188_s17 = inlined_call_operand.vmem [shape: f32[1,32], index: 17, kind: input, shape index: {}]   ;;  %s22189_s18 = inlined_call_operand.hbm [shape: f32[2,1,32], index: 18, kind: output, shape index: {}]  }
   0x1   :  { %22238 = sst [smem:[#allocation22_spill]] %s22171_s0 }
   0x2   :  { %22239 = sst [smem:[#allocation23_spill]] %s22172_s1 }
   0x3   :  { %22240 = sst [smem:[#allocation24_spill]] %s22173_s2 }
   0x4   :  { %22241 = sst [smem:[#allocation25_spill]] %s22181_s10 }
   0x5   :  { %25 = vsyncpa [#allocation4], 0 }
   0x6   :  { %26 = vsyncpa [#allocation5], 0 }
   0x7   :  { %28 = vsyncpa [#allocation5 + $0x1], 0  ;;  %s16574_s27 = smov 0   ;;  %s16576_s28 = smov 0  }
   0x8   :  { %s16578_s14 = smov 0   ;;  %s16580_s29 = smov 0  }
   0x9 LB: > { %22242 = sst [smem:[#allocation9_spill]] %s16461_s14  ;;  %s16595_s15 = sadd.s32 4294967295, %s16465_s29   ;;  %s16465_s29 = sphi %s16580_s29, %s22328_s29   ;;  %s16461_s14 = sphi %s16578_s14, %s22330_s14   ;;  %s16457_s28 = sphi %s16576_s28, %s22332_s28   ;;  %s16453_s27 = sphi %s16574_s27, %s22331_s27  }
   0xa   : > { %s11939_s30 = sadd.s32 4294967294, %s16465_s29   ;;  %s16599_s0 = sadd.s32 1, %s16465_s29  }
   0xb   : > { %22243 = sst [smem:[#allocation10_spill]] %s16599_s0  ;;  %s424_s19 = sadd.s32 1, %s16461_s14 }
   0xc   : > { %s421_s1 = ssub.s32 %s16465_s29, %s16599_s0  ;;  %p434_p0 = scmp.ne.s32.totalorder %s16461_s14, %s16457_s28 }
   0xd   : > { %p422_p1 = scmp.eq.s32.totalorder %s421_s1, 0  ;;  %p435_p2 = scmp.eq.s32.totalorder %s16595_s15, 1 }
   0xe   : > { %p440_p3 = scmp.ne.s32.totalorder %s16457_s28, %s16453_s27  ;;  %p441_p4 = scmp.eq.s32.totalorder %s11939_s30, 1 }
   0xf   : > { %s16610_s20 = scalar_select %p422_p1, %s16461_s14, %s424_s19  }
  0x10   : > { %p16612_p5 = por %p435_p2, %p434_p0  ;;  %p16616_p6 = por %p441_p4, %p440_p3 }
  0x11   : > { %22244 = sst [smem:[#allocation11_spill]] %s16610_s20  ;;  %p11940_p7 = scmp.ge.s32.totalorder %s16465_s29, 1 }
  0x12   : > { %s22245_s21 = scalar_select %p16612_p5, 1, 0 }
  0x13   : > { %s22246_s22 = scalar_select %p16616_p6, 1, 0 }
  0x14   : > { %p448_p8 = scmp.lt.s32.totalorder %s16465_s29, 3  ;;  %p22194_p9 = scmp.eq.s32.totalorder %s16595_s15, 0 }
  0x15   : > { %22247 = sst [smem:[#allocation12_spill]] %s22246_s22  ;;  %s16467_s23 = smov [#allocation3]  }
  0x16   : > { %p16623_p10 = pnand %p11940_p7, %p448_p8  ;;  %s487_s24 = sshll.u32 %s16467_s23, 4  ;;  %s488_s24 = int_to_ptr.vmem [resolvable:$true] %s487_s24 }
  0x17   : > { %s22250_s10 = sld [smem:[#allocation25_spill]] }
  0x18   : > { %s22248_s2 = scalar_select %p16623_p10, 1, 0 }
  0x19   : > { %p14684_p11 = pneg %p16623_p10 }
  0x1b   : > { %p16631_p12 = pnand %p22194_p9, %p14684_p11 }
  0x1d   : > { %s16371_s19 = scalar_lea.hbm %s22250_s10, 14336  ;;  %p16373_p0 = pneg %p16631_p12 }
  0x1e   : > { %p16372_p13 = scmp.ne.s32.totalorder %s22250_s10, %s16371_s19  ;;  %p16378_p3 = scmp.lt.u32.totalorder %s16371_s19, %s22250_s10 }
  0x20   : > { %p16374_p1 = pnand %p16373_p0, %p16372_p13 }
  0x22   : > { %p16375_p2 = pneg %p16374_p1 }
  0x24   : > { %p16380_p4 = pnand %p16378_p3, %p16375_p2 }
  0x26   : > { %16383 = shalt.err (!%p16380_p4)
}
  0x27   : > { %s16384_s0 = scalar_lea.vmem %s488_s24, 14336  ;;  %p16392_p9 = scmp.lt.s32.totalorder %s488_s24, %s488_s24 }
  0x28   : > { %p16385_p7 = scmp.ne.s32.totalorder %s488_s24, %s16384_s0  ;;  %p16393_p6 = scmp.lt.s32.totalorder %s16384_s0, %s16384_s0 }
  0x2a   : > { %p16387_p8 = pnand %p16385_p7, %p16373_p0  ;;  %p16394_p5 = por %p16393_p6, %p16392_p9 }
  0x2c   : > { %p16388_p11 = pneg %p16387_p8 }
  0x2e   : > { %p16395_p10 = pnand %p16394_p5, %p16388_p11 }
  0x30   : > { %16398 = shalt.err (!%p16395_p10)
}
  0x31   : > { %s16468_s20 = smov 256   ;;  %s16469_s26 = smov 16  }
  0x32   : > { %14687 = dma.hbm_to_vmem [thread:$0]  (!%p16631_p12), %s22250_s10, 14336, %s488_s24, [#allocation4], %s16468_s20, %s16468_s20, %s16469_s26  }
  0x33   : > { %p22251_p13 = scmp.ne.s32.totalorder %s22248_s2, 0 }
  0x35   : > { %532 = sbr.rel (%p22251_p13) target bundleno = 3554 (0xde2), region = 92 }
  0x3c   : > { %p22252_p1 = scmp.eq.s32.totalorder %s16595_s15, 0 }
  0x3e   : > { %16444 = dma.done.wait (%p22252_p1), [#allocation4], 14336   ;;  %p22253_p0 = pmov %p22252_p1 }
  0x3f   : > { %s22254_s19 = sld [smem:[#allocation23_spill]]  ;;  %p585_p5 = scmp.lt.s32.totalorder %s16595_s15, 1  ;;  %vm718_vm0 = vsmask.f32 7424  ;;  %vm1038_vm1 = vcmask 130048   ;;  %vm1763_vm3 = vcmask 1046528  }
  0x40   : > { %16446 = vsyncadd (%p22253_p0), [#allocation4], 4294952960  ;;  %s22255_s10 = sld [smem:[#allocation22_spill]]  ;;  %vm2336_vm2 = vsmask.f32 6400  ;;  %vm2921_vm5 = vcmask 1045504  }
  0x41   : > { %s586_s1 = scalar_select %p585_p5, %s16595_s15, 1  ;;  %vm3494_vm4 = vsmask.f32 5376  ;;  %vm4079_vm6 = vcmask 1044480  }
  0x42   : > { %s22204_s2 = smov 96   ;;  %s22289_s23 = smov 96  }
  0x43   : > { %s14677_s26 = smul.u32 96, %s586_s1  ;;  %s22202_s1 = smov 112  }
  0x44   : > { %s16476_s22 = smov 64   ;;  %s13760_s14 = sshll.u32 %s16595_s15, 4 }
  0x45   : > { %v14898_v0 = vld [vmem:[%s22254_s19 + $0x1b4] ss:$24 sps:$4 sm:$0xff]   ;;  %v14900_v1 = vld [vmem:[%s22254_s19 + $0x1b0] ss:$24 sps:$4 sm:$0xff]   ;;  %v14903_v3 = vld [vmem:[%s22254_s19 + $0x1e4] ss:$24 sps:$4 sm:$0xff]   ;;  %s22129_s24 = scalar_lea.hbm %s22189_s18, %s13760_s14 }
  0x46   : > { %1048 = vmatprep.subr.bf16.mxu0 %v14898_v0  ;;  %v14901_v2 = vld [vmem:[%s22254_s19 + $0x1bc] ss:$24 sps:$4 sm:$0xff]   ;;  %v14905_v4 = vld [vmem:[%s22254_s19 + $0x1b8] ss:$24 sps:$4 sm:$0xff]   ;;  %v14907_v6 = vld [vmem:[%s22254_s19 + $0x1ec] ss:$24 sps:$4 sm:$0xff]   ;;  %s16734_s30 = scalar_lea.vmem %s22255_s10, %s14677_s26 }
  0x47   : > { %1049 = vmatpush1.bf16.msra.mxu0 %v14900_v1  ;;  %v14906_v5 = vld [vmem:[%s22254_s19 + $0x1e0] ss:$24 sps:$4 sm:$0xff]   ;;  %1111 = vmatprep.subr.bf16.mxu1 %v14901_v2  ;;  %v14909_v7 = vld [vmem:[%s22254_s19 + $0x214] ss:$24 sps:$4 sm:$0xff]   ;;  %v14912_v9 = vld [vmem:[%s22254_s19 + $0x210] ss:$24 sps:$4 sm:$0xff]  }
  0x48   : > { %1050 = vmatprep.subr.bf16.mxu0 %v14903_v3  ;;  %1112 = vmatpush1.bf16.msra.mxu1 %v14905_v4  ;;  %v14911_v8 = vld [vmem:[%s22254_s19 + $0x1e8] ss:$24 sps:$4 sm:$0xff]   ;;  %v14913_v10 = vld [vmem:[%s22254_s19 + $0x21c] ss:$24 sps:$4 sm:$0xff]   ;;  %v14917_v12 = vld [vmem:[%s22254_s19 + $0x218] ss:$24 sps:$4 sm:$0xff]  }
  0x49   : > { %1113 = vmatprep.subr.bf16.mxu1 %v14907_v6  ;;  %v14915_v11 = vld [vmem:[%s22254_s19 + $0x244] ss:$24 sps:$4 sm:$0xff]   ;;  %v14918_v14 = vld [vmem:[%s22254_s19 + $0x240] ss:$24 sps:$4 sm:$0xff]   ;;  %v14921_v15 = vld [vmem:[%s22254_s19 + $0x274] ss:$24 sps:$4 sm:$0xff]  }
  0x4a   : > { %v14919_v13 = vld [vmem:[%s22254_s19 + $0x24c] ss:$24 sps:$4 sm:$0xff]   ;;  %v14923_v16 = vld [vmem:[%s22254_s19 + $0x248] ss:$24 sps:$4 sm:$0xff]   ;;  %v14925_v17 = vld [vmem:[%s22254_s19 + $0x27c] ss:$24 sps:$4 sm:$0xff]  }
  0x4b   : > { %1051 = vmatpush1.bf16.msra.mxu0 %v14906_v5  ;;  %v14924_v18 = vld [vmem:[%s22254_s19 + $0x270] ss:$24 sps:$4 sm:$0xff]   ;;  %v14927_v19 = vld [vmem:[%s22254_s19 + $0x2a4] ss:$24 sps:$4 sm:$0xff]   ;;  %v14930_v22 = vld [vmem:[%s22254_s19 + $0x2a0] ss:$24 sps:$4 sm:$0xff]  }
  0x4c   : > { %1052 = vmatprep.subr.bf16.mxu0 %v14909_v7  ;;  %1114 = vmatpush1.bf16.msra.mxu1 %v14911_v8  ;;  %v14929_v20 = vld [vmem:[%s22254_s19 + $0x278] ss:$24 sps:$4 sm:$0xff]   ;;  %v14931_v21 = vld [vmem:[%s22254_s19 + $0x2ac] ss:$24 sps:$4 sm:$0xff]   ;;  %v14935_v24 = vld [vmem:[%s22254_s19 + $0x2a8] ss:$24 sps:$4 sm:$0xff]  }
  0x4d   : > { %1115 = vmatprep.subr.bf16.mxu1 %v14913_v10  ;;  %v14933_v23 = vld [vmem:[%s22254_s19 + $0x2d4] ss:$24 sps:$4 sm:$0xff]   ;;  %v14936_v25 = vld [vmem:[%s22254_s19 + $0x2d0] ss:$24 sps:$4 sm:$0xff]   ;;  %v14939_v27 = vld [vmem:[%s22254_s19 + $0x304] ss:$24 sps:$4 sm:$0xff]  }
  0x4e   : > { %v14937_v26 = vld [vmem:[%s22254_s19 + $0x2dc] ss:$24 sps:$4 sm:$0xff]   ;;  %v592_v28 = vld [vmem:[%s16734_s30 + $0x8] sm:$0xff]  ;;  %v14941_v32 = vld [vmem:[%s22254_s19 + $0x2d8] ss:$24 sps:$4 sm:$0xff]   ;;  %p22325_p9 = scmp.ne.s32.totalorder %s22245_s21, 0 }
  0x4f   : > { %1053 = vmatpush1.bf16.msra.mxu0 %v14912_v9  ;;  %v594_v29 = vld [vmem:[%s16734_s30 + $0x18] sm:$0xff]  ;;  %v596_v30 = vld [vmem:[%s16734_s30 + $0x28] sm:$0xff]  ;;  %v591_v37 = vld [vmem:[%s16734_s30] sm:$0xff] }
  0x50   : > { %1054 = vmatprep.subr.bf16.mxu0 %v14915_v11  ;;  %1116 = vmatpush1.bf16.msra.mxu1 %v14917_v12  ;;  %v598_v31 = vld [vmem:[%s16734_s30 + $0x38] sm:$0xff]  ;;  %v16755_v33 = vpack.c.bf16 %v594_v29, %v592_v28  ;;  %v14943_v36 = vld [vmem:[%s22254_s19 + $0x30c] ss:$24 sps:$4 sm:$0xff]   ;;  %v593_v41 = vld [vmem:[%s16734_s30 + $0x10] sm:$0xff] }
  0x51   : > { %1117 = vmatprep.subr.bf16.mxu1 %v14919_v13  ;;  %v16757_v34 = vpack.c.bf16 %v598_v31, %v596_v30  ;;  %v14942_v35 = vld [vmem:[%s22254_s19 + $0x300] ss:$24 sps:$4 sm:$0xff]   ;;  %v597_v43 = vld [vmem:[%s16734_s30 + $0x30] sm:$0xff]  ;;  %v16781_v45 = vpack.c.bf16 %v593_v41, %v591_v37  ;;  %v14954_v56 = vld [vmem:[%s22254_s19 + $0x1c4] ss:$24 sps:$4 sm:$0xff]  }
  0x52   : > { %v16767_v38 = vshrl.u32 %v16755_v33, 16  ;;  %v16770_v39 = vshll.u32 %v16755_v33, 16  ;;  %v595_v42 = vld [vmem:[%s16734_s30 + $0x20] sm:$0xff]  ;;  %v14945_v44 = vld [vmem:[%s22254_s19 + $0x334] ss:$24 sps:$4 sm:$0xff]  }
  0x53   : > { %1055 = vmatpush1.bf16.msra.mxu0 %v14918_v14  ;;  %v16773_v40 = vshll.u32 %v16757_v34, 16  ;;  %v16783_v46 = vpack.c.bf16 %v597_v43, %v595_v42  ;;  %v14947_v47 = vld [vmem:[%s22254_s19 + $0x308] ss:$24 sps:$4 sm:$0xff]   ;;  %v14949_v50 = vld [vmem:[%s22254_s19 + $0x33c] ss:$24 sps:$4 sm:$0xff]   ;;  %v16794_v51 = vshrl.u32 %v16781_v45, 16 }
  0x54   : > { %1056 = vmatprep.subr.bf16.mxu0 %v14921_v15  ;;  %1118 = vmatpush1.bf16.msra.mxu1 %v14923_v16  ;;  %v736_v48 = vrot.slane %v16770_v39, 1  ;;  %v16797_v52 = vshll.u32 %v16781_v45, 16  ;;  %v14948_v54 = vld [vmem:[%s22254_s19 + $0x330] ss:$24 sps:$4 sm:$0xff]   ;;  %v14957_v62 = vld [vmem:[%s22254_s19 + $0xc] ss:$24 sps:$4 sm:$0xff]  }
  0x55   : > { %1119 = vmatprep.subr.bf16.mxu1 %v14925_v17  ;;  %v741_v49 = vrot.slane %v16773_v40, 1  ;;  %v16800_v53 = vshll.u32 %v16783_v46, 16  ;;  %v14951_v60 = vld [vmem:[%s22254_s19 + $0x338] ss:$24 sps:$4 sm:$0xff]   ;;  %v16826_v63 = vshrl.u32 %v16757_v34, 16  ;;  %v2344_v1 = vrot.slane %v16767_v38, 1 }
  0x56   : > { %v737_v55 = vor.u32 %v736_v48, %v16767_v38  ;;  %v724_v57 = vrot.slane %v16797_v52, 1  ;;  %v14952_v0 = vld [vmem:[%s22254_s19 + $0x1c0] ss:$24 sps:$4 sm:$0xff]   ;;  %v14960_v3 = vld [vmem:[%s22254_s19 + $0x1f4] ss:$24 sps:$4 sm:$0xff]   ;;  %v2345_v4 = vrot.slane %v16770_v39, 2 }
  0x57   : > { %1057 = vmatpush1.bf16.msra.mxu0 %v14924_v18  ;;  %v729_v58 = vrot.slane %v16800_v53, 1  ;;  %v2347_v5 = vrot.slane %v16826_v63, 1  ;;  %v14955_v6 = vld [vmem:[%s22254_s19 + $0x8] ss:$24 sps:$4 sm:$0xff]   ;;  %v16846_v7 = vshrl.u32 %v16783_v46, 16  ;;  %v2348_v8 = vrot.slane %v16773_v40, 2 }
  0x58   : > { %1058 = vmatprep.subr.bf16.mxu0 %v14927_v19  ;;  %1120 = vmatpush1.bf16.msra.mxu1 %v14929_v20  ;;  %v16814_v59 = vsel %vm718_vm0, %v737_v55, %v741_v49  ;;  %v725_v61 = vor.u32 %v724_v57, %v16794_v51  ;;  %v14963_v9 = vld [vmem:[%s22254_s19 + $0x3c] ss:$24 sps:$4 sm:$0xff]   ;;  %v2346_v10 = vor.u32 %v2345_v4, %v2344_v1  ;;  %v2337_v11 = vrot.slane %v16794_v51, 1  ;;  %v14958_v12 = vld [vmem:[%s22254_s19 + $0x1f0] ss:$24 sps:$4 sm:$0xff]  }
  0x59   : > { %1121 = vmatprep.subr.bf16.mxu1 %v14931_v21  ;;  %12054 = vmatprep.mubr.msk.bf16.mxu0 %vm1038_vm1, %v16814_v59  ;;  %v16857_v13 = vor.u32 %v2348_v8, %v2347_v5  ;;  %v2338_v14 = vrot.slane %v16797_v52, 2  ;;  %v2340_v15 = vrot.slane %v16846_v7, 1  ;;  %v14966_v16 = vld [vmem:[%s22254_s19 + $0x224] ss:$24 sps:$4 sm:$0xff]   ;;  %v600_v17 = vld [vmem:[%s16734_s30 + $0x48] sm:$0xff]  ;;  %v2341_v19 = vrot.slane %v16800_v53, 2 }
  0x5a   : > { %12057 = vmatprep.mubr.msk.bf16.mxu1 %vm1038_vm1, %v16814_v59  ;;  %v16835_v2 = vsel %vm718_vm0, %v725_v61, %v729_v58  ;;  %v602_v18 = vld [vmem:[%s16734_s30 + $0x58] sm:$0xff]  ;;  %v753_v29 = vor.u32 %v16826_v63, %v741_v49  ;;  %v14967_v37 = vld [vmem:[%s22254_s19 + $0x68] ss:$24 sps:$4 sm:$0xff]   ;;  %v745_v43 = vor.u32 %v16846_v7, %v729_v58  ;;  %v14984_v4 = vld [vmem:[%s22254_s19 + $0x2b4] ss:$24 sps:$4 sm:$0xff]  }
  0x5b   : > { %1059 = vmatpush1.bf16.msra.mxu0 %v14930_v22  ;;  %v14961_v20 = vld [vmem:[%s22254_s19 + $0x38] ss:$24 sps:$4 sm:$0xff]   ;;  %v16871_v21 = vpack.c.bf16 %v602_v18, %v600_v17  ;;  %v16875_v22 = vsel %vm2336_vm2, %v2346_v10, %v16857_v13  ;;  %v14978_v55 = vld [vmem:[%s22254_s19 + $0x284] ss:$24 sps:$4 sm:$0xff]   ;;  %v14991_v17 = vld [vmem:[%s22254_s19 + $0x128] ss:$24 sps:$4 sm:$0xff]  }
  0x5c   : > { %1060 = vmatprep.subr.bf16.mxu0 %v14933_v23  ;;  %1122 = vmatpush1.bf16.msra.mxu1 %v14935_v24  ;;  %v2339_v23 = vor.u32 %v2338_v14, %v2337_v11  ;;  %v14969_v24 = vld [vmem:[%s22254_s19 + $0x6c] ss:$24 sps:$4 sm:$0xff]   ;;  %v14964_v28 = vld [vmem:[%s22254_s19 + $0x220] ss:$24 sps:$4 sm:$0xff]   ;;  %v14970_v41 = vld [vmem:[%s22254_s19 + $0x250] ss:$24 sps:$4 sm:$0xff]  }
  0x5d   : > { %1123 = vmatprep.subr.bf16.mxu1 %v14937_v26  ;;  %v601_v26 = vld [vmem:[%s16734_s30 + $0x50] sm:$0xff]  ;;  %v16891_v30 = vshll.u32 %v16871_v21, 16  ;;  %v14990_v11 = vld [vmem:[%s22254_s19 + $0x2e4] ss:$24 sps:$4 sm:$0xff]  }
  0x5e   : > { %v14973_v58 = vld [vmem:[%s22254_s19 + $0x98] ss:$24 sps:$4 sm:$0xff]   ;;  %v14987_v8 = vld [vmem:[%s22254_s19 + $0xfc] ss:$24 sps:$4 sm:$0xff]   ;;  %v14993_v14 = vld [vmem:[%s22254_s19 + $0x12c] ss:$24 sps:$4 sm:$0xff]  }
  0x5f   : > { %1061 = vmatpush1.bf16.msra.mxu0 %v14936_v25  ;;  %v599_v25 = vld [vmem:[%s16734_s30 + $0x40] sm:$0xff]  ;;  %v757_v42 = vrot.slane %v16891_v30, 1  ;;  %v2356_v57 = vrot.slane %v16891_v30, 2  ;;  %v14982_v10 = vld [vmem:[%s22254_s19 + $0x2b0] ss:$24 sps:$4 sm:$0xff]   ;;  %s22257_s30 = sld [smem:[#allocation24_spill]] }
  0x60   : > { %1062 = vmatprep.subr.bf16.mxu0 %v14939_v27  ;;  %1124 = vmatpush1.bf16.msra.mxu1 %v14941_v32  ;;  %v16882_v27 = vor.u32 %v2341_v19, %v2340_v15  ;;  %v16893_v31 = vpack.c.bf16 %v601_v26, %v599_v25  ;;  %v14972_v32 = vld [vmem:[%s22254_s19 + $0x254] ss:$24 sps:$4 sm:$0xff]   ;;  %v14988_v15 = vld [vmem:[%s22254_s19 + $0x2e0] ss:$24 sps:$4 sm:$0xff]   ;;  %v14994_v19 = vld [vmem:[%s22254_s19 + $0x310] ss:$24 sps:$4 sm:$0xff]  }
  0x61   : > { %1125 = vmatprep.subr.bf16.mxu1 %v14943_v36  ;;  %v16920_v48 = vsel %vm718_vm0, %v753_v29, %v757_v42  ;;  %v14999_v18 = vld [vmem:[%s22254_s19 + $0x15c] ss:$24 sps:$4 sm:$0xff]   ;;  %v15003_v26 = vld [vmem:[%s22254_s19 + $0x188] ss:$24 sps:$4 sm:$0xff]  }
  0x62   : > { %v16903_v36 = vsel %vm2336_vm2, %v2339_v23, %v16882_v27  ;;  %v15005_v23 = vld [vmem:[%s22254_s19 + $0x18c] ss:$24 sps:$4 sm:$0xff]   ;;  %v15006_v29 = vld [vmem:[%s22254_s19] ss:$24 sps:$4 sm:$0xff]  }
  0x63   : > { %1063 = vmatpush1.bf16.msra.mxu0 %v14942_v35  ;;  %v16899_v35 = vshrl.u32 %v16871_v21, 16  ;;  %v15008_v25 = vld [vmem:[%s22254_s19 + $0x4] ss:$24 sps:$4 sm:$0xff]  }
  0x64   : > { %1064 = vmatprep.subr.bf16.mxu0 %v14945_v44  ;;  %1126 = vmatpush1.bf16.msra.mxu1 %v14947_v47  ;;  %v16914_v44 = vshll.u32 %v16893_v31, 16  ;;  %v14975_v47 = vld [vmem:[%s22254_s19 + $0x9c] ss:$24 sps:$4 sm:$0xff]  }
  0x65   : > { %1127 = vmatprep.subr.bf16.mxu1 %v14949_v50  ;;  %v16924_v50 = vshrl.u32 %v16893_v31, 16 }
  0x66   : > { %v749_v49 = vrot.slane %v16914_v44, 1  ;;  %v2352_v1 = vrot.slane %v16914_v44, 2 }
  0x67   : > { %1065 = vmatpush1.bf16.msra.mxu0 %v14948_v54  ;;  %v2355_v54 = vrot.slane %v16899_v35, 1  ;;  %v2351_v61 = vrot.slane %v16924_v50, 1 }
  0x68   : > { %1174 = vmatprep.subr.bf16.mxu0 %v14954_v56  ;;  %1128 = vmatpush1.bf16.msra.mxu1 %v14951_v60  ;;  %v16933_v56 = vor.u32 %v16899_v35, %v757_v42  ;;  %v16940_v60 = vsel %vm718_vm0, %v745_v43, %v749_v49  ;;  %v15012_v42 = vld [vmem:[%s22254_s19 + $0x30] ss:$24 sps:$4 sm:$0xff]  }
  0x69   : > { %1576 = vmatprep.subr.bf16.mxu1 %v14957_v62  ;;  %v14981_v62 = vld [vmem:[%s22254_s19 + $0xcc] ss:$24 sps:$4 sm:$0xff]   ;;  %v16961_v5 = vor.u32 %v2352_v1, %v2351_v61  ;;  %v15015_v43 = vld [vmem:[%s22254_s19 + $0x398] ss:$24 sps:$4 sm:$0xff]   ;;  %v1767_v61 = vrot.slane %v16755_v33, 1 }
  0x6a   : > { %1081 = vmatmul.mubr.bf16.vlgmr.msra.gmra.mrb[0].mxu0 %v16835_v2  ;;  %v15030_v1 = vld [vmem:[%s22254_s19 + $0xc0] ss:$24 sps:$4 sm:$0xff]  }
  0x6b   : > { %1175 = vmatpush1.bf16.msra.mxu0 %v14952_v0  ;;  %1144 = vmatmul.mubr.bf16.vlgmr.msra.gmra.mrb[0].mxu1 %v16835_v2  ;;  %v16949_v0 = vor.u32 %v2356_v57, %v2355_v54  ;;  %v15021_v54 = vld [vmem:[%s22254_s19 + $0x3c8] ss:$24 sps:$4 sm:$0xff]  }
  0x6c   : > { %1176 = vmatprep.subr.bf16.mxu0 %v14960_v3  ;;  %1577 = vmatpush1.bf16.msra.mxu1 %v14955_v6  ;;  %v14976_v3 = vld [vmem:[%s22254_s19 + $0x280] ss:$24 sps:$4 sm:$0xff]   ;;  %v15024_v57 = vld [vmem:[%s22254_s19 + $0x90] ss:$24 sps:$4 sm:$0xff]  }
  0x6d   : > { %1578 = vmatprep.subr.bf16.mxu1 %v14963_v9  ;;  %12055 = vmatprep.mubr.msk.bf16.mxu0 %vm1038_vm1, %v16920_v48  ;;  %v14979_v6 = vld [vmem:[%s22254_s19 + $0xc8] ss:$24 sps:$4 sm:$0xff]   ;;  %v16972_v9 = vor.u32 %v16924_v50, %v749_v49  ;;  %v15026_v49 = vld [vmem:[%s22254_s19 + $0x94] ss:$24 sps:$4 sm:$0xff]  }
  0x6e   : > { %12058 = vmatprep.mubr.msk.bf16.mxu1 %vm1038_vm1, %v16920_v48 }
  0x6f   : > { %1177 = vmatpush1.bf16.msra.mxu0 %v14958_v12  ;;  %v14985_v12 = vld [vmem:[%s22254_s19 + $0xf8] ss:$24 sps:$4 sm:$0xff]  }
  0x70   : > { %1178 = vmatprep.subr.bf16.mxu0 %v14966_v16  ;;  %1579 = vmatpush1.bf16.msra.mxu1 %v14961_v20  ;;  %v14996_v16 = vld [vmem:[%s22254_s19 + $0x314] ss:$24 sps:$4 sm:$0xff]   ;;  %v14997_v20 = vld [vmem:[%s22254_s19 + $0x158] ss:$24 sps:$4 sm:$0xff]  }
  0x71   : > { %1580 = vmatprep.subr.bf16.mxu1 %v14969_v24  ;;  %v15000_v24 = vld [vmem:[%s22254_s19 + $0x340] ss:$24 sps:$4 sm:$0xff]  }
  0x72   : > { %1091 = vmatmul.mubr.bf16.gmra.mrb[4].mxu0 %v16940_v60 }
  0x73   : > { %1179 = vmatpush1.bf16.msra.mxu0 %v14964_v28  ;;  %1154 = vmatmul.mubr.bf16.gmra.mrb[4].mxu1 %v16940_v60  ;;  %v15011_v28 = vld [vmem:[%s22254_s19 + $0x36c] ss:$24 sps:$4 sm:$0xff]  }
  0x74   : > { %1180 = vmatprep.subr.bf16.mxu0 %v14972_v32  ;;  %1581 = vmatpush1.bf16.msra.mxu1 %v14967_v37  ;;  %v15014_v32 = vld [vmem:[%s22254_s19 + $0x34] ss:$24 sps:$4 sm:$0xff]   ;;  %v15009_v37 = vld [vmem:[%s22254_s19 + $0x368] ss:$24 sps:$4 sm:$0xff]  }
  0x75   : > { %1582 = vmatprep.subr.bf16.mxu1 %v14975_v47  ;;  %12056 = vmatprep.mubr.msk.bf16.mxu0 %vm1038_vm1, %v16933_v56  ;;  %v15023_v47 = vld [vmem:[%s22254_s19 + $0x3cc] ss:$24 sps:$4 sm:$0xff]  }
  0x76   : > { %12059 = vmatprep.mubr.msk.bf16.mxu1 %vm1038_vm1, %v16933_v56 }
  0x77   : > { %1181 = vmatpush1.bf16.msra.mxu0 %v14970_v41  ;;  %v15017_v41 = vld [vmem:[%s22254_s19 + $0x39c] ss:$24 sps:$4 sm:$0xff]  }
  0x78   : > { %1182 = vmatprep.subr.bf16.mxu0 %v14978_v55  ;;  %1583 = vmatpush1.bf16.msra.mxu1 %v14973_v58  ;;  %v15029_v55 = vld [vmem:[%s22254_s19 + $0x3fc] ss:$24 sps:$4 sm:$0xff]  }
  0x79   : > { %1584 = vmatprep.subr.bf16.mxu1 %v14981_v62  ;;  %v15032_v58 = vld [vmem:[%s22254_s19 + $0xc4] ss:$24 sps:$4 sm:$0xff]   ;;  %v1768_v62 = vrot.slane %v16757_v34, 1 }
  0x7a   : > { %1101 = vmatmul.mubr.bf16.gmra.mrb[8].mxu0 %v16972_v9 }
  0x7b   : > { %1183 = vmatpush1.bf16.msra.mxu0 %v14976_v3  ;;  %1164 = vmatmul.mubr.bf16.gmra.mrb[8].mxu1 %v16972_v9  ;;  %v15038_v3 = vld [vmem:[%s22254_s19 + $0xf4] ss:$24 sps:$4 sm:$0xff]  }
  0x7c   : > { %1184 = vmatprep.subr.bf16.mxu0 %v14984_v4  ;;  %1585 = vmatpush1.bf16.msra.mxu1 %v14979_v6  ;;  %v3502_v4 = vrot.slane %v16767_v38, 2  ;;  %v15033_v6 = vld [vmem:[%s22254_s19 + $0x428] ss:$24 sps:$4 sm:$0xff]   ;;  %v3505_v38 = vrot.slane %v16826_v63, 2 }
  0x7d   : > { %1586 = vmatprep.subr.bf16.mxu1 %v14987_v8  ;;  %12060 = vmatprep.mubr.msk.bf16.mxu0 %vm1038_vm1, %v16814_v59  ;;  %v15002_v59 = vld [vmem:[%s22254_s19 + $0x344] ss:$24 sps:$4 sm:$0xff]   ;;  %v3503_v8 = vrot.slane %v16770_v39, 3  ;;  %v15036_v39 = vld [vmem:[%s22254_s19 + $0xf0] ss:$24 sps:$4 sm:$0xff]  }
  0x7e   : > { %12120 = vmatprep.mubr.msk.bf16.mxu1 %vm1038_vm1, %v16755_v33 }
  0x7f   : > { %1185 = vmatpush1.bf16.msra.mxu0 %v14982_v10  ;;  %v15041_v10 = vld [vmem:[%s22254_s19 + $0x45c] ss:$24 sps:$4 sm:$0xff]  }
  0x80   : > { %1186 = vmatprep.subr.bf16.mxu0 %v14990_v11  ;;  %1587 = vmatpush1.bf16.msra.mxu1 %v14985_v12  ;;  %v17108_v11 = vsel %vm1763_vm3, %v1767_v61, %v1768_v62  ;;  %v3506_v12 = vrot.slane %v16773_v40, 3  ;;  %v3495_v40 = vrot.slane %v16794_v51, 2  ;;  %v3498_v51 = vrot.slane %v16846_v7, 2  ;;  %v15045_v7 = vld [vmem:[%s22254_s19 + $0x488] ss:$24 sps:$4 sm:$0xff]  }
  0x81   : > { %1588 = vmatprep.subr.bf16.mxu1 %v14993_v14  ;;  %v3504_v14 = vor.u32 %v3503_v8, %v3502_v4  ;;  %v15066_v61 = vld [vmem:[%s22254_s19 + $0x40] ss:$24 sps:$4 sm:$0xff]   ;;  %v15077_v4 = vld [vmem:[%s22254_s19 + $0x57c] ss:$24 sps:$4 sm:$0xff]  }
  0x82   : > { %v17121_v63 = vor.u32 %v3506_v12, %v3505_v38  ;;  %v15080_v8 = vld [vmem:[%s22254_s19 + $0xa4] ss:$24 sps:$4 sm:$0xff]  }
  0x83   : > { %1187 = vmatpush1.bf16.msra.mxu0 %v14988_v15  ;;  %v15039_v15 = vld [vmem:[%s22254_s19 + $0x458] ss:$24 sps:$4 sm:$0xff]   ;;  %v15083_v12 = vld [vmem:[%s22254_s19 + $0x5ac] ss:$24 sps:$4 sm:$0xff]  }
  0x84   : > { %1188 = vmatprep.subr.bf16.mxu0 %v14996_v16  ;;  %1589 = vmatpush1.bf16.msra.mxu1 %v14991_v17  ;;  %v3496_v16 = vrot.slane %v16797_v52, 3  ;;  %v15047_v17 = vld [vmem:[%s22254_s19 + $0x48c] ss:$24 sps:$4 sm:$0xff]  }
  0x85   : > { %1590 = vmatprep.subr.bf16.mxu1 %v14999_v18  ;;  %v17135_v18 = vsel %vm3494_vm4, %v3504_v14, %v17121_v63  ;;  %v15050_v52 = vld [vmem:[%s22254_s19 + $0x154] ss:$24 sps:$4 sm:$0xff]  }
  0x86   : > { %v15086_v14 = vld [vmem:[%s22254_s19 + $0xd4] ss:$24 sps:$4 sm:$0xff]  }
  0x87   : > { %1189 = vmatpush1.bf16.msra.mxu0 %v14994_v19  ;;  %v3499_v19 = vrot.slane %v16800_v53, 3  ;;  %v15053_v53 = vld [vmem:[%s22254_s19 + $0x4bc] ss:$24 sps:$4 sm:$0xff]  }
  0x88   : > { %1190 = vmatprep.subr.bf16.mxu0 %v15002_v59  ;;  %1591 = vmatpush1.bf16.msra.mxu1 %v14997_v20  ;;  %v15042_v59 = vld [vmem:[%s22254_s19 + $0x120] ss:$24 sps:$4 sm:$0xff]   ;;  %v3497_v20 = vor.u32 %v3496_v16, %v3495_v40  ;;  %v15089_v40 = vld [vmem:[%s22254_s19 + $0x5dc] ss:$24 sps:$4 sm:$0xff]  }
  0x89   : > { %1592 = vmatprep.subr.bf16.mxu1 %v15005_v23  ;;  %v17145_v23 = vor.u32 %v3499_v19, %v3498_v51  ;;  %v15092_v16 = vld [vmem:[%s22254_s19 + $0x104] ss:$24 sps:$4 sm:$0xff]   ;;  %v15090_v19 = vld [vmem:[%s22254_s19 + $0x100] ss:$24 sps:$4 sm:$0xff]  }
  0x8a   : > { %v15095_v51 = vld [vmem:[%s22254_s19 + $0x60c] ss:$24 sps:$4 sm:$0xff]  }
  0x8b   : > { %1191 = vmatpush1.bf16.msra.mxu0 %v15000_v24  ;;  %v17155_v24 = vsel %vm3494_vm4, %v3497_v20, %v17145_v23  ;;  %v15093_v20 = vld [vmem:[%s22254_s19 + $0x608] ss:$24 sps:$4 sm:$0xff]  }
  0x8c   : > { %1513 = vmatprep.subr.bf16.mxu0 %v15008_v25  ;;  %1593 = vmatpush1.bf16.msra.mxu1 %v15003_v26  ;;  %v15048_v25 = vld [vmem:[%s22254_s19 + $0x150] ss:$24 sps:$4 sm:$0xff]   ;;  %v15056_v26 = vld [vmem:[%s22254_s19 + $0x184] ss:$24 sps:$4 sm:$0xff]  }
  0x8d   : > { %2119 = vmatprep.subr.bf16.mxu1 %v15011_v28  ;;  %v15051_v28 = vld [vmem:[%s22254_s19 + $0x4b8] ss:$24 sps:$4 sm:$0xff]  }
  0x8e   : > { %1207 = vmatmul.mubr.bf16.vlgmr.msra.gmra.mrb[12].mxu0 %v16835_v2  ;;  %v15020_v2 = vld [vmem:[%s22254_s19 + $0x64] ss:$24 sps:$4 sm:$0xff]  }
  0x8f   : > { %1514 = vmatpush1.bf16.msra.mxu0 %v15006_v29  ;;  %12061 = vmatprep.mubr.msk.bf16.mxu0 %vm1038_vm1, %v16920_v48  ;;  %v15018_v48 = vld [vmem:[%s22254_s19 + $0x60] ss:$24 sps:$4 sm:$0xff]   ;;  %v15059_v29 = vld [vmem:[%s22254_s19 + $0x4ec] ss:$24 sps:$4 sm:$0xff]  }
  0x90   : > { %1515 = vmatprep.subr.bf16.mxu0 %v15014_v32  ;;  %1609 = vmatmul.mubr.bf16.vlgmr.msra.gmra.mrb[0].mxu1 %v16781_v45  ;;  %v15054_v32 = vld [vmem:[%s22254_s19 + $0x180] ss:$24 sps:$4 sm:$0xff]  }
  0x91   : > { %2120 = vmatpush1.bf16.msra.mxu1 %v15009_v37  ;;  %12121 = vmatprep.mubr.msk.bf16.mxu1 %vm1038_vm1, %v16757_v34  ;;  %v15062_v37 = vld [vmem:[%s22254_s19 + $0x14] ss:$24 sps:$4 sm:$0xff]  }
  0x92   : > { %2121 = vmatprep.subr.bf16.mxu1 %v15017_v41  ;;  %v15057_v41 = vld [vmem:[%s22254_s19 + $0x4e8] ss:$24 sps:$4 sm:$0xff]  }
  0x93   : > { %1516 = vmatpush1.bf16.msra.mxu0 %v15012_v42  ;;  %v1764_v42 = vrot.slane %v16781_v45, 1 }
  0x94   : > { %1517 = vmatprep.subr.bf16.mxu0 %v15020_v2  ;;  %v1765_v2 = vrot.slane %v16783_v46, 1 }
  0x95   : > { %2122 = vmatpush1.bf16.msra.mxu1 %v15015_v43  ;;  %v15065_v43 = vld [vmem:[%s22254_s19 + $0x51c] ss:$24 sps:$4 sm:$0xff]  }
  0x96   : > { %2123 = vmatprep.subr.bf16.mxu1 %v15023_v47  ;;  %1217 = vmatmul.mubr.bf16.gmra.mrb[16].mxu0 %v16940_v60  ;;  %v15027_v60 = vld [vmem:[%s22254_s19 + $0x3f8] ss:$24 sps:$4 sm:$0xff]   ;;  %v17184_v47 = vrot.slane %v16871_v21, 1 }
  0x97   : > { %1518 = vmatpush1.bf16.msra.mxu0 %v15018_v48  ;;  %12062 = vmatprep.mubr.msk.bf16.mxu0 %vm1038_vm1, %v16933_v56  ;;  %v15035_v56 = vld [vmem:[%s22254_s19 + $0x42c] ss:$24 sps:$4 sm:$0xff]   ;;  %v15060_v48 = vld [vmem:[%s22254_s19 + $0x10] ss:$24 sps:$4 sm:$0xff]  }
  0x98   : > { %1519 = vmatprep.subr.bf16.mxu0 %v15026_v49  ;;  %1619 = vmatmul.mubr.bf16.gmra.mrb[4].mxu1 %v16783_v46  ;;  %v3513_v49 = vrot.slane %v16899_v35, 2  ;;  %v3510_v35 = vrot.slane %v16914_v44, 3 }
  0x99   : > { %2124 = vmatpush1.bf16.msra.mxu1 %v15021_v54  ;;  %12122 = vmatprep.mubr.msk.bf16.mxu1 %vm1038_vm1, %v16871_v21  ;;  %v3514_v54 = vrot.slane %v16891_v30, 3  ;;  %v15071_v30 = vld [vmem:[%s22254_s19 + $0x54c] ss:$24 sps:$4 sm:$0xff]  }
  0x9a   : > { %2125 = vmatprep.subr.bf16.mxu1 %v15029_v55  ;;  %v15068_v55 = vld [vmem:[%s22254_s19 + $0x44] ss:$24 sps:$4 sm:$0xff]  }
  0x9b   : > { %1520 = vmatpush1.bf16.msra.mxu0 %v15024_v57  ;;  %v3509_v57 = vrot.slane %v16924_v50, 2  ;;  %v17212_v50 = vsel %vm1763_vm3, %v1768_v62, %v17184_v47  ;;  %v15069_v62 = vld [vmem:[%s22254_s19 + $0x548] ss:$24 sps:$4 sm:$0xff]  }
  0x9c   : > { %1521 = vmatprep.subr.bf16.mxu0 %v15032_v58  ;;  %v15063_v58 = vld [vmem:[%s22254_s19 + $0x518] ss:$24 sps:$4 sm:$0xff]  }
  0x9d   : > { %2126 = vmatpush1.bf16.msra.mxu1 %v15027_v60  ;;  %v17199_v60 = vsel %vm1763_vm3, %v1764_v42, %v1765_v2  ;;  %v17219_v44 = vor.u32 %v3510_v35, %v3509_v57  ;;  %v15116_v42 = vld [vmem:[%s22254_s19 + $0x364] ss:$24 sps:$4 sm:$0xff]   ;;  %v17352_v57 = vsel %vm2336_vm2, %v16857_v13, %v16949_v0  ;;  %v15123_v13 = vld [vmem:[%s22254_s19 + $0x6f8] ss:$24 sps:$4 sm:$0xff]  }
  0x9e   : > { %2127 = vmatprep.subr.bf16.mxu1 %v15035_v56  ;;  %1227 = vmatmul.mubr.bf16.gmra.mrb[20].mxu0 %v16972_v9  ;;  %v15044_v9 = vld [vmem:[%s22254_s19 + $0x124] ss:$24 sps:$4 sm:$0xff]   ;;  %v17201_v56 = vor.u32 %v3514_v54, %v3513_v49  ;;  %v15122_v49 = vld [vmem:[%s22254_s19 + $0x394] ss:$24 sps:$4 sm:$0xff]   ;;  %v15117_v54 = vld [vmem:[%s22254_s19 + $0x6c8] ss:$24 sps:$4 sm:$0xff]  }
  0x9f   : > { %1522 = vmatpush1.bf16.msra.mxu0 %v15030_v1  ;;  %12117 = vmatprep.mubr.msk.bf16.mxu0 %vm1038_vm1, %v16755_v33  ;;  %v15074_v1 = vld [vmem:[%s22254_s19 + $0x74] ss:$24 sps:$4 sm:$0xff]   ;;  %v15128_v35 = vld [vmem:[%s22254_s19 + $0x3c4] ss:$24 sps:$4 sm:$0xff]  }
  0xa0   : > { %1523 = vmatprep.subr.bf16.mxu0 %v15038_v3  ;;  %1629 = vmatmul.mubr.bf16.gmra.mrb[8].mxu1 %v16893_v31  ;;  %v17231_v3 = vrot.slane %v16893_v31, 1 }
  0xa1   : > { %2128 = vmatpush1.bf16.msra.mxu1 %v15033_v6  ;;  %12237 = vmatprep.mubr.msk.bf16.mxu1 %vm1038_vm1, %v17108_v11  ;;  %v15072_v6 = vld [vmem:[%s22254_s19 + $0x70] ss:$24 sps:$4 sm:$0xff]  }
  0xa2   : > { %2129 = vmatprep.subr.bf16.mxu1 %v15041_v10  ;;  %v15075_v10 = vld [vmem:[%s22254_s19 + $0x578] ss:$24 sps:$4 sm:$0xff]   ;;  %v17247_v38 = vsel %vm1763_vm3, %v1765_v2, %v17231_v3 }
  0xa3   : > { %1524 = vmatpush1.bf16.msra.mxu0 %v15036_v39  ;;  %v15078_v39 = vld [vmem:[%s22254_s19 + $0xa0] ss:$24 sps:$4 sm:$0xff]  }
  0xa4   : > { %1525 = vmatprep.subr.bf16.mxu0 %v15044_v9  ;;  %v15081_v9 = vld [vmem:[%s22254_s19 + $0x5a8] ss:$24 sps:$4 sm:$0xff]   ;;  %v15111_v2 = vld [vmem:[%s22254_s19 + $0x698] ss:$24 sps:$4 sm:$0xff]  }
  0xa5   : > { %2130 = vmatpush1.bf16.msra.mxu1 %v15039_v15  ;;  %v15084_v15 = vld [vmem:[%s22254_s19 + $0xd0] ss:$24 sps:$4 sm:$0xff]  }
  0xa6   : > { %2131 = vmatprep.subr.bf16.mxu1 %v15047_v17  ;;  %v15087_v17 = vld [vmem:[%s22254_s19 + $0x5d8] ss:$24 sps:$4 sm:$0xff]  }
  0xa7   : > { %1526 = vmatpush1.bf16.msra.mxu0 %v15042_v59  ;;  %v15098_v59 = vld [vmem:[%s22254_s19 + $0x134] ss:$24 sps:$4 sm:$0xff]  }
  0xa8   : > { %1527 = vmatprep.subr.bf16.mxu0 %v15050_v52  ;;  %v15101_v52 = vld [vmem:[%s22254_s19 + $0x63c] ss:$24 sps:$4 sm:$0xff]  }
  0xa9   : > { %2132 = vmatpush1.bf16.msra.mxu1 %v15045_v7  ;;  %v15096_v7 = vld [vmem:[%s22254_s19 + $0x130] ss:$24 sps:$4 sm:$0xff]  }
  0xaa   : > { %2133 = vmatprep.subr.bf16.mxu1 %v15053_v53  ;;  %v15104_v53 = vld [vmem:[%s22254_s19 + $0x164] ss:$24 sps:$4 sm:$0xff]  }
  0xab   : > { %1528 = vmatpush1.bf16.msra.mxu0 %v15048_v25  ;;  %v15099_v25 = vld [vmem:[%s22254_s19 + $0x638] ss:$24 sps:$4 sm:$0xff]  }
  0xac   : > { %1529 = vmatprep.subr.bf16.mxu0 %v15056_v26  ;;  %v15107_v26 = vld [vmem:[%s22254_s19 + $0x66c] ss:$24 sps:$4 sm:$0xff]  }
  0xad   : > { %2134 = vmatpush1.bf16.msra.mxu1 %v15051_v28  ;;  %v15102_v28 = vld [vmem:[%s22254_s19 + $0x160] ss:$24 sps:$4 sm:$0xff]  }
  0xae   : > { %2135 = vmatprep.subr.bf16.mxu1 %v15059_v29  ;;  %v15110_v29 = vld [vmem:[%s22254_s19 + $0x194] ss:$24 sps:$4 sm:$0xff]  }
  0xaf   : > { %1530 = vmatpush1.bf16.msra.mxu0 %v15054_v32  ;;  %v15105_v32 = vld [vmem:[%s22254_s19 + $0x668] ss:$24 sps:$4 sm:$0xff]  }
  0xb0   : > { %1639 = vmatprep.subr.bf16.mxu0 %v15062_v37  ;;  %v15113_v37 = vld [vmem:[%s22254_s19 + $0x69c] ss:$24 sps:$4 sm:$0xff]  }
  0xb1   : > { %2136 = vmatpush1.bf16.msra.mxu1 %v15057_v41  ;;  %v15108_v41 = vld [vmem:[%s22254_s19 + $0x190] ss:$24 sps:$4 sm:$0xff]  }
  0xb2   : > { %1546 = vmatmul.mubr.bf16.vlgmr.msra.gmra.mrb[0].mxu0 %v16781_v45  ;;  %2704 = vmatprep.subr.bf16.mxu1 %v15065_v43  ;;  %v15119_v43 = vld [vmem:[%s22254_s19 + $0x6cc] ss:$24 sps:$4 sm:$0xff]  }
  0xb3   : > { %1640 = vmatpush1.bf16.msra.mxu0 %v15060_v48  ;;  %12118 = vmatprep.mubr.msk.bf16.mxu0 %vm1038_vm1, %v16757_v34  ;;  %v15114_v48 = vld [vmem:[%s22254_s19 + $0x360] ss:$24 sps:$4 sm:$0xff]  }
  0xb4   : > { %1641 = vmatprep.subr.bf16.mxu0 %v15068_v55  ;;  %2152 = vmatmul.mubr.bf16.vlgmr.msra.gmra.mrb[0].mxu1 %v17199_v60  ;;  %v15125_v55 = vld [vmem:[%s22254_s19 + $0x6fc] ss:$24 sps:$4 sm:$0xff]  }
  0xb5   : > { %2705 = vmatpush1.bf16.msra.mxu1 %v15063_v58  ;;  %12238 = vmatprep.mubr.msk.bf16.mxu1 %vm1038_vm1, %v17212_v50  ;;  %v15120_v58 = vld [vmem:[%s22254_s19 + $0x390] ss:$24 sps:$4 sm:$0xff]  }
  0xb6   : > { %2706 = vmatprep.subr.bf16.mxu1 %v15071_v30  ;;  %v15131_v30 = vld [vmem:[%s22254_s19 + $0x72c] ss:$24 sps:$4 sm:$0xff]  }
  0xb7   : > { %1642 = vmatpush1.bf16.msra.mxu0 %v15066_v61  ;;  %v15126_v61 = vld [vmem:[%s22254_s19 + $0x3c0] ss:$24 sps:$4 sm:$0xff]  }
  0xb8   : > { %1643 = vmatprep.subr.bf16.mxu0 %v15074_v1  ;;  %v15134_v1 = vld [vmem:[%s22254_s19 + $0x3f4] ss:$24 sps:$4 sm:$0xff]  }
  0xb9   : > { %2707 = vmatpush1.bf16.msra.mxu1 %v15069_v62  ;;  %v15129_v62 = vld [vmem:[%s22254_s19 + $0x728] ss:$24 sps:$4 sm:$0xff]  }
  0xba   : > { %2708 = vmatprep.subr.bf16.mxu1 %v15077_v4  ;;  %1556 = vmatmul.mubr.bf16.gmra.mrb[4].mxu0 %v16783_v46  ;;  %v17383_v4 = vsel %vm2336_vm2, %v16882_v27, %v16961_v5  ;;  %v15140_v27 = vld [vmem:[%s22254_s19 + $0x424] ss:$24 sps:$4 sm:$0xff]  }
  0xbb   : > { %1644 = vmatpush1.bf16.msra.mxu0 %v15072_v6  ;;  %12119 = vmatprep.mubr.msk.bf16.mxu0 %vm1038_vm1, %v16871_v21  ;;  %v15137_v6 = vld [vmem:[%s22254_s19 + $0x75c] ss:$24 sps:$4 sm:$0xff]  }
  0xbc   : > { %1645 = vmatprep.subr.bf16.mxu0 %v15080_v8  ;;  %2162 = vmatmul.mubr.bf16.gmra.mrb[4].mxu1 %v17247_v38  ;;  %v15132_v8 = vld [vmem:[%s22254_s19 + $0x3f0] ss:$24 sps:$4 sm:$0xff]  }
  0xbd   : > { %2709 = vmatpush1.bf16.msra.mxu1 %v15075_v10  ;;  %12239 = vmatprep.mubr.msk.bf16.mxu1 %vm1038_vm1, %v17184_v47  ;;  %v15135_v10 = vld [vmem:[%s22254_s19 + $0x758] ss:$24 sps:$4 sm:$0xff]  }
  0xbe   : > { %2710 = vmatprep.subr.bf16.mxu1 %v15083_v12  ;;  %v15143_v12 = vld [vmem:[%s22254_s19 + $0x78c] ss:$24 sps:$4 sm:$0xff]  }
  0xbf   : > { %1646 = vmatpush1.bf16.msra.mxu0 %v15078_v39  ;;  %v2925_v39 = vrot.slane %v16755_v33, 2 }
  0xc0   : > { %1647 = vmatprep.subr.bf16.mxu0 %v15086_v14  ;;  %v2926_v14 = vrot.slane %v16757_v34, 2 }
  0xc1   : > { %2711 = vmatpush1.bf16.msra.mxu1 %v15081_v9  ;;  %v15138_v9 = vld [vmem:[%s22254_s19 + $0x420] ss:$24 sps:$4 sm:$0xff]  }
  0xc2   : > { %2712 = vmatprep.subr.bf16.mxu1 %v15089_v40  ;;  %1566 = vmatmul.mubr.bf16.gmra.mrb[8].mxu0 %v16893_v31  ;;  %v15146_v40 = vld [vmem:[%s22254_s19 + $0x454] ss:$24 sps:$4 sm:$0xff]  }
  0xc3   : > { %1648 = vmatpush1.bf16.msra.mxu0 %v15084_v15  ;;  %12123 = vmatprep.mubr.msk.bf16.mxu0 %vm1038_vm1, %v16755_v33  ;;  %v15141_v15 = vld [vmem:[%s22254_s19 + $0x788] ss:$24 sps:$4 sm:$0xff]  }
  0xc4   : > { %1649 = vmatprep.subr.bf16.mxu0 %v15092_v16  ;;  %2172 = vmatmul.mubr.bf16.gmra.mrb[8].mxu1 %v17231_v3  ;;  %v15149_v16 = vld [vmem:[%s22254_s19 + $0x7bc] ss:$24 sps:$4 sm:$0xff]  }
  0xc5   : > { %2713 = vmatpush1.bf16.msra.mxu1 %v15087_v17  ;;  %12354 = vmatprep.mubr.msk.bf16.mxu1 %vm1038_vm1, %v16875_v22  ;;  %v17422_v17 = vsel %vm2921_vm5, %v2925_v39, %v2926_v14 }
  0xc6   : > { %2714 = vmatprep.subr.bf16.mxu1 %v15095_v51  ;;  %v15144_v51 = vld [vmem:[%s22254_s19 + $0x450] ss:$24 sps:$4 sm:$0xff]  }
  0xc7   : > { %1650 = vmatpush1.bf16.msra.mxu0 %v15090_v19  ;;  %v15152_v19 = vld [vmem:[%s22254_s19 + $0x484] ss:$24 sps:$4 sm:$0xff]  }
  0xc8   : > { %1651 = vmatprep.subr.bf16.mxu0 %v15098_v59  ;;  %v15147_v59 = vld [vmem:[%s22254_s19 + $0x7b8] ss:$24 sps:$4 sm:$0xff]  }
  0xc9   : > { %2715 = vmatpush1.bf16.msra.mxu1 %v15093_v20  ;;  %v15155_v20 = vld [vmem:[%s22254_s19 + $0x7ec] ss:$24 sps:$4 sm:$0xff]  }
  0xca   : > { %2716 = vmatprep.subr.bf16.mxu1 %v15101_v52  ;;  %v15150_v52 = vld [vmem:[%s22254_s19 + $0x480] ss:$24 sps:$4 sm:$0xff]  }
  0xcb   : > { %1652 = vmatpush1.bf16.msra.mxu0 %v15096_v7  ;;  %v15158_v7 = vld [vmem:[%s22254_s19 + $0x4b4] ss:$24 sps:$4 sm:$0xff]  }
  0xcc   : > { %1653 = vmatprep.subr.bf16.mxu0 %v15104_v53  ;;  %v15153_v53 = vld [vmem:[%s22254_s19 + $0x7e8] ss:$24 sps:$4 sm:$0xff]  }
  0xcd   : > { %2717 = vmatpush1.bf16.msra.mxu1 %v15099_v25  ;;  %v15161_v25 = vld [vmem:[%s22254_s19 + $0x81c] ss:$24 sps:$4 sm:$0xff]  }
  0xce   : > { %2718 = vmatprep.subr.bf16.mxu1 %v15107_v26  ;;  %v15156_v26 = vld [vmem:[%s22254_s19 + $0x4b0] ss:$24 sps:$4 sm:$0xff]  }
  0xcf   : > { %1654 = vmatpush1.bf16.msra.mxu0 %v15102_v28  ;;  %v15164_v28 = vld [vmem:[%s22254_s19 + $0x4e4] ss:$24 sps:$4 sm:$0xff]  }
  0xd0   : > { %1655 = vmatprep.subr.bf16.mxu0 %v15110_v29  ;;  %v15159_v29 = vld [vmem:[%s22254_s19 + $0x818] ss:$24 sps:$4 sm:$0xff]  }
  0xd1   : > { %2719 = vmatpush1.bf16.msra.mxu1 %v15105_v32  ;;  %v15167_v32 = vld [vmem:[%s22254_s19 + $0x84c] ss:$24 sps:$4 sm:$0xff]  }
  0xd2   : > { %2720 = vmatprep.subr.bf16.mxu1 %v15113_v37  ;;  %v15162_v37 = vld [vmem:[%s22254_s19 + $0x4e0] ss:$24 sps:$4 sm:$0xff]  }
  0xd3   : > { %1656 = vmatpush1.bf16.msra.mxu0 %v15108_v41  ;;  %v15170_v41 = vld [vmem:[%s22254_s19 + $0x374] ss:$24 sps:$4 sm:$0xff]  }
  0xd4   : > { %2056 = vmatprep.subr.bf16.mxu0 %v15116_v42  ;;  %v15165_v42 = vld [vmem:[%s22254_s19 + $0x848] ss:$24 sps:$4 sm:$0xff]  }
  0xd5   : > { %2721 = vmatpush1.bf16.msra.mxu1 %v15111_v2  ;;  %v2922_v2 = vrot.slane %v16781_v45, 2 }
  0xd6   : > { %1672 = vmatmul.mubr.bf16.vlgmr.msra.gmra.mrb[12].mxu0 %v16781_v45  ;;  %3277 = vmatprep.subr.bf16.mxu1 %v15119_v43  ;;  %v2923_v43 = vrot.slane %v16783_v46, 2 }
  0xd7   : > { %2057 = vmatpush1.bf16.msra.mxu0 %v15114_v48  ;;  %12124 = vmatprep.mubr.msk.bf16.mxu0 %vm1038_vm1, %v16757_v34  ;;  %v15173_v48 = vld [vmem:[%s22254_s19 + $0x87c] ss:$24 sps:$4 sm:$0xff]  }
  0xd8   : > { %2058 = vmatprep.subr.bf16.mxu0 %v15122_v49  ;;  %2737 = vmatmul.mubr.bf16.vlgmr.msra.gmra.mrb[0].mxu1 %v16903_v36  ;;  %v17480_v49 = vrot.slane %v16871_v21, 2 }
  0xd9   : > { %3278 = vmatpush1.bf16.msra.mxu1 %v15117_v54  ;;  %12355 = vmatprep.mubr.msk.bf16.mxu1 %vm1038_vm1, %v17352_v57  ;;  %v15168_v54 = vld [vmem:[%s22254_s19 + $0x370] ss:$24 sps:$4 sm:$0xff]  }
  0xda   : > { %3279 = vmatprep.subr.bf16.mxu1 %v15125_v55  ;;  %v15176_v55 = vld [vmem:[%s22254_s19 + $0x3a4] ss:$24 sps:$4 sm:$0xff]  }
  0xdb   : > { %2059 = vmatpush1.bf16.msra.mxu0 %v15120_v58  ;;  %v15171_v58 = vld [vmem:[%s22254_s19 + $0x878] ss:$24 sps:$4 sm:$0xff]  }
  0xdc   : > { %2060 = vmatprep.subr.bf16.mxu0 %v15128_v35  ;;  %v17492_v35 = vsel %vm2921_vm5, %v2922_v2, %v2923_v43  ;;  %v15216_v2 = vld [vmem:[%s22254_s19 + $0x4f0] ss:$24 sps:$4 sm:$0xff]  }
  0xdd   : > { %3280 = vmatpush1.bf16.msra.mxu1 %v15123_v13  ;;  %v15179_v13 = vld [vmem:[%s22254_s19 + $0x8ac] ss:$24 sps:$4 sm:$0xff]  }
  0xde   : > { %3281 = vmatprep.subr.bf16.mxu1 %v15131_v30  ;;  %1682 = vmatmul.mubr.bf16.gmra.mrb[16].mxu0 %v16783_v46  ;;  %v17500_v30 = vsel %vm2921_vm5, %v2926_v14, %v17480_v49  ;;  %v15191_v14 = vld [vmem:[%s22254_s19 + $0x90c] ss:$24 sps:$4 sm:$0xff]  }
  0xdf   : > { %2061 = vmatpush1.bf16.msra.mxu0 %v15126_v61  ;;  %12125 = vmatprep.mubr.msk.bf16.mxu0 %vm1038_vm1, %v16871_v21  ;;  %v15174_v61 = vld [vmem:[%s22254_s19 + $0x3a0] ss:$24 sps:$4 sm:$0xff]  }
  0xe0   : > { %2062 = vmatprep.subr.bf16.mxu0 %v15134_v1  ;;  %2747 = vmatmul.mubr.bf16.gmra.mrb[4].mxu1 %v17383_v4  ;;  %v15182_v1 = vld [vmem:[%s22254_s19 + $0x3d4] ss:$24 sps:$4 sm:$0xff]  }
  0xe1   : > { %3282 = vmatpush1.bf16.msra.mxu1 %v15129_v62  ;;  %12356 = vmatprep.mubr.msk.bf16.mxu1 %vm1038_vm1, %v16949_v0  ;;  %v15177_v62 = vld [vmem:[%s22254_s19 + $0x8a8] ss:$24 sps:$4 sm:$0xff]  }
  0xe2   : > { %3283 = vmatprep.subr.bf16.mxu1 %v15137_v6  ;;  %v17517_v6 = vrot.slane %v16893_v31, 2 }
  0xe3   : > { %2063 = vmatpush1.bf16.msra.mxu0 %v15132_v8  ;;  %v15185_v8 = vld [vmem:[%s22254_s19 + $0x8dc] ss:$24 sps:$4 sm:$0xff]  }
  0xe4   : > { %2064 = vmatprep.subr.bf16.mxu0 %v15140_v27  ;;  %v15180_v27 = vld [vmem:[%s22254_s19 + $0x3d0] ss:$24 sps:$4 sm:$0xff]   ;;  %v17533_v39 = vsel %vm2921_vm5, %v2923_v43, %v17517_v6 }
  0xe5   : > { %3284 = vmatpush1.bf16.msra.mxu1 %v15135_v10  ;;  %v15188_v10 = vld [vmem:[%s22254_s19 + $0x404] ss:$24 sps:$4 sm:$0xff]   ;;  %v15219_v43 = vld [vmem:[%s22254_s19 + $0x9f8] ss:$24 sps:$4 sm:$0xff]  }
  0xe6   : > { %3285 = vmatprep.subr.bf16.mxu1 %v15143_v12  ;;  %1692 = vmatmul.mubr.bf16.gmra.mrb[20].mxu0 %v16893_v31  ;;  %v15183_v12 = vld [vmem:[%s22254_s19 + $0x8d8] ss:$24 sps:$4 sm:$0xff]  }
  0xe7   : > { %2065 = vmatpush1.bf16.msra.mxu0 %v15138_v9  ;;  %12234 = vmatprep.mubr.msk.bf16.mxu0 %vm1038_vm1, %v17108_v11  ;;  %v15186_v9 = vld [vmem:[%s22254_s19 + $0x400] ss:$24 sps:$4 sm:$0xff]  }
  0xe8   : > { %2066 = vmatprep.subr.bf16.mxu0 %v15146_v40  ;;  %2757 = vmatmul.mubr.bf16.gmra.mrb[8].mxu1 %v16961_v5  ;;  %v15194_v40 = vld [vmem:[%s22254_s19 + $0x434] ss:$24 sps:$4 sm:$0xff]  }
  0xe9   : > { %3286 = vmatpush1.bf16.msra.mxu1 %v15141_v15  ;;  %12471 = vmatprep.mubr.msk.bf16.mxu1 %vm1038_vm1, %v17422_v17  ;;  %v15189_v15 = vld [vmem:[%s22254_s19 + $0x908] ss:$24 sps:$4 sm:$0xff]  }
  0xea   : > { %3287 = vmatprep.subr.bf16.mxu1 %v15149_v16  ;;  %v15197_v16 = vld [vmem:[%s22254_s19 + $0x93c] ss:$24 sps:$4 sm:$0xff]  }
  0xeb   : > { %2067 = vmatpush1.bf16.msra.mxu0 %v15144_v51  ;;  %v15192_v51 = vld [vmem:[%s22254_s19 + $0x430] ss:$24 sps:$4 sm:$0xff]  }
  0xec   : > { %2068 = vmatprep.subr.bf16.mxu0 %v15152_v19  ;;  %v15195_v19 = vld [vmem:[%s22254_s19 + $0x938] ss:$24 sps:$4 sm:$0xff]  }
  0xed   : > { %3288 = vmatpush1.bf16.msra.mxu1 %v15147_v59  ;;  %v15200_v59 = vld [vmem:[%s22254_s19 + $0x464] ss:$24 sps:$4 sm:$0xff]  }
  0xee   : > { %3289 = vmatprep.subr.bf16.mxu1 %v15155_v20  ;;  %v15198_v20 = vld [vmem:[%s22254_s19 + $0x460] ss:$24 sps:$4 sm:$0xff]  }
  0xef   : > { %2069 = vmatpush1.bf16.msra.mxu0 %v15150_v52  ;;  %v15203_v52 = vld [vmem:[%s22254_s19 + $0x96c] ss:$24 sps:$4 sm:$0xff]  }
  0xf0   : > { %2070 = vmatprep.subr.bf16.mxu0 %v15158_v7  ;;  %v15201_v7 = vld [vmem:[%s22254_s19 + $0x968] ss:$24 sps:$4 sm:$0xff]  }
  0xf1   : > { %3290 = vmatpush1.bf16.msra.mxu1 %v15153_v53  ;;  %v15206_v53 = vld [vmem:[%s22254_s19 + $0x494] ss:$24 sps:$4 sm:$0xff]  }
  0xf2   : > { %3291 = vmatprep.subr.bf16.mxu1 %v15161_v25  ;;  %v15209_v25 = vld [vmem:[%s22254_s19 + $0x99c] ss:$24 sps:$4 sm:$0xff]  }
  0xf3   : > { %2071 = vmatpush1.bf16.msra.mxu0 %v15156_v26  ;;  %v15204_v26 = vld [vmem:[%s22254_s19 + $0x490] ss:$24 sps:$4 sm:$0xff]  }
  0xf4   : > { %2072 = vmatprep.subr.bf16.mxu0 %v15164_v28  ;;  %v15212_v28 = vld [vmem:[%s22254_s19 + $0x4c4] ss:$24 sps:$4 sm:$0xff]  }
  0xf5   : > { %3292 = vmatpush1.bf16.msra.mxu1 %v15159_v29  ;;  %v15215_v29 = vld [vmem:[%s22254_s19 + $0x9cc] ss:$24 sps:$4 sm:$0xff]  }
  0xf6   : > { %3293 = vmatprep.subr.bf16.mxu1 %v15167_v32  ;;  %v15210_v32 = vld [vmem:[%s22254_s19 + $0x4c0] ss:$24 sps:$4 sm:$0xff]  }
  0xf7   : > { %2073 = vmatpush1.bf16.msra.mxu0 %v15162_v37  ;;  %v15213_v37 = vld [vmem:[%s22254_s19 + $0x9c8] ss:$24 sps:$4 sm:$0xff]  }
  0xf8   : > { %2182 = vmatprep.subr.bf16.mxu0 %v15170_v41  ;;  %v15218_v41 = vld [vmem:[%s22254_s19 + $0x4f4] ss:$24 sps:$4 sm:$0xff]  }
  0xf9   : > { %3294 = vmatpush1.bf16.msra.mxu1 %v15165_v42  ;;  %v15221_v42 = vld [vmem:[%s22254_s19 + $0x9fc] ss:$24 sps:$4 sm:$0xff]  }
  0xfa   : > { %2089 = vmatmul.mubr.bf16.vlgmr.msra.gmra.mrb[0].mxu0 %v17199_v60  ;;  %3862 = vmatprep.subr.bf16.mxu1 %v15173_v48  ;;  %v15224_v48 = vld [vmem:[%s22254_s19 + $0x514] ss:$24 sps:$4 sm:$0xff]  }
  0xfb   : > { %2183 = vmatpush1.bf16.msra.mxu0 %v15168_v54  ;;  %12235 = vmatprep.mubr.msk.bf16.mxu0 %vm1038_vm1, %v17212_v50  ;;  %v15227_v54 = vld [vmem:[%s22254_s19 + $0xa2c] ss:$24 sps:$4 sm:$0xff]  }
  0xfc   : > { %2184 = vmatprep.subr.bf16.mxu0 %v15176_v55  ;;  %3310 = vmatmul.mubr.bf16.vlgmr.msra.gmra.mrb[0].mxu1 %v17492_v35  ;;  %v15222_v55 = vld [vmem:[%s22254_s19 + $0x510] ss:$24 sps:$4 sm:$0xff]  }
  0xfd   : > { %3863 = vmatpush1.bf16.msra.mxu1 %v15171_v58  ;;  %12472 = vmatprep.mubr.msk.bf16.mxu1 %vm1038_vm1, %v17500_v30  ;;  %v15225_v58 = vld [vmem:[%s22254_s19 + $0xa28] ss:$24 sps:$4 sm:$0xff]  }
  0xfe   : > { %3864 = vmatprep.subr.bf16.mxu1 %v15179_v13  ;;  %v15230_v13 = vld [vmem:[%s22254_s19 + $0x544] ss:$24 sps:$4 sm:$0xff]  }
  0xff   : > { %2185 = vmatpush1.bf16.msra.mxu0 %v15174_v61  ;;  %v15233_v61 = vld [vmem:[%s22254_s19 + $0xa5c] ss:$24 sps:$4 sm:$0xff]  }
 0x100   : > { %2186 = vmatprep.subr.bf16.mxu0 %v15182_v1  ;;  %v15228_v1 = vld [vmem:[%s22254_s19 + $0x540] ss:$24 sps:$4 sm:$0xff]  }
 0x101   : > { %3865 = vmatpush1.bf16.msra.mxu1 %v15177_v62  ;;  %v17641_v62 = vsel %vm3494_vm4, %v17121_v63, %v17201_v56  ;;  %v15239_v63 = vld [vmem:[%s22254_s19 + $0xa8c] ss:$24 sps:$4 sm:$0xff]  }
 0x102   : > { %3866 = vmatprep.subr.bf16.mxu1 %v15185_v8  ;;  %2099 = vmatmul.mubr.bf16.gmra.mrb[4].mxu0 %v17247_v38  ;;  %v15231_v8 = vld [vmem:[%s22254_s19 + $0xa58] ss:$24 sps:$4 sm:$0xff]  }
 0x103   : > { %2187 = vmatpush1.bf16.msra.mxu0 %v15180_v27  ;;  %12236 = vmatprep.mubr.msk.bf16.mxu0 %vm1038_vm1, %v17184_v47  ;;  %v15236_v27 = vld [vmem:[%s22254_s19 + $0x574] ss:$24 sps:$4 sm:$0xff]  }
 0x104   : > { %2188 = vmatprep.subr.bf16.mxu0 %v15188_v10  ;;  %3320 = vmatmul.mubr.bf16.gmra.mrb[4].mxu1 %v17533_v39  ;;  %v15242_v10 = vld [vmem:[%s22254_s19 + $0x5a4] ss:$24 sps:$4 sm:$0xff]  }
 0x105   : > { %3867 = vmatpush1.bf16.msra.mxu1 %v15183_v12  ;;  %12473 = vmatprep.mubr.msk.bf16.mxu1 %vm1038_vm1, %v17480_v49  ;;  %v15245_v12 = vld [vmem:[%s22254_s19 + $0xabc] ss:$24 sps:$4 sm:$0xff]  }
 0x106   : > { %3868 = vmatprep.subr.bf16.mxu1 %v15191_v14  ;;  %v15240_v14 = vld [vmem:[%s22254_s19 + $0x5a0] ss:$24 sps:$4 sm:$0xff]  }
 0x107   : > { %2189 = vmatpush1.bf16.msra.mxu0 %v15186_v9  ;;  %v17675_v9 = vsel %vm3494_vm4, %v17145_v23, %v17219_v44  ;;  %v15251_v23 = vld [vmem:[%s22254_s19 + $0xaec] ss:$24 sps:$4 sm:$0xff]  }
 0x108   : > { %2190 = vmatprep.subr.bf16.mxu0 %v15194_v40  ;;  %v15243_v40 = vld [vmem:[%s22254_s19 + $0xab8] ss:$24 sps:$4 sm:$0xff]  }
 0x109   : > { %3869 = vmatpush1.bf16.msra.mxu1 %v15189_v15  ;;  %v15248_v15 = vld [vmem:[%s22254_s19 + $0x5d4] ss:$24 sps:$4 sm:$0xff]  }
 0x10a   : > { %3870 = vmatprep.subr.bf16.mxu1 %v15197_v16  ;;  %2109 = vmatmul.mubr.bf16.gmra.mrb[8].mxu0 %v17231_v3  ;;  %v4083_v16 = vrot.slane %v16755_v33, 3  ;;  %v15252_v33 = vld [vmem:[%s22254_s19 + $0x600] ss:$24 sps:$4 sm:$0xff]  }
 0x10b   : > { %2191 = vmatpush1.bf16.msra.mxu0 %v15192_v51  ;;  %12240 = vmatprep.mubr.msk.bf16.mxu0 %vm1038_vm1, %v17108_v11  ;;  %v15207_v11 = vld [vmem:[%s22254_s19 + $0x998] ss:$24 sps:$4 sm:$0xff]   ;;  %v15249_v51 = vld [vmem:[%s22254_s19 + $0xae8] ss:$24 sps:$4 sm:$0xff]  }
 0x10c   : > { %2192 = vmatprep.subr.bf16.mxu0 %v15200_v59  ;;  %3330 = vmatmul.mubr.bf16.gmra.mrb[8].mxu1 %v17517_v6  ;;  %v15257_v59 = vld [vmem:[%s22254_s19 + $0xb1c] ss:$24 sps:$4 sm:$0xff]  }
 0x10d   : > { %3871 = vmatpush1.bf16.msra.mxu1 %v15195_v19  ;;  %12588 = vmatprep.mubr.msk.bf16.mxu1 %vm1038_vm1, %v17135_v18  ;;  %v15254_v19 = vld [vmem:[%s22254_s19 + $0x604] ss:$24 sps:$4 sm:$0xff]  }
 0x10e   : > { %3872 = vmatprep.subr.bf16.mxu1 %v15203_v52  ;;  %v15260_v52 = vld [vmem:[%s22254_s19 + $0x634] ss:$24 sps:$4 sm:$0xff]  }
 0x10f   : > { %2193 = vmatpush1.bf16.msra.mxu0 %v15198_v20  ;;  %v15255_v20 = vld [vmem:[%s22254_s19 + $0xb18] ss:$24 sps:$4 sm:$0xff]  }
 0x110   : > { %2194 = vmatprep.subr.bf16.mxu0 %v15206_v53  ;;  %v15261_v53 = vld [vmem:[%s22254_s19 + $0xb48] ss:$24 sps:$4 sm:$0xff]  }
 0x111   : > { %3873 = vmatpush1.bf16.msra.mxu1 %v15201_v7  ;;  %v15258_v7 = vld [vmem:[%s22254_s19 + $0x630] ss:$24 sps:$4 sm:$0xff]  }
 0x112   : > { %3874 = vmatprep.subr.bf16.mxu1 %v15209_v25  ;;  %v15266_v25 = vld [vmem:[%s22254_s19 + $0x664] ss:$24 sps:$4 sm:$0xff]  }
 0x113   : > { %2195 = vmatpush1.bf16.msra.mxu0 %v15204_v26  ;;  %v15269_v26 = vld [vmem:[%s22254_s19 + $0xb7c] ss:$24 sps:$4 sm:$0xff]  }
 0x114   : > { %2196 = vmatprep.subr.bf16.mxu0 %v15212_v28  ;;  %v15267_v28 = vld [vmem:[%s22254_s19 + $0xb78] ss:$24 sps:$4 sm:$0xff]  }
 0x115   : > { %3875 = vmatpush1.bf16.msra.mxu1 %v15207_v11  ;;  %v15264_v11 = vld [vmem:[%s22254_s19 + $0x660] ss:$24 sps:$4 sm:$0xff]  }
 0x116   : > { %3876 = vmatprep.subr.bf16.mxu1 %v15215_v29  ;;  %v15272_v29 = vld [vmem:[%s22254_s19 + $0x694] ss:$24 sps:$4 sm:$0xff]  }
 0x117   : > { %2197 = vmatpush1.bf16.msra.mxu0 %v15210_v32  ;;  %v15275_v32 = vld [vmem:[%s22254_s19 + $0xbac] ss:$24 sps:$4 sm:$0xff]  }
 0x118   : > { %2198 = vmatprep.subr.bf16.mxu0 %v15218_v41  ;;  %v15273_v41 = vld [vmem:[%s22254_s19 + $0xba8] ss:$24 sps:$4 sm:$0xff]  }
 0x119   : > { %3877 = vmatpush1.bf16.msra.mxu1 %v15213_v37  ;;  %v15270_v37 = vld [vmem:[%s22254_s19 + $0x690] ss:$24 sps:$4 sm:$0xff]  }
 0x11a   : > { %3878 = vmatprep.subr.bf16.mxu1 %v15221_v42  ;;  %v15278_v42 = vld [vmem:[%s22254_s19 + $0x524] ss:$24 sps:$4 sm:$0xff]  }
 0x11b   : > { %2199 = vmatpush1.bf16.msra.mxu0 %v15216_v2  ;;  %v4080_v2 = vrot.slane %v16781_v45, 3 }
 0x11c   : > { %2641 = vmatprep.subr.bf16.mxu0 %v15224_v48  ;;  %v17763_v48 = vrot.slane %v16871_v21, 3  ;;  %v15284_v21 = vld [vmem:[%s22254_s19 + $0x584] ss:$24 sps:$4 sm:$0xff]  }
 0x11d   : > { %3879 = vmatpush1.bf16.msra.mxu1 %v15219_v43  ;;  %v4081_v43 = vrot.slane %v16783_v46, 3  ;;  %v15279_v46 = vld [vmem:[%s22254_s19 + $0x550] ss:$24 sps:$4 sm:$0xff]  }
 0x11e   : > { %2215 = vmatmul.mubr.bf16.vlgmr.msra.gmra.mrb[12].mxu0 %v17199_v60  ;;  %4435 = vmatprep.subr.bf16.mxu1 %v15227_v54  ;;  %v15234_v60 = vld [vmem:[%s22254_s19 + $0x570] ss:$24 sps:$4 sm:$0xff]   ;;  %v15276_v54 = vld [vmem:[%s22254_s19 + $0x520] ss:$24 sps:$4 sm:$0xff]  }
 0x11f   : > { %2642 = vmatpush1.bf16.msra.mxu0 %v15222_v55  ;;  %12241 = vmatprep.mubr.msk.bf16.mxu0 %vm1038_vm1, %v17212_v50  ;;  %v15237_v50 = vld [vmem:[%s22254_s19 + $0xa88] ss:$24 sps:$4 sm:$0xff]   ;;  %v15281_v55 = vld [vmem:[%s22254_s19 + $0x554] ss:$24 sps:$4 sm:$0xff]  }
 0x120   : > { %2643 = vmatprep.subr.bf16.mxu0 %v15230_v13  ;;  %3895 = vmatmul.mubr.bf16.vlgmr.msra.gmra.mrb[0].mxu1 %v17155_v24  ;;  %v17791_v13 = vrot.slane %v16893_v31, 3  ;;  %v15285_v31 = vld [vmem:[%s22254_s19 + $0x5b0] ss:$24 sps:$4 sm:$0xff]  }
 0x121   : > { %4436 = vmatpush1.bf16.msra.mxu1 %v15225_v58  ;;  %12589 = vmatprep.mubr.msk.bf16.mxu1 %vm1038_vm1, %v17641_v62  ;;  %v17772_v58 = vsel %vm4079_vm6, %v4080_v2, %v4081_v43  ;;  %v15342_v2 = vld [vmem:[%s22254_s19 + $0x790] ss:$24 sps:$4 sm:$0xff]  }
 0x122   : > { %4437 = vmatprep.subr.bf16.mxu1 %v15233_v61  ;;  %v15282_v61 = vld [vmem:[%s22254_s19 + $0x580] ss:$24 sps:$4 sm:$0xff]  }
 0x123   : > { %2644 = vmatpush1.bf16.msra.mxu0 %v15228_v1  ;;  %v15287_v1 = vld [vmem:[%s22254_s19 + $0x5b4] ss:$24 sps:$4 sm:$0xff]  }
 0x124   : > { %2645 = vmatprep.subr.bf16.mxu0 %v15236_v27  ;;  %v15290_v27 = vld [vmem:[%s22254_s19 + $0x5e4] ss:$24 sps:$4 sm:$0xff]  }
 0x125   : > { %4438 = vmatpush1.bf16.msra.mxu1 %v15231_v8  ;;  %v17801_v8 = vsel %vm4079_vm6, %v4081_v43, %v17791_v13  ;;  %v15347_v43 = vld [vmem:[%s22254_s19 + $0x7c4] ss:$24 sps:$4 sm:$0xff]  }
 0x126   : > { %4439 = vmatprep.subr.bf16.mxu1 %v15239_v63  ;;  %2225 = vmatmul.mubr.bf16.gmra.mrb[16].mxu0 %v17247_v38  ;;  %v15246_v38 = vld [vmem:[%s22254_s19 + $0x5d0] ss:$24 sps:$4 sm:$0xff]   ;;  %v15288_v63 = vld [vmem:[%s22254_s19 + $0x5e0] ss:$24 sps:$4 sm:$0xff]  }
 0x127   : > { %2646 = vmatpush1.bf16.msra.mxu0 %v15234_v60  ;;  %12242 = vmatprep.mubr.msk.bf16.mxu0 %vm1038_vm1, %v17184_v47  ;;  %v4084_v47 = vrot.slane %v16757_v34, 3  ;;  %v15293_v60 = vld [vmem:[%s22254_s19 + $0x614] ss:$24 sps:$4 sm:$0xff]  }
 0x128   : > { %2647 = vmatprep.subr.bf16.mxu0 %v15242_v10  ;;  %3905 = vmatmul.mubr.bf16.gmra.mrb[4].mxu1 %v17675_v9  ;;  %v15296_v10 = vld [vmem:[%s22254_s19 + $0x644] ss:$24 sps:$4 sm:$0xff]  }
 0x129   : > { %4440 = vmatpush1.bf16.msra.mxu1 %v15237_v50  ;;  %12590 = vmatprep.mubr.msk.bf16.mxu1 %vm1038_vm1, %v17201_v56  ;;  %v17711_v34 = vsel %vm4079_vm6, %v4083_v16, %v4084_v47  ;;  %v17777_v45 = vsel %vm4079_vm6, %v4084_v47, %v17763_v48  ;;  %v15291_v50 = vld [vmem:[%s22254_s19 + $0x610] ss:$24 sps:$4 sm:$0xff]   ;;  %v15308_v16 = vld [vmem:[%s22254_s19 + $0x6f4] ss:$24 sps:$4 sm:$0xff]  }
 0x12a   : > { %4441 = vmatprep.subr.bf16.mxu1 %v15245_v12  ;;  %v15294_v12 = vld [vmem:[%s22254_s19 + $0x640] ss:$24 sps:$4 sm:$0xff]   ;;  %v15306_v47 = vld [vmem:[%s22254_s19 + $0x6f0] ss:$24 sps:$4 sm:$0xff]  }
 0x12b   : > { %2648 = vmatpush1.bf16.msra.mxu0 %v15240_v14  ;;  %v15299_v14 = vld [vmem:[%s22254_s19 + $0x674] ss:$24 sps:$4 sm:$0xff]  }
 0x12c   : > { %2649 = vmatprep.subr.bf16.mxu0 %v15248_v15  ;;  %v15300_v15 = vld [vmem:[%s22254_s19 + $0x6a0] ss:$24 sps:$4 sm:$0xff]  }
 0x12d   : > { %4442 = vmatpush1.bf16.msra.mxu1 %v15243_v40  ;;  %v15297_v40 = vld [vmem:[%s22254_s19 + $0x670] ss:$24 sps:$4 sm:$0xff]  }
 0x12e   : > { %4443 = vmatprep.subr.bf16.mxu1 %v15251_v23  ;;  %2235 = vmatmul.mubr.bf16.gmra.mrb[20].mxu0 %v17231_v3  ;;  %v15263_v3 = vld [vmem:[%s22254_s19 + $0xb4c] ss:$24 sps:$4 sm:$0xff]  }
 0x12f   : > { %2650 = vmatpush1.bf16.msra.mxu0 %v15246_v38  ;;  %12351 = vmatprep.mubr.msk.bf16.mxu0 %vm1038_vm1, %v16875_v22  ;;  %v15305_v23 = vld [vmem:[%s22254_s19 + $0x6c4] ss:$24 sps:$4 sm:$0xff]   ;;  %v15303_v38 = vld [vmem:[%s22254_s19 + $0x6c0] ss:$24 sps:$4 sm:$0xff]  }
 0x130   : > { %2651 = vmatprep.subr.bf16.mxu0 %v15254_v19  ;;  %3915 = vmatmul.mubr.bf16.gmra.mrb[8].mxu1 %v17219_v44  ;;  %v15309_v19 = vld [vmem:[%s22254_s19 + $0x720] ss:$24 sps:$4 sm:$0xff]  }
 0x131   : > { %4444 = vmatpush1.bf16.msra.mxu1 %v15249_v51  ;;  %12705 = vmatprep.mubr.msk.bf16.mxu1 %vm1038_vm1, %v17711_v34  ;;  %v15311_v51 = vld [vmem:[%s22254_s19 + $0x724] ss:$24 sps:$4 sm:$0xff]  }
 0x132   : > { %4445 = vmatprep.subr.bf16.mxu1 %v15257_v59  ;;  %v15312_v59 = vld [vmem:[%s22254_s19 + $0x750] ss:$24 sps:$4 sm:$0xff]  }
 0x133   : > { %2652 = vmatpush1.bf16.msra.mxu0 %v15252_v33  ;;  %v15315_v33 = vld [vmem:[%s22254_s19 + $0x780] ss:$24 sps:$4 sm:$0xff]  }
 0x134   : > { %2653 = vmatprep.subr.bf16.mxu0 %v15260_v52  ;;  %v15321_v52 = vld [vmem:[%s22254_s19 + $0x7e0] ss:$24 sps:$4 sm:$0xff]  }
 0x135   : > { %4446 = vmatpush1.bf16.msra.mxu1 %v15255_v20  ;;  %v15318_v20 = vld [vmem:[%s22254_s19 + $0x7b0] ss:$24 sps:$4 sm:$0xff]  }
 0x136   : > { %4447 = vmatprep.subr.bf16.mxu1 %v15263_v3  ;;  %v15324_v3 = vld [vmem:[%s22254_s19 + $0x810] ss:$24 sps:$4 sm:$0xff]  }
 0x137   : > { %2654 = vmatpush1.bf16.msra.mxu0 %v15258_v7  ;;  %v15329_v7 = vld [vmem:[%s22254_s19 + $0x844] ss:$24 sps:$4 sm:$0xff]  }
 0x138   : > { %2655 = vmatprep.subr.bf16.mxu0 %v15266_v25  ;;  %v15332_v25 = vld [vmem:[%s22254_s19 + $0x6d4] ss:$24 sps:$4 sm:$0xff]  }
 0x139   : > { %4448 = vmatpush1.bf16.msra.mxu1 %v15261_v53  ;;  %v15327_v53 = vld [vmem:[%s22254_s19 + $0x840] ss:$24 sps:$4 sm:$0xff]  }
 0x13a   : > { %4449 = vmatprep.subr.bf16.mxu1 %v15269_v26  ;;  %v15330_v26 = vld [vmem:[%s22254_s19 + $0x6d0] ss:$24 sps:$4 sm:$0xff]  }
 0x13b   : > { %2656 = vmatpush1.bf16.msra.mxu0 %v15264_v11  ;;  %v15335_v11 = vld [vmem:[%s22254_s19 + $0x704] ss:$24 sps:$4 sm:$0xff]  }
 0x13c   : > { %2657 = vmatprep.subr.bf16.mxu0 %v15272_v29  ;;  %v15338_v29 = vld [vmem:[%s22254_s19 + $0x734] ss:$24 sps:$4 sm:$0xff]  }
 0x13d   : > { %4450 = vmatpush1.bf16.msra.mxu1 %v15267_v28  ;;  %v15333_v28 = vld [vmem:[%s22254_s19 + $0x700] ss:$24 sps:$4 sm:$0xff]  }
 0x13e   : > { %4451 = vmatprep.subr.bf16.mxu1 %v15275_v32  ;;  %v15336_v32 = vld [vmem:[%s22254_s19 + $0x730] ss:$24 sps:$4 sm:$0xff]  }
 0x13f   : > { %2658 = vmatpush1.bf16.msra.mxu0 %v15270_v37  ;;  %v15341_v37 = vld [vmem:[%s22254_s19 + $0x764] ss:$24 sps:$4 sm:$0xff]  }
 0x140   : > { %2767 = vmatprep.subr.bf16.mxu0 %v15278_v42  ;;  %v15344_v42 = vld [vmem:[%s22254_s19 + $0x794] ss:$24 sps:$4 sm:$0xff]  }
 0x141   : > { %4452 = vmatpush1.bf16.msra.mxu1 %v15273_v41  ;;  %v15339_v41 = vld [vmem:[%s22254_s19 + $0x760] ss:$24 sps:$4 sm:$0xff]  }
 0x142   : > { %2674 = vmatmul.mubr.bf16.vlgmr.msra.gmra.mrb[0].mxu0 %v16903_v36 }
 0x143   : > { %2768 = vmatpush1.bf16.msra.mxu0 %v15276_v54  ;;  %12352 = vmatprep.mubr.msk.bf16.mxu0 %vm1038_vm1, %v17352_v57  ;;  %v15345_v54 = vld [vmem:[%s22254_s19 + $0x7c0] ss:$24 sps:$4 sm:$0xff]  }
 0x144   : > { %4468 = vmatmul.mubr.bf16.vlgmr.msra.gmra.mrb[0].mxu1 %v17772_v58  ;;  %2769 = vmatprep.subr.bf16.mxu0 %v15281_v55  ;;  %v15350_v55 = vld [vmem:[%s22254_s19 + $0x7f4] ss:$24 sps:$4 sm:$0xff]  }
 0x145   : > { %12706 = vmatprep.mubr.msk.bf16.mxu1 %vm1038_vm1, %v17777_v45 }
 0x147   : > { %2770 = vmatpush1.bf16.msra.mxu0 %v15279_v46  ;;  %v15348_v46 = vld [vmem:[%s22254_s19 + $0x7f0] ss:$24 sps:$4 sm:$0xff]  }
 0x148   : > { %2771 = vmatprep.subr.bf16.mxu0 %v15284_v21  ;;  %v15353_v21 = vld [vmem:[%s22254_s19 + $0x824] ss:$24 sps:$4 sm:$0xff]  }
 0x14a   : > { %2684 = vmatmul.mubr.bf16.gmra.mrb[4].mxu0 %v17383_v4 }
 0x14b   : > { %2772 = vmatpush1.bf16.msra.mxu0 %v15282_v61  ;;  %12353 = vmatprep.mubr.msk.bf16.mxu0 %vm1038_vm1, %v16949_v0  ;;  %v15351_v61 = vld [vmem:[%s22254_s19 + $0x820] ss:$24 sps:$4 sm:$0xff]  }
 0x14c   : > { %4478 = vmatmul.mubr.bf16.gmra.mrb[4].mxu1 %v17801_v8  ;;  %2773 = vmatprep.subr.bf16.mxu0 %v15287_v1  ;;  %v15354_v1 = vld [vmem:[%s22254_s19 + $0x850] ss:$24 sps:$4 sm:$0xff]  }
 0x14d   : > { %12707 = vmatprep.mubr.msk.bf16.mxu1 %vm1038_vm1, %v17763_v48 }
 0x14f   : > { %2774 = vmatpush1.bf16.msra.mxu0 %v15285_v31  ;;  %v15359_v31 = vld [vmem:[%s22254_s19 + $0x874] ss:$24 sps:$4 sm:$0xff]  }
 0x150   : > { %2775 = vmatprep.subr.bf16.mxu0 %v15290_v27  ;;  %v15357_v27 = vld [vmem:[%s22254_s19 + $0x870] ss:$24 sps:$4 sm:$0xff]  }
 0x152   : > { %2694 = vmatmul.mubr.bf16.gmra.mrb[8].mxu0 %v16961_v5 }
 0x153   : > { %2776 = vmatpush1.bf16.msra.mxu0 %v15288_v63  ;;  %12357 = vmatprep.mubr.msk.bf16.mxu0 %vm1038_vm1, %v16875_v22  ;;  %v15302_v22 = vld [vmem:[%s22254_s19 + $0x6a4] ss:$24 sps:$4 sm:$0xff]  }
 0x154   : > { %2777 = vmatprep.subr.bf16.mxu0 %v15293_v60  ;;  %4488 = vmatmul.mubr.bf16.gmra.mrb[8].mxu1 %v17791_v13  ;;  %v15362_v63 = vld [vmem:[%s22254_s19 + $0x8a4] ss:$24 sps:$4 sm:$0xff]   ;;  %v15360_v60 = vld [vmem:[%s22254_s19 + $0x8a0] ss:$24 sps:$4 sm:$0xff]  }
 0x157   : > { %2778 = vmatpush1.bf16.msra.mxu0 %v15291_v50  ;;  %v15365_v50 = vld [vmem:[%s22254_s19 + $0x8d4] ss:$24 sps:$4 sm:$0xff]  }
 0x158   : > { %2779 = vmatprep.subr.bf16.mxu0 %v15296_v10  ;;  %v15363_v10 = vld [vmem:[%s22254_s19 + $0x8d0] ss:$24 sps:$4 sm:$0xff]  }
 0x15b   : > { %2780 = vmatpush1.bf16.msra.mxu0 %v15294_v12  ;;  %v15368_v12 = vld [vmem:[%s22254_s19 + $0x904] ss:$24 sps:$4 sm:$0xff]  }
 0x15c   : > { %2781 = vmatprep.subr.bf16.mxu0 %v15299_v14  ;;  %v15369_v14 = vld [vmem:[%s22254_s19 + $0x930] ss:$24 sps:$4 sm:$0xff]  }
 0x15f   : > { %2782 = vmatpush1.bf16.msra.mxu0 %v15297_v40  ;;  %v15374_v40 = vld [vmem:[%s22254_s19 + $0x964] ss:$24 sps:$4 sm:$0xff]  }
 0x160   : > { %2783 = vmatprep.subr.bf16.mxu0 %v15302_v22  ;;  %v15375_v22 = vld [vmem:[%s22254_s19 + $0x990] ss:$24 sps:$4 sm:$0xff]  }
 0x163   : > { %2784 = vmatpush1.bf16.msra.mxu0 %v15300_v15  ;;  %v15380_v15 = vld [vmem:[%s22254_s19 + $0x9c4] ss:$24 sps:$4 sm:$0xff]  }
 0x164   : > { %3214 = vmatprep.subr.bf16.mxu0 %v15305_v23  ;;  %v15378_v23 = vld [vmem:[%s22254_s19 + $0x9c0] ss:$24 sps:$4 sm:$0xff]  }
 0x166   : > { %2800 = vmatmul.mubr.bf16.vlgmr.msra.gmra.mrb[12].mxu0 %v16903_v36  ;;  %v15314_v36 = vld [vmem:[%s22254_s19 + $0x754] ss:$24 sps:$4 sm:$0xff]  }
 0x167   : > { %3215 = vmatpush1.bf16.msra.mxu0 %v15303_v38  ;;  %12358 = vmatprep.mubr.msk.bf16.mxu0 %vm1038_vm1, %v17352_v57  ;;  %v15317_v57 = vld [vmem:[%s22254_s19 + $0x784] ss:$24 sps:$4 sm:$0xff]   ;;  %v15381_v38 = vld [vmem:[%s22254_s19 + $0x9f0] ss:$24 sps:$4 sm:$0xff]  }
 0x168   : > { %3216 = vmatprep.subr.bf16.mxu0 %v15308_v16  ;;  %v15386_v16 = vld [vmem:[%s22254_s19 + $0x884] ss:$24 sps:$4 sm:$0xff]  }
 0x16b   : > { %3217 = vmatpush1.bf16.msra.mxu0 %v15306_v47  ;;  %v15384_v47 = vld [vmem:[%s22254_s19 + $0x880] ss:$24 sps:$4 sm:$0xff]  }
 0x16c   : > { %3218 = vmatprep.subr.bf16.mxu0 %v15311_v51  ;;  %v15389_v51 = vld [vmem:[%s22254_s19 + $0x8b4] ss:$24 sps:$4 sm:$0xff]  }
 0x16e   : > { %2810 = vmatmul.mubr.bf16.gmra.mrb[16].mxu0 %v17383_v4  ;;  %v15320_v4 = vld [vmem:[%s22254_s19 + $0x7b4] ss:$24 sps:$4 sm:$0xff]  }
 0x16f   : > { %3219 = vmatpush1.bf16.msra.mxu0 %v15309_v19  ;;  %12359 = vmatprep.mubr.msk.bf16.mxu0 %vm1038_vm1, %v16949_v0  ;;  %v15323_v0 = vld [vmem:[%s22254_s19 + $0x7e4] ss:$24 sps:$4 sm:$0xff]   ;;  %v15387_v19 = vld [vmem:[%s22254_s19 + $0x8b0] ss:$24 sps:$4 sm:$0xff]  }
 0x170   : > { %3220 = vmatprep.subr.bf16.mxu0 %v15314_v36  ;;  %v15392_v36 = vld [vmem:[%s22254_s19 + $0x8e4] ss:$24 sps:$4 sm:$0xff]  }
 0x173   : > { %3221 = vmatpush1.bf16.msra.mxu0 %v15312_v59  ;;  %v15390_v59 = vld [vmem:[%s22254_s19 + $0x8e0] ss:$24 sps:$4 sm:$0xff]  }
 0x174   : > { %3222 = vmatprep.subr.bf16.mxu0 %v15317_v57  ;;  %v15395_v57 = vld [vmem:[%s22254_s19 + $0x914] ss:$24 sps:$4 sm:$0xff]  }
 0x176   : > { %2820 = vmatmul.mubr.bf16.gmra.mrb[20].mxu0 %v16961_v5  ;;  %v15326_v5 = vld [vmem:[%s22254_s19 + $0x814] ss:$24 sps:$4 sm:$0xff]  }
 0x177   : > { %3223 = vmatpush1.bf16.msra.mxu0 %v15315_v33  ;;  %12468 = vmatprep.mubr.msk.bf16.mxu0 %vm1038_vm1, %v17422_v17  ;;  %v15393_v33 = vld [vmem:[%s22254_s19 + $0x910] ss:$24 sps:$4 sm:$0xff]  }
 0x178   : > { %3224 = vmatprep.subr.bf16.mxu0 %v15320_v4  ;;  %v15398_v4 = vld [vmem:[%s22254_s19 + $0x944] ss:$24 sps:$4 sm:$0xff]  }
 0x17b   : > { %3225 = vmatpush1.bf16.msra.mxu0 %v15318_v20  ;;  %v15396_v20 = vld [vmem:[%s22254_s19 + $0x940] ss:$24 sps:$4 sm:$0xff]  }
 0x17c   : > { %3226 = vmatprep.subr.bf16.mxu0 %v15323_v0  ;;  %v15401_v0 = vld [vmem:[%s22254_s19 + $0x974] ss:$24 sps:$4 sm:$0xff]  }
 0x17f   : > { %3227 = vmatpush1.bf16.msra.mxu0 %v15321_v52  ;;  %v15399_v52 = vld [vmem:[%s22254_s19 + $0x970] ss:$24 sps:$4 sm:$0xff]  }
 0x180   : > { %3228 = vmatprep.subr.bf16.mxu0 %v15326_v5  ;;  %v15404_v5 = vld [vmem:[%s22254_s19 + $0x9a4] ss:$24 sps:$4 sm:$0xff]  }
 0x183   : > { %3229 = vmatpush1.bf16.msra.mxu0 %v15324_v3  ;;  %v15402_v3 = vld [vmem:[%s22254_s19 + $0x9a0] ss:$24 sps:$4 sm:$0xff]  }
 0x184   : > { %3230 = vmatprep.subr.bf16.mxu0 %v15329_v7  ;;  %v15407_v7 = vld [vmem:[%s22254_s19 + $0x9d4] ss:$24 sps:$4 sm:$0xff]  }
 0x187   : > { %3231 = vmatpush1.bf16.msra.mxu0 %v15327_v53  ;;  %v15405_v53 = vld [vmem:[%s22254_s19 + $0x9d0] ss:$24 sps:$4 sm:$0xff]  }
 0x188   : > { %3340 = vmatprep.subr.bf16.mxu0 %v15332_v25  ;;  %v15410_v25 = vld [vmem:[%s22254_s19 + $0xa04] ss:$24 sps:$4 sm:$0xff]  }
 0x18a   : > { %3247 = vmatmul.mubr.bf16.vlgmr.msra.gmra.mrb[0].mxu0 %v17492_v35 }
 0x18b   : > { %3341 = vmatpush1.bf16.msra.mxu0 %v15330_v26  ;;  %12469 = vmatprep.mubr.msk.bf16.mxu0 %vm1038_vm1, %v17500_v30  ;;  %v15413_v26 = vld [vmem:[%s22254_s19 + $0xa24] ss:$24 sps:$4 sm:$0xff]  }
 0x18c   : > { %3342 = vmatprep.subr.bf16.mxu0 %v15335_v11  ;;  %v15411_v11 = vld [vmem:[%s22254_s19 + $0xa20] ss:$24 sps:$4 sm:$0xff]  }
 0x18f   : > { %3343 = vmatpush1.bf16.msra.mxu0 %v15333_v28  ;;  %v15416_v28 = vld [vmem:[%s22254_s19 + $0xa54] ss:$24 sps:$4 sm:$0xff]  }
 0x190   : > { %3344 = vmatprep.subr.bf16.mxu0 %v15338_v29  ;;  %v15414_v29 = vld [vmem:[%s22254_s19 + $0xa50] ss:$24 sps:$4 sm:$0xff]  }
 0x192   : > { %3257 = vmatmul.mubr.bf16.gmra.mrb[4].mxu0 %v17533_v39 }
 0x193   : > { %3345 = vmatpush1.bf16.msra.mxu0 %v15336_v32  ;;  %12470 = vmatprep.mubr.msk.bf16.mxu0 %vm1038_vm1, %v17480_v49  ;;  %v15419_v32 = vld [vmem:[%s22254_s19 + $0xa84] ss:$24 sps:$4 sm:$0xff]  }
 0x194   : > { %3346 = vmatprep.subr.bf16.mxu0 %v15341_v37  ;;  %v15417_v37 = vld [vmem:[%s22254_s19 + $0xa80] ss:$24 sps:$4 sm:$0xff]  }
 0x197   : > { %3347 = vmatpush1.bf16.msra.mxu0 %v15339_v41  ;;  %v15422_v41 = vld [vmem:[%s22254_s19 + $0xab4] ss:$24 sps:$4 sm:$0xff]  }
 0x198   : > { %3348 = vmatprep.subr.bf16.mxu0 %v15344_v42  ;;  %v15423_v42 = vld [vmem:[%s22254_s19 + $0xae0] ss:$24 sps:$4 sm:$0xff]  }
 0x19a   : > { %3267 = vmatmul.mubr.bf16.gmra.mrb[8].mxu0 %v17517_v6 }
 0x19b   : > { %3349 = vmatpush1.bf16.msra.mxu0 %v15342_v2  ;;  %12474 = vmatprep.mubr.msk.bf16.mxu0 %vm1038_vm1, %v17422_v17  ;;  %v15356_v17 = vld [vmem:[%s22254_s19 + $0x854] ss:$24 sps:$4 sm:$0xff]   ;;  %v15431_v2 = vld [vmem:[%s22254_s19 + $0xb44] ss:$24 sps:$4 sm:$0xff]  }
 0x19c   : > { %3350 = vmatprep.subr.bf16.mxu0 %v15347_v43  ;;  %v4599_v43 = vlaneseq }
 0x19f   : > { %3351 = vmatpush1.bf16.msra.mxu0 %v15345_v54  ;;  %v15429_v54 = vld [vmem:[%s22254_s19 + $0xb40] ss:$24 sps:$4 sm:$0xff]  }
 0x1a0   : > { %3352 = vmatprep.subr.bf16.mxu0 %v15350_v55  ;;  %v18152_v55 = vshrl.u32 %v4599_v43, 7 }
 0x1a3   : > { %3353 = vmatpush1.bf16.msra.mxu0 %v15348_v46  ;;  %v15432_v46 = vld [vmem:[%s22254_s19 + $0xb70] ss:$24 sps:$4 sm:$0xff]  }
 0x1a4   : > { %3354 = vmatprep.subr.bf16.mxu0 %v15353_v21  ;;  %v15437_v21 = vld [vmem:[%s22254_s19 + $0xba4] ss:$24 sps:$4 sm:$0xff]  }
 0x1a7   : > { %3355 = vmatpush1.bf16.msra.mxu0 %v15351_v61  ;;  %v18161_v61 = vsub.s32 2, %v18152_v55 }
 0x1a8   : > { %3356 = vmatprep.subr.bf16.mxu0 %v15356_v17  ;;  %v18166_v17 = vld [vmem:[%s22257_s30] sm:$0x3f] }
 0x1a9   : > { %22256 = vst [vmem:[#allocation13_spill] sm:$0xff] %v18161_v61 }
 0x1ab   : > { %3357 = vmatpush1.bf16.msra.mxu0 %v15354_v1  ;;  %v18169_v1 = vsub.s32 3, %v18152_v55 }
 0x1ac   : > { %3799 = vmatprep.subr.bf16.mxu0 %v15359_v31  ;;  %v15435_v31 = vld [vmem:[%s22254_s19 + $0xba0] ss:$24 sps:$4 sm:$0xff]  }
 0x1ad   : > { %22258 = vst [vmem:[#allocation14_spill] sm:$0xff] %v18169_v1 }
 0x1ae   : > { %3373 = vmatmul.mubr.bf16.vlgmr.msra.gmra.mrb[12].mxu0 %v17492_v35  ;;  %v15366_v35 = vld [vmem:[%s22254_s19 + $0x900] ss:$24 sps:$4 sm:$0xff]  }
 0x1af   : > { %3800 = vmatpush1.bf16.msra.mxu0 %v15357_v27  ;;  %12475 = vmatprep.mubr.msk.bf16.mxu0 %vm1038_vm1, %v17500_v30  ;;  %v15371_v30 = vld [vmem:[%s22254_s19 + $0x934] ss:$24 sps:$4 sm:$0xff]   ;;  %v18177_v27 = vld [vmem:[%s22174_s3] sm:$0x3f] }
 0x1b0   : > { %3801 = vmatprep.subr.bf16.mxu0 %v15362_v63  ;;  %v15440_v63 = vld [vmem:[%s22254_s19 + $0xa34] ss:$24 sps:$4 sm:$0xff]  }
 0x1b3   : > { %3802 = vmatpush1.bf16.msra.mxu0 %v15360_v60  ;;  %v18184_v60 = vrot.slane %v18166_v17, %v18161_v61 }
 0x1b4   : > { %3803 = vmatprep.subr.bf16.mxu0 %v15365_v50  ;;  %v18188_v50 = vrot.slane %v18166_v17, %v18169_v1 }
 0x1b6   : > { %3383 = vmatmul.mubr.bf16.gmra.mrb[16].mxu0 %v17533_v39  ;;  %v15372_v39 = vld [vmem:[%s22254_s19 + $0x960] ss:$24 sps:$4 sm:$0xff]  }
 0x1b7   : > { %3804 = vmatpush1.bf16.msra.mxu0 %v15363_v10  ;;  %12476 = vmatprep.mubr.msk.bf16.mxu0 %vm1038_vm1, %v17480_v49  ;;  %v15377_v49 = vld [vmem:[%s22254_s19 + $0x994] ss:$24 sps:$4 sm:$0xff]   ;;  %v18192_v10 = vrot.slane %v18177_v27, %v18161_v61  ;;  %v19747_v61 = vld [vmem:[%s22176_s5 + $0xa0] sm:$0xff] }
 0x1b8   : > { %3805 = vmatprep.subr.bf16.mxu0 %v15368_v12  ;;  %v15438_v12 = vld [vmem:[%s22254_s19 + $0xa30] ss:$24 sps:$4 sm:$0xff]  }
 0x1bb   : > { %3806 = vmatpush1.bf16.msra.mxu0 %v15366_v35 }
 0x1bc   : > { %3807 = vmatprep.subr.bf16.mxu0 %v15371_v30  ;;  %v18199_v30 = vrot.slane %v18177_v27, %v18169_v1 }
 0x1be   : > { %3393 = vmatmul.mubr.bf16.gmra.mrb[20].mxu0 %v17517_v6  ;;  %v15383_v6 = vld [vmem:[%s22254_s19 + $0x9f4] ss:$24 sps:$4 sm:$0xff]  }
 0x1bf   : > { %3808 = vmatpush1.bf16.msra.mxu0 %v15369_v14  ;;  %12585 = vmatprep.mubr.msk.bf16.mxu0 %vm1038_vm1, %v17135_v18 }
 0x1c0   : > { %3809 = vmatprep.subr.bf16.mxu0 %v15374_v40 }
 0x1c3   : > { %3810 = vmatpush1.bf16.msra.mxu0 %v15372_v39  ;;  %v15443_v39 = vld [vmem:[%s22254_s19 + $0xa64] ss:$24 sps:$4 sm:$0xff]  }
 0x1c4   : > { %3811 = vmatprep.subr.bf16.mxu0 %v15377_v49 }
 0x1c7   : > { %3812 = vmatpush1.bf16.msra.mxu0 %v15375_v22 }
 0x1c8   : > { %3813 = vmatprep.subr.bf16.mxu0 %v15380_v15 }
 0x1cb   : > { %3814 = vmatpush1.bf16.msra.mxu0 %v15378_v23 }
 0x1cc   : > { %3815 = vmatprep.subr.bf16.mxu0 %v15383_v6 }
 0x1cf   : > { %3816 = vmatpush1.bf16.msra.mxu0 %v15381_v38 }
 0x1d0   : > { %3925 = vmatprep.subr.bf16.mxu0 %v15386_v16  ;;  %v15441_v16 = vld [vmem:[%s22254_s19 + $0xa60] ss:$24 sps:$4 sm:$0xff]  }
 0x1d2   : > { %3832 = vmatmul.mubr.bf16.vlgmr.msra.gmra.mrb[0].mxu0 %v17155_v24 }
 0x1d3   : > { %3926 = vmatpush1.bf16.msra.mxu0 %v15384_v47  ;;  %12586 = vmatprep.mubr.msk.bf16.mxu0 %vm1038_vm1, %v17641_v62 }
 0x1d4   : > { %3927 = vmatprep.subr.bf16.mxu0 %v15389_v51 }
 0x1d7   : > { %3928 = vmatpush1.bf16.msra.mxu0 %v15387_v19 }
 0x1d8   : > { %3929 = vmatprep.subr.bf16.mxu0 %v15392_v36  ;;  %v15446_v36 = vld [vmem:[%s22254_s19 + $0xa94] ss:$24 sps:$4 sm:$0xff]  }
 0x1da   : > { %3842 = vmatmul.mubr.bf16.gmra.mrb[4].mxu0 %v17675_v9 }
 0x1db   : > { %3930 = vmatpush1.bf16.msra.mxu0 %v15390_v59  ;;  %12587 = vmatprep.mubr.msk.bf16.mxu0 %vm1038_vm1, %v17201_v56 }
 0x1dc   : > { %3931 = vmatprep.subr.bf16.mxu0 %v15395_v57 }
 0x1df   : > { %3932 = vmatpush1.bf16.msra.mxu0 %v15393_v33 }
 0x1e0   : > { %3933 = vmatprep.subr.bf16.mxu0 %v15398_v4 }
 0x1e2   : > { %3852 = vmatmul.mubr.bf16.gmra.mrb[8].mxu0 %v17219_v44 }
 0x1e3   : > { %3934 = vmatpush1.bf16.msra.mxu0 %v15396_v20  ;;  %12591 = vmatprep.mubr.msk.bf16.mxu0 %vm1038_vm1, %v17135_v18  ;;  %v15408_v18 = vld [vmem:[%s22254_s19 + $0xa00] ss:$24 sps:$4 sm:$0xff]  }
 0x1e4   : > { %3935 = vmatprep.subr.bf16.mxu0 %v15401_v0 }
 0x1e7   : > { %3936 = vmatpush1.bf16.msra.mxu0 %v15399_v52 }
 0x1e8   : > { %3937 = vmatprep.subr.bf16.mxu0 %v15404_v5  ;;  %v15444_v5 = vld [vmem:[%s22254_s19 + $0xa90] ss:$24 sps:$4 sm:$0xff]  }
 0x1eb   : > { %3938 = vmatpush1.bf16.msra.mxu0 %v15402_v3 }
 0x1ec   : > { %3939 = vmatprep.subr.bf16.mxu0 %v15407_v7 }
 0x1ef   : > { %3940 = vmatpush1.bf16.msra.mxu0 %v15405_v53 }
 0x1f0   : > { %3941 = vmatprep.subr.bf16.mxu0 %v15410_v25  ;;  %v15449_v25 = vld [vmem:[%s22254_s19 + $0xac4] ss:$24 sps:$4 sm:$0xff]  }
 0x1f3   : > { %3942 = vmatpush1.bf16.msra.mxu0 %v15408_v18 }
 0x1f4   : > { %4372 = vmatprep.subr.bf16.mxu0 %v15413_v26 }
 0x1f6   : > { %3958 = vmatmul.mubr.bf16.vlgmr.msra.gmra.mrb[12].mxu0 %v17155_v24  ;;  %v15420_v24 = vld [vmem:[%s22254_s19 + $0xab0] ss:$24 sps:$4 sm:$0xff]  }
 0x1f7   : > { %4373 = vmatpush1.bf16.msra.mxu0 %v15411_v11  ;;  %12592 = vmatprep.mubr.msk.bf16.mxu0 %vm1038_vm1, %v17641_v62  ;;  %v15425_v62 = vld [vmem:[%s22254_s19 + $0xae4] ss:$24 sps:$4 sm:$0xff]  }
 0x1f8   : > { %4374 = vmatprep.subr.bf16.mxu0 %v15416_v28 }
 0x1fb   : > { %4375 = vmatpush1.bf16.msra.mxu0 %v15414_v29 }
 0x1fc   : > { %4376 = vmatprep.subr.bf16.mxu0 %v15419_v32 }
 0x1fe   : > { %3968 = vmatmul.mubr.bf16.gmra.mrb[16].mxu0 %v17675_v9  ;;  %v15428_v9 = vld [vmem:[%s22254_s19 + $0xb14] ss:$24 sps:$4 sm:$0xff]  }
 0x1ff   : > { %4377 = vmatpush1.bf16.msra.mxu0 %v15417_v37  ;;  %12593 = vmatprep.mubr.msk.bf16.mxu0 %vm1038_vm1, %v17201_v56  ;;  %v15426_v56 = vld [vmem:[%s22254_s19 + $0xb10] ss:$24 sps:$4 sm:$0xff]  }
 0x200   : > { %4378 = vmatprep.subr.bf16.mxu0 %v15422_v41  ;;  %v15447_v41 = vld [vmem:[%s22254_s19 + $0xac0] ss:$24 sps:$4 sm:$0xff]  }
 0x203   : > { %4379 = vmatpush1.bf16.msra.mxu0 %v15420_v24 }
 0x204   : > { %4380 = vmatprep.subr.bf16.mxu0 %v15425_v62 }
 0x206   : > { %3978 = vmatmul.mubr.bf16.gmra.mrb[20].mxu0 %v17219_v44  ;;  %v15434_v44 = vld [vmem:[%s22254_s19 + $0xb74] ss:$24 sps:$4 sm:$0xff]  }
 0x207   : > { %4381 = vmatpush1.bf16.msra.mxu0 %v15423_v42  ;;  %12702 = vmatprep.mubr.msk.bf16.mxu0 %vm1038_vm1, %v17711_v34  ;;  %v15452_v42 = vld [vmem:[%s22254_s19 + $0xaf4] ss:$24 sps:$4 sm:$0xff]  }
 0x208   : > { %4382 = vmatprep.subr.bf16.mxu0 %v15428_v9 }
 0x20b   : > { %4383 = vmatpush1.bf16.msra.mxu0 %v15426_v56 }
 0x20c   : > { %4384 = vmatprep.subr.bf16.mxu0 %v15431_v2 }
 0x20f   : > { %4385 = vmatpush1.bf16.msra.mxu0 %v15429_v54 }
 0x210   : > { %4386 = vmatprep.subr.bf16.mxu0 %v15434_v44 }
 0x213   : > { %4387 = vmatpush1.bf16.msra.mxu0 %v15432_v46  ;;  %v15450_v46 = vld [vmem:[%s22254_s19 + $0xaf0] ss:$24 sps:$4 sm:$0xff]  }
 0x214   : > { %4388 = vmatprep.subr.bf16.mxu0 %v15437_v21 }
 0x217   : > { %4389 = vmatpush1.bf16.msra.mxu0 %v15435_v31  ;;  %v4469_v35 = vpop.f32.mrb[0].mxu1 }
 0x218   : > { %4498 = vmatprep.subr.bf16.mxu0 %v15440_v63  ;;  %v4631_v14 = vmul.f32 %v18184_v60, %v4469_v35  ;;  %v4471_v40 = vpop.f32.mrb[1].mxu1  ;;  %v15455_v63 = vld [vmem:[%s22254_s19 + $0xb24] ss:$24 sps:$4 sm:$0xff]  }
 0x219   : > { %v4632_v49 = vmul.f32 %v18188_v50, %v4471_v40  ;;  %v4473_v22 = vpop.f32.mrb[2].mxu1 }
 0x21a   : > { %4405 = vmatmul.mubr.bf16.vlgmr.msra.gmra.mrb[0].mxu0 %v17772_v58  ;;  %v18208_v15 = vadd.f32 %v18192_v10, %v4631_v14  ;;  %v4637_v23 = vmul.f32 %v18184_v60, %v4473_v22  ;;  %v4475_v6 = vpop.f32.mrb[3].mxu1 }
 0x21b   : > { %4499 = vmatpush1.bf16.msra.mxu0 %v15438_v12  ;;  %v18212_v38 = vadd.f32 %v18199_v30, %v4632_v49  ;;  %v4638_v47 = vmul.f32 %v18188_v50, %v4475_v6  ;;  %12703 = vmatprep.mubr.msk.bf16.mxu0 %vm1038_vm1, %v17777_v45 }
 0x21c   : > { %v4771_v51 = vmin.f32 %v18208_v15, 0.0  ;;  %v18222_v19 = vadd.f32 %v18192_v10, %v4637_v23  ;;  %4500 = vmatprep.subr.bf16.mxu0 %v15443_v39  ;;  %vm4735_vm7 = vcmp.gt.f32.partialorder %v18208_v15, 0.0 }
 0x21d   : > { %v4772_v59 = vmin.f32 %v18212_v38, 0.0  ;;  %v18229_v57 = vadd.f32 %v18199_v30, %v4638_v47  ;;  %vm4736_vm8 = vcmp.gt.f32.partialorder %v18212_v38, 0.0 }
 0x21e   : > { %v4809_v33 = vmul.f32 1.442695, %v4771_v51  ;;  %v4777_v4 = vmin.f32 %v18222_v19, 0.0  ;;  %vm4741_vm9 = vcmp.gt.f32.partialorder %v18222_v19, 0.0 }
 0x21f   : > { %v4811_v20 = vmul.f32 1.442695, %v4772_v59  ;;  %v4778_v0 = vmin.f32 %v18229_v57, 0.0  ;;  %4501 = vmatpush1.bf16.msra.mxu0 %v15441_v16  ;;  %v4479_v52 = vpop.f32.mrb[4].mxu1  ;;  %vm4742_vm10 = vcmp.gt.f32.partialorder %v18229_v57, 0.0 }
 0x220   : > { %16279 = vpow2.f32 %v4809_v33  ;;  %v4821_v3 = vmul.f32 1.442695, %v4777_v4  ;;  %v4643_v7 = vmul.f32 %v18184_v60, %v4479_v52  ;;  %v4481_v53 = vpop.f32.mrb[5].mxu1  ;;  %4502 = vmatprep.subr.bf16.mxu0 %v15446_v36  ;;  %v15453_v36 = vld [vmem:[%s22254_s19 + $0xb20] ss:$24 sps:$4 sm:$0xff]  }
 0x221   : > { %16281 = vpow2.f32 %v4811_v20  ;;  %v4823_v18 = vmul.f32 1.442695, %v4778_v0  ;;  %v4644_v26 = vmul.f32 %v18188_v50, %v4481_v53  ;;  %v4483_v11 = vpop.f32.mrb[6].mxu1 }
 0x222   : > { %16283 = vpow2.f32 %v4821_v3  ;;  %v18242_v28 = vadd.f32 %v18192_v10, %v4643_v7  ;;  %4415 = vmatmul.mubr.bf16.gmra.mrb[4].mxu0 %v17801_v8  ;;  %v4649_v29 = vmul.f32 %v18184_v60, %v4483_v11  ;;  %v4485_v32 = vpop.f32.mrb[7].mxu1 }
 0x223   : > { %16285 = vpow2.f32 %v4823_v18  ;;  %v18247_v37 = vadd.f32 %v18199_v30, %v4644_v26  ;;  %4503 = vmatpush1.bf16.msra.mxu0 %v15444_v5  ;;  %12704 = vmatprep.mubr.msk.bf16.mxu0 %vm1038_vm1, %v17763_v48  ;;  %v4650_v24 = vmul.f32 %v18188_v50, %v4485_v32 }
 0x224   : > { %v4783_v62 = vmin.f32 %v18242_v28, 0.0  ;;  %4504 = vmatprep.subr.bf16.mxu0 %v15449_v25  ;;  %v18260_v9 = vadd.f32 %v18192_v10, %v4649_v29  ;;  %vm4747_vm11 = vcmp.gt.f32.partialorder %v18242_v28, 0.0 }
 0x225   : > { %v4784_v56 = vmin.f32 %v18247_v37, 0.0  ;;  %v18264_v2 = vadd.f32 %v18199_v30, %v4650_v24  ;;  %vm4748_vm12 = vcmp.gt.f32.partialorder %v18247_v37, 0.0 }
 0x226   : > { %v4833_v43 = vmul.f32 1.442695, %v4783_v62  ;;  %v4789_v54 = vmin.f32 %v18260_v9, 0.0  ;;  %vm4753_vm13 = vcmp.gt.f32.partialorder %v18260_v9, 0.0 }
 0x227   : > { %v4835_v44 = vmul.f32 1.442695, %v4784_v56  ;;  %4505 = vmatpush1.bf16.msra.mxu0 %v15447_v41  ;;  %v4790_v21 = vmin.f32 %v18264_v2, 0.0  ;;  %v4489_v31 = vpop.f32.mrb[8].mxu1  ;;  %vm4754_vm14 = vcmp.gt.f32.partialorder %v18264_v2, 0.0 }
 0x228   : > { %16287 = vpow2.f32 %v4833_v43  ;;  %4506 = vmatprep.subr.bf16.mxu0 %v15452_v42  ;;  %v4845_v12 = vmul.f32 1.442695, %v4789_v54  ;;  %v4655_v35 = vmul.f32 %v18184_v60, %v4489_v31  ;;  %v4491_v14 = vpop.f32.mrb[9].mxu1 }
 0x229   : > { %16289 = vpow2.f32 %v4835_v44  ;;  %v4847_v40 = vmul.f32 1.442695, %v4790_v21  ;;  %v4656_v39 = vmul.f32 %v18188_v50, %v4491_v14  ;;  %v4493_v49 = vpop.f32.mrb[10].mxu1 }
 0x22a   : > { %v16280_v22 = vpop.eup %16279  ;;  %4425 = vmatmul.mubr.bf16.gmra.mrb[8].mxu0 %v17791_v13  ;;  %16291 = vpow2.f32 %v4845_v12  ;;  %v18281_v23 = vadd.f32 %v18192_v10, %v4655_v35  ;;  %v4661_v6 = vmul.f32 %v18184_v60, %v4493_v49  ;;  %v4495_v16 = vpop.f32.mrb[11].mxu1  ;;  %v15458_v60 = vld [vmem:[%s22254_s19 + $0xb54] ss:$24 sps:$4 sm:$0xff]  }
 0x22b   : > { %v16282_v47 = vpop.eup %16281  ;;  %v12713_v51 = vadd.f32 -1.0, %v16280_v22  ;;  %4507 = vmatpush1.bf16.msra.mxu0 %v15450_v46  ;;  %16293 = vpow2.f32 %v4847_v40  ;;  %v18289_v59 = vadd.f32 %v18199_v30, %v4656_v39  ;;  %12708 = vmatprep.mubr.msk.bf16.mxu0 %vm1038_vm1, %v17711_v34  ;;  %v15456_v34 = vld [vmem:[%s22254_s19 + $0xb50] ss:$24 sps:$4 sm:$0xff]   ;;  %v4662_v26 = vmul.f32 %v18188_v50, %v4495_v16  ;;  %v15461_v50 = vld [vmem:[%s22254_s19 + $0xb84] ss:$24 sps:$4 sm:$0xff]  }
 0x22c   : > { %v16284_v33 = vpop.eup %16283  ;;  %v12714_v4 = vadd.f32 -1.0, %v16282_v47  ;;  %4508 = vmatprep.subr.bf16.mxu0 %v15455_v63  ;;  %v4795_v20 = vmin.f32 %v18281_v23, 0.0  ;;  %v18299_v0 = vadd.f32 %v18192_v10, %v4661_v6  ;;  %vm4759_vm15 = vcmp.gt.f32.partialorder %v18281_v23, 0.0  ;;  %v15464_v40 = vld [vmem:[%s22254_s19 + $0xbb4] ss:$24 sps:$4 sm:$0xff]  }
 0x22d   : > { %v16286_v52 = vpop.eup %16285  ;;  %v4915_v5 = vmul.f32 1.6732632, %v12713_v51  ;;  %v12719_v3 = vadd.f32 -1.0, %v16284_v33  ;;  %v4796_v7 = vmin.f32 %v18289_v59, 0.0  ;;  %v18345_v39 = vadd.f32 %v18199_v30, %v4662_v26 }
 0x22e   : > { %v4916_v53 = vmul.f32 1.6732632, %v12714_v4  ;;  %v12720_v25 = vadd.f32 -1.0, %v16286_v52  ;;  %v4857_v18 = vmul.f32 1.442695, %v4795_v20  ;;  %v4801_v32 = vmin.f32 %v18299_v0, 0.0 }
 0x22f   : > { %v4951_v10 = vsel %vm4735_vm7, %v18208_v15, %v4915_v5  ;;  %v4921_v11 = vmul.f32 1.6732632, %v12719_v3  ;;  %4509 = vmatpush1.bf16.msra.mxu0 %v15453_v36  ;;  %v4859_v29 = vmul.f32 1.442695, %v4796_v7  ;;  %vm4760_vm4 = vcmp.gt.f32.partialorder %v18289_v59, 0.0 }
 0x230   : > { %v18312_v41 = vmul.f32 1.050701, %v4951_v10  ;;  %v4952_v24 = vsel %vm4736_vm8, %v18212_v38, %v4916_v53  ;;  %v4922_v62 = vmul.f32 1.6732632, %v12720_v25  ;;  %4510 = vmatprep.subr.bf16.mxu0 %v15458_v60  ;;  %16295 = vpow2.f32 %v4857_v18  ;;  %v15462_v20 = vld [vmem:[%s22254_s19 + $0xbb0] ss:$24 sps:$4 sm:$0xff]  }
 0x231   : > { %v18320_v42 = vmul.f32 1.050701, %v4952_v24  ;;  %v4957_v15 = vsel %vm4741_vm9, %v18222_v19, %v4921_v11  ;;  %16297 = vpow2.f32 %v4859_v29  ;;  %v4869_v56 = vmul.f32 1.442695, %v4801_v32  ;;  %v15459_v19 = vld [vmem:[%s22254_s19 + $0xb80] ss:$24 sps:$4 sm:$0xff]  }
 0x232   : > { %v16288_v43 = vpop.eup %16287  ;;  %v5064_v54 = vrot.slane %v18312_v41, 1  ;;  %v18326_v44 = vmul.f32 1.050701, %v4957_v15  ;;  %v4958_v38 = vsel %vm4742_vm10, %v18229_v57, %v4922_v62  ;;  %v5191_v35 = vrot.slane %v18312_v41, 2 }
 0x233   : > { %v16290_v46 = vpop.eup %16289  ;;  %v5067_v21 = vrot.slane %v18320_v42, 1  ;;  %v18333_v31 = vmul.f32 1.050701, %v4958_v38  ;;  %v12725_v63 = vadd.f32 -1.0, %v16288_v43  ;;  %4511 = vmatpush1.bf16.msra.mxu0 %v15456_v34  ;;  %16299 = vpow2.f32 %v4869_v56 }
 0x234   : > { %v16292_v12 = vpop.eup %16291  ;;  %v5065_v14 = vrot.slane %v18326_v44, 1  ;;  %v12726_v57 = vadd.f32 -1.0, %v16290_v46  ;;  %4512 = vmatprep.subr.bf16.mxu0 %v15461_v50  ;;  %v5194_v47 = vrot.slane %v18320_v42, 2  ;;  %v5192_v51 = vrot.slane %v18326_v44, 2 }
 0x235   : > { %v16294_v49 = vpop.eup %16293  ;;  %v5068_v22 = vrot.slane %v18333_v31, 1  ;;  %v4927_v6 = vmul.f32 1.6732632, %v12725_v63  ;;  %v12731_v16 = vadd.f32 -1.0, %v16292_v12  ;;  %v4802_v4 = vmin.f32 %v18345_v39, 0.0 }
 0x236   : > { %v4928_v36 = vmul.f32 1.6732632, %v12726_v57  ;;  %v12732_v33 = vadd.f32 -1.0, %v16294_v49  ;;  %vm4765_vm6 = vcmp.gt.f32.partialorder %v18299_v0, 0.0  ;;  %v5195_v5 = vrot.slane %v18333_v31, 2 }
 0x237   : > { %v4963_v30 = vsel %vm4747_vm11, %v18242_v28, %v4927_v6  ;;  %v4933_v60 = vmul.f32 1.6732632, %v12731_v16  ;;  %4513 = vmatpush1.bf16.msra.mxu0 %v15459_v19  ;;  %v5069_v52 = vsel %vm1763_vm3, %v5067_v21, %v5068_v22  ;;  %v4871_v28 = vmul.f32 1.442695, %v4802_v4 }
 0x238   : > { %v18361_v3 = vmul.f32 1.050701, %v4963_v30  ;;  %v4964_v34 = vsel %vm4748_vm12, %v18247_v37, %v4928_v36  ;;  %v4934_v7 = vmul.f32 1.6732632, %v12732_v33  ;;  %4514 = vmatprep.subr.bf16.mxu0 %v15464_v40  ;;  %v5157_v18 = vmax.f32 %v18320_v42, %v5069_v52 }
 0x239   : > { %v18366_v53 = vmul.f32 1.050701, %v4964_v34  ;;  %v4969_v25 = vsel %vm4753_vm13, %v18260_v9, %v4933_v60  ;;  %v5196_v26 = vsel %vm2921_vm5, %v5194_v47, %v5195_v5  ;;  %16301 = vpow2.f32 %v4871_v28 }
 0x23a   : > { %v16296_v10 = vpop.eup %16295  ;;  %v5080_v11 = vrot.slane %v18361_v3, 1  ;;  %v5207_v29 = vrot.slane %v18361_v3, 2  ;;  %v18375_v32 = vmul.f32 1.050701, %v4969_v25  ;;  %v4970_v37 = vsel %vm4754_vm14, %v18264_v2, %v4934_v7 }
 0x23b   : > { %v16298_v24 = vpop.eup %16297  ;;  %v5082_v62 = vrot.slane %v18366_v53, 1  ;;  %v5209_v9 = vrot.slane %v18366_v53, 2  ;;  %v5006_v50 = vmul.f32 1.050701, %v4970_v37  ;;  %v12737_v42 = vadd.f32 -1.0, %v16296_v10  ;;  %4515 = vmatpush1.bf16.msra.mxu0 %v15462_v20 }
 0x23c   : > { %v5092_v15 = vrot.slane %v18375_v32, 1  ;;  %v5219_v56 = vrot.slane %v18375_v32, 2  ;;  %v12738_v43 = vadd.f32 -1.0, %v16298_v24  ;;  %v18384_v19 = vmax.f32 %v5157_v18, %v5196_v26 }
 0x23d   : > { %v16300_v38 = vpop.eup %16299  ;;  %v5094_v46 = vrot.slane %v5006_v50, 1  ;;  %v5221_v21 = vrot.slane %v5006_v50, 2  ;;  %v4939_v63 = vmul.f32 1.6732632, %v12737_v42  ;;  %v5066_v57 = vsel %vm1763_vm3, %v5064_v54, %v5065_v14 }
 0x23e   : > { %v4940_v2 = vmul.f32 1.6732632, %v12738_v43  ;;  %v12743_v12 = vadd.f32 -1.0, %v16300_v38  ;;  %4531 = vmatmul.mubr.bf16.vlgmr.msra.gmra.mrb[12].mxu0 %v17772_v58  ;;  %v5083_v40 = vsel %vm1763_vm3, %v5068_v22, %v5082_v62  ;;  %v5156_v6 = vmax.f32 %v18312_v41, %v5066_v57 }
 0x23f   : > { %v4975_v49 = vsel %vm4759_vm15, %v18281_v23, %v4939_v63  ;;  %12709 = vmatprep.mubr.msk.bf16.mxu0 %vm1038_vm1, %v17777_v45  ;;  %v5163_v16 = vmax.f32 %v18333_v31, %v5083_v40  ;;  %v5193_v58 = vsel %vm2921_vm5, %v5191_v35, %v5192_v51  ;;  %v5210_v23 = vsel %vm2921_vm5, %v5195_v5, %v5209_v9 }
 0x240   : > { %v5011_v54 = vmul.f32 1.050701, %v4975_v49  ;;  %v4976_v22 = vsel %vm4760_vm4, %v18289_v59, %v4940_v2  ;;  %v4945_v47 = vmul.f32 1.6732632, %v12743_v12  ;;  %v18409_v45 = vmax.f32 %v5156_v6, %v5193_v58 }
 0x241   : > { %v5012_v36 = vmul.f32 1.050701, %v4976_v22  ;;  %v18411_v33 = vmax.f32 %v5163_v16, %v5210_v23  ;;  %v5093_v31 = vsel %vm1763_vm3, %v5080_v11, %v5092_v15  ;;  %vm4766_vm7 = vcmp.gt.f32.partialorder %v18345_v39, 0.0 }
 0x242   : > { %v4981_v41 = vsel %vm4765_vm6, %v18299_v0, %v4945_v47  ;;  %v5168_v35 = vmax.f32 %v18361_v3, %v5093_v31  ;;  %v5104_v4 = vrot.slane %v5011_v54, 1  ;;  %v5231_v20 = vrot.slane %v5011_v54, 2 }
 0x243   : > { %v5106_v59 = vrot.slane %v5012_v36, 1  ;;  %v5233_v30 = vrot.slane %v5012_v36, 2  ;;  %v5017_v60 = vmul.f32 1.050701, %v4981_v41  ;;  %v5220_v52 = vsel %vm2921_vm5, %v5207_v29, %v5219_v56  ;;  %v16302_v25 = vpop.eup %16301 }
 0x244   : > { %v5081_v5 = vsel %vm1763_vm3, %v5065_v14, %v5080_v11  ;;  %v5208_v34 = vsel %vm2921_vm5, %v5192_v51, %v5207_v29  ;;  %v18429_v26 = vmax.f32 %v5168_v35, %v5220_v52  ;;  %v5095_v14 = vsel %vm1763_vm3, %v5082_v62, %v5094_v46 }
 0x245   : > { %v5116_v0 = vrot.slane %v5017_v60, 1  ;;  %v5243_v7 = vrot.slane %v5017_v60, 2  ;;  %v5107_v28 = vsel %vm1763_vm3, %v5094_v46, %v5106_v59  ;;  %v5234_v3 = vsel %vm2921_vm5, %v5221_v21, %v5233_v30 }
 0x246   : > { %4541 = vmatmul.mubr.bf16.gmra.mrb[16].mxu0 %v17801_v8  ;;  %v5175_v18 = vmax.f32 %v5006_v50, %v5107_v28  ;;  %v5162_v10 = vmax.f32 %v18326_v44, %v5081_v5  ;;  %v12744_v11 = vadd.f32 -1.0, %v16302_v25  ;;  %v5169_v51 = vmax.f32 %v18366_v53, %v5095_v14 }
 0x247   : > { %12710 = vmatprep.mubr.msk.bf16.mxu0 %vm1038_vm1, %v17763_v48  ;;  %v5222_v29 = vsel %vm2921_vm5, %v5209_v9, %v5221_v21  ;;  %v5105_v37 = vsel %vm1763_vm3, %v5092_v15, %v5104_v4  ;;  %v5232_v44 = vsel %vm2921_vm5, %v5219_v56, %v5231_v20  ;;  %v5117_v43 = vsel %vm1763_vm3, %v5104_v4, %v5116_v0 }
 0x248   : > { %v18438_v24 = vmax.f32 %v5175_v18, %v5234_v3  ;;  %v18440_v8 = vmax.f32 %v5162_v10, %v5208_v34  ;;  %v5174_v50 = vmax.f32 %v18375_v32, %v5105_v37  ;;  %v4946_v42 = vmul.f32 1.6732632, %v12744_v11  ;;  %v5710_v11 = vld [vmem:[%s22176_s5 + $0x308] sm:$0xff] }
 0x249   : > { %v18444_v62 = vmax.f32 %v5169_v51, %v5222_v29  ;;  %v5244_v48 = vsel %vm2921_vm5, %v5231_v20, %v5243_v7  ;;  %v5180_v9 = vmax.f32 %v5011_v54, %v5117_v43  ;;  %v18461_v57 = vsub.s32 0, %v18152_v55  ;;  %v5713_v51 = vld [vmem:[%s22176_s5 + $0x320] sm:$0xff]  ;;  %v5712_v43 = vld [vmem:[%s22176_s5 + $0x318] sm:$0xff] }
 0x24a   : > { %v18448_v53 = vmax.f32 %v5174_v50, %v5232_v44  ;;  %v4982_v15 = vsel %vm4766_vm7, %v18345_v39, %v4946_v42  ;;  %v18464_v40 = vsub.s32 1, %v18152_v55  ;;  %v18506_v14 = vpack.i.bf16 %v18411_v33, %v18409_v45  ;;  %v5709_v29 = vld [vmem:[%s22176_s5 + $0x300] sm:$0xff] }
 0x24b   : > { %v5018_v38 = vmul.f32 1.050701, %v4982_v15  ;;  %v18453_v46 = vmax.f32 %v5180_v9, %v5244_v48  ;;  %22259 = vst [vmem:[#allocation15_spill] sm:$0xff] %v18461_v57  ;;  %v18468_v39 = vrot.slane %v18166_v17, %v18461_v57  ;;  %v18476_v49 = vrot.slane %v18177_v27, %v18461_v57  ;;  %v5716_v48 = vld [vmem:[%s22176_s5 + $0x338] sm:$0xff]  ;;  %v5719_v9 = vld [vmem:[%s22176_s5 + $0x350] sm:$0xff] }
 0x24c   : > { %22260 = vst [vmem:[#allocation16_spill] sm:$0xff] %v18464_v40  ;;  %v18480_v16 = vrot.slane %v18177_v27, %v18464_v40  ;;  %v14033_v42 = vpack.c.bf16 %v5713_v51, %v5710_v11  ;;  %v19752_v57 = vld [vmem:[%s22176_s5 + $0xb8] sm:$0xff] }
 0x24d   : > { %v5118_v32 = vrot.slane %v5018_v38, 1  ;;  %v5245_v21 = vrot.slane %v5018_v38, 2 }
 0x24e   : > { %4551 = vmatmul.mubr.bf16.gmra.mrb[20].mxu0 %v17791_v13  ;;  %v18472_v13 = vrot.slane %v18166_v17, %v18464_v40  ;;  %14034 = vmatprep.subr.bf16.mxu1 %v14033_v42  ;;  %v19737_v40 = vld [vmem:[%s22176_s5 + $0x220] sm:$0xff] }
 0x24f   : > { %v5119_v56 = vsel %vm1763_vm3, %v5106_v59, %v5118_v32  ;;  %v5246_v63 = vsel %vm2921_vm5, %v5233_v30, %v5245_v21  ;;  %v14035_v32 = vpack.c.bf16 %v5712_v43, %v5709_v29  ;;  %v5715_v21 = vld [vmem:[%s22176_s5 + $0x330] sm:$0xff] }
 0x250   : > { %v5181_v2 = vmax.f32 %v5012_v36, %v5119_v56  ;;  %v5718_v56 = vld [vmem:[%s22176_s5 + $0x348] sm:$0xff] }
 0x251   : > { %14036 = vmatpush1.bf16.msra.mxu1 %v14035_v32  ;;  %v5727_v32 = vld [vmem:[%s22176_s5 + $0x390] sm:$0xff] }
 0x252   : > { %v18458_v12 = vmax.f32 %v5181_v2, %v5246_v63  ;;  %v5722_v63 = vld [vmem:[%s22176_s5 + $0x368] sm:$0xff] }
 0x2ed   : > { %v4406_v6 = vpop.f32.mrb[0].mxu0 }
 0x2ee   : > { %v4629_v58 = vmul.f32 %v18468_v39, %v4406_v6  ;;  %v4408_v54 = vpop.f32.mrb[1].mxu0 }
 0x2ef   : > { %v4630_v22 = vmul.f32 %v18472_v13, %v4408_v54  ;;  %v4410_v47 = vpop.f32.mrb[2].mxu0  ;;  %v14037_v54 = vpack.c.bf16 %v5719_v9, %v5716_v48 }
 0x2f0   : > { %v18485_v23 = vadd.f32 %v18476_v49, %v4629_v58  ;;  %v4635_v36 = vmul.f32 %v18468_v39, %v4410_v47  ;;  %v4412_v31 = vpop.f32.mrb[3].mxu0  ;;  %v4617_v58 = vsub.s32 4, %v18152_v55 }
 0x2f1   : > { %v18489_v41 = vadd.f32 %v18480_v16, %v4630_v22  ;;  %v4636_v35 = vmul.f32 %v18472_v13, %v4412_v31  ;;  %v5725_v22 = vld [vmem:[%s22176_s5 + $0x380] sm:$0xff]  ;;  %v4621_v31 = vsub.s32 5, %v18152_v55  ;;  %14038 = vmatprep.subr.bf16.mxu1 %v14037_v54 }
 0x2f2   : > { %v4769_v4 = vmin.f32 %v18485_v23, 0.0  ;;  %v18494_v59 = vadd.f32 %v18476_v49, %v4635_v36  ;;  %vm4733_vm1 = vcmp.gt.f32.partialorder %v18485_v23, 0.0  ;;  %v5737_v54 = vld [vmem:[%s22176_s5 + $0x3e0] sm:$0xff] }
 0x2f3   : > { %v4770_v30 = vmin.f32 %v18489_v41, 0.0  ;;  %v18498_v60 = vadd.f32 %v18480_v16, %v4636_v35  ;;  %v14039_v35 = vpack.c.bf16 %v5718_v56, %v5715_v21  ;;  %vm4734_vm8 = vcmp.gt.f32.partialorder %v18489_v41, 0.0  ;;  %v5730_v21 = vld [vmem:[%s22176_s5 + $0x3a8] sm:$0xff] }
 0x2f4   : > { %v4805_v20 = vmul.f32 1.442695, %v4769_v4  ;;  %v4775_v52 = vmin.f32 %v18494_v59, 0.0  ;;  %vm4739_vm9 = vcmp.gt.f32.partialorder %v18494_v59, 0.0 }
 0x2f5   : > { %v4807_v5 = vmul.f32 1.442695, %v4770_v30  ;;  %v4776_v34 = vmin.f32 %v18498_v60, 0.0  ;;  %v4416_v0 = vpop.f32.mrb[4].mxu0  ;;  %14040 = vmatpush1.bf16.msra.mxu1 %v14039_v35  ;;  %vm4740_vm10 = vcmp.gt.f32.partialorder %v18498_v60, 0.0 }
 0x2f6   : > { %16303 = vpow2.f32 %v4805_v20  ;;  %v4817_v7 = vmul.f32 1.442695, %v4775_v52  ;;  %v4641_v28 = vmul.f32 %v18468_v39, %v4416_v0  ;;  %v4418_v3 = vpop.f32.mrb[5].mxu0  ;;  %v14041_v20 = vpack.c.bf16 %v5725_v22, %v5722_v63  ;;  %v5721_v52 = vld [vmem:[%s22176_s5 + $0x360] sm:$0xff] }
 0x2f7   : > { %16305 = vpow2.f32 %v4807_v5  ;;  %v4819_v25 = vmul.f32 1.442695, %v4776_v34  ;;  %v4642_v18 = vmul.f32 %v18472_v13, %v4418_v3  ;;  %v4420_v10 = vpop.f32.mrb[6].mxu0  ;;  %v5724_v5 = vld [vmem:[%s22176_s5 + $0x378] sm:$0xff] }
 0x2f8   : > { %16307 = vpow2.f32 %v4817_v7  ;;  %v18518_v37 = vadd.f32 %v18476_v49, %v4641_v28  ;;  %v4647_v50 = vmul.f32 %v18468_v39, %v4420_v10  ;;  %v4422_v44 = vpop.f32.mrb[7].mxu0  ;;  %v18567_v28 = vpack.i.bf16 %v18438_v24, %v18429_v26  ;;  %v5728_v3 = vld [vmem:[%s22176_s5 + $0x398] sm:$0xff]  ;;  %14042 = vmatprep.subr.bf16.mxu1 %v14041_v20 }
 0x2f9   : > { %16309 = vpow2.f32 %v4819_v25  ;;  %v18531_v15 = vadd.f32 %v18480_v16, %v4642_v18  ;;  %v4648_v38 = vmul.f32 %v18472_v13, %v4422_v44  ;;  %v5731_v25 = vld [vmem:[%s22176_s5 + $0x3b0] sm:$0xff]  ;;  %v14043_v44 = vpack.c.bf16 %v5724_v5, %v5721_v52 }
 0x2fa   : > { %v4781_v2 = vmin.f32 %v18518_v37, 0.0  ;;  %v18545_v6 = vadd.f32 %v18476_v49, %v4647_v50  ;;  %vm4745_vm11 = vcmp.gt.f32.partialorder %v18518_v37, 0.0 }
 0x2fb   : > { %v4782_v47 = vmin.f32 %v18531_v15, 0.0  ;;  %v18553_v36 = vadd.f32 %v18480_v16, %v4648_v38  ;;  %v14045_v38 = vpack.c.bf16 %v5731_v25, %v5728_v3  ;;  %14044 = vmatpush1.bf16.msra.mxu1 %v14043_v44  ;;  %vm4746_vm12 = vcmp.gt.f32.partialorder %v18531_v15, 0.0 }
 0x2fc   : > { %v4829_v4 = vmul.f32 1.442695, %v4781_v2  ;;  %v4787_v30 = vmin.f32 %v18545_v6, 0.0  ;;  %vm4751_vm13 = vcmp.gt.f32.partialorder %v18545_v6, 0.0 }
 0x2fd   : > { %v4831_v34 = vmul.f32 1.442695, %v4782_v47  ;;  %v4788_v0 = vmin.f32 %v18553_v36, 0.0  ;;  %v4426_v7 = vpop.f32.mrb[8].mxu0  ;;  %14046 = vmatprep.subr.bf16.mxu1 %v14045_v38  ;;  %vm4752_vm14 = vcmp.gt.f32.partialorder %v18553_v36, 0.0 }
 0x2fe   : > { %16311 = vpow2.f32 %v4829_v4  ;;  %v4841_v18 = vmul.f32 1.442695, %v4787_v30  ;;  %v4653_v10 = vmul.f32 %v18468_v39, %v4426_v7  ;;  %v4428_v11 = vpop.f32.mrb[9].mxu0 }
 0x2ff   : > { %16313 = vpow2.f32 %v4831_v34  ;;  %v4843_v51 = vmul.f32 1.442695, %v4788_v0  ;;  %v4654_v29 = vmul.f32 %v18472_v13, %v4428_v11  ;;  %v4430_v50 = vpop.f32.mrb[10].mxu0  ;;  %v14047_v34 = vpack.c.bf16 %v5730_v21, %v5727_v32 }
 0x300   : > { %v16304_v42 = vpop.eup %16303  ;;  %16315 = vpow2.f32 %v4841_v18  ;;  %v18579_v43 = vadd.f32 %v18476_v49, %v4653_v10  ;;  %v4659_v48 = vmul.f32 %v18468_v39, %v4430_v50  ;;  %v4432_v9 = vpop.f32.mrb[11].mxu0  ;;  %v5734_v39 = vld [vmem:[%s22176_s5 + $0x3c8] sm:$0xff] }
 0x301   : > { %v16306_v56 = vpop.eup %16305  ;;  %v12711_v63 = vadd.f32 -1.0, %v16304_v42  ;;  %16317 = vpow2.f32 %v4843_v51  ;;  %v18590_v2 = vadd.f32 %v18480_v16, %v4654_v29  ;;  %v14049_v25 = vpack.c.bf16 %v5737_v54, %v5734_v39  ;;  %14048 = vmatpush1.bf16.msra.mxu1 %v14047_v34 }
 0x302   : > { %v16308_v22 = vpop.eup %16307  ;;  %v12712_v47 = vadd.f32 -1.0, %v16306_v56  ;;  %v4793_v35 = vmin.f32 %v18579_v43, 0.0  ;;  %v18601_v4 = vadd.f32 %v18476_v49, %v4659_v48  ;;  %v18634_v39 = vrot.slane %v18166_v17, %v4621_v31 }
 0x303   : > { %v16310_v30 = vpop.eup %16309  ;;  %v4913_v20 = vmul.f32 1.6732632, %v12711_v63  ;;  %v12717_v52 = vadd.f32 -1.0, %v16308_v22  ;;  %v4794_v5 = vmin.f32 %v18590_v2, 0.0  ;;  %14050 = vmatprep.subr.bf16.mxu1 %v14049_v25  ;;  %vm4757_vm15 = vcmp.gt.f32.partialorder %v18579_v43, 0.0 }
 0x304   : > { %v4914_v0 = vmul.f32 1.6732632, %v12712_v47  ;;  %v12718_v7 = vadd.f32 -1.0, %v16310_v30  ;;  %v4853_v3 = vmul.f32 1.442695, %v4793_v35  ;;  %v4799_v49 = vmin.f32 %v18601_v4, 0.0 }
 0x305   : > { %v4949_v18 = vsel %vm4733_vm1, %v18485_v23, %v4913_v20  ;;  %v4919_v10 = vmul.f32 1.6732632, %v12717_v52  ;;  %v4855_v11 = vmul.f32 1.442695, %v4794_v5  ;;  %vm4758_vm4 = vcmp.gt.f32.partialorder %v18590_v2, 0.0 }
 0x306   : > { %v18608_v51 = vmul.f32 1.050701, %v4949_v18  ;;  %v4950_v29 = vsel %vm4734_vm8, %v18489_v41, %v4914_v0  ;;  %v4920_v50 = vmul.f32 1.6732632, %v12718_v7  ;;  %16319 = vpow2.f32 %v4853_v3 }
 0x307   : > { %v18613_v44 = vmul.f32 1.050701, %v4950_v29  ;;  %v4955_v42 = vsel %vm4739_vm9, %v18494_v59, %v4919_v10  ;;  %16321 = vpow2.f32 %v4855_v11  ;;  %v4865_v23 = vmul.f32 1.442695, %v4799_v49 }
 0x308   : > { %v16312_v48 = vpop.eup %16311  ;;  %v18618_v38 = vmul.f32 1.050701, %v4955_v42  ;;  %v4956_v32 = vsel %vm4740_vm10, %v18498_v60, %v4920_v50  ;;  %v4660_v41 = vmul.f32 %v18472_v13, %v4432_v9  ;;  %v18629_v59 = vrot.slane %v18166_v17, %v4617_v58 }
 0x309   : > { %v16314_v21 = vpop.eup %16313  ;;  %v18624_v56 = vmul.f32 1.050701, %v4956_v32  ;;  %v12723_v63 = vadd.f32 -1.0, %v16312_v48  ;;  %v5058_v60 = vrot.slane %v18608_v51, 1  ;;  %16323 = vpow2.f32 %v4865_v23 }
 0x30a   : > { %v16316_v54 = vpop.eup %16315  ;;  %v22201_v13 = vrot.slane %v18618_v38, 1  ;;  %v12724_v9 = vadd.f32 -1.0, %v16314_v21  ;;  %v5061_v47 = vrot.slane %v18613_v44, 1  ;;  %v18641_v34 = vadd.f32 %v18480_v16, %v4660_v41 }
 0x30b   : > { %v16318_v22 = vpop.eup %16317  ;;  %v22200_v35 = vrot.slane %v18624_v56, 1  ;;  %v4925_v30 = vmul.f32 1.6732632, %v12723_v63  ;;  %v12729_v20 = vadd.f32 -1.0, %v16316_v54  ;;  %v18651_v7 = vrot.slane %v18177_v27, %v4617_v58 }
 0x30c   : > { %v4926_v52 = vmul.f32 1.6732632, %v12724_v9  ;;  %v12730_v5 = vadd.f32 -1.0, %v16318_v22  ;;  %v18646_v17 = vsel %vm1763_vm3, %v5058_v60, %v22201_v13  ;;  %v18665_v18 = vrot.slane %v18177_v27, %v4621_v31 }
 0x30d   : > { %v4931_v0 = vmul.f32 1.6732632, %v12729_v20  ;;  %v18656_v3 = vsel %vm1763_vm3, %v5061_v47, %v22200_v35  ;;  %v5154_v16 = vmax.f32 %v18608_v51, %v18646_v17  ;;  %v4961_v58 = vsel %vm4745_vm11, %v18518_v37, %v4925_v30 }
 0x30e   : > { %v4932_v25 = vmul.f32 1.6732632, %v12730_v5  ;;  %v4800_v10 = vmin.f32 %v18641_v34, 0.0  ;;  %v5155_v11 = vmax.f32 %v18613_v44, %v18656_v3  ;;  %v4962_v29 = vsel %vm4746_vm12, %v18531_v15, %v4926_v52 }
 0x30f   : > { %v5185_v27 = vrot.slane %v18608_v51, 2  ;;  %v5188_v37 = vrot.slane %v18613_v44, 2  ;;  %v4967_v31 = vsel %vm4751_vm13, %v18545_v6, %v4931_v0  ;;  %v18679_v23 = vmul.f32 1.050701, %v4961_v58 }
 0x310   : > { %v16320_v49 = vpop.eup %16319  ;;  %v4968_v48 = vsel %vm4752_vm14, %v18553_v36, %v4932_v25  ;;  %v4867_v32 = vmul.f32 1.442695, %v4800_v10  ;;  %v22199_v21 = vrot.slane %v18618_v38, 2  ;;  %v18683_v63 = vmul.f32 1.050701, %v4962_v29 }
 0x311   : > { %v16322_v55 = vpop.eup %16321  ;;  %v12735_v50 = vadd.f32 -1.0, %v16320_v49  ;;  %v4532_v42 = vpop.f32.mrb[12].mxu0  ;;  %v18686_v47 = vmul.f32 1.050701, %v4967_v31  ;;  %v22198_v20 = vrot.slane %v18624_v56, 2  ;;  %vm4763_vm6 = vcmp.gt.f32.partialorder %v18601_v4, 0.0 }
 0x312   : > { %v12736_v15 = vadd.f32 -1.0, %v16322_v55  ;;  %v4534_v41 = vpop.f32.mrb[13].mxu0  ;;  %v4633_v60 = vmul.f32 %v18629_v59, %v4532_v42  ;;  %16325 = vpow2.f32 %v4867_v32  ;;  %v18691_v52 = vmul.f32 1.050701, %v4968_v48 }
 0x313   : > { %v4937_v54 = vmul.f32 1.6732632, %v12735_v50  ;;  %v4536_v9 = vpop.f32.mrb[14].mxu0  ;;  %v16324_v22 = vpop.eup %16323  ;;  %v4634_v6 = vmul.f32 %v18634_v39, %v4534_v41  ;;  %v5076_v29 = vrot.slane %v18679_v23, 1  ;;  %vm4764_vm7 = vcmp.gt.f32.partialorder %v18641_v34, 0.0 }
 0x314   : > { %v4639_v30 = vmul.f32 %v18629_v59, %v4536_v9  ;;  %v4538_v36 = vpop.f32.mrb[15].mxu0  ;;  %v4938_v5 = vmul.f32 1.6732632, %v12736_v15  ;;  %v18694_v0 = vadd.f32 %v18651_v7, %v4633_v60  ;;  %v12741_v58 = vadd.f32 -1.0, %v16324_v22 }
 0x315   : > { %v4973_v25 = vsel %vm4757_vm15, %v18579_v43, %v4937_v54  ;;  %v18701_v10 = vadd.f32 %v18665_v18, %v4634_v6  ;;  %v4640_v50 = vmul.f32 %v18634_v39, %v4538_v36  ;;  %v5187_v43 = vsel %vm2921_vm5, %v5185_v27, %v22199_v21 }
 0x316   : > { %v18704_v49 = vadd.f32 %v18651_v7, %v4639_v30  ;;  %v4773_v31 = vmin.f32 %v18694_v0, 0.0  ;;  %v18715_v41 = vmul.f32 1.050701, %v4973_v25  ;;  %v4974_v54 = vsel %vm4758_vm4, %v18590_v2, %v4938_v5 }
 0x317   : > { %v4774_v15 = vmin.f32 %v18701_v10, 0.0  ;;  %v4943_v6 = vmul.f32 1.6732632, %v12741_v58  ;;  %v18723_v48 = vadd.f32 %v18665_v18, %v4640_v50  ;;  %v18730_v5 = vmul.f32 1.050701, %v4974_v54 }
 0x318   : > { %v4813_v60 = vmul.f32 1.442695, %v4773_v31  ;;  %v4779_v36 = vmin.f32 %v18704_v49, 0.0  ;;  %vm4737_vm1 = vcmp.gt.f32.partialorder %v18694_v0, 0.0  ;;  %vm4738_vm8 = vcmp.gt.f32.partialorder %v18701_v10, 0.0 }
 0x319   : > { %v4542_v9 = vpop.f32.mrb[16].mxu0  ;;  %v4815_v30 = vmul.f32 1.442695, %v4774_v15  ;;  %vm4743_vm9 = vcmp.gt.f32.partialorder %v18704_v49, 0.0  ;;  %vm4744_vm10 = vcmp.gt.f32.partialorder %v18723_v48, 0.0 }
 0x31a   : > { %16327 = vpow2.f32 %v4813_v60  ;;  %v4645_v32 = vmul.f32 %v18629_v59, %v4542_v9  ;;  %v4544_v25 = vpop.f32.mrb[17].mxu0  ;;  %v4825_v58 = vmul.f32 1.442695, %v4779_v36  ;;  %v4780_v60 = vmin.f32 %v18723_v48, 0.0 }
 0x31b   : > { %16329 = vpow2.f32 %v4815_v30  ;;  %v4546_v31 = vpop.f32.mrb[18].mxu0  ;;  %v4646_v9 = vmul.f32 %v18634_v39, %v4544_v25  ;;  %v5190_v30 = vsel %vm2921_vm5, %v5188_v37, %v22198_v20  ;;  %v18762_v37 = vmax.f32 %v5154_v16, %v5187_v43 }
 0x31c   : > { %v18735_v50 = vadd.f32 %v18651_v7, %v4645_v32  ;;  %v4548_v22 = vpop.f32.mrb[19].mxu0  ;;  %v16326_v55 = vpop.eup %16325  ;;  %16331 = vpow2.f32 %v4825_v58  ;;  %v4651_v27 = vmul.f32 %v18629_v59, %v4546_v31  ;;  %v4979_v32 = vsel %vm4763_vm6, %v18601_v4, %v4943_v6 }
 0x31d   : > { %v4652_v54 = vmul.f32 %v18634_v39, %v4548_v22  ;;  %v12742_v36 = vadd.f32 -1.0, %v16326_v55  ;;  %v4827_v25 = vmul.f32 1.442695, %v4780_v60  ;;  %v18751_v31 = vadd.f32 %v18665_v18, %v4646_v9 }
 0x31e   : > { %v4785_v58 = vmin.f32 %v18735_v50, 0.0  ;;  %v18754_v22 = vadd.f32 %v18651_v7, %v4651_v27  ;;  %v18769_v60 = vmax.f32 %v5155_v11, %v5190_v30  ;;  %v18771_v9 = vmul.f32 1.050701, %v4979_v32 }
 0x31f   : > { %v18757_v15 = vadd.f32 %v18665_v18, %v4652_v54  ;;  %16333 = vpow2.f32 %v4827_v25  ;;  %v4786_v51 = vmin.f32 %v18751_v31, 0.0  ;;  %v4944_v44 = vmul.f32 1.6732632, %v12742_v36 }
 0x320   : > { %v4837_v55 = vmul.f32 1.442695, %v4785_v58  ;;  %v4791_v17 = vmin.f32 %v18754_v22, 0.0  ;;  %vm4749_vm11 = vcmp.gt.f32.partialorder %v18735_v50, 0.0  ;;  %vm4750_vm12 = vcmp.gt.f32.partialorder %v18751_v31, 0.0 }
 0x321   : > { %v4552_v6 = vpop.f32.mrb[20].mxu0  ;;  %v4792_v54 = vmin.f32 %v18757_v15, 0.0  ;;  %v4839_v3 = vmul.f32 1.442695, %v4786_v51  ;;  %vm4755_vm13 = vcmp.gt.f32.partialorder %v18754_v22, 0.0  ;;  %vm4756_vm14 = vcmp.gt.f32.partialorder %v18757_v15, 0.0 }
 0x322   : > { %v4554_v16 = vpop.f32.mrb[21].mxu0  ;;  %16335 = vpow2.f32 %v4837_v55  ;;  %v4849_v11 = vmul.f32 1.442695, %v4791_v17  ;;  %v4657_v30 = vmul.f32 %v18629_v59, %v4552_v6 }
 0x323   : > { %v4556_v25 = vpop.f32.mrb[22].mxu0  ;;  %v4851_v58 = vmul.f32 1.442695, %v4792_v54  ;;  %v4658_v4 = vmul.f32 %v18634_v39, %v4554_v16  ;;  %16337 = vpow2.f32 %v4839_v3 }
 0x324   : > { %v16328_v32 = vpop.eup %16327  ;;  %v4663_v2 = vmul.f32 %v18629_v59, %v4556_v25  ;;  %v4558_v43 = vpop.f32.mrb[23].mxu0  ;;  %16339 = vpow2.f32 %v4849_v11  ;;  %v18786_v6 = vadd.f32 %v18651_v7, %v4657_v30  ;;  %v4980_v59 = vsel %vm4764_vm7, %v18641_v34, %v4944_v44 }
 0x325   : > { %v16330_v20 = vpop.eup %16329  ;;  %v12715_v21 = vadd.f32 -1.0, %v16328_v32  ;;  %v18789_v51 = vadd.f32 %v18665_v18, %v4658_v4  ;;  %16341 = vpow2.f32 %v4851_v58  ;;  %v4664_v11 = vmul.f32 %v18634_v39, %v4558_v43 }
 0x326   : > { %v12716_v36 = vadd.f32 -1.0, %v16330_v20  ;;  %v16332_v17 = vpop.eup %16331  ;;  %v18795_v54 = vadd.f32 %v18651_v7, %v4663_v2  ;;  %v4797_v20 = vmin.f32 %v18786_v6, 0.0  ;;  %v18808_v32 = vmul.f32 1.050701, %v4980_v59 }
 0x327   : > { %v4917_v16 = vmul.f32 1.6732632, %v12715_v21  ;;  %v12721_v3 = vadd.f32 -1.0, %v16332_v17  ;;  %v4798_v34 = vmin.f32 %v18789_v51, 0.0  ;;  %vm4761_vm15 = vcmp.gt.f32.partialorder %v18786_v6, 0.0 }
 0x328   : > { %v4918_v25 = vmul.f32 1.6732632, %v12716_v36  ;;  %v4861_v30 = vmul.f32 1.442695, %v4797_v20  ;;  %v4803_v43 = vmin.f32 %v18795_v54, 0.0  ;;  %vm4762_vm4 = vcmp.gt.f32.partialorder %v18789_v51, 0.0 }
 0x329   : > { %v4953_v4 = vsel %vm4737_vm1, %v18694_v0, %v4917_v16  ;;  %v16334_v21 = vpop.eup %16333  ;;  %v4923_v2 = vmul.f32 1.6732632, %v12721_v3  ;;  %v4863_v0 = vmul.f32 1.442695, %v4798_v34  ;;  %vm4767_vm6 = vcmp.gt.f32.partialorder %v18795_v54, 0.0 }
 0x32a   : > { %v4989_v44 = vmul.f32 1.050701, %v4953_v4  ;;  %v4954_v7 = vsel %vm4738_vm8, %v18701_v10, %v4918_v25  ;;  %v12722_v39 = vadd.f32 -1.0, %v16334_v21  ;;  %16343 = vpow2.f32 %v4861_v30 }
 0x32b   : > { %v18812_v36 = vmul.f32 1.050701, %v4954_v7  ;;  %v4959_v17 = vsel %vm4743_vm9, %v18704_v49, %v4923_v2  ;;  %v18819_v10 = vadd.f32 %v18665_v18, %v4664_v11  ;;  %16345 = vpow2.f32 %v4863_v0 }
 0x32c   : > { %v16336_v58 = vpop.eup %16335  ;;  %v18821_v59 = vmul.f32 1.050701, %v4959_v17  ;;  %v4924_v16 = vmul.f32 1.6732632, %v12722_v39  ;;  %v5070_v3 = vrot.slane %v4989_v44, 1  ;;  %v5197_v34 = vrot.slane %v4989_v44, 2 }
 0x32d   : > { %v12727_v25 = vadd.f32 -1.0, %v16336_v58  ;;  %v4873_v20 = vmul.f32 1.442695, %v4803_v43  ;;  %v4804_v4 = vmin.f32 %v18819_v10, 0.0  ;;  %v16338_v21 = vpop.eup %16337  ;;  %vm4768_vm7 = vcmp.gt.f32.partialorder %v18819_v10, 0.0 }
 0x32e   : > { %v5071_v49 = vrot.slane %v18821_v59, 1  ;;  %v4960_v18 = vsel %vm4744_vm10, %v18723_v48, %v4924_v16  ;;  %v5198_v7 = vrot.slane %v18821_v59, 2  ;;  %v16340_v2 = vpop.eup %16339  ;;  %v12728_v39 = vadd.f32 -1.0, %v16338_v21 }
 0x32f   : > { %v4929_v11 = vmul.f32 1.6732632, %v12727_v25  ;;  %v18830_v30 = vmul.f32 1.050701, %v4960_v18  ;;  %16347 = vpow2.f32 %v4873_v20  ;;  %v4875_v0 = vmul.f32 1.442695, %v4804_v4  ;;  %v16342_v43 = vpop.eup %16341 }
 0x330   : > { %v12733_v17 = vadd.f32 -1.0, %v16340_v2  ;;  %v5072_v27 = vsel %vm1763_vm3, %v5070_v3, %v5071_v49  ;;  %v5199_v55 = vsel %vm2921_vm5, %v5197_v34, %v5198_v7  ;;  %v4930_v16 = vmul.f32 1.6732632, %v12728_v39 }
 0x331   : > { %v4965_v58 = vsel %vm4749_vm11, %v18735_v50, %v4929_v11  ;;  %v12734_v25 = vadd.f32 -1.0, %v16342_v43  ;;  %16349 = vpow2.f32 %v4875_v0  ;;  %v5158_v20 = vmax.f32 %v4989_v44, %v5072_v27 }
 0x332   : > { %v18837_v48 = vmul.f32 1.050701, %v4965_v58  ;;  %v4935_v21 = vmul.f32 1.6732632, %v12733_v17  ;;  %v5073_v4 = vrot.slane %v18812_v36, 1  ;;  %v5074_v50 = vrot.slane %v18830_v30, 1 }
 0x333   : > { %v4966_v34 = vsel %vm4750_vm12, %v18751_v31, %v4930_v16  ;;  %v4936_v11 = vmul.f32 1.6732632, %v12734_v25  ;;  %v18853_v27 = vmax.f32 %v5158_v20, %v5199_v55  ;;  %vm5401_vm1 = vcmask 916480  }
 0x334   : > { %v5084_v18 = vrot.slane %v18837_v48, 1  ;;  %v5211_v3 = vrot.slane %v18837_v48, 2  ;;  %v18848_v2 = vmul.f32 1.050701, %v4966_v34  ;;  %v4971_v39 = vsel %vm4755_vm13, %v18754_v22, %v4935_v21  ;;  %v16344_v0 = vpop.eup %16343 }
 0x335   : > { %v5075_v44 = vsel %vm1763_vm3, %v5073_v4, %v5074_v50  ;;  %v5007_v43 = vmul.f32 1.050701, %v4971_v39  ;;  %v16346_v31 = vpop.eup %16345  ;;  %v4972_v25 = vsel %vm4756_vm14, %v18757_v15, %v4936_v11  ;;  %v12739_v22 = vadd.f32 -1.0, %v16344_v0 }
 0x336   : > { %v5085_v58 = vsel %vm1763_vm3, %v5071_v49, %v5084_v18  ;;  %v5212_v17 = vsel %vm2921_vm5, %v5198_v7, %v5211_v3  ;;  %v5086_v16 = vrot.slane %v18848_v2, 1  ;;  %v14748_v55 = vpack.i.bf16 %v18853_v27, %v18384_v19 }
 0x337   : > { %v5096_v21 = vrot.slane %v5007_v43, 1  ;;  %v5223_v20 = vrot.slane %v5007_v43, 2  ;;  %v12740_v4 = vadd.f32 -1.0, %v16346_v31  ;;  %v4941_v34 = vmul.f32 1.6732632, %v12739_v22 }
 0x338   : > { %14749 = vrot.lane.b32.xlu1 %v14748_v55, %s22204_s2  ;;  %v5164_v49 = vmax.f32 %v18821_v59, %v5085_v58  ;;  %v5159_v7 = vmax.f32 %v18812_v36, %v5075_v44  ;;  %v18869_v35 = vmul.f32 1.050701, %v4972_v25  ;;  %14739 = vrot.lane.b32.xlu0 %v14748_v55, %s22202_s1  ;;  %v5201_v55 = vrot.slane %v18830_v30, 2 }
 0x339   : > { %v16348_v39 = vpop.eup %16347  ;;  %v4942_v15 = vmul.f32 1.6732632, %v12740_v4  ;;  %v5097_v11 = vsel %vm1763_vm3, %v5084_v18, %v5096_v21  ;;  %v5224_v0 = vsel %vm2921_vm5, %v5211_v3, %v5223_v20  ;;  %v4977_v31 = vsel %vm4761_vm15, %v18786_v6, %v4941_v34 }
 0x33a   : > { %v12745_v22 = vadd.f32 -1.0, %v16348_v39  ;;  %v18877_v42 = vmax.f32 %v5164_v49, %v5212_v17  ;;  %v5170_v59 = vmax.f32 %v18837_v48, %v5097_v11  ;;  %v5013_v58 = vmul.f32 1.050701, %v4977_v31 }
 0x33b   : > { %v16350_v44 = vpop.eup %16349  ;;  %v4978_v25 = vsel %vm4762_vm4, %v18789_v51, %v4942_v15  ;;  %v5087_v18 = vsel %vm1763_vm3, %v5074_v50, %v5086_v16  ;;  %v5200_v6 = vrot.slane %v18812_v36, 2  ;;  %v5098_v48 = vrot.slane %v18869_v35, 1 }
 0x33c   : > { %v18885_v3 = vmul.f32 1.050701, %v4978_v25  ;;  %v4947_v4 = vmul.f32 1.6732632, %v12745_v22  ;;  %v12746_v13 = vadd.f32 -1.0, %v16350_v44  ;;  %14754 = vrot.lane.b32.xlu1 %v18506_v14, %s22204_s2  ;;  %v5108_v17 = vrot.slane %v5013_v58, 1  ;;  %14744 = vrot.lane.b32.xlu0 %v18506_v14, %s22202_s1 }
 0x33d   : > { %v5235_v34 = vrot.slane %v5013_v58, 2  ;;  %v18893_v51 = vmax.f32 %v5170_v59, %v5224_v0  ;;  %v14763_v39 = vpack.i.bf16 %v18440_v8, %v18877_v42  ;;  %v5202_v15 = vsel %vm2921_vm5, %v5200_v6, %v5201_v55 }
 0x33e   : > { %v4983_v50 = vsel %vm4767_vm6, %v18795_v54, %v4947_v4  ;;  %v4948_v49 = vmul.f32 1.6732632, %v12746_v13  ;;  %v5110_v36 = vrot.slane %v18885_v3, 1  ;;  %v5109_v31 = vsel %vm1763_vm3, %v5096_v21, %v5108_v17 }
 0x33f   : > { %v5019_v11 = vmul.f32 1.050701, %v4983_v50  ;;  %v5176_v0 = vmax.f32 %v5007_v43, %v5109_v31  ;;  %v5236_v13 = vsel %vm2921_vm5, %v5223_v20, %v5235_v34  ;;  %v18909_v54 = vmax.f32 %v5159_v7, %v5202_v15 }
 0x340   : > { %v4984_v14 = vsel %vm4768_vm7, %v18819_v10, %v4948_v49  ;;  %14759 = vrot.lane.b32.xlu1 %v18567_v28, %s22202_s1  ;;  %14764 = vrot.lane.b32.xlu0 %v14763_v39, %s22202_s1  ;;  %v5099_v25 = vsel %vm1763_vm3, %v5086_v16, %v5098_v48  ;;  %v5165_v4 = vmax.f32 %v18830_v30, %v5087_v18  ;;  %v5213_v6 = vrot.slane %v18848_v2, 2 }
 0x341   : > { %v5120_v22 = vrot.slane %v5019_v11, 1  ;;  %v5247_v59 = vrot.slane %v5019_v11, 2  ;;  %v5020_v44 = vmul.f32 1.050701, %v4984_v14  ;;  %v18913_v21 = vmax.f32 %v5176_v0, %v5236_v13 }
 0x342   : > { %v5171_v10 = vmax.f32 %v18848_v2, %v5099_v25  ;;  %v14778_v20 = vpack.i.bf16 %v18893_v51, %v18444_v62  ;;  %v5114_v49 = vrot.slane %v18808_v32, 1  ;;  %v5214_v30 = vsel %vm2921_vm5, %v5201_v55, %v5213_v6 }
 0x343   : > { %v5122_v43 = vrot.slane %v5020_v44, 1  ;;  %v5121_v7 = vsel %vm1763_vm3, %v5108_v17, %v5120_v22  ;;  %v5248_v50 = vsel %vm2921_vm5, %v5235_v34, %v5247_v59  ;;  %v5249_v15 = vrot.slane %v5020_v44, 2 }
 0x344   : > { %14769 = vrot.lane.b32.xlu1 %v14763_v39, %s22204_s2  ;;  %v5182_v16 = vmax.f32 %v5013_v58, %v5121_v7  ;;  %14779 = vrot.lane.b32.xlu0 %v14778_v20, %s22202_s1  ;;  %v5225_v2 = vrot.slane %v18869_v35, 2  ;;  %v5292_v18 = vmax.f32 %v5165_v4, %v5214_v30  ;;  %v5111_v11 = vsel %vm1763_vm3, %v5098_v48, %v5110_v36 }
 0x345   : > { %v5123_v31 = vsel %vm1763_vm3, %v5110_v36, %v5122_v43  ;;  %v5177_v34 = vmax.f32 %v18869_v35, %v5111_v11  ;;  %v5237_v39 = vrot.slane %v18885_v3, 2  ;;  %v22261_v55 = vrot.slane %v18618_v38, 1 }
 0x346   : > { %v18929_v17 = vmax.f32 %v5182_v16, %v5248_v50  ;;  %v5183_v14 = vmax.f32 %v18885_v3, %v5123_v31  ;;  %v5226_v58 = vsel %vm2921_vm5, %v5213_v6, %v5225_v2  ;;  %v22262_v48 = vrot.slane %v18683_v63, 1 }
 0x347   : > { %v5077_v0 = vsel %vm1763_vm3, %v22261_v55, %v5076_v29  ;;  %v22263_v36 = vrot.slane %v18624_v56, 1  ;;  %v14793_v35 = vpack.i.bf16 %v18448_v53, %v18913_v21  ;;  %v5298_v3 = vmax.f32 %v5171_v10, %v5226_v58 }
 0x348   : > { %14774 = vrot.lane.b32.xlu1 %v18567_v28, %s22204_s2  ;;  %v5238_v22 = vsel %vm2921_vm5, %v5225_v2, %v5237_v39  ;;  %14784 = vrot.lane.b32.xlu0 %v14778_v20, %s22204_s2  ;;  %v5250_v59 = vsel %vm2921_vm5, %v5237_v39, %v5249_v15  ;;  %v5160_v25 = vmax.f32 %v18618_v38, %v5077_v0  ;;  %v22264_v28 = vrot.slane %v18679_v23, 2 }
 0x349   : > { %v5079_v13 = vsel %vm1763_vm3, %v22263_v36, %v22262_v48  ;;  %v5304_v44 = vmax.f32 %v5177_v34, %v5238_v22  ;;  %v18954_v6 = vpack.i.bf16 %v5298_v3, %v5292_v18  ;;  %v5310_v43 = vmax.f32 %v5183_v14, %v5250_v59 }
 0x34a   : > { %v5161_v4 = vmax.f32 %v18624_v56, %v5079_v13  ;;  %v22265_v7 = vrot.slane %v18618_v38, 2  ;;  %v22266_v50 = vrot.slane %v18683_v63, 2  ;;  %v22267_v20 = vrot.slane %v18624_v56, 2 }
 0x34b   : > { %v22268_v30 = vrot.slane %v18686_v47, 1  ;;  %v22269_v18 = vrot.slane %v18691_v52, 1  ;;  %v22270_v38 = vmov %v22262_v48  ;;  %v18979_v31 = vpack.i.bf16 %v5310_v43, %v5304_v44 }
 0x34c   : > { %v5204_v10 = vsel %vm2921_vm5, %v22265_v7, %v22264_v28  ;;  %v5206_v15 = vsel %vm2921_vm5, %v22267_v20, %v22266_v50  ;;  %14794 = vrot.lane.b32.xlu1 %v14793_v35, %s22204_s2  ;;  %14789 = vrot.lane.b32.xlu0 %v14793_v35, %s22202_s1  ;;  %v22272_v39 = vmov %v22264_v28  ;;  %v22273_v55 = vrot.slane %v18691_v52, 2 }
 0x34d   : > { %v18966_v16 = vmax.f32 %v5160_v25, %v5204_v10  ;;  %v5089_v2 = vsel %vm1763_vm3, %v5076_v29, %v22268_v30  ;;  %v5091_v11 = vsel %vm1763_vm3, %v22270_v38, %v22269_v18  ;;  %v18981_v56 = vmax.f32 %v5161_v4, %v5206_v15  ;;  %v5733_v10 = vld [vmem:[%s22176_s5 + $0x3c0] sm:$0xff] }
 0x34e   : > { %v5166_v34 = vmax.f32 %v18679_v23, %v5089_v2  ;;  %v5167_v14 = vmax.f32 %v18683_v63, %v5091_v11  ;;  %v22271_v29 = vrot.slane %v18686_v47, 2  ;;  %v22274_v0 = vmov %v22266_v50  ;;  %v5736_v50 = vld [vmem:[%s22176_s5 + $0x3d8] sm:$0xff] }
 0x34f   : > { %v5218_v48 = vsel %vm2921_vm5, %v22274_v0, %v22273_v55  ;;  %v22275_v36 = vrot.slane %v18715_v41, 1  ;;  %v22276_v13 = vmov %v22268_v30  ;;  %v5241_v3 = vrot.slane %v18808_v32, 2 }
 0x350   : > { %v5216_v58 = vsel %vm2921_vm5, %v22272_v39, %v22271_v29  ;;  %v14798_v22 = vpack.i.bf16 %v18929_v17, %v18458_v12  ;;  %v22277_v59 = vrot.slane %v18730_v5, 1  ;;  %v22278_v44 = vmov %v22269_v18  ;;  %5393 = vrot.lane.b32.xlu1 %v18453_v46, %s22202_s1  ;;  %v5743_v39 = vld [vmem:[%s22176_s5 + $0x410] sm:$0xff] }
 0x351   : > { %v5101_v35 = vsel %vm1763_vm3, %v22276_v13, %v22275_v36  ;;  %v19004_v23 = vmax.f32 %v5166_v34, %v5216_v58  ;;  %v19011_v25 = vmax.f32 %v5167_v14, %v5218_v48  ;;  %v22279_v28 = vrot.slane %v18715_v41, 2 }
 0x352   : > { %v5103_v63 = vsel %vm1763_vm3, %v22278_v44, %v22277_v59  ;;  %v5172_v4 = vmax.f32 %v18686_v47, %v5101_v35  ;;  %v22280_v32 = vmov %v22271_v29  ;;  %v22281_v20 = vrot.slane %v18730_v5, 2  ;;  %14799 = vrot.lane.b32.xlu0 %v14798_v22, %s22202_s1  ;;  %v5749_v44 = vld [vmem:[%s22176_s5 + $0x440] sm:$0xff]  ;;  %s16478_s1 = smov [#allocation6]  }
 0x353   : > { %v5173_v43 = vmax.f32 %v18691_v52, %v5103_v63  ;;  %v5228_v7 = vsel %vm2921_vm5, %v22280_v32, %v22279_v28  ;;  %v22282_v15 = vmov %v22273_v55  ;;  %v22283_v47 = vrot.slane %v18771_v9, 1  ;;  %v5740_v52 = vld [vmem:[%s22176_s5 + $0x3f8] sm:$0xff]  ;;  %s16403_s26 = sshll.u32 %s16478_s1, 4  ;;  %s16404_s26 = int_to_ptr.vmem [resolvable:$false] %s16403_s26 }
 0x354   : > { %v5230_v30 = vsel %vm2921_vm5, %v22282_v15, %v22281_v20  ;;  %v22284_v2 = vmov %v22275_v36  ;;  %v22285_v38 = vmov %v22277_v59  ;;  %v22286_v34 = vrot.slane %v18771_v9, 2  ;;  %v5739_v9 = vld [vmem:[%s22176_s5 + $0x3f0] sm:$0xff]  ;;  %v5746_v59 = vld [vmem:[%s22176_s5 + $0x428] sm:$0xff]  ;;  %5529 = vrot.lane.b32.xlu1 %v18453_v46, %s22204_s2  ;;  %v5620_v15 = vld [vmem:[%s22176_s5 + $0x38] sm:$0xff]  ;;  %s16405_s20 = scalar_lea.vmem %s16404_s26, 32 }
 0x355   : > { %v5113_v18 = vsel %vm1763_vm3, %v22284_v2, %v22283_v47  ;;  %v5115_v11 = vsel %vm1763_vm3, %v22285_v38, %v5114_v49  ;;  %v22287_v14 = vmov %v22279_v28  ;;  %v19053_v58 = vmax.f32 %v5172_v4, %v5228_v7  ;;  %v5742_v49 = vld [vmem:[%s22176_s5 + $0x408] sm:$0xff]  ;;  %v5617_v7 = vld [vmem:[%s22176_s5 + $0x20] sm:$0xff]  ;;  %v5619_v38 = vld [vmem:[%s22176_s5 + $0x30] sm:$0xff] }
 0x356   : > { %v5240_v29 = vsel %vm2921_vm5, %v22287_v14, %v22286_v34  ;;  %v19055_v55 = vmax.f32 %v5173_v43, %v5230_v30  ;;  %v5178_v0 = vmax.f32 %v18715_v41, %v5113_v18  ;;  %v5179_v48 = vmax.f32 %v18730_v5, %v5115_v11  ;;  %v5748_v43 = vld [vmem:[%s22176_s5 + $0x438] sm:$0xff]  ;;  %v5614_v28 = vld [vmem:[%s22176_s5 + $0x8] sm:$0xff]  ;;  %14804 = vrot.lane.b32.xlu0 %v14798_v22, %s22204_s2  ;;  %v5755_v22 = vld [vmem:[%s22176_s5 + $0x470] sm:$0xff]  ;;  %s22290_s2 = smov 112  }
 0x357   : > { %v22288_v36 = vmov %v22281_v20  ;;  %v14051_v35 = vpack.c.bf16 %v5736_v50, %v5733_v10  ;;  %v14053_v63 = vpack.c.bf16 %v5743_v39, %v5740_v52  ;;  %v14055_v5 = vpack.c.bf16 %v5742_v49, %v5739_v9  ;;  %v5613_v10 = vld [vmem:[%s22176_s5] sm:$0xff]  ;;  %v5616_v50 = vld [vmem:[%s22176_s5 + $0x18] sm:$0xff]  ;;  %v5623_v30 = vld [vmem:[%s22176_s5 + $0x50] sm:$0xff] }
 0x358   : > { %v5242_v13 = vsel %vm2921_vm5, %v22288_v36, %v5241_v3  ;;  %v19076_v41 = vmax.f32 %v5178_v0, %v5240_v29  ;;  %v5745_v3 = vld [vmem:[%s22176_s5 + $0x420] sm:$0xff]  ;;  %v14057_v32 = vpack.c.bf16 %v5749_v44, %v5746_v59  ;;  %v5752_v20 = vld [vmem:[%s22176_s5 + $0x458] sm:$0xff]  ;;  %5487 = vrot.lane.b32.xlu1 %v18909_v54, %s22289_s23  ;;  %v13969_v2 = vpack.c.bf16 %v5617_v7, %v5614_v28  ;;  %v5622_v11 = vld [vmem:[%s22176_s5 + $0x48] sm:$0xff] }
 0x359   : > { %v19078_v4 = vmax.f32 %v5179_v48, %v5242_v13  ;;  %14052 = vmatpush1.bf16.msra.mxu1 %v14051_v35  ;;  %v14059_v47 = vpack.c.bf16 %v5748_v43, %v5745_v3  ;;  %v13971_v18 = vpack.c.bf16 %v5616_v50, %v5613_v10  ;;  %v14061_v34 = vpack.c.bf16 %v5755_v22, %v5752_v20  ;;  %v5751_v14 = vld [vmem:[%s22176_s5 + $0x450] sm:$0xff]  ;;  %v5754_v29 = vld [vmem:[%s22176_s5 + $0x468] sm:$0xff]  ;;  %v5761_v39 = vld [vmem:[%s22176_s5 + $0x4a0] sm:$0xff] }
 0x35a   : > { %14054 = vmatprep.subr.bf16.mxu1 %v14053_v63  ;;  %5351 = vrot.lane.b32.xlu0 %v18909_v54, %s22290_s2  ;;  %v5758_v52 = vld [vmem:[%s22176_s5 + $0x488] sm:$0xff]  ;;  %v13973_v54 = vpack.c.bf16 %v5623_v30, %v5620_v15  ;;  %v13975_v9 = vpack.c.bf16 %v5622_v11, %v5619_v38  ;;  %v5629_v0 = vld [vmem:[%s22176_s5 + $0x80] sm:$0xff]  ;;  %v14063_v48 = vpack.c.bf16 %v5754_v29, %v5751_v14  ;;  %v5628_v13 = vld [vmem:[%s22176_s5 + $0x78] sm:$0xff]  ;;  %vm5537_vm8 = vcmask 785408  }
 0x35b   : > { %13970 = vmatprep.subr.bf16.mxu0 %v13969_v2  ;;  %v5626_v49 = vld [vmem:[%s22176_s5 + $0x68] sm:$0xff]  ;;  %v5625_v36 = vld [vmem:[%s22176_s5 + $0x60] sm:$0xff]  ;;  %v14065_v35 = vpack.c.bf16 %v5761_v39, %v5758_v52  ;;  %v5760_v44 = vld [vmem:[%s22176_s5 + $0x498] sm:$0xff]  ;;  %v14833_v15 = vpack.i.bf16 %v18762_v37, %v18769_v60  ;;  %vm16474_vm9 = vmmov 0   ;;  %vm6411_vm10 = vcmask 326656  }
 0x35c   : > { %13972 = vmatpush1.bf16.msra.mxu0 %v13971_v18  ;;  %14814 = vrot.lane.b32.xlu1 %v18954_v6, %s22289_s23  ;;  %v5757_v59 = vld [vmem:[%s22176_s5 + $0x480] sm:$0xff]  ;;  %v5764_v63 = vld [vmem:[%s22176_s5 + $0x4b8] sm:$0xff]  ;;  %v13979_v3 = vpack.c.bf16 %v5628_v13, %v5625_v36  ;;  %v5635_v28 = vld [vmem:[%s22176_s5 + $0xb0] sm:$0xff]  ;;  %vm7189_vm11 = vcmask 523264  }
 0x35d   : > { %14056 = vmatpush1.bf16.msra.mxu1 %v14055_v5  ;;  %v5767_v5 = vld [vmem:[%s22176_s5 + $0x4d0] sm:$0xff]  ;;  %13974 = vmatprep.subr.bf16.mxu0 %v13973_v54  ;;  %v5632_v43 = vld [vmem:[%s22176_s5 + $0x98] sm:$0xff]  ;;  %v5634_v10 = vld [vmem:[%s22176_s5 + $0xa8] sm:$0xff]  ;;  %v14843_v54 = vpack.i.bf16 %v18966_v16, %v18981_v56 }
 0x35e   : > { %14058 = vmatprep.subr.bf16.mxu1 %v14057_v32  ;;  %14809 = vrot.lane.b32.xlu0 %v18954_v6, %s22290_s2  ;;  %v13977_v6 = vpack.c.bf16 %v5629_v0, %v5626_v49  ;;  %v14067_v32 = vpack.c.bf16 %v5760_v44, %v5757_v59  ;;  %v5631_v7 = vld [vmem:[%s22176_s5 + $0x90] sm:$0xff]  ;;  %v14069_v50 = vpack.c.bf16 %v5767_v5, %v5764_v63  ;;  %v5766_v22 = vld [vmem:[%s22176_s5 + $0x4c8] sm:$0xff]  ;;  %v5641_v38 = vld [vmem:[%s22176_s5 + $0xe0] sm:$0xff] }
 0x35f   : > { %v5763_v20 = vld [vmem:[%s22176_s5 + $0x4b0] sm:$0xff]  ;;  %v5770_v30 = vld [vmem:[%s22176_s5 + $0x4e8] sm:$0xff]  ;;  %v13983_v2 = vpack.c.bf16 %v5634_v10, %v5631_v7  ;;  %v5640_v14 = vld [vmem:[%s22176_s5 + $0xd8] sm:$0xff] }
 0x360   : > { %13976 = vmatpush1.bf16.msra.mxu0 %v13975_v9  ;;  %14824 = vrot.lane.b32.xlu1 %v18979_v31, %s22289_s23  ;;  %v5638_v18 = vld [vmem:[%s22176_s5 + $0xc8] sm:$0xff]  ;;  %v14071_v11 = vpack.c.bf16 %v5766_v22, %v5763_v20  ;;  %v5769_v52 = vld [vmem:[%s22176_s5 + $0x4e0] sm:$0xff]  ;;  %v5772_v39 = vld [vmem:[%s22176_s5 + $0x4f8] sm:$0xff] }
 0x361   : > { %14060 = vmatpush1.bf16.msra.mxu1 %v14059_v47  ;;  %13978 = vmatprep.subr.bf16.mxu0 %v13977_v6  ;;  %v13981_v47 = vpack.c.bf16 %v5635_v28, %v5632_v43  ;;  %v5776_v9 = vld [vmem:[%s22176_s5 + $0x518] sm:$0xff]  ;;  %v5779_v49 = vld [vmem:[%s22176_s5 + $0x530] sm:$0xff]  ;;  %v13985_v0 = vpack.c.bf16 %v5641_v38, %v5638_v18  ;;  %v5646_v44 = vld [vmem:[%s22176_s5 + $0x108] sm:$0xff] }
 0x362   : > { %14062 = vmatprep.subr.bf16.mxu1 %v14061_v34  ;;  %14819 = vrot.lane.b32.xlu0 %v18979_v31, %s22290_s2  ;;  %v5773_v31 = vld [vmem:[%s22176_s5 + $0x500] sm:$0xff]  ;;  %v5644_v36 = vld [vmem:[%s22176_s5 + $0xf8] sm:$0xff]  ;;  %v5647_v13 = vld [vmem:[%s22176_s5 + $0x110] sm:$0xff]  ;;  %v14077_v63 = vpack.c.bf16 %v5779_v49, %v5776_v9 }
 0x363   : > { %v5637_v34 = vld [vmem:[%s22176_s5 + $0xc0] sm:$0xff]  ;;  %v14073_v29 = vpack.c.bf16 %v5773_v31, %v5770_v30  ;;  %v5643_v59 = vld [vmem:[%s22176_s5 + $0xf0] sm:$0xff]  ;;  %v5778_v6 = vld [vmem:[%s22176_s5 + $0x528] sm:$0xff] }
 0x364   : > { %13980 = vmatpush1.bf16.msra.mxu0 %v13979_v3  ;;  %14834 = vrot.lane.b32.xlu1 %v14833_v15, %s22289_s23  ;;  %v5775_v5 = vld [vmem:[%s22176_s5 + $0x510] sm:$0xff]  ;;  %v14853_v3 = vpack.i.bf16 %v19004_v23, %v19011_v25  ;;  %v5782_v43 = vld [vmem:[%s22176_s5 + $0x548] sm:$0xff]  ;;  %v5785_v28 = vld [vmem:[%s22176_s5 + $0x560] sm:$0xff]  ;;  %v13991_v7 = vpack.c.bf16 %v5646_v44, %v5643_v59 }
 0x365   : > { %14064 = vmatpush1.bf16.msra.mxu1 %v14063_v48  ;;  %13982 = vmatprep.subr.bf16.mxu0 %v13981_v47  ;;  %v13987_v48 = vpack.c.bf16 %v5640_v14, %v5637_v34  ;;  %v5650_v10 = vld [vmem:[%s22176_s5 + $0x128] sm:$0xff]  ;;  %v14079_v20 = vpack.c.bf16 %v5778_v6, %v5775_v5  ;;  %v5649_v22 = vld [vmem:[%s22176_s5 + $0x120] sm:$0xff]  ;;  %v14081_v30 = vpack.c.bf16 %v5785_v28, %v5782_v43  ;;  %v5784_v47 = vld [vmem:[%s22176_s5 + $0x558] sm:$0xff] }
 0x366   : > { %14066 = vmatprep.subr.bf16.mxu1 %v14065_v35  ;;  %14829 = vrot.lane.b32.xlu0 %v14833_v15, %s22290_s2  ;;  %v14075_v35 = vpack.c.bf16 %v5772_v39, %v5769_v52  ;;  %v5652_v15 = vld [vmem:[%s22176_s5 + $0x138] sm:$0xff]  ;;  %v5781_v31 = vld [vmem:[%s22176_s5 + $0x540] sm:$0xff]  ;;  %v5791_v38 = vld [vmem:[%s22176_s5 + $0x590] sm:$0xff] }
 0x367   : > { %v5788_v18 = vld [vmem:[%s22176_s5 + $0x578] sm:$0xff]  ;;  %v13995_v34 = vpack.c.bf16 %v5652_v15, %v5649_v22  ;;  %v14083_v52 = vpack.c.bf16 %v5784_v47, %v5781_v31  ;;  %v5787_v39 = vld [vmem:[%s22176_s5 + $0x570] sm:$0xff]  ;;  %v5658_v9 = vld [vmem:[%s22176_s5 + $0x168] sm:$0xff] }
 0x368   : > { %13984 = vmatpush1.bf16.msra.mxu0 %v13983_v2  ;;  %14844 = vrot.lane.b32.xlu1 %v14843_v54, %s22289_s23  ;;  %v14863_v2 = vpack.i.bf16 %v19053_v58, %v19055_v55  ;;  %v5656_v14 = vld [vmem:[%s22176_s5 + $0x158] sm:$0xff]  ;;  %v14085_v49 = vpack.c.bf16 %v5791_v38, %v5788_v18  ;;  %v5797_v59 = vld [vmem:[%s22176_s5 + $0x5c0] sm:$0xff]  ;;  %v5803_v22 = vld [vmem:[%s22176_s5 + $0x5f0] sm:$0xff] }
 0x369   : > { %14068 = vmatpush1.bf16.msra.mxu1 %v14067_v32  ;;  %13986 = vmatprep.subr.bf16.mxu0 %v13985_v0  ;;  %v13989_v32 = vpack.c.bf16 %v5647_v13, %v5644_v36  ;;  %v5790_v0 = vld [vmem:[%s22176_s5 + $0x588] sm:$0xff]  ;;  %v5665_v36 = vld [vmem:[%s22176_s5 + $0x1a0] sm:$0xff]  ;;  %v14873_v13 = vpack.i.bf16 %v19076_v41, %v19078_v4  ;;  %v5664_v28 = vld [vmem:[%s22176_s5 + $0x198] sm:$0xff] }
 0x36a   : > { %14070 = vmatprep.subr.bf16.mxu1 %v14069_v50  ;;  %14839 = vrot.lane.b32.xlu0 %v14843_v54, %s22290_s2  ;;  %v5653_v50 = vld [vmem:[%s22176_s5 + $0x140] sm:$0xff]  ;;  %v5655_v54 = vld [vmem:[%s22176_s5 + $0x150] sm:$0xff]  ;;  %v14087_v5 = vpack.c.bf16 %v5790_v0, %v5787_v39  ;;  %v5670_v18 = vld [vmem:[%s22176_s5 + $0x1c8] sm:$0xff] }
 0x36b   : > { %v5793_v6 = vld [vmem:[%s22176_s5 + $0x5a0] sm:$0xff]  ;;  %v5799_v31 = vld [vmem:[%s22176_s5 + $0x5d0] sm:$0xff]  ;;  %v5676_v0 = vld [vmem:[%s22176_s5 + $0x1f8] sm:$0xff] }
 0x36c   : > { %13988 = vmatpush1.bf16.msra.mxu0 %v13987_v48  ;;  %14854 = vrot.lane.b32.xlu1 %v14853_v3, %s22289_s23  ;;  %v5662_v48 = vld [vmem:[%s22176_s5 + $0x188] sm:$0xff]  ;;  %v5661_v43 = vld [vmem:[%s22176_s5 + $0x180] sm:$0xff] }
 0x36d   : > { %14072 = vmatpush1.bf16.msra.mxu1 %v14071_v11  ;;  %13990 = vmatprep.subr.bf16.mxu0 %v13989_v32  ;;  %v13993_v11 = vpack.c.bf16 %v5653_v50, %v5650_v10  ;;  %v5668_v10 = vld [vmem:[%s22176_s5 + $0x1b8] sm:$0xff]  ;;  %v5671_v50 = vld [vmem:[%s22176_s5 + $0x1d0] sm:$0xff]  ;;  %v14003_v15 = vpack.c.bf16 %v5664_v28, %v5661_v43  ;;  %v5685_v28 = vld [vmem:[%s22176_s5 + $0x240] sm:$0xff] }
 0x36e   : > { %14074 = vmatprep.subr.bf16.mxu1 %v14073_v29  ;;  %14849 = vrot.lane.b32.xlu0 %v14853_v3, %s22290_s2  ;;  %v5659_v29 = vld [vmem:[%s22176_s5 + $0x170] sm:$0xff]  ;;  %v14001_v3 = vpack.c.bf16 %v5665_v36, %v5662_v48  ;;  %v14005_v47 = vpack.c.bf16 %v5671_v50, %v5668_v10  ;;  %v5680_v36 = vld [vmem:[%s22176_s5 + $0x218] sm:$0xff] }
 0x36f   : > { %v13997_v44 = vpack.c.bf16 %v5659_v29, %v5656_v14  ;;  %v5677_v14 = vld [vmem:[%s22176_s5 + $0x200] sm:$0xff]  ;;  %v5806_v29 = vld [vmem:[%s22176_s5 + $0x608] sm:$0xff]  ;;  %v5695_v10 = vld [vmem:[%s22176_s5 + $0x290] sm:$0xff] }
 0x370   : > { %13992 = vmatpush1.bf16.msra.mxu0 %v13991_v7  ;;  %14864 = vrot.lane.b32.xlu1 %v14863_v2, %s22289_s23  ;;  %v5796_v7 = vld [vmem:[%s22176_s5 + $0x5b8] sm:$0xff] }
 0x371   : > { %14076 = vmatpush1.bf16.msra.mxu1 %v14075_v35  ;;  %v5794_v35 = vld [vmem:[%s22176_s5 + $0x5a8] sm:$0xff]  ;;  %13994 = vmatprep.subr.bf16.mxu0 %v13993_v11 }
 0x372   : > { %14078 = vmatprep.subr.bf16.mxu1 %v14077_v63  ;;  %14859 = vrot.lane.b32.xlu0 %v14863_v2, %s22290_s2  ;;  %v13999_v63 = vpack.c.bf16 %v5658_v9, %v5655_v54  ;;  %v14089_v32 = vpack.c.bf16 %v5797_v59, %v5794_v35  ;;  %v5667_v2 = vld [vmem:[%s22176_s5 + $0x1b0] sm:$0xff]  ;;  %v5802_v11 = vld [vmem:[%s22176_s5 + $0x5e8] sm:$0xff] }
 0x373   : > { %v14007_v39 = vpack.c.bf16 %v5670_v18, %v5667_v2  ;;  %v14095_v54 = vpack.c.bf16 %v5802_v11, %v5799_v31  ;;  %v5701_v31 = vld [vmem:[%s22176_s5 + $0x2c0] sm:$0xff]  ;;  %v5704_v11 = vld [vmem:[%s22176_s5 + $0x2d8] sm:$0xff] }
 0x374   : > { %13996 = vmatpush1.bf16.msra.mxu0 %v13995_v34  ;;  %14874 = vrot.lane.b32.xlu1 %v14873_v13, %s22289_s23  ;;  %v5674_v34 = vld [vmem:[%s22176_s5 + $0x1e8] sm:$0xff]  ;;  %v5697_v18 = vld [vmem:[%s22176_s5 + $0x2a0] sm:$0xff] }
 0x375   : > { %14080 = vmatpush1.bf16.msra.mxu1 %v14079_v20  ;;  %v5800_v20 = vld [vmem:[%s22176_s5 + $0x5d8] sm:$0xff]  ;;  %13998 = vmatprep.subr.bf16.mxu0 %v13997_v44  ;;  %v14009_v9 = vpack.c.bf16 %v5677_v14, %v5674_v34  ;;  %v5679_v44 = vld [vmem:[%s22176_s5 + $0x210] sm:$0xff] }
 0x376   : > { %14082 = vmatprep.subr.bf16.mxu1 %v14081_v30  ;;  %14869 = vrot.lane.b32.xlu0 %v14873_v13, %s22290_s2  ;;  %v14091_v30 = vpack.c.bf16 %v5796_v7, %v5793_v6  ;;  %v14093_v38 = vpack.c.bf16 %v5803_v22, %v5800_v20  ;;  %v5683_v13 = vld [vmem:[%s22176_s5 + $0x230] sm:$0xff]  ;;  %v5689_v6 = vld [vmem:[%s22176_s5 + $0x260] sm:$0xff]  ;;  %v5692_v7 = vld [vmem:[%s22176_s5 + $0x278] sm:$0xff] }
 0x377   : > { %v14013_v59 = vpack.c.bf16 %v5683_v13, %v5680_v36  ;;  %v14021_v20 = vpack.c.bf16 %v5695_v10, %v5692_v7  ;;  %v5691_v22 = vld [vmem:[%s22176_s5 + $0x270] sm:$0xff]  ;;  %v5812_v10 = vld [vmem:[%s22176_s5 + $0x638] sm:$0xff] }
 0x378   : > { %14000 = vmatpush1.bf16.msra.mxu0 %v13999_v63  ;;  %v5682_v63 = vld [vmem:[%s22176_s5 + $0x228] sm:$0xff]  ;;  %v5707_v34 = vld [vmem:[%s22176_s5 + $0x2f0] sm:$0xff] }
 0x379   : > { %14084 = vmatpush1.bf16.msra.mxu1 %v14083_v52  ;;  %14002 = vmatprep.subr.bf16.mxu0 %v14001_v3  ;;  %v5809_v52 = vld [vmem:[%s22176_s5 + $0x620] sm:$0xff]  ;;  %v14015_v3 = vpack.c.bf16 %v5682_v63, %v5679_v44 }
 0x37a   : > { %14086 = vmatprep.subr.bf16.mxu1 %v14085_v49  ;;  %v5673_v49 = vld [vmem:[%s22176_s5 + $0x1e0] sm:$0xff]  ;;  %v14097_v48 = vpack.c.bf16 %v5809_v52, %v5806_v29  ;;  %v14029_v29 = vpack.c.bf16 %v5707_v34, %v5704_v11  ;;  %v5703_v52 = vld [vmem:[%s22176_s5 + $0x2d0] sm:$0xff] }
 0x37b   : > { %v14011_v35 = vpack.c.bf16 %v5676_v0, %v5673_v49 }
 0x37c   : > { %14004 = vmatpush1.bf16.msra.mxu0 %v14003_v15  ;;  %v5694_v15 = vld [vmem:[%s22176_s5 + $0x288] sm:$0xff] }
 0x37d   : > { %14088 = vmatpush1.bf16.msra.mxu1 %v14087_v5  ;;  %14006 = vmatprep.subr.bf16.mxu0 %v14005_v47  ;;  %v5686_v5 = vld [vmem:[%s22176_s5 + $0x248] sm:$0xff]  ;;  %v14023_v47 = vpack.c.bf16 %v5694_v15, %v5691_v22 }
 0x37e   : > { %14090 = vmatprep.subr.bf16.mxu1 %v14089_v32  ;;  %v14017_v43 = vpack.c.bf16 %v5689_v6, %v5686_v5  ;;  %v5688_v32 = vld [vmem:[%s22176_s5 + $0x258] sm:$0xff] }
 0x37f   : > { %v14019_v50 = vpack.c.bf16 %v5688_v32, %v5685_v28  ;;  %v5808_v28 = vld [vmem:[%s22176_s5 + $0x618] sm:$0xff] }
 0x380   : > { %14008 = vmatpush1.bf16.msra.mxu0 %v14007_v39  ;;  %v5706_v39 = vld [vmem:[%s22176_s5 + $0x2e8] sm:$0xff] }
 0x381   : > { %14092 = vmatpush1.bf16.msra.mxu1 %v14091_v30  ;;  %14010 = vmatprep.subr.bf16.mxu0 %v14009_v9  ;;  %v5698_v30 = vld [vmem:[%s22176_s5 + $0x2a8] sm:$0xff] }
 0x382   : > { %14094 = vmatprep.subr.bf16.mxu1 %v14093_v38  ;;  %v14025_v2 = vpack.c.bf16 %v5701_v31, %v5698_v30  ;;  %v5700_v38 = vld [vmem:[%s22176_s5 + $0x2b8] sm:$0xff]  ;;  %v5811_v30 = vld [vmem:[%s22176_s5 + $0x630] sm:$0xff]  ;;  %v5814_v31 = vld [vmem:[%s22176_s5 + $0x648] sm:$0xff] }
 0x383   : > { %v14027_v14 = vpack.c.bf16 %v5700_v38, %v5697_v18 }
 0x384   : > { %14012 = vmatpush1.bf16.msra.mxu0 %v14011_v35 }
 0x385   : > { %14096 = vmatpush1.bf16.msra.mxu1 %v14095_v54  ;;  %14014 = vmatprep.subr.bf16.mxu0 %v14013_v59  ;;  %v14031_v54 = vpack.c.bf16 %v5706_v39, %v5703_v52  ;;  %v14103_v52 = vpack.c.bf16 %v5814_v31, %v5811_v30  ;;  %v5818_v39 = vld [vmem:[%s22176_s5 + $0x668] sm:$0xff] }
 0x386   : > { %14098 = vmatprep.subr.bf16.mxu1 %v14097_v48 }
 0x388   : > { %14016 = vmatpush1.bf16.msra.mxu0 %v14015_v3 }
 0x389   : > { %14018 = vmatprep.subr.bf16.mxu0 %v14017_v43  ;;  %v5805_v43 = vld [vmem:[%s22176_s5 + $0x600] sm:$0xff] }
 0x38a   : > { %v14099_v15 = vpack.c.bf16 %v5808_v28, %v5805_v43 }
 0x38c   : > { %14020 = vmatpush1.bf16.msra.mxu0 %v14019_v50  ;;  %v5815_v50 = vld [vmem:[%s22176_s5 + $0x650] sm:$0xff] }
 0x38d   : > { %14022 = vmatprep.subr.bf16.mxu0 %v14021_v20  ;;  %v14101_v11 = vpack.c.bf16 %v5815_v50, %v5812_v10 }
 0x390   : > { %14024 = vmatpush1.bf16.msra.mxu0 %v14023_v47 }
 0x391   : > { %14026 = vmatprep.subr.bf16.mxu0 %v14025_v2 }
 0x394   : > { %14028 = vmatpush1.bf16.msra.mxu0 %v14027_v14 }
 0x395   : > { %14030 = vmatprep.subr.bf16.mxu0 %v14029_v29 }
 0x398   : > { %14032 = vmatpush1.bf16.msra.mxu0 %v14031_v54  ;;  %v5821_v54 = vld [vmem:[%s22176_s5 + $0x680] sm:$0xff] }
 0x399   : > { %v14105_v30 = vpack.c.bf16 %v5821_v54, %v5818_v39 }
 0x3aa   : > { %v19425_v9 = vpop.permute.xlu1 %14749  ;;  %v19427_v49 = vpop.permute.xlu0 %14739 }
 0x3ab   : > { %v22216_v0 = vunpack.i.h.bf16 %v19425_v9  ;;  %v14751_v48 = vunpack.i.l.bf16 %v19425_v9  ;;  %v14742_v36 = vunpack.i.h.bf16 %v19427_v49  ;;  %v14741_v13 = vunpack.i.l.bf16 %v19427_v49  ;;  %v5615_v49 = vld [vmem:[%s22176_s5 + $0x10] sm:$0xff] }
 0x3ad   : > { %v5405_v35 = vsel %vm5401_vm1, %v14741_v13, %v14742_v36  ;;  %v5541_v3 = vsel %vm5537_vm8, %v14751_v48, %v22216_v0 }
 0x3ae   : > { %v19436_v59 = vpop.permute.xlu1 %14754  ;;  %v19438_v44 = vpop.permute.xlu0 %14744  ;;  %v5455_v63 = vmax.f32 %v18384_v19, %v5405_v35 }
 0x3af   : > { %v22210_v5 = vunpack.i.l.bf16 %v19436_v59  ;;  %v22211_v6 = vunpack.i.l.bf16 %v19438_v44  ;;  %v14747_v2 = vunpack.i.h.bf16 %v19438_v44 }
 0x3b0   : > { %v19452_v32 = vmax.f32 %v5455_v63, %v5541_v3 }
 0x3b1   : > { %v5404_v19 = vsel %vm5401_vm1, %v22211_v6, %v14741_v13  ;;  %v5540_v47 = vsel %vm5537_vm8, %v22210_v5, %v14751_v48  ;;  %v14757_v48 = vunpack.i.h.bf16 %v19436_v59  ;;  %v5829_v6 = vld [vmem:[%s22176_s5 + $0x6c0] sm:$0xff] }
 0x3b2   : > { %v19457_v7 = vpop.permute.xlu1 %14759  ;;  %v5454_v20 = vmax.f32 %v18409_v45, %v5404_v19  ;;  %6012 = vmatprep.mubr.f32.mxu1 %v19452_v32  ;;  %v19467_v22 = vpop.permute.xlu0 %14764 }
 0x3b3   : > { %v22208_v45 = vunpack.i.h.bf16 %v19467_v22  ;;  %v22217_v18 = vunpack.i.l.bf16 %v19467_v22  ;;  %v22206_v13 = vunpack.i.l.bf16 %v19457_v7 }
 0x3b4   : > { %v19481_v38 = vmax.f32 %v5454_v20, %v5540_v47 }
 0x3b5   : > { %v5409_v34 = vsel %vm5401_vm1, %v22208_v45, %v14747_v2  ;;  %v5410_v14 = vsel %vm5401_vm1, %v14747_v2, %v22217_v18  ;;  %v5830_v45 = vld [vmem:[%s22176_s5 + $0x6c8] sm:$0xff] }
 0x3b6   : > { %v19489_v29 = vpop.permute.xlu1 %14769  ;;  %6013 = vmatmul.mubr.f32.vlgmr.msra.gmra.mrb[12].mxu1 %v19481_v38  ;;  %v19502_v3 = vpop.permute.xlu0 %14779  ;;  %v5460_v19 = vmax.f32 %v18411_v33, %v5410_v14  ;;  %v5459_v10 = vmax.f32 %v18440_v8, %v5409_v34  ;;  %v5820_v33 = vld [vmem:[%s22176_s5 + $0x678] sm:$0xff]  ;;  %v5827_v14 = vld [vmem:[%s22176_s5 + $0x6b0] sm:$0xff] }
 0x3b7   : > { %v22207_v35 = vunpack.i.h.bf16 %v19489_v29  ;;  %v22215_v63 = vunpack.i.l.bf16 %v19489_v29  ;;  %14100 = vmatpush1.bf16.msra.mxu1 %v14099_v15  ;;  %v22224_v43 = vunpack.i.h.bf16 %v19502_v3  ;;  %v14781_v28 = vunpack.i.l.bf16 %v19502_v3  ;;  %v5817_v15 = vld [vmem:[%s22176_s5 + $0x660] sm:$0xff]  ;;  %v5824_v34 = vld [vmem:[%s22176_s5 + $0x698] sm:$0xff] }
 0x3b8   : > { %14102 = vmatprep.subr.bf16.mxu1 %v14101_v11  ;;  %v22296_v1 = vunpack.i.h.bf16 %v19502_v3 }
 0x3b9   : > { %v5546_v50 = vsel %vm5537_vm8, %v14757_v48, %v22215_v63  ;;  %v5545_v20 = vsel %vm5537_vm8, %v22207_v35, %v14757_v48  ;;  %v5414_v8 = vsel %vm5401_vm1, %v22206_v13, %v14781_v28  ;;  %v5415_v31 = vsel %vm5401_vm1, %v14781_v28, %v22224_v43 }
 0x3ba   : > { %v19526_v47 = vpop.permute.xlu1 %14774  ;;  %v19528_v2 = vmax.f32 %v5460_v19, %v5546_v50  ;;  %v19530_v11 = vmax.f32 %v5459_v10, %v5545_v20  ;;  %v19539_v54 = vpop.permute.xlu0 %14784  ;;  %v14107_v19 = vpack.c.bf16 %v5820_v33, %v5817_v15  ;;  %v5823_v10 = vld [vmem:[%s22176_s5 + $0x690] sm:$0xff]  ;;  %v5826_v50 = vld [vmem:[%s22176_s5 + $0x6a8] sm:$0xff]  ;;  %v5464_v20 = vmax.f32 %v18429_v26, %v5414_v8 }
 0x3bb   : > { %v22209_v39 = vunpack.i.l.bf16 %v19526_v47  ;;  %14104 = vmatpush1.bf16.msra.mxu1 %v14103_v52  ;;  %v22213_v48 = vunpack.i.h.bf16 %v19539_v54  ;;  %v14786_v28 = vunpack.i.l.bf16 %v19539_v54  ;;  %v5465_v52 = vmax.f32 %v18444_v62, %v5415_v31  ;;  %v5833_v62 = vld [vmem:[%s22176_s5 + $0x6e0] sm:$0xff] }
 0x3bc   : > { %6018 = vmatprep.mubr.f32.mxu1 %v19528_v2  ;;  %14106 = vmatprep.subr.bf16.mxu1 %v14105_v30  ;;  %v14109_v13 = vpack.c.bf16 %v5827_v14, %v5824_v34  ;;  %v14762_v26 = vunpack.i.h.bf16 %v19457_v7  ;;  %v14111_v34 = vpack.c.bf16 %v5826_v50, %v5823_v10  ;;  %v14777_v10 = vunpack.i.h.bf16 %v19526_v47 }
 0x3bd   : > { %6019 = vmatmul.mubr.f32.gmra.mrb[14].mxu1 %v19530_v11  ;;  %v5551_v15 = vsel %vm5537_vm8, %v14786_v28, %v22213_v48  ;;  %v5550_v33 = vsel %vm5537_vm8, %v22209_v39, %v14786_v28 }
 0x3be   : > { %v19553_v35 = vpop.permute.xlu1 %14794  ;;  %v19568_v30 = vpop.permute.xlu0 %14789  ;;  %v19570_v8 = vmax.f32 %v5465_v52, %v5551_v15  ;;  %v19572_v31 = vmax.f32 %v5464_v20, %v5550_v33  ;;  %v5832_v52 = vld [vmem:[%s22176_s5 + $0x6d8] sm:$0xff] }
 0x3bf   : > { %14108 = vmatpush1.bf16.msra.mxu1 %v14107_v19  ;;  %v22218_v14 = vunpack.i.h.bf16 %v19553_v35  ;;  %v22219_v28 = vunpack.i.l.bf16 %v19553_v35  ;;  %v22212_v39 = vunpack.i.h.bf16 %v19568_v30  ;;  %v22214_v5 = vunpack.i.l.bf16 %v19568_v30  ;;  %v5836_v33 = vld [vmem:[%s22176_s5 + $0x6f8] sm:$0xff] }
 0x3c0   : > { %22291 = vst [vmem:[#allocation17_spill] sm:$0xff] %v19572_v31  ;;  %6024 = vmatprep.mubr.f32.mxu1 %v19570_v8  ;;  %14110 = vmatprep.subr.bf16.mxu1 %v14109_v13  ;;  %v14113_v19 = vpack.c.bf16 %v5833_v62, %v5830_v45  ;;  %v5839_v45 = vld [vmem:[%s22176_s5 + $0x710] sm:$0xff]  ;;  %v14115_v62 = vpack.c.bf16 %v5832_v52, %v5829_v6 }
 0x3c1   : > { %v5419_v50 = vsel %vm5401_vm1, %v22212_v39, %v14762_v26  ;;  %v5420_v20 = vsel %vm5401_vm1, %v14762_v26, %v22214_v5  ;;  %6025 = vmatmul.mubr.f32.gmra.mrb[16].mxu1 %v19572_v31  ;;  %v5556_v63 = vsel %vm5537_vm8, %v14777_v10, %v22219_v28  ;;  %v5555_v0 = vsel %vm5537_vm8, %v22218_v14, %v14777_v10  ;;  %v5841_v14 = vld [vmem:[%s22176_s5 + $0x720] sm:$0xff]  ;;  %v19774_v31 = vld [vmem:[%s22176_s5 + $0xd0] sm:$0xff] }
 0x3c2   : > { %v19593_v15 = vpop.permute.xlu1 %5393  ;;  %v5470_v39 = vmax.f32 %v18438_v24, %v5420_v20  ;;  %v5469_v48 = vmax.f32 %v18448_v53, %v5419_v50  ;;  %v14117_v24 = vpack.c.bf16 %v5839_v45, %v5836_v33  ;;  %v5835_v53 = vld [vmem:[%s22176_s5 + $0x6f0] sm:$0xff] }
 0x3c3   : > { %14112 = vmatpush1.bf16.msra.mxu1 %v14111_v34  ;;  %v5838_v34 = vld [vmem:[%s22176_s5 + $0x708] sm:$0xff] }
 0x3c4   : > { %v19601_v13 = vpop.permute.xlu0 %14799  ;;  %14114 = vmatprep.subr.bf16.mxu1 %v14113_v19  ;;  %v19613_v18 = vmax.f32 %v5470_v39, %v5556_v63  ;;  %v19615_v6 = vmax.f32 %v5469_v48, %v5555_v0  ;;  %v5842_v0 = vld [vmem:[%s22176_s5 + $0x728] sm:$0xff]  ;;  %v5845_v39 = vld [vmem:[%s22176_s5 + $0x740] sm:$0xff] }
 0x3c5   : > { %v22221_v26 = vunpack.i.h.bf16 %v19601_v13  ;;  %v14801_v5 = vunpack.i.l.bf16 %v19601_v13  ;;  %v14121_v45 = vpack.c.bf16 %v5845_v39, %v5842_v0 }
 0x3c6   : > { %22292 = vst [vmem:[#allocation18_spill] sm:$0xff] %v19613_v18  ;;  %22293 = vst [vmem:[#allocation19_spill] sm:$0xff] %v19615_v6  ;;  %v19628_v63 = vpop.permute.xlu1 %5529  ;;  %6030 = vmatprep.mubr.f32.mxu1 %v19613_v18  ;;  %v19769_v18 = vld [vmem:[%s22176_s5 + $0x268] sm:$0xff] }
 0x3c7   : > { %v5424_v52 = vsel %vm5401_vm1, %v19593_v15, %v14801_v5  ;;  %v5425_v19 = vsel %vm5401_vm1, %v14801_v5, %v22221_v26  ;;  %14116 = vmatpush1.bf16.msra.mxu1 %v14115_v62  ;;  %v14119_v5 = vpack.c.bf16 %v5838_v34, %v5835_v53  ;;  %v5844_v62 = vld [vmem:[%s22176_s5 + $0x738] sm:$0xff]  ;;  %v19698_v26 = vld [vmem:[%s22176_s5 + $0x40] sm:$0xff] }
 0x3c8   : > { %v19637_v48 = vpop.permute.xlu0 %14804  ;;  %6031 = vmatmul.mubr.f32.gmra.mrb[18].mxu1 %v19615_v6  ;;  %14118 = vmatprep.subr.bf16.mxu1 %v14117_v24  ;;  %v5475_v20 = vmax.f32 %v18458_v12, %v5425_v19  ;;  %v5474_v33 = vmax.f32 %v18453_v46, %v5424_v52  ;;  %v5848_v46 = vld [vmem:[%s22176_s5 + $0x758] sm:$0xff]  ;;  %v5851_v12 = vld [vmem:[%s22176_s5 + $0x770] sm:$0xff]  ;;  %v14123_v0 = vpack.c.bf16 %v5844_v62, %v5841_v14  ;;  %v22222_v62 = vmov 0.0  }
 0x3c9   : > { %v22220_v10 = vunpack.i.h.bf16 %v19637_v48  ;;  %v14806_v50 = vunpack.i.l.bf16 %v19637_v48  ;;  %v14125_v39 = vpack.c.bf16 %v5851_v12, %v5848_v46  ;;  %v5663_v14 = vld [vmem:[%s22176_s5 + $0x190] sm:$0xff] }
 0x3ca   : > { %v5488_v28 = vpop.permute.xlu1 %5487 }
 0x3cb   : > { %v5561_v53 = vsel %vm5537_vm8, %v14806_v50, %v22220_v10  ;;  %v5560_v24 = vsel %vm5537_vm8, %v19628_v63, %v14806_v50  ;;  %14120 = vmatpush1.bf16.msra.mxu1 %v14119_v5  ;;  %v5847_v50 = vld [vmem:[%s22176_s5 + $0x750] sm:$0xff]  ;;  %v5850_v10 = vld [vmem:[%s22176_s5 + $0x768] sm:$0xff] }
 0x3cc   : > { %v5352_v34 = vpop.permute.xlu0 %5351  ;;  %v19661_v52 = vmax.f32 %v5475_v20, %v5561_v53  ;;  %v19663_v19 = vmax.f32 %v5474_v33, %v5560_v24  ;;  %14122 = vmatprep.subr.bf16.mxu1 %v14121_v45  ;;  %v5666_v33 = vld [vmem:[%s22176_s5 + $0x1a8] sm:$0xff]  ;;  %v5669_v53 = vld [vmem:[%s22176_s5 + $0x1c0] sm:$0xff]  ;;  %v14127_v12 = vpack.c.bf16 %v5850_v10, %v5847_v50  ;;  %v19709_v10 = vld [vmem:[%s22176_s5 + $0x1f0] sm:$0xff] }
 0x3cd   : > { %v5406_v20 = vsel %vm5401_vm1, %v14742_v36, %v5352_v34  ;;  %v5618_v36 = vld [vmem:[%s22176_s5 + $0x28] sm:$0xff]  ;;  %v5672_v34 = vld [vmem:[%s22176_s5 + $0x1d8] sm:$0xff] }
 0x3ce   : > { %22294 = vst [vmem:[#allocation20_spill] sm:$0xff] %v19661_v52  ;;  %22295 = vst [vmem:[#allocation21_spill] sm:$0xff] %v19663_v19  ;;  %6036 = vmatprep.mubr.f32.mxu1 %v19661_v52  ;;  %v14815_v5 = vpop.permute.xlu1 %14814  ;;  %v5456_v43 = vmax.f32 %v18853_v27, %v5406_v20  ;;  %v19714_v50 = vld [vmem:[%s22176_s5 + $0x208] sm:$0xff]  ;;  %v22298_v52 = vunpack.i.h.bf16 %v19425_v9 }
 0x3cf   : > { %6037 = vmatmul.mubr.f32.gmra.mrb[20].mxu1 %v19663_v19  ;;  %v14817_v3 = vunpack.i.h.bf16 %v14815_v5  ;;  %v19757_v19 = vld [vmem:[%s22176_s5 + $0x250] sm:$0xff]  ;;  %v14137_v6 = vpack.c.bf16 %v19714_v50, %v19709_v10  ;;  %v19779_v9 = vld [vmem:[%s22176_s5 + $0xe8] sm:$0xff] }
 0x3d0   : > { %v14810_v45 = vpop.permute.xlu0 %14809  ;;  %6107 = vmatprep.mubr.f32.mxu1 %v22222_v62  ;;  %14124 = vmatpush1.bf16.msra.mxu1 %v14123_v0  ;;  %v19703_v62 = vld [vmem:[%s22176_s5 + $0x58] sm:$0xff]  ;;  %v14129_v0 = vpack.c.bf16 %v5666_v33, %v5663_v14  ;;  %v19732_v33 = vld [vmem:[%s22176_s5 + $0x88] sm:$0xff] }
 0x3d1   : > { %v14812_v24 = vunpack.i.h.bf16 %v14810_v45  ;;  %v14811_v46 = vunpack.i.l.bf16 %v14810_v45  ;;  %14126 = vmatprep.subr.bf16.mxu1 %v14125_v39  ;;  %v19719_v45 = vld [vmem:[%s22176_s5 + $0x70] sm:$0xff]  ;;  %v22297_v39 = vunpack.i.l.bf16 %v19467_v22 }
 0x3d2   : > { %v19727_v14 = vpop.permute.xlu1 %14824 }
 0x3d3   : > { %v5416_v27 = vsel %vm5401_vm1, %v22296_v1, %v14812_v24  ;;  %v5411_v20 = vsel %vm5401_vm1, %v22297_v39, %v14811_v46  ;;  %v19742_v1 = vld [vmem:[%s22176_s5 + $0x238] sm:$0xff]  ;;  %v14816_v24 = vunpack.i.l.bf16 %v14815_v5  ;;  %v14131_v39 = vpack.c.bf16 %v5618_v36, %v5615_v49 }
 0x3d4   : > { %v14820_v46 = vpop.permute.xlu0 %14819  ;;  %v5542_v5 = vsel %vm5537_vm8, %v22298_v52, %v5488_v28  ;;  %14128 = vmatpush1.bf16.msra.mxu1 %v14127_v12  ;;  %v14133_v49 = vpack.c.bf16 %v5672_v34, %v5669_v53  ;;  %v14135_v36 = vpack.c.bf16 %v19703_v62, %v19698_v26  ;;  %v5461_v26 = vmax.f32 %v18877_v42, %v5411_v20 }
 0x3d5   : > { %v19781_v28 = vmax.f32 %v5456_v43, %v5542_v5  ;;  %14130 = vmatprep.subr.bf16.mxu1 %v14129_v0  ;;  %v5466_v52 = vmax.f32 %v18893_v51, %v5416_v27  ;;  %v14139_v62 = vpack.c.bf16 %v19732_v33, %v19719_v45  ;;  %v14822_v53 = vunpack.i.h.bf16 %v14820_v46 }
 0x3d6   : > { %v14821_v12 = vunpack.i.l.bf16 %v14820_v46  ;;  %v14835_v34 = vpop.permute.xlu1 %14834  ;;  %v14141_v10 = vpack.c.bf16 %v19742_v1, %v19737_v40  ;;  %v22299_v0 = vunpack.i.l.bf16 %v19489_v29  ;;  %v22300_v51 = vunpack.i.h.bf16 %v19539_v54 }
 0x3d7   : > { %6108 = vmatmul.mubr.f32.vlgmr.msra.gmra.mrb[12].mxu1 %v19781_v28  ;;  %v14145_v27 = vpack.c.bf16 %v19769_v18, %v19757_v19  ;;  %v14837_v20 = vunpack.i.h.bf16 %v14835_v34  ;;  %v14836_v33 = vunpack.i.l.bf16 %v14835_v34  ;;  %v22301_v5 = vmov 0.0   ;;  %v5699_v18 = vld [vmem:[%s22176_s5 + $0x2b0] sm:$0xff]  ;;  %v5702_v19 = vld [vmem:[%s22176_s5 + $0x2c8] sm:$0xff] }
 0x3d8   : > { %v14830_v43 = vpop.permute.xlu0 %14829  ;;  %v5547_v42 = vsel %vm5537_vm8, %v22299_v0, %v14816_v24  ;;  %v5552_v45 = vsel %vm5537_vm8, %v22300_v51, %v14817_v3  ;;  %14132 = vmatpush3.bf16.msra.mxu1 %v14131_v39  ;;  %6113 = vmatprep.mubr.f32.mxu1 %v22301_v5  ;;  %v14827_v50 = vunpack.i.h.bf16 %v19727_v14  ;;  %v14826_v24 = vunpack.i.l.bf16 %v19727_v14 }
 0x3d9   : > { %v14832_v1 = vunpack.i.h.bf16 %v14830_v43  ;;  %v14831_v46 = vunpack.i.l.bf16 %v14830_v43  ;;  %v19805_v54 = vmax.f32 %v5461_v26, %v5547_v42  ;;  %14134 = vmatprep.subr.bf16.mxu1 %v14133_v49  ;;  %v19807_v3 = vmax.f32 %v5466_v52, %v5552_v45 }
 0x3da   : > { %v22302_v0 = vunpack.i.h.bf16 %v19601_v13  ;;  %v22303_v39 = vunpack.i.l.bf16 %v19568_v30  ;;  %v22304_v40 = vunpack.i.l.bf16 %v19438_v44  ;;  %v14845_v26 = vpop.permute.xlu1 %14844  ;;  %v5538_v45 = vsel %vm5537_vm8, %v14837_v20, %v14836_v33 }
 0x3db   : > { %v5402_v43 = vsel %vm5401_vm1, %v14832_v1, %v14831_v46  ;;  %6114 = vmatmul.mubr.f32.gmra.mrb[14].mxu1 %v19805_v54  ;;  %v14847_v52 = vunpack.i.h.bf16 %v14845_v26  ;;  %v14846_v13 = vunpack.i.l.bf16 %v14845_v26  ;;  %v22305_v44 = vunpack.i.l.bf16 %v19436_v59  ;;  %v5696_v26 = vld [vmem:[%s22176_s5 + $0x298] sm:$0xff] }
 0x3dc   : > { %v19812_v51 = vsel %vm5401_vm1, %v22302_v0, %v14822_v53  ;;  %v5421_v34 = vsel %vm5401_vm1, %v22303_v39, %v14821_v12  ;;  %v5403_v14 = vsel %vm5401_vm1, %v14831_v46, %v22304_v40  ;;  %v5452_v49 = vmax.f32 %v18762_v37, %v5402_v43  ;;  %v14840_v42 = vpop.permute.xlu0 %14839  ;;  %14136 = vmatpush3.bf16.msra.mxu1 %v14135_v36 }
 0x3dd   : > { %v5453_v53 = vmax.f32 %v18769_v60, %v5403_v14  ;;  %v14842_v12 = vunpack.i.h.bf16 %v14840_v42  ;;  %v14841_v0 = vunpack.i.l.bf16 %v14840_v42  ;;  %6119 = vmatprep.mubr.f32.mxu1 %v22301_v5  ;;  %v5539_v40 = vsel %vm5537_vm8, %v14836_v33, %v22305_v44  ;;  %14138 = vmatprep.subr.bf16.mxu1 %v14137_v6 }
 0x3de   : > { %v19829_v1 = vmax.f32 %v5452_v49, %v5538_v45  ;;  %v5471_v46 = vmax.f32 %v18913_v21, %v5421_v34  ;;  %v22306_v60 = vunpack.i.l.bf16 %v19553_v35  ;;  %v22307_v39 = vunpack.i.h.bf16 %v19467_v22  ;;  %v14855_v59 = vpop.permute.xlu1 %14854 }
 0x3df   : > { %v19831_v37 = vmax.f32 %v5453_v53, %v5539_v40  ;;  %v5407_v36 = vsel %vm5401_vm1, %v14842_v12, %v14841_v0  ;;  %v22308_v33 = vunpack.i.h.bf16 %v19489_v29  ;;  %v5476_v6 = vmax.f32 %v18929_v17, %v19812_v51  ;;  %6120 = vmatmul.mubr.f32.gmra.mrb[16].mxu1 %v19807_v3  ;;  %v5693_v29 = vld [vmem:[%s22176_s5 + $0x280] sm:$0xff] }
 0x3e0   : > { %v5557_v20 = vsel %vm5537_vm8, %v22306_v60, %v14826_v24  ;;  %v5408_v43 = vsel %vm5401_vm1, %v14841_v0, %v22307_v39  ;;  %v14850_v21 = vpop.permute.xlu0 %14849  ;;  %v5457_v34 = vmax.f32 %v18966_v16, %v5407_v36  ;;  %v5543_v22 = vsel %vm5537_vm8, %v14847_v52, %v14846_v13  ;;  %14140 = vmatpush3.bf16.msra.mxu1 %v14139_v62 }
 0x3e1   : > { %v5544_v14 = vsel %vm5537_vm8, %v14846_v13, %v22308_v33  ;;  %5917 = vmatprep.mubr.f32.mxu0 %v19831_v37  ;;  %v5458_v24 = vmax.f32 %v18981_v56, %v5408_v43  ;;  %v14857_v17 = vunpack.i.h.bf16 %v14855_v59  ;;  %v14856_v51 = vunpack.i.l.bf16 %v14855_v59  ;;  %6125 = vmatprep.mubr.f32.mxu1 %v22301_v5 }
 0x3e2   : > { %v14852_v49 = vunpack.i.h.bf16 %v14850_v21  ;;  %v14851_v42 = vunpack.i.l.bf16 %v14850_v21  ;;  %5918 = vmatmul.mubr.f32.vlgmr.msra.gmra.mrb[24].mxu0 %v19829_v1  ;;  %v19859_v16 = vmax.f32 %v5471_v46, %v5557_v20  ;;  %14142 = vmatprep.subr.bf16.mxu1 %v14141_v10  ;;  %v19863_v52 = vmax.f32 %v5457_v34, %v5543_v22  ;;  %v14865_v45 = vpop.permute.xlu1 %14864 }
 0x3e3   : > { %v19861_v56 = vmax.f32 %v5458_v24, %v5544_v14  ;;  %v22309_v53 = vunpack.i.l.bf16 %v19457_v7  ;;  %v22310_v12 = vunpack.i.h.bf16 %v19637_v48  ;;  %v14149_v44 = vpack.c.bf16 %v5696_v26, %v5693_v29  ;;  %v5645_v7 = vld [vmem:[%s22176_s5 + $0x100] sm:$0xff]  ;;  %v5648_v48 = vld [vmem:[%s22176_s5 + $0x118] sm:$0xff] }
 0x3e4   : > { %v5412_v13 = vsel %vm5401_vm1, %v14852_v49, %v14851_v42  ;;  %6126 = vmatmul.mubr.f32.gmra.mrb[18].mxu1 %v19859_v16  ;;  %v14867_v40 = vunpack.i.h.bf16 %v14865_v45  ;;  %v14866_v10 = vunpack.i.l.bf16 %v14865_v45  ;;  %v14860_v46 = vpop.permute.xlu0 %14859  ;;  %v5548_v43 = vsel %vm5537_vm8, %v14857_v17, %v14856_v51 }
 0x3e5   : > { %v5413_v62 = vsel %vm5401_vm1, %v14851_v42, %v22309_v53  ;;  %v5562_v0 = vsel %vm5537_vm8, %v22310_v12, %v14827_v50  ;;  %5923 = vmatprep.mubr.f32.mxu0 %v19861_v56  ;;  %v5462_v20 = vmax.f32 %v19004_v23, %v5412_v13  ;;  %v22311_v50 = vpack.c.bf16 %v19752_v57, %v19747_v61  ;;  %v5651_v13 = vld [vmem:[%s22176_s5 + $0x130] sm:$0xff]  ;;  %v5705_v53 = vld [vmem:[%s22176_s5 + $0x2e0] sm:$0xff] }
 0x3e6   : > { %v5463_v60 = vmax.f32 %v19011_v25, %v5413_v62  ;;  %v14862_v36 = vunpack.i.h.bf16 %v14860_v46  ;;  %v14861_v39 = vunpack.i.l.bf16 %v14860_v46  ;;  %5924 = vmatmul.mubr.f32.gmra.mrb[26].mxu0 %v19863_v52  ;;  %v22312_v25 = vunpack.i.l.bf16 %v19526_v47  ;;  %6131 = vmatprep.mubr.f32.mxu1 %v22301_v5  ;;  %v14875_v21 = vpop.permute.xlu1 %14874  ;;  %v5708_v62 = vld [vmem:[%s22176_s5 + $0x2f8] sm:$0xff] }
 0x3e7   : > { %14144 = vmatpush3.bf16.msra.mxu1 %v22311_v50  ;;  %v19891_v59 = vmax.f32 %v5476_v6, %v5562_v0  ;;  %v19898_v57 = vmax.f32 %v5462_v20, %v5548_v43  ;;  %v22313_v47 = vunpack.i.h.bf16 %v19568_v30  ;;  %v22314_v24 = vunpack.i.h.bf16 %v19553_v35  ;;  %v5714_v50 = vld [vmem:[%s22176_s5 + $0x328] sm:$0xff]  ;;  %v5717_v43 = vld [vmem:[%s22176_s5 + $0x340] sm:$0xff] }
 0x3e8   : > { %v5549_v23 = vsel %vm5537_vm8, %v14856_v51, %v22312_v25  ;;  %14146 = vmatprep.subr.bf16.mxu1 %v14145_v27  ;;  %v5417_v33 = vsel %vm5401_vm1, %v14862_v36, %v14861_v39  ;;  %v14151_v34 = vpack.c.bf16 %v5648_v48, %v5645_v7  ;;  %v14870_v27 = vpop.permute.xlu0 %14869  ;;  %v5553_v22 = vsel %vm5537_vm8, %v14867_v40, %v14866_v10  ;;  %v5711_v48 = vld [vmem:[%s22176_s5 + $0x310] sm:$0xff]  ;;  %v5765_v36 = vld [vmem:[%s22176_s5 + $0x4c0] sm:$0xff] }
 0x3e9   : > { %v19896_v61 = vmax.f32 %v5463_v60, %v5549_v23  ;;  %v5418_v14 = vsel %vm5401_vm1, %v14861_v39, %v22313_v47  ;;  %v5554_v6 = vsel %vm5537_vm8, %v14866_v10, %v22314_v24  ;;  %6132 = vmatmul.mubr.f32.gmra.mrb[20].mxu1 %v19891_v59  ;;  %v5467_v35 = vmax.f32 %v19053_v58, %v5417_v33  ;;  %v5762_v60 = vld [vmem:[%s22176_s5 + $0x4a8] sm:$0xff]  ;;  %v5768_v39 = vld [vmem:[%s22176_s5 + $0x4d8] sm:$0xff]  ;;  %v5771_v47 = vld [vmem:[%s22176_s5 + $0x4f0] sm:$0xff] }
 0x3ea   : > { %v5468_v30 = vmax.f32 %v19055_v55, %v5418_v14  ;;  %v22315_v29 = vpack.c.bf16 %v19779_v9, %v19774_v31  ;;  %v14877_v26 = vunpack.i.h.bf16 %v14875_v21  ;;  %v14876_v17 = vunpack.i.l.bf16 %v14875_v21  ;;  %6202 = vmatprep.mubr.f32.mxu1 %v19831_v37  ;;  %v5654_v31 = vld [vmem:[%s22176_s5 + $0x148] sm:$0xff]  ;;  %v5720_v33 = vld [vmem:[%s22176_s5 + $0x358] sm:$0xff] }
 0x3eb   : > { %5929 = vmatprep.mubr.f32.mxu0 %v19896_v61  ;;  %v14872_v51 = vunpack.i.h.bf16 %v14870_v27  ;;  %v14871_v49 = vunpack.i.l.bf16 %v14870_v27  ;;  %v19925_v55 = vmax.f32 %v5467_v35, %v5553_v22  ;;  %v14153_v58 = vpack.c.bf16 %v5702_v19, %v5699_v18  ;;  %v5774_v14 = vld [vmem:[%s22176_s5 + $0x508] sm:$0xff]  ;;  %v5777_v18 = vld [vmem:[%s22176_s5 + $0x520] sm:$0xff]  ;;  %v5783_v35 = vld [vmem:[%s22176_s5 + $0x550] sm:$0xff] }
 0x3ec   : > { %14148 = vmatpush3.bf16.msra.mxu1 %v22315_v29  ;;  %5930 = vmatmul.mubr.f32.gmra.mrb[28].mxu0 %v19898_v57  ;;  %v19923_v42 = vmax.f32 %v5468_v30, %v5554_v6  ;;  %v5559_v0 = vsel %vm5537_vm8, %v14876_v17, %v19628_v63  ;;  %v14157_v46 = vpack.c.bf16 %v5708_v62, %v5705_v53  ;;  %v5759_v63 = vld [vmem:[%s22176_s5 + $0x490] sm:$0xff]  ;;  %v5729_v27 = vld [vmem:[%s22176_s5 + $0x3a0] sm:$0xff]  ;;  %v5732_v30 = vld [vmem:[%s22176_s5 + $0x3b8] sm:$0xff] }
 0x3ed   : > { %14150 = vmatprep.subr.bf16.mxu1 %v14149_v44  ;;  %v5422_v9 = vsel %vm5401_vm1, %v14872_v51, %v14871_v49  ;;  %v5423_v37 = vsel %vm5401_vm1, %v14871_v49, %v19593_v15  ;;  %v14155_v44 = vpack.c.bf16 %v5654_v31, %v5651_v13  ;;  %v5558_v15 = vsel %vm5537_vm8, %v14877_v26, %v14876_v17  ;;  %v5723_v6 = vld [vmem:[%s22176_s5 + $0x370] sm:$0xff]  ;;  %v5738_v26 = vld [vmem:[%s22176_s5 + $0x3e8] sm:$0xff]  ;;  %v5789_v17 = vld [vmem:[%s22176_s5 + $0x580] sm:$0xff] }
 0x3ee   : > { %5935 = vmatprep.mubr.f32.mxu0 %v19923_v42  ;;  %v5473_v45 = vmax.f32 %v19078_v4, %v5423_v37  ;;  %v5472_v12 = vmax.f32 %v19076_v41, %v5422_v9  ;;  %v5657_v4 = vld [vmem:[%s22176_s5 + $0x160] sm:$0xff]  ;;  %v5660_v41 = vld [vmem:[%s22176_s5 + $0x178] sm:$0xff]  ;;  %v14161_v7 = vpack.c.bf16 %v5762_v60, %v5759_v63  ;;  %v14163_v25 = vpack.c.bf16 %v5714_v50, %v5711_v48  ;;  %v5735_v29 = vld [vmem:[%s22176_s5 + $0x3d0] sm:$0xff] }
 0x3ef   : > { %v14159_v20 = vpack.c.bf16 %v5660_v41, %v5657_v4  ;;  %v14165_v23 = vpack.c.bf16 %v5768_v39, %v5765_v36  ;;  %v14167_v21 = vpack.c.bf16 %v5720_v33, %v5717_v43  ;;  %v14169_v24 = vpack.c.bf16 %v5774_v14, %v5771_v47  ;;  %v5795_v13 = vld [vmem:[%s22176_s5 + $0x5b0] sm:$0xff]  ;;  %v5750_v53 = vld [vmem:[%s22176_s5 + $0x448] sm:$0xff]  ;;  %v5801_v62 = vld [vmem:[%s22176_s5 + $0x5e0] sm:$0xff] }
 0x3f0   : > { %14152 = vmatpush3.bf16.msra.mxu1 %v14151_v34  ;;  %5936 = vmatmul.mubr.f32.gmra.mrb[30].mxu0 %v19925_v55  ;;  %v5609_v40 = vmax.f32 %v5473_v45, %v5559_v0  ;;  %v19949_v10 = vmax.f32 %v5472_v12, %v5558_v15  ;;  %v5726_v34 = vld [vmem:[%s22176_s5 + $0x388] sm:$0xff]  ;;  %v14179_v51 = vpack.c.bf16 %v5738_v26, %v5735_v29  ;;  %v5747_v37 = vld [vmem:[%s22176_s5 + $0x430] sm:$0xff]  ;;  %v5804_v45 = vld [vmem:[%s22176_s5 + $0x5f8] sm:$0xff]  ;;  %v16473_v4 = vmov 0.0|0.0  }
 0x3f1   : > { %14154 = vmatprep.subr.bf16.mxu1 %v14153_v58  ;;  %v5744_v58 = vld [vmem:[%s22176_s5 + $0x418] sm:$0xff]  ;;  %v14189_v12 = vpack.c.bf16 %v5804_v45, %v5801_v62  ;;  %v5753_v0 = vld [vmem:[%s22176_s5 + $0x460] sm:$0xff]  ;;  %v22317_v36 = vld [vmem:[#allocation18_spill] sm:$0xff]  ;;  %vm10533_vm1 = vcmask 113664  }
 0x3f2   : > { %5941 = vmatprep.mubr.f32.mxu0 %v5609_v40  ;;  %v5813_v41 = vld [vmem:[%s22176_s5 + $0x640] sm:$0xff]  ;;  %v5816_v63 = vld [vmem:[%s22176_s5 + $0x658] sm:$0xff]  ;;  %v5834_v39 = vld [vmem:[%s22176_s5 + $0x6e8] sm:$0xff] }
 0x3f3   : > { %v14197_v60 = vpack.c.bf16 %v5816_v63, %v5813_v41  ;;  %v5828_v48 = vld [vmem:[%s22176_s5 + $0x6b8] sm:$0xff]  ;;  %v22316_v50 = vld [vmem:[#allocation17_spill] sm:$0xff] }
 0x3f4   : > { %14156 = vmatpush3.bf16.msra.mxu1 %v14155_v44  ;;  %5942 = vmatmul.mubr.f32.gmra.mrb[32].mxu0 %v19949_v10  ;;  %v5756_v44 = vld [vmem:[%s22176_s5 + $0x478] sm:$0xff]  ;;  %v5837_v33 = vld [vmem:[%s22176_s5 + $0x700] sm:$0xff] }
 0x3f5   : > { %14158 = vmatprep.subr.bf16.mxu1 %v14157_v46  ;;  %6485 = vmatprep.mubr.f32.mxu0 %v22301_v5  ;;  %v14191_v15 = vpack.c.bf16 %v5756_v44, %v5753_v0  ;;  %v5840_v47 = vld [vmem:[%s22176_s5 + $0x718] sm:$0xff]  ;;  %v22320_v14 = vld [vmem:[#allocation21_spill] sm:$0xff] }
 0x3f6   : > { %v15500_v62 = vld [vmem:[%s22177_s6 + $0x32c] ss:$16 sps:$4 sm:$0xff]  }
 0x3f8   : > { %14160 = vmatpush3.bf16.msra.mxu1 %v14159_v20  ;;  %v5819_v20 = vld [vmem:[%s22176_s5 + $0x670] sm:$0xff] }
 0x3f9   : > { %14162 = vmatprep.subr.bf16.mxu1 %v14161_v7  ;;  %v5822_v7 = vld [vmem:[%s22176_s5 + $0x688] sm:$0xff] }
 0x3fb   : > { %6203 = vmatmul.mubr.f32.vlgmr.msra.gmra.mrb[22].mxu1 %v19829_v1  ;;  %v5780_v1 = vld [vmem:[%s22176_s5 + $0x538] sm:$0xff] }
 0x3fc   : > { %6207 = vmatprep.mubr.f32.mxu1 %v19861_v56  ;;  %14164 = vmatpush3.bf16.msra.mxu1 %v14163_v25  ;;  %v14171_v56 = vpack.c.bf16 %v5726_v34, %v5723_v6  ;;  %v14173_v19 = vpack.c.bf16 %v5780_v1, %v5777_v18  ;;  %v22318_v25 = vld [vmem:[#allocation19_spill] sm:$0xff]  ;;  %v5846_v6 = vld [vmem:[%s22176_s5 + $0x748] sm:$0xff]  ;;  %v5849_v18 = vld [vmem:[%s22176_s5 + $0x760] sm:$0xff] }
 0x3fd   : > { %14166 = vmatprep.subr.bf16.mxu1 %v14165_v23  ;;  %v22319_v23 = vld [vmem:[#allocation20_spill] sm:$0xff] }
 0x3fe   : > { %v5852_v1 = vld [vmem:[%s22176_s5 + $0x778] sm:$0xff] }
 0x3ff   : > { %6208 = vmatmul.mubr.f32.gmra.mrb[24].mxu1 %v19863_v52  ;;  %v5786_v52 = vld [vmem:[%s22176_s5 + $0x568] sm:$0xff] }
 0x400   : > { %6212 = vmatprep.mubr.f32.mxu1 %v19896_v61  ;;  %14168 = vmatpush3.bf16.msra.mxu1 %v14167_v21  ;;  %v14175_v61 = vpack.c.bf16 %v5732_v30, %v5729_v27  ;;  %v14177_v22 = vpack.c.bf16 %v5786_v52, %v5783_v35  ;;  %v14209_v21 = vpack.c.bf16 %v5840_v47, %v5837_v33  ;;  %v15480_v52 = vld [vmem:[%s22177_s6 + $0x2c8] ss:$16 sps:$4 sm:$0xff]  }
 0x401   : > { %14170 = vmatprep.subr.bf16.mxu1 %v14169_v24  ;;  %v5843_v24 = vld [vmem:[%s22176_s5 + $0x730] sm:$0xff]  ;;  %v15516_v33 = vld [vmem:[%s22177_s6 + $0x388] ss:$16 sps:$4 sm:$0xff]  }
 0x402   : > { %v14212_v34 = vpack.c.bf16 %v5846_v6, %v5843_v24  ;;  %v20213_v6 = vld [vmem:[%s22175_s4 + $0x8] sm:$0xff] }
 0x403   : > { %6213 = vmatmul.mubr.f32.gmra.mrb[26].mxu1 %v19898_v57  ;;  %v5792_v57 = vld [vmem:[%s22176_s5 + $0x598] sm:$0xff] }
 0x404   : > { %6217 = vmatprep.mubr.f32.mxu1 %v19923_v42  ;;  %14172 = vmatpush3.bf16.msra.mxu1 %v14171_v56  ;;  %v14181_v49 = vpack.c.bf16 %v5792_v57, %v5789_v17  ;;  %v5741_v42 = vld [vmem:[%s22176_s5 + $0x400] sm:$0xff]  ;;  %v14215_v56 = vpack.c.bf16 %v5852_v1, %v5849_v18  ;;  %v15530_v1 = vld [vmem:[%s22177_s6 + $0x3cc] ss:$16 sps:$4 sm:$0xff]  }
 0x405   : > { %14174 = vmatprep.subr.bf16.mxu1 %v14173_v19  ;;  %v14183_v31 = vpack.c.bf16 %v5744_v58, %v5741_v42  ;;  %v15494_v42 = vld [vmem:[%s22177_s6 + $0x30c] ss:$16 sps:$4 sm:$0xff]  }
 0x407   : > { %6218 = vmatmul.mubr.f32.gmra.mrb[28].mxu1 %v19925_v55  ;;  %v5798_v55 = vld [vmem:[%s22176_s5 + $0x5c8] sm:$0xff] }
 0x408   : > { %6222 = vmatprep.mubr.f32.mxu1 %v5609_v40  ;;  %14176 = vmatpush3.bf16.msra.mxu1 %v14175_v61  ;;  %v14185_v9 = vpack.c.bf16 %v5798_v55, %v5795_v13  ;;  %v5807_v40 = vld [vmem:[%s22176_s5 + $0x610] sm:$0xff]  ;;  %v15488_v61 = vld [vmem:[%s22177_s6 + $0x2ec] ss:$16 sps:$4 sm:$0xff]  }
 0x409   : > { %14178 = vmatprep.subr.bf16.mxu1 %v14177_v22 }
 0x40b   : > { %6223 = vmatmul.mubr.f32.gmra.mrb[30].mxu1 %v19949_v10  ;;  %v5810_v10 = vld [vmem:[%s22176_s5 + $0x628] sm:$0xff] }
 0x40c   : > { %14180 = vmatpush3.bf16.msra.mxu1 %v14179_v51  ;;  %6292 = vmatprep.mubr.f32.mxu1 %v19452_v32  ;;  %v14187_v32 = vpack.c.bf16 %v5750_v53, %v5747_v37  ;;  %v14194_v46 = vpack.c.bf16 %v5810_v10, %v5807_v40  ;;  %v15486_v51 = vld [vmem:[%s22177_s6 + $0x2e8] ss:$16 sps:$4 sm:$0xff]  }
 0x40d   : > { %14182 = vmatprep.subr.bf16.mxu1 %v14181_v49  ;;  %v15492_v37 = vld [vmem:[%s22177_s6 + $0x308] ss:$16 sps:$4 sm:$0xff]  }
 0x410   : > { %14184 = vmatpush3.bf16.msra.mxu1 %v14183_v31 }
 0x411   : > { %14186 = vmatprep.subr.bf16.mxu1 %v14185_v9 }
 0x414   : > { %14188 = vmatpush3.bf16.msra.mxu1 %v14187_v32 }
 0x415   : > { %14190 = vmatprep.subr.bf16.mxu1 %v14189_v12 }
 0x418   : > { %14192 = vmatpush3.bf16.msra.mxu1 %v14191_v15  ;;  %v15498_v15 = vld [vmem:[%s22177_s6 + $0x328] ss:$16 sps:$4 sm:$0xff]  }
 0x419   : > { %14193 = vmatprep.subr.bf16.mxu1 %v16473_v4 }
 0x41b   : > { %6293 = vmatmul.mubr.f32.vlgmr.msra.gmra.mrb[32].mxu1 %v19481_v38  ;;  %v14200_v38 = vpack.c.bf16 %v5822_v7, %v5819_v20 }
 0x41c   : > { %6297 = vmatprep.mubr.f32.mxu1 %v19528_v2  ;;  %14195 = vmatpush3.bf16.msra.mxu1 %v14194_v46  ;;  %v5825_v2 = vld [vmem:[%s22176_s5 + $0x6a0] sm:$0xff]  ;;  %v15506_v46 = vld [vmem:[%s22177_s6 + $0x34c] ss:$16 sps:$4 sm:$0xff]  }
 0x41d   : > { %14196 = vmatprep.subr.bf16.mxu1 %v16473_v4 }
 0x41f   : > { %6298 = vmatmul.mubr.f32.gmra.mrb[34].mxu1 %v19530_v11  ;;  %v14203_v11 = vpack.c.bf16 %v5828_v48, %v5825_v2 }
 0x420   : > { %6302 = vmatprep.mubr.f32.mxu1 %v19570_v8  ;;  %14198 = vmatpush3.bf16.msra.mxu1 %v14197_v60  ;;  %v5831_v8 = vld [vmem:[%s22176_s5 + $0x6d0] sm:$0xff]  ;;  %v15504_v60 = vld [vmem:[%s22177_s6 + $0x348] ss:$16 sps:$4 sm:$0xff]  }
 0x421   : > { %14199 = vmatprep.subr.bf16.mxu1 %v16473_v4  ;;  %v14206_v43 = vpack.c.bf16 %v5834_v39, %v5831_v8 }
 0x423   : > { %6303 = vmatmul.mubr.f32.gmra.mrb[36].mxu1 %v22316_v50 }
 0x424   : > { %6307 = vmatprep.mubr.f32.mxu1 %v22317_v36  ;;  %14201 = vmatpush3.bf16.msra.mxu1 %v14200_v38  ;;  %v15512_v38 = vld [vmem:[%s22177_s6 + $0x36c] ss:$16 sps:$4 sm:$0xff]  }
 0x425   : > { %14202 = vmatprep.subr.bf16.mxu1 %v16473_v4 }
 0x427   : > { %6308 = vmatmul.mubr.f32.gmra.mrb[38].mxu1 %v22318_v25  ;;  %v15518_v25 = vld [vmem:[%s22177_s6 + $0x38c] ss:$16 sps:$4 sm:$0xff]  }
 0x428   : > { %6312 = vmatprep.mubr.f32.mxu1 %v22319_v23  ;;  %14204 = vmatpush3.bf16.msra.mxu1 %v14203_v11  ;;  %v15510_v11 = vld [vmem:[%s22177_s6 + $0x368] ss:$16 sps:$4 sm:$0xff]  }
 0x429   : > { %14205 = vmatprep.subr.bf16.mxu1 %v16473_v4 }
 0x42b   : > { %6313 = vmatmul.mubr.f32.gmra.mrb[40].mxu1 %v22320_v14  ;;  %v15524_v14 = vld [vmem:[%s22177_s6 + $0x3ac] ss:$16 sps:$4 sm:$0xff]  }
 0x42c   : > { %14207 = vmatpush3.bf16.msra.mxu1 %v14206_v43  ;;  %13923 = vmatprep.mubr.msk.f32.mxu1 %vm16474_vm9, %v22301_v5  ;;  %v20198_v43 = vld [vmem:[%s22175_s4] sm:$0xff] }
 0x42d   : > { %14208 = vmatprep.subr.bf16.mxu1 %v16473_v4 }
 0x430   : > { %14210 = vmatpush3.bf16.msra.mxu1 %v14209_v21 }
 0x431   : > { %14211 = vmatprep.subr.bf16.mxu1 %v16473_v4 }
 0x434   : > { %14213 = vmatpush3.bf16.msra.mxu1 %v14212_v34  ;;  %v15522_v34 = vld [vmem:[%s22177_s6 + $0x3a8] ss:$16 sps:$4 sm:$0xff]  }
 0x435   : > { %14214 = vmatprep.subr.bf16.mxu1 %v16473_v4 }
 0x438   : > { %14216 = vmatpush3.bf16.msra.mxu1 %v14215_v56 }
 0x43b   : > { %13924 = vmatmul.mubr.f32.vlgmr.msra.gmra.mrb[42].mxu1 %v19781_v28  ;;  %v15468_v28 = vld [vmem:[%s22177_s6 + $0x288] ss:$16 sps:$4 sm:$0xff]  }
 0x43c   : > { %13926 = vmatprep.mubr.msk.f32.mxu1 %vm16474_vm9, %v22301_v5 }
 0x43f   : > { %13927 = vmatmul.mubr.f32.gmra.mrb[44].mxu1 %v19805_v54  ;;  %v15470_v54 = vld [vmem:[%s22177_s6 + $0x28c] ss:$16 sps:$4 sm:$0xff]  }
 0x440   : > { %13929 = vmatprep.mubr.msk.f32.mxu1 %vm16474_vm9, %v22301_v5  ;;  %7279 = vmatprep.subr.bf16.mxu1 %v15470_v54  ;;  %v20227_v54 = vld [vmem:[%s22175_s4 + $0x10] sm:$0xf] }
 0x441   : > { %7280 = vmatpush1.bf16.msra.mxu1 %v15468_v28 }
 0x443   : > { %13930 = vmatmul.mubr.f32.gmra.mrb[46].mxu1 %v19807_v3  ;;  %v15476_v3 = vld [vmem:[%s22177_s6 + $0x2ac] ss:$16 sps:$4 sm:$0xff]  }
 0x444   : > { %13932 = vmatprep.mubr.msk.f32.mxu1 %vm16474_vm9, %v22301_v5  ;;  %7281 = vmatprep.subr.bf16.mxu1 %v15476_v3 }
 0x447   : > { %13933 = vmatmul.mubr.f32.gmra.mrb[48].mxu1 %v19859_v16  ;;  %v15474_v16 = vld [vmem:[%s22177_s6 + $0x2a8] ss:$16 sps:$4 sm:$0xff]  }
 0x448   : > { %13935 = vmatprep.mubr.msk.f32.mxu1 %vm16474_vm9, %v22301_v5  ;;  %7282 = vmatpush1.bf16.msra.mxu1 %v15474_v16 }
 0x44b   : > { %13936 = vmatmul.mubr.f32.gmra.mrb[50].mxu1 %v19891_v59  ;;  %v15482_v59 = vld [vmem:[%s22177_s6 + $0x2cc] ss:$16 sps:$4 sm:$0xff]  }
 0x44c   : > { %7283 = vmatprep.subr.bf16.mxu1 %v15482_v59 }
 0x44d   : > { %7284 = vmatpush1.bf16.msra.mxu1 %v15480_v52  ;;  %v15542_v52 = vld [vmem:[%s22177_s6 + $0x40c] ss:$16 sps:$4 sm:$0xff]  }
 0x44e   : > { %7285 = vmatprep.subr.bf16.mxu1 %v15488_v61 }
 0x451   : > { %7286 = vmatpush1.bf16.msra.mxu1 %v15486_v51 }
 0x452   : > { %7287 = vmatprep.subr.bf16.mxu1 %v15494_v42 }
 0x455   : > { %7288 = vmatpush1.bf16.msra.mxu1 %v15492_v37 }
 0x456   : > { %7289 = vmatprep.subr.bf16.mxu1 %v15500_v62 }
 0x459   : > { %7290 = vmatpush1.bf16.msra.mxu1 %v15498_v15 }
 0x45a   : > { %7291 = vmatprep.subr.bf16.mxu1 %v15506_v46 }
 0x45d   : > { %7292 = vmatpush1.bf16.msra.mxu1 %v15504_v60 }
 0x45e   : > { %7293 = vmatprep.subr.bf16.mxu1 %v15512_v38 }
 0x461   : > { %7294 = vmatpush1.bf16.msra.mxu1 %v15510_v11 }
 0x462   : > { %7295 = vmatprep.subr.bf16.mxu1 %v15518_v25 }
 0x465   : > { %7296 = vmatpush1.bf16.msra.mxu1 %v15516_v33 }
 0x466   : > { %7297 = vmatprep.subr.bf16.mxu1 %v15524_v14  ;;  %v15467_v14 = vld [vmem:[%s22177_s6 + $0x284] ss:$16 sps:$4 sm:$0xff]  }
 0x469   : > { %7298 = vmatpush1.bf16.msra.mxu1 %v15522_v34  ;;  %v15479_v34 = vld [vmem:[%s22177_s6 + $0x2c4] ss:$16 sps:$4 sm:$0xff]  }
 0x46a   : > { %7299 = vmatprep.subr.bf16.mxu1 %v15530_v1  ;;  %v15548_v1 = vld [vmem:[%s22177_s6 + $0x42c] ss:$16 sps:$4 sm:$0xff]  }
 0x4aa   : > { %v6109_v19 = vpop.f32.mrb[12].mxu1 }
 0x4ab   : > { %v6111_v27 = vpop.f32.mrb[13].mxu1 }
 0x4ae   : > { %v6115_v30 = vpop.f32.mrb[14].mxu1 }
 0x4af   : > { %v6117_v35 = vpop.f32.mrb[15].mxu1 }
 0x4b2   : > { %v6121_v22 = vpop.f32.mrb[16].mxu1 }
 0x4b3   : > { %v6123_v29 = vpop.f32.mrb[17].mxu1 }
 0x4b5   : > { %v5919_v26 = vpop.f32.mrb[24].mxu0 }
 0x4b6   : > { %v14349_v17 = vadd.f32 %v6109_v19, %v5919_v26  ;;  %v5921_v57 = vpop.f32.mrb[25].mxu0  ;;  %v15528_v19 = vld [vmem:[%s22177_s6 + $0x3c8] ss:$16 sps:$4 sm:$0xff]  }
 0x4b7   : > { %v14350_v49 = vadd.f32 %v6111_v27, %v5921_v57  ;;  %v6127_v58 = vpop.f32.mrb[18].mxu1  ;;  %v15536_v27 = vld [vmem:[%s22177_s6 + $0x3ec] ss:$16 sps:$4 sm:$0xff]   ;;  %7300 = vmatpush1.bf16.msra.mxu1 %v15528_v19  ;;  %v15552_v19 = vld [vmem:[%s22177_s6 + $0x448] ss:$16 sps:$4 sm:$0xff]  }
 0x4b8   : > { %v6129_v13 = vpop.f32.mrb[19].mxu1  ;;  %7301 = vmatprep.subr.bf16.mxu1 %v15536_v27  ;;  %v15497_v27 = vld [vmem:[%s22177_s6 + $0x324] ss:$16 sps:$4 sm:$0xff]  }
 0x4b9   : > { %v5925_v55 = vpop.f32.mrb[26].mxu0 }
 0x4ba   : > { %v14351_v31 = vadd.f32 %v6115_v30, %v5925_v55  ;;  %v5927_v9 = vpop.f32.mrb[27].mxu0  ;;  %v15534_v30 = vld [vmem:[%s22177_s6 + $0x3e8] ss:$16 sps:$4 sm:$0xff]  }
 0x4bb   : > { %v14352_v53 = vadd.f32 %v6117_v35, %v5927_v9  ;;  %7302 = vmatpush1.bf16.msra.mxu1 %v15534_v30  ;;  %v15495_v30 = vld [vmem:[%s22177_s6 + $0x320] ss:$16 sps:$4 sm:$0xff]  }
 0x4bc   : > { %v14219_v45 = vpack.c.bf16 %v14351_v31, %v14349_v17  ;;  %v6133_v32 = vpop.f32.mrb[20].mxu1  ;;  %7303 = vmatprep.subr.bf16.mxu1 %v15542_v52  ;;  %v15566_v52 = vld [vmem:[%s22177_s6 + $0x48c] ss:$16 sps:$4 sm:$0xff]  }
 0x4bd   : > { %v14217_v12 = vpack.c.bf16 %v14352_v53, %v14350_v49  ;;  %v6135_v0 = vpop.f32.mrb[21].mxu1 }
 0x4bf   : > { %v5931_v44 = vpop.f32.mrb[28].mxu0  ;;  %14218 = vmatprep.subr.bf16.mxu0 %v14217_v12 }
 0x4c0   : > { %v14353_v40 = vadd.f32 %v6121_v22, %v5931_v44  ;;  %v5933_v10 = vpop.f32.mrb[29].mxu0  ;;  %14220 = vmatpush1.bf16.msra.mxu0 %v14219_v45 }
 0x4c1   : > { %v14354_v41 = vadd.f32 %v6123_v29, %v5933_v10  ;;  %v15540_v29 = vld [vmem:[%s22177_s6 + $0x408] ss:$16 sps:$4 sm:$0xff]  }
 0x4c2   : > { %7304 = vmatpush1.bf16.msra.mxu1 %v15540_v29  ;;  %v15507_v29 = vld [vmem:[%s22177_s6 + $0x360] ss:$16 sps:$4 sm:$0xff]  }
 0x4c3   : > { %v5937_v63 = vpop.f32.mrb[30].mxu0  ;;  %7305 = vmatprep.subr.bf16.mxu1 %v15548_v1 }
 0x4c4   : > { %v14355_v20 = vadd.f32 %v6127_v58, %v5937_v63  ;;  %v5939_v7 = vpop.f32.mrb[31].mxu0 }
 0x4c5   : > { %v14356_v2 = vadd.f32 %v6129_v13, %v5939_v7 }
 0x4c6   : > { %v14223_v48 = vpack.c.bf16 %v14355_v20, %v14353_v40 }
 0x4c7   : > { %v14221_v50 = vpack.c.bf16 %v14356_v2, %v14354_v41  ;;  %v5943_v36 = vpop.f32.mrb[32].mxu0 }
 0x4c8   : > { %v14357_v8 = vadd.f32 %v6133_v32, %v5943_v36  ;;  %v5945_v39 = vpop.f32.mrb[33].mxu0 }
 0x4c9   : > { %v14358_v23 = vadd.f32 %v6135_v0, %v5945_v39  ;;  %14222 = vmatprep.subr.bf16.mxu0 %v14221_v50 }
 0x4ca   : > { %14224 = vmatpush1.bf16.msra.mxu0 %v14223_v48 }
 0x4cb   : > { %6429 = vmatprep.subr.mxu0 %v14358_v23 }
 0x4ce   : > { %v13795_v47 = vpop.f32.mrb[22].mxu1  ;;  %6430 = vmatpush1.msra.mxu0 %v14357_v8 }
 0x4cf   : > { %v13796_v21 = vpop.f32.mrb[23].mxu1  ;;  %12747 = vmatmul.mubr.msk.f32.vlgmr.msra.gmra.mrb[34].mxu0 %vm6411_vm10, %v20198_v43  ;;  %14225 = vmatprep.subr.bf16.mxu0 %v16473_v4 }
 0x4d0   : > { %v13797_v24 = vadd.f32 %v13796_v21, %v13795_v47  ;;  %6491 = vmatprep.mubr.f32.mxu0 %v22301_v5  ;;  %v15465_v21 = vld [vmem:[%s22177_s6 + $0x280] ss:$16 sps:$4 sm:$0xff]  }
 0x4d2   : > { %v13798_v18 = vpop.f32.mrb[24].mxu1 }
 0x4d3   : > { %v13799_v56 = vpop.f32.mrb[25].mxu1  ;;  %12748 = vmatmul.mubr.msk.f32.gmra.mrb[36].mxu0 %vm6411_vm10, %v20213_v6 }
 0x4d4   : > { %v13800_v28 = vadd.f32 %v13799_v56, %v13798_v18  ;;  %6497 = vmatprep.mubr.f32.mxu0 %v22301_v5  ;;  %v15477_v18 = vld [vmem:[%s22177_s6 + $0x2c0] ss:$16 sps:$4 sm:$0xff]  }
 0x4d5   : > { %v15483_v56 = vld [vmem:[%s22177_s6 + $0x2e0] ss:$16 sps:$4 sm:$0xff]  }
 0x4d6   : > { %v13801_v3 = vpop.f32.mrb[26].mxu1 }
 0x4d7   : > { %v13802_v16 = vpop.f32.mrb[27].mxu1  ;;  %12749 = vmatmul.mubr.msk.f32.gmra.mrb[38].mxu0 %vm6411_vm10, %v20227_v54 }
 0x4d8   : > { %v13803_v59 = vadd.f32 %v13802_v16, %v13801_v3  ;;  %13948 = vmatprep.mubr.msk.f32.mxu0 %vm16474_vm9, %v22301_v5  ;;  %v15554_v3 = vld [vmem:[%s22177_s6 + $0x44c] ss:$16 sps:$4 sm:$0xff]  }
 0x4d9   : > { %v15560_v16 = vld [vmem:[%s22177_s6 + $0x46c] ss:$16 sps:$4 sm:$0xff]  }
 0x4da   : > { %v13804_v35 = vpop.f32.mrb[28].mxu1 }
 0x4db   : > { %v13805_v61 = vpop.f32.mrb[29].mxu1 }
 0x4dc   : > { %v13806_v22 = vadd.f32 %v13805_v61, %v13804_v35  ;;  %v15503_v35 = vld [vmem:[%s22177_s6 + $0x344] ss:$16 sps:$4 sm:$0xff]   ;;  %v15501_v61 = vld [vmem:[%s22177_s6 + $0x340] ss:$16 sps:$4 sm:$0xff]  }
 0x4de   : > { %v13807_v26 = vpop.f32.mrb[30].mxu1 }
 0x4df   : > { %v13808_v17 = vpop.f32.mrb[31].mxu1 }
 0x4e0   : > { %v13809_v57 = vadd.f32 %v13808_v17, %v13807_v26  ;;  %v15515_v26 = vld [vmem:[%s22177_s6 + $0x384] ss:$16 sps:$4 sm:$0xff]   ;;  %v15513_v17 = vld [vmem:[%s22177_s6 + $0x380] ss:$16 sps:$4 sm:$0xff]  }
 0x4ee   : > { %v13842_v51 = vpop.f32.mrb[32].mxu1 }
 0x4ef   : > { %v13843_v49 = vpop.f32.mrb[33].mxu1 }
 0x4f0   : > { %v13844_v42 = vadd.f32 %v13843_v49, %v13842_v51  ;;  %v15519_v51 = vld [vmem:[%s22177_s6 + $0x3a0] ss:$16 sps:$4 sm:$0xff]   ;;  %v15527_v49 = vld [vmem:[%s22177_s6 + $0x3c4] ss:$16 sps:$4 sm:$0xff]  }
 0x4f2   : > { %v13845_v58 = vpop.f32.mrb[34].mxu1  ;;  %v6295_v13 = vadd.f32 %v13844_v42, %v13797_v24  ;;  %v15471_v24 = vld [vmem:[%s22177_s6 + $0x2a0] ss:$16 sps:$4 sm:$0xff]  }
 0x4f3   : > { %v13846_v55 = vpop.f32.mrb[35].mxu1  ;;  %v15525_v42 = vld [vmem:[%s22177_s6 + $0x3c0] ss:$16 sps:$4 sm:$0xff]  }
 0x4f4   : > { %v13847_v31 = vadd.f32 %v13846_v55, %v13845_v58  ;;  %v15533_v58 = vld [vmem:[%s22177_s6 + $0x3e4] ss:$16 sps:$4 sm:$0xff]  }
 0x4f5   : > { %v15539_v55 = vld [vmem:[%s22177_s6 + $0x404] ss:$16 sps:$4 sm:$0xff]  }
 0x4f6   : > { %v13848_v9 = vpop.f32.mrb[36].mxu1  ;;  %v6300_v37 = vadd.f32 %v13847_v31, %v13800_v28  ;;  %v15491_v28 = vld [vmem:[%s22177_s6 + $0x304] ss:$16 sps:$4 sm:$0xff]   ;;  %v15537_v31 = vld [vmem:[%s22177_s6 + $0x400] ss:$16 sps:$4 sm:$0xff]  }
 0x4f7   : > { %v13849_v53 = vpop.f32.mrb[37].mxu1 }
 0x4f8   : > { %v13850_v62 = vadd.f32 %v13849_v53, %v13848_v9  ;;  %v15545_v9 = vld [vmem:[%s22177_s6 + $0x424] ss:$16 sps:$4 sm:$0xff]  }
 0x4f9   : > { %v15551_v53 = vld [vmem:[%s22177_s6 + $0x444] ss:$16 sps:$4 sm:$0xff]  }
 0x4fa   : > { %v13851_v45 = vpop.f32.mrb[38].mxu1  ;;  %v6305_v32 = vadd.f32 %v13850_v62, %v13803_v59  ;;  %v15558_v59 = vld [vmem:[%s22177_s6 + $0x468] ss:$16 sps:$4 sm:$0xff]   ;;  %v15549_v62 = vld [vmem:[%s22177_s6 + $0x440] ss:$16 sps:$4 sm:$0xff]  }
 0x4fb   : > { %v13852_v12 = vpop.f32.mrb[39].mxu1 }
 0x4fc   : > { %v13853_v0 = vadd.f32 %v13852_v12, %v13851_v45  ;;  %v15557_v45 = vld [vmem:[%s22177_s6 + $0x464] ss:$16 sps:$4 sm:$0xff]  }
 0x4fd   : > { %v15563_v12 = vld [vmem:[%s22177_s6 + $0x484] ss:$16 sps:$4 sm:$0xff]  }
 0x4fe   : > { %v13854_v44 = vpop.f32.mrb[40].mxu1  ;;  %v6310_v15 = vadd.f32 %v13853_v0, %v13806_v22  ;;  %v15509_v22 = vld [vmem:[%s22177_s6 + $0x364] ss:$16 sps:$4 sm:$0xff]  }
 0x4ff   : > { %v13855_v40 = vpop.f32.mrb[41].mxu1 }
 0x500   : > { %v13856_v10 = vadd.f32 %v13855_v40, %v13854_v44 }
 0x502   : > { %v6315_v46 = vadd.f32 %v13856_v10, %v13809_v57  ;;  %v15521_v57 = vld [vmem:[%s22177_s6 + $0x3a4] ss:$16 sps:$4 sm:$0xff]  }
 0x50e   : > { %v6384_v41 = vpop.f32.mrb[42].mxu1 }
 0x50f   : > { %v6385_v63 = vadd.f32 %v6384_v41, %v6295_v13  ;;  %v13925_v60 = vpop.f32.mrb[43].mxu1  ;;  %v15531_v13 = vld [vmem:[%s22177_s6 + $0x3e0] ss:$16 sps:$4 sm:$0xff]  }
 0x512   : > { %v6389_v20 = vpop.f32.mrb[44].mxu1 }
 0x513   : > { %v6390_v7 = vadd.f32 %v6389_v20, %v6300_v37  ;;  %v13928_v38 = vpop.f32.mrb[45].mxu1  ;;  %v15543_v37 = vld [vmem:[%s22177_s6 + $0x420] ss:$16 sps:$4 sm:$0xff]  }
 0x515   : > { %v14226_v2 = vpack.c.bf16 %v6390_v7, %v6385_v63 }
 0x516   : > { %v6394_v48 = vpop.f32.mrb[46].mxu1 }
 0x517   : > { %v6395_v50 = vadd.f32 %v6394_v48, %v6305_v32  ;;  %v13931_v36 = vpop.f32.mrb[47].mxu1  ;;  %14227 = vmatpush3.bf16.msra.mxu0 %v14226_v2  ;;  %v15555_v32 = vld [vmem:[%s22177_s6 + $0x460] ss:$16 sps:$4 sm:$0xff]  }
 0x518   : > { %14228 = vmatprep.subr.bf16.mxu0 %v16473_v4  ;;  %v15473_v4 = vld [vmem:[%s22177_s6 + $0x2a4] ss:$16 sps:$4 sm:$0xff]  }
 0x51a   : > { %v6399_v11 = vpop.f32.mrb[48].mxu1 }
 0x51b   : > { %v6400_v8 = vadd.f32 %v6399_v11, %v6310_v15  ;;  %v13934_v39 = vpop.f32.mrb[49].mxu1 }
 0x51d   : > { %v14229_v25 = vpack.c.bf16 %v6400_v8, %v6395_v50 }
 0x51e   : > { %v6404_v23 = vpop.f32.mrb[50].mxu1 }
 0x51f   : > { %v6405_v33 = vadd.f32 %v6404_v23, %v6315_v46  ;;  %v13937_v47 = vpop.f32.mrb[51].mxu1  ;;  %14230 = vmatpush3.bf16.msra.mxu0 %v14229_v25 }
 0x520   : > { %13946 = vmatprep.subr.mxu0 %v22301_v5 }
 0x523   : > { %13947 = vmatpush3.msra.mxu0 %v6405_v33 }
 0x524   : > { %13949 = vmatmul.mubr.msk.f32.vlgmr.msra.gmra.mrb[40].mxu0 %vm6411_vm10, %v20198_v43  ;;  %7193 = vmatprep.subr.bf16.mxu0 %v15467_v14  ;;  %v15546_v43 = vld [vmem:[%s22177_s6 + $0x428] ss:$16 sps:$4 sm:$0xff]  }
 0x525   : > { %13951 = vmatprep.mubr.msk.f32.mxu0 %vm16474_vm9, %v22301_v5  ;;  %7194 = vmatpush1.bf16.msra.mxu0 %v15465_v21 }
 0x526   : > { %7195 = vmatprep.subr.bf16.mxu0 %v15473_v4  ;;  %7306 = vmatpush1.bf16.msra.mxu1 %v15546_v43 }
 0x527   : > { %7307 = vmatprep.subr.bf16.mxu1 %v15554_v3 }
 0x528   : > { %13952 = vmatmul.mubr.msk.f32.gmra.mrb[42].mxu0 %vm6411_vm10, %v20213_v6  ;;  %v15485_v6 = vld [vmem:[%s22177_s6 + $0x2e4] ss:$16 sps:$4 sm:$0xff]  }
 0x529   : > { %13954 = vmatprep.mubr.msk.f32.mxu0 %vm16474_vm9, %v22301_v5  ;;  %7196 = vmatpush1.bf16.msra.mxu0 %v15471_v24  ;;  %v15561_v24 = vld [vmem:[%s22177_s6 + $0x480] ss:$16 sps:$4 sm:$0xff]  }
 0x52a   : > { %7197 = vmatprep.subr.bf16.mxu0 %v15479_v34  ;;  %7308 = vmatpush1.bf16.msra.mxu1 %v15552_v19  ;;  %v15569_v19 = vld [vmem:[%s22177_s6 + $0x4a4] ss:$16 sps:$4 sm:$0xff]  }
 0x52b   : > { %7309 = vmatprep.subr.bf16.mxu1 %v15560_v16 }
 0x52c   : > { %13955 = vmatmul.mubr.msk.f32.gmra.mrb[44].mxu0 %vm6411_vm10, %v20227_v54  ;;  %v15489_v54 = vld [vmem:[%s22177_s6 + $0x300] ss:$16 sps:$4 sm:$0xff]  }
 0x52d   : > { %7198 = vmatpush1.bf16.msra.mxu0 %v15477_v18  ;;  %v15564_v18 = vld [vmem:[%s22177_s6 + $0x488] ss:$16 sps:$4 sm:$0xff]  }
 0x52e   : > { %7199 = vmatprep.subr.bf16.mxu0 %v15485_v6  ;;  %7310 = vmatpush1.bf16.msra.mxu1 %v15558_v59 }
 0x52f   : > { %7322 = vmatprep.subr.bf16.mxu1 %v15566_v52  ;;  %v15567_v52 = vld [vmem:[%s22177_s6 + $0x4a0] ss:$16 sps:$4 sm:$0xff]  }
 0x531   : > { %7200 = vmatpush1.bf16.msra.mxu0 %v15483_v56 }
 0x532   : > { %7201 = vmatprep.subr.bf16.mxu0 %v15491_v28 }
 0x535   : > { %7202 = vmatpush1.bf16.msra.mxu0 %v15489_v54  ;;  %v15572_v54 = vld [vmem:[%s22177_s6 + $0x4ac] ss:$16 sps:$4 sm:$0xff]  }
 0x536   : > { %7203 = vmatprep.subr.bf16.mxu0 %v15497_v27 }
 0x539   : > { %7204 = vmatpush1.bf16.msra.mxu0 %v15495_v30 }
 0x53a   : > { %7205 = vmatprep.subr.bf16.mxu0 %v15503_v35 }
 0x53d   : > { %7206 = vmatpush1.bf16.msra.mxu0 %v15501_v61  ;;  %v15570_v61 = vld [vmem:[%s22177_s6 + $0x4a8] ss:$16 sps:$4 sm:$0xff]  }
 0x53e   : > { %7207 = vmatprep.subr.bf16.mxu0 %v15509_v22 }
 0x541   : > { %7208 = vmatpush1.bf16.msra.mxu0 %v15507_v29  ;;  %v15575_v29 = vld [vmem:[%s22177_s6 + $0x4c4] ss:$16 sps:$4 sm:$0xff]  }
 0x542   : > { %7209 = vmatprep.subr.bf16.mxu0 %v15515_v26  ;;  %v15578_v26 = vld [vmem:[%s22177_s6 + $0x4cc] ss:$16 sps:$4 sm:$0xff]  }
 0x545   : > { %7210 = vmatpush1.bf16.msra.mxu0 %v15513_v17 }
 0x546   : > { %7211 = vmatprep.subr.bf16.mxu0 %v15521_v57  ;;  %v16475_v57 = vmov 0  }
 0x549   : > { %7212 = vmatpush1.bf16.msra.mxu0 %v15519_v51  ;;  %v15573_v51 = vld [vmem:[%s22177_s6 + $0x4c0] ss:$16 sps:$4 sm:$0xff]  }
 0x54a   : > { %7213 = vmatprep.subr.bf16.mxu0 %v15527_v49  ;;  %v15576_v49 = vld [vmem:[%s22177_s6 + $0x4c8] ss:$16 sps:$4 sm:$0xff]  }
 0x54d   : > { %7214 = vmatpush1.bf16.msra.mxu0 %v15525_v42  ;;  %v15581_v42 = vld [vmem:[%s22177_s6 + $0x4e4] ss:$16 sps:$4 sm:$0xff]  }
 0x54e   : > { %7215 = vmatprep.subr.bf16.mxu0 %v15533_v58  ;;  %v15584_v58 = vld [vmem:[%s22177_s6 + $0x4ec] ss:$16 sps:$4 sm:$0xff]  }
 0x551   : > { %7216 = vmatpush1.bf16.msra.mxu0 %v15531_v13  ;;  %v15579_v13 = vld [vmem:[%s22177_s6 + $0x4e0] ss:$16 sps:$4 sm:$0xff]  }
 0x552   : > { %7217 = vmatprep.subr.bf16.mxu0 %v15539_v55  ;;  %v15582_v55 = vld [vmem:[%s22177_s6 + $0x4e8] ss:$16 sps:$4 sm:$0xff]  }
 0x555   : > { %7218 = vmatpush1.bf16.msra.mxu0 %v15537_v31  ;;  %v15587_v31 = vld [vmem:[%s22177_s6 + $0x4] ss:$16 sps:$4 sm:$0xff]  }
 0x556   : > { %7219 = vmatprep.subr.bf16.mxu0 %v15545_v9  ;;  %v15590_v9 = vld [vmem:[%s22177_s6 + $0xc] ss:$16 sps:$4 sm:$0xff]  }
 0x559   : > { %7220 = vmatpush1.bf16.msra.mxu0 %v15543_v37 }
 0x55a   : > { %7221 = vmatprep.subr.bf16.mxu0 %v15551_v53 }
 0x55d   : > { %7222 = vmatpush1.bf16.msra.mxu0 %v15549_v62 }
 0x55e   : > { %7223 = vmatprep.subr.bf16.mxu0 %v15557_v45 }
 0x561   : > { %7224 = vmatpush1.bf16.msra.mxu0 %v15555_v32 }
 0x562   : > { %7236 = vmatprep.subr.bf16.mxu0 %v15563_v12 }
 0x5a2   : > { %v6487_v0 = vpop.f32.mrb[34].mxu0 }
 0x5a3   : > { %v6489_v44 = vpop.f32.mrb[35].mxu0 }
 0x5a6   : > { %v6493_v15 = vpop.f32.mrb[36].mxu0 }
 0x5a7   : > { %v20380_v40 = vpack.c.bf16 %v6493_v15, %v6487_v0  ;;  %v6495_v10 = vpop.f32.mrb[37].mxu0 }
 0x5a8   : > { %v20382_v46 = vpack.c.bf16 %v6495_v10, %v6489_v44 }
 0x5a9   : > { %v6752_v41 = vshrl.u32 %v20380_v40, 16  ;;  %v6754_v63 = vshll.u32 %v20380_v40, 16 }
 0x5aa   : > { %v6499_v60 = vpop.f32.mrb[38].mxu0  ;;  %v6764_v20 = vshrl.u32 %v20382_v46, 16  ;;  %v6766_v7 = vshll.u32 %v20382_v46, 16 }
 0x5ab   : > { %v20388_v38 = vpack.c.bf16 %v6499_v60, %v6499_v60  ;;  %v6501_v2 = vpop.f32.mrb[39].mxu0  ;;  %v6756_v48 = vrot.slane %v6754_v63, 1  ;;  %v8701_v56 = vrot.slane %v6752_v41, 1  ;;  %v8702_v27 = vrot.slane %v6754_v63, 2 }
 0x5ac   : > { %v20390_v50 = vpack.c.bf16 %v6501_v2, %v6501_v2  ;;  %v6768_v36 = vrot.slane %v6766_v7, 1  ;;  %v8710_v47 = vrot.slane %v6764_v20, 1  ;;  %v8711_v34 = vrot.slane %v6766_v7, 2  ;;  %v15585_v2 = vld [vmem:[%s22177_s6] ss:$16 sps:$4 sm:$0xff]  }
 0x5ad   : > { %v6759_v11 = vshll.u32 %v20388_v38, 16  ;;  %v8704_v8 = vshrl.u32 %v20388_v38, 16  ;;  %v6757_v39 = vor.u32 %v6756_v48, %v6752_v41  ;;  %v8703_v30 = vor.u32 %v8702_v27, %v8701_v56  ;;  %v15608_v56 = vld [vmem:[%s22177_s6 + $0x6c] ss:$16 sps:$4 sm:$0xff]   ;;  %v15609_v27 = vld [vmem:[%s22177_s6 + $0x80] ss:$16 sps:$4 sm:$0xff]  }
 0x5ae   : > { %v8713_v25 = vshrl.u32 %v20390_v50, 16  ;;  %v6769_v23 = vor.u32 %v6768_v36, %v6764_v20  ;;  %v6771_v33 = vshll.u32 %v20390_v50, 16  ;;  %v8712_v3 = vor.u32 %v8711_v34, %v8710_v47  ;;  %v15596_v47 = vld [vmem:[%s22177_s6 + $0x2c] ss:$16 sps:$4 sm:$0xff]   ;;  %v15599_v34 = vld [vmem:[%s22177_s6 + $0x44] ss:$16 sps:$4 sm:$0xff]  }
 0x5af   : > { %v6761_v14 = vrot.slane %v6759_v11, 1  ;;  %v8706_v21 = vrot.slane %v8704_v8, 1  ;;  %v8707_v16 = vrot.slane %v6759_v11, 2  ;;  %v15588_v8 = vld [vmem:[%s22177_s6 + $0x8] ss:$16 sps:$4 sm:$0xff]  }
 0x5b0   : > { %v6773_v4 = vrot.slane %v6771_v33, 1  ;;  %v8715_v1 = vrot.slane %v8713_v25, 1  ;;  %v8716_v6 = vrot.slane %v6771_v33, 2  ;;  %v15593_v33 = vld [vmem:[%s22177_s6 + $0x24] ss:$16 sps:$4 sm:$0xff]  }
 0x5b1   : > { %v6762_v43 = vsel %vm718_vm0, %v6757_v39, %v6761_v14  ;;  %v8708_v35 = vor.u32 %v8707_v16, %v8706_v21  ;;  %v15591_v21 = vld [vmem:[%s22177_s6 + $0x20] ss:$16 sps:$4 sm:$0xff]   ;;  %v15612_v16 = vld [vmem:[%s22177_s6 + $0x88] ss:$16 sps:$4 sm:$0xff]  }
 0x5b2   : > { %v6774_v28 = vsel %vm718_vm0, %v6769_v23, %v6773_v4  ;;  %v8717_v59 = vor.u32 %v8716_v6, %v8715_v1  ;;  %v15594_v4 = vld [vmem:[%s22177_s6 + $0x28] ss:$16 sps:$4 sm:$0xff]   ;;  %v15605_v6 = vld [vmem:[%s22177_s6 + $0x64] ss:$16 sps:$4 sm:$0xff]  }
 0x5b3   : > { %7225 = vmatprep.mubr.bf16.mxu0 %v6774_v28  ;;  %7311 = vmatprep.mubr.bf16.mxu1 %v6774_v28  ;;  %v20426_v17 = vsel %vm2336_vm2, %v8703_v30, %v8708_v35  ;;  %v15600_v1 = vld [vmem:[%s22177_s6 + $0x48] ss:$16 sps:$4 sm:$0xff]   ;;  %v15603_v28 = vld [vmem:[%s22177_s6 + $0x60] ss:$16 sps:$4 sm:$0xff]   ;;  %v15620_v30 = vld [vmem:[%s22177_s6 + $0xac] ss:$16 sps:$4 sm:$0xff]  }
 0x5b4   : > { %7226 = vmatmul.mubr.bf16.vlgmr.msra.gmra.mrb[48].mxu0 %v6762_v43  ;;  %7312 = vmatmul.mubr.bf16.vlgmr.msra.gmra.mrb[52].mxu1 %v6762_v43  ;;  %v20417_v22 = vsel %vm2336_vm2, %v8712_v3, %v8717_v59  ;;  %v15602_v43 = vld [vmem:[%s22177_s6 + $0x4c] ss:$16 sps:$4 sm:$0xff]   ;;  %v15617_v59 = vld [vmem:[%s22177_s6 + $0xa4] ss:$16 sps:$4 sm:$0xff]   ;;  %v15615_v35 = vld [vmem:[%s22177_s6 + $0xa0] ss:$16 sps:$4 sm:$0xff]  }
 0x5b5   : > { %7237 = vmatpush1.bf16.msra.mxu0 %v15561_v24  ;;  %7323 = vmatpush1.bf16.msra.mxu1 %v15564_v18  ;;  %v15597_v18 = vld [vmem:[%s22177_s6 + $0x40] ss:$16 sps:$4 sm:$0xff]   ;;  %v15614_v3 = vld [vmem:[%s22177_s6 + $0x8c] ss:$16 sps:$4 sm:$0xff]  }
 0x5b6   : > { %7238 = vmatprep.subr.bf16.mxu0 %v15569_v19  ;;  %7324 = vmatprep.subr.bf16.mxu1 %v15572_v54  ;;  %v15606_v19 = vld [vmem:[%s22177_s6 + $0x68] ss:$16 sps:$4 sm:$0xff]   ;;  %v15611_v54 = vld [vmem:[%s22177_s6 + $0x84] ss:$16 sps:$4 sm:$0xff]  }
 0x5b7   : > { %7268 = vmatprep.mubr.bf16.mxu0 %v16475_v57  ;;  %7354 = vmatprep.mubr.bf16.mxu1 %v16475_v57 }
 0x5b9   : > { %7239 = vmatpush1.bf16.msra.mxu0 %v15567_v52  ;;  %7325 = vmatpush1.bf16.msra.mxu1 %v15570_v61  ;;  %v15618_v52 = vld [vmem:[%s22177_s6 + $0xa8] ss:$16 sps:$4 sm:$0xff]   ;;  %v15623_v61 = vld [vmem:[%s22177_s6 + $0xc4] ss:$16 sps:$4 sm:$0xff]  }
 0x5ba   : > { %7240 = vmatprep.subr.bf16.mxu0 %v15575_v29  ;;  %7326 = vmatprep.subr.bf16.mxu1 %v15578_v26  ;;  %v15626_v29 = vld [vmem:[%s22177_s6 + $0xcc] ss:$16 sps:$4 sm:$0xff]   ;;  %v15621_v26 = vld [vmem:[%s22177_s6 + $0xc0] ss:$16 sps:$4 sm:$0xff]  }
 0x5bd   : > { %7241 = vmatpush1.bf16.msra.mxu0 %v15573_v51  ;;  %7327 = vmatpush1.bf16.msra.mxu1 %v15576_v49  ;;  %v15624_v51 = vld [vmem:[%s22177_s6 + $0xc8] ss:$16 sps:$4 sm:$0xff]   ;;  %v15629_v49 = vld [vmem:[%s22177_s6 + $0xe4] ss:$16 sps:$4 sm:$0xff]  }
 0x5be   : > { %7242 = vmatprep.subr.bf16.mxu0 %v15581_v42  ;;  %7328 = vmatprep.subr.bf16.mxu1 %v15584_v58  ;;  %v15632_v42 = vld [vmem:[%s22177_s6 + $0xec] ss:$16 sps:$4 sm:$0xff]   ;;  %v15627_v58 = vld [vmem:[%s22177_s6 + $0xe0] ss:$16 sps:$4 sm:$0xff]  }
 0x5c1   : > { %7243 = vmatpush1.bf16.msra.mxu0 %v15579_v13  ;;  %7329 = vmatpush1.bf16.msra.mxu1 %v15582_v55  ;;  %v15630_v13 = vld [vmem:[%s22177_s6 + $0xe8] ss:$16 sps:$4 sm:$0xff]   ;;  %v15635_v55 = vld [vmem:[%s22177_s6 + $0x104] ss:$16 sps:$4 sm:$0xff]  }
 0x5c2   : > { %7767 = vmatprep.subr.bf16.mxu0 %v15587_v31  ;;  %7853 = vmatprep.subr.bf16.mxu1 %v15590_v9  ;;  %v15638_v31 = vld [vmem:[%s22177_s6 + $0x10c] ss:$16 sps:$4 sm:$0xff]   ;;  %v15633_v9 = vld [vmem:[%s22177_s6 + $0x100] ss:$16 sps:$4 sm:$0xff]  }
 0x5f7   : > { %v6570_v37 = vpop.f32.mrb[40].mxu0 }
 0x5f8   : > { %v13950_v53 = vpop.f32.mrb[41].mxu0 }
 0x5f9   : > { %v15641_v53 = vld [vmem:[%s22177_s6 + $0x124] ss:$16 sps:$4 sm:$0xff]  }
 0x5fb   : > { %v6575_v62 = vpop.f32.mrb[42].mxu0 }
 0x5fc   : > { %v20454_v45 = vpack.c.bf16 %v6575_v62, %v6570_v37  ;;  %v13953_v32 = vpop.f32.mrb[43].mxu0  ;;  %v15636_v37 = vld [vmem:[%s22177_s6 + $0x108] ss:$16 sps:$4 sm:$0xff]   ;;  %v15644_v62 = vld [vmem:[%s22177_s6 + $0x12c] ss:$16 sps:$4 sm:$0xff]  }
 0x5fd   : > { %v15639_v32 = vld [vmem:[%s22177_s6 + $0x120] ss:$16 sps:$4 sm:$0xff]  }
 0x5fe   : > { %v6776_v12 = vshrl.u32 %v20454_v45, 16  ;;  %v6778_v0 = vshll.u32 %v20454_v45, 16 }
 0x5ff   : > { %v6580_v44 = vpop.f32.mrb[44].mxu0 }
 0x600   : > { %v20458_v15 = vpack.c.bf16 %v6580_v44, %v6580_v44  ;;  %v13956_v10 = vpop.f32.mrb[45].mxu0  ;;  %v6780_v41 = vrot.slane %v6778_v0, 1  ;;  %v8719_v63 = vrot.slane %v6776_v12, 1  ;;  %v8720_v60 = vrot.slane %v6778_v0, 2  ;;  %v15647_v0 = vld [vmem:[%s22177_s6 + $0x144] ss:$16 sps:$4 sm:$0xff]  }
 0x601   : > { %v15650_v44 = vld [vmem:[%s22177_s6 + $0x14c] ss:$16 sps:$4 sm:$0xff]   ;;  %v15645_v10 = vld [vmem:[%s22177_s6 + $0x140] ss:$16 sps:$4 sm:$0xff]  }
 0x602   : > { %v6783_v20 = vshll.u32 %v20458_v15, 16  ;;  %v8722_v7 = vshrl.u32 %v20458_v15, 16  ;;  %v8721_v48 = vor.u32 %v8720_v60, %v8719_v63  ;;  %v6781_v39 = vor.u32 %v6780_v41, %v6776_v12  ;;  %v15642_v12 = vld [vmem:[%s22177_s6 + $0x128] ss:$16 sps:$4 sm:$0xff]   ;;  %v15653_v63 = vld [vmem:[%s22177_s6 + $0x164] ss:$16 sps:$4 sm:$0xff]  }
 0x603   : > { %v15648_v41 = vld [vmem:[%s22177_s6 + $0x148] ss:$16 sps:$4 sm:$0xff]   ;;  %v15656_v60 = vld [vmem:[%s22177_s6 + $0x16c] ss:$16 sps:$4 sm:$0xff]  }
 0x604   : > { %v8724_v36 = vrot.slane %v8722_v7, 1  ;;  %v8725_v11 = vrot.slane %v6783_v20, 2  ;;  %v6785_v25 = vrot.slane %v6783_v20, 1  ;;  %v15651_v20 = vld [vmem:[%s22177_s6 + $0x160] ss:$16 sps:$4 sm:$0xff]  }
 0x605   : > { %v15654_v7 = vld [vmem:[%s22177_s6 + $0x168] ss:$16 sps:$4 sm:$0xff]  }
 0x606   : > { %v6786_v23 = vsel %vm718_vm0, %v6781_v39, %v6785_v25  ;;  %v8726_v14 = vor.u32 %v8725_v11, %v8724_v36  ;;  %v15657_v36 = vld [vmem:[%s22177_s6 + $0x180] ss:$16 sps:$4 sm:$0xff]   ;;  %v15660_v11 = vld [vmem:[%s22177_s6 + $0x188] ss:$16 sps:$4 sm:$0xff]   ;;  %v15668_v39 = vld [vmem:[%s22177_s6 + $0x1ac] ss:$16 sps:$4 sm:$0xff]  }
 0x607   : > { %12913 = vmatmul.mubr.msk.bf16.vlgmr.msra.gmra.mrb[48].mxu0 %vm7189_vm11, %v6786_v23  ;;  %12914 = vmatmul.mubr.msk.bf16.vlgmr.msra.gmra.mrb[52].mxu1 %vm7189_vm11, %v6786_v23  ;;  %v15663_v25 = vld [vmem:[%s22177_s6 + $0x1a0] ss:$16 sps:$4 sm:$0xff]   ;;  %v15666_v23 = vld [vmem:[%s22177_s6 + $0x1a8] ss:$16 sps:$4 sm:$0xff]  }
 0x608   : > { %7768 = vmatpush1.bf16.msra.mxu0 %v15585_v2  ;;  %7854 = vmatpush1.bf16.msra.mxu1 %v15588_v8  ;;  %v20484_v24 = vsel %vm2336_vm2, %v8721_v48, %v8726_v14  ;;  %v15659_v2 = vld [vmem:[%s22177_s6 + $0x184] ss:$16 sps:$4 sm:$0xff]   ;;  %v15662_v48 = vld [vmem:[%s22177_s6 + $0x18c] ss:$16 sps:$4 sm:$0xff]   ;;  %v15669_v14 = vld [vmem:[%s22177_s6 + $0x1c0] ss:$16 sps:$4 sm:$0xff]  }
 0x609   : > { %7799 = vmatprep.mubr.bf16.mxu0 %v20382_v46  ;;  %7885 = vmatprep.mubr.bf16.mxu1 %v20382_v46  ;;  %v15665_v8 = vld [vmem:[%s22177_s6 + $0x1a4] ss:$16 sps:$4 sm:$0xff]  }
 0x60a   : > { %7769 = vmatprep.subr.bf16.mxu0 %v15593_v33  ;;  %7855 = vmatprep.subr.bf16.mxu1 %v15596_v47  ;;  %v15671_v33 = vld [vmem:[%s22177_s6 + $0x1c4] ss:$16 sps:$4 sm:$0xff]   ;;  %v15674_v47 = vld [vmem:[%s22177_s6 + $0x1cc] ss:$16 sps:$4 sm:$0xff]  }
 0x60c   : > { %7770 = vmatpush1.bf16.msra.mxu0 %v15591_v21  ;;  %7856 = vmatpush1.bf16.msra.mxu1 %v15594_v4  ;;  %v15672_v21 = vld [vmem:[%s22177_s6 + $0x1c8] ss:$16 sps:$4 sm:$0xff]   ;;  %v15677_v4 = vld [vmem:[%s22177_s6 + $0x1e4] ss:$16 sps:$4 sm:$0xff]  }
 0x60d   : > { %7771 = vmatprep.subr.bf16.mxu0 %v15599_v34  ;;  %7857 = vmatprep.subr.bf16.mxu1 %v15602_v43  ;;  %v15680_v34 = vld [vmem:[%s22177_s6 + $0x1ec] ss:$16 sps:$4 sm:$0xff]   ;;  %v15675_v43 = vld [vmem:[%s22177_s6 + $0x1e0] ss:$16 sps:$4 sm:$0xff]  }
 0x610   : > { %7772 = vmatpush1.bf16.msra.mxu0 %v15597_v18  ;;  %7858 = vmatpush1.bf16.msra.mxu1 %v15600_v1  ;;  %v15678_v18 = vld [vmem:[%s22177_s6 + $0x1e8] ss:$16 sps:$4 sm:$0xff]   ;;  %v15683_v1 = vld [vmem:[%s22177_s6 + $0x204] ss:$16 sps:$4 sm:$0xff]  }
 0x611   : > { %7773 = vmatprep.subr.bf16.mxu0 %v15605_v6  ;;  %7859 = vmatprep.subr.bf16.mxu1 %v15608_v56  ;;  %v15686_v6 = vld [vmem:[%s22177_s6 + $0x20c] ss:$16 sps:$4 sm:$0xff]   ;;  %v15681_v56 = vld [vmem:[%s22177_s6 + $0x200] ss:$16 sps:$4 sm:$0xff]  }
 0x614   : > { %7774 = vmatpush1.bf16.msra.mxu0 %v15603_v28  ;;  %7860 = vmatpush1.bf16.msra.mxu1 %v15606_v19  ;;  %v15684_v28 = vld [vmem:[%s22177_s6 + $0x208] ss:$16 sps:$4 sm:$0xff]   ;;  %v15689_v19 = vld [vmem:[%s22177_s6 + $0x224] ss:$16 sps:$4 sm:$0xff]  }
 0x615   : > { %7775 = vmatprep.subr.bf16.mxu0 %v15611_v54  ;;  %7861 = vmatprep.subr.bf16.mxu1 %v15614_v3  ;;  %v15692_v54 = vld [vmem:[%s22177_s6 + $0x22c] ss:$16 sps:$4 sm:$0xff]   ;;  %v15687_v3 = vld [vmem:[%s22177_s6 + $0x220] ss:$16 sps:$4 sm:$0xff]  }
 0x618   : > { %7776 = vmatpush1.bf16.msra.mxu0 %v15609_v27  ;;  %7862 = vmatpush1.bf16.msra.mxu1 %v15612_v16  ;;  %v15690_v27 = vld [vmem:[%s22177_s6 + $0x228] ss:$16 sps:$4 sm:$0xff]   ;;  %v15695_v16 = vld [vmem:[%s22177_s6 + $0x244] ss:$16 sps:$4 sm:$0xff]  }
 0x619   : > { %7777 = vmatprep.subr.bf16.mxu0 %v15617_v59  ;;  %7863 = vmatprep.subr.bf16.mxu1 %v15620_v30  ;;  %v15698_v59 = vld [vmem:[%s22177_s6 + $0x24c] ss:$16 sps:$4 sm:$0xff]   ;;  %v15693_v30 = vld [vmem:[%s22177_s6 + $0x240] ss:$16 sps:$4 sm:$0xff]  }
 0x61c   : > { %7778 = vmatpush1.bf16.msra.mxu0 %v15615_v35  ;;  %7864 = vmatpush1.bf16.msra.mxu1 %v15618_v52  ;;  %v15696_v35 = vld [vmem:[%s22177_s6 + $0x248] ss:$16 sps:$4 sm:$0xff]   ;;  %v15701_v52 = vld [vmem:[%s22177_s6 + $0x264] ss:$16 sps:$4 sm:$0xff]  }
 0x61d   : > { %7779 = vmatprep.subr.bf16.mxu0 %v15623_v61  ;;  %7865 = vmatprep.subr.bf16.mxu1 %v15626_v29  ;;  %v15704_v61 = vld [vmem:[%s22177_s6 + $0x26c] ss:$16 sps:$4 sm:$0xff]   ;;  %v15699_v29 = vld [vmem:[%s22177_s6 + $0x260] ss:$16 sps:$4 sm:$0xff]  }
 0x620   : > { %7780 = vmatpush1.bf16.msra.mxu0 %v15621_v26  ;;  %7866 = vmatpush1.bf16.msra.mxu1 %v15624_v51  ;;  %v15702_v26 = vld [vmem:[%s22177_s6 + $0x268] ss:$16 sps:$4 sm:$0xff]   ;;  %v15707_v51 = vld [vmem:[%s22177_s6 + $0x504] ss:$16 sps:$4 sm:$0xff]  }
 0x621   : > { %7781 = vmatprep.subr.bf16.mxu0 %v15629_v49  ;;  %7867 = vmatprep.subr.bf16.mxu1 %v15632_v42  ;;  %v15710_v49 = vld [vmem:[%s22177_s6 + $0x50c] ss:$16 sps:$4 sm:$0xff]   ;;  %v8029_v42 = vrot.slane %v20382_v46, 1 }
 0x624   : > { %7782 = vmatpush1.bf16.msra.mxu0 %v15627_v58  ;;  %7868 = vmatpush1.bf16.msra.mxu1 %v15630_v13  ;;  %v8030_v58 = vrot.slane %v20390_v50, 1  ;;  %v15705_v13 = vld [vmem:[%s22177_s6 + $0x500] ss:$16 sps:$4 sm:$0xff]  }
 0x625   : > { %7783 = vmatprep.subr.bf16.mxu0 %v15635_v55  ;;  %7869 = vmatprep.subr.bf16.mxu1 %v15638_v31  ;;  %v15708_v55 = vld [vmem:[%s22177_s6 + $0x508] ss:$16 sps:$4 sm:$0xff]   ;;  %v15713_v31 = vld [vmem:[%s22177_s6 + $0x524] ss:$16 sps:$4 sm:$0xff]  }
 0x628   : > { %7784 = vmatpush1.bf16.msra.mxu0 %v15633_v9  ;;  %7870 = vmatpush1.bf16.msra.mxu1 %v15636_v37  ;;  %v15716_v9 = vld [vmem:[%s22177_s6 + $0x52c] ss:$16 sps:$4 sm:$0xff]   ;;  %v8031_v37 = vsel %vm1763_vm3, %v8029_v42, %v8030_v58  ;;  %v15785_v42 = vld [vmem:[%s22177_s6 + $0x6a4] ss:$16 sps:$4 sm:$0xff]  }
 0x629   : > { %7785 = vmatprep.subr.bf16.mxu0 %v15641_v53  ;;  %7871 = vmatprep.subr.bf16.mxu1 %v15644_v62  ;;  %v15711_v53 = vld [vmem:[%s22177_s6 + $0x520] ss:$16 sps:$4 sm:$0xff]   ;;  %v15714_v62 = vld [vmem:[%s22177_s6 + $0x528] ss:$16 sps:$4 sm:$0xff]   ;;  %v15788_v58 = vld [vmem:[%s22177_s6 + $0x6ac] ss:$16 sps:$4 sm:$0xff]  }
 0x62c   : > { %7786 = vmatpush1.bf16.msra.mxu0 %v15639_v32  ;;  %7872 = vmatpush1.bf16.msra.mxu1 %v15642_v12  ;;  %v15719_v32 = vld [vmem:[%s22177_s6 + $0x544] ss:$16 sps:$4 sm:$0xff]   ;;  %v15722_v12 = vld [vmem:[%s22177_s6 + $0x54c] ss:$16 sps:$4 sm:$0xff]  }
 0x62d   : > { %7787 = vmatprep.subr.bf16.mxu0 %v15647_v0  ;;  %7873 = vmatprep.subr.bf16.mxu1 %v15650_v44  ;;  %v15717_v0 = vld [vmem:[%s22177_s6 + $0x540] ss:$16 sps:$4 sm:$0xff]   ;;  %v15720_v44 = vld [vmem:[%s22177_s6 + $0x548] ss:$16 sps:$4 sm:$0xff]  }
 0x630   : > { %7788 = vmatpush1.bf16.msra.mxu0 %v15645_v10  ;;  %7874 = vmatpush1.bf16.msra.mxu1 %v15648_v41  ;;  %v15725_v10 = vld [vmem:[%s22177_s6 + $0x564] ss:$16 sps:$4 sm:$0xff]   ;;  %v15728_v41 = vld [vmem:[%s22177_s6 + $0x56c] ss:$16 sps:$4 sm:$0xff]  }
 0x631   : > { %7789 = vmatprep.subr.bf16.mxu0 %v15653_v63  ;;  %7875 = vmatprep.subr.bf16.mxu1 %v15656_v60  ;;  %v15723_v63 = vld [vmem:[%s22177_s6 + $0x560] ss:$16 sps:$4 sm:$0xff]   ;;  %v15726_v60 = vld [vmem:[%s22177_s6 + $0x568] ss:$16 sps:$4 sm:$0xff]  }
 0x634   : > { %7790 = vmatpush1.bf16.msra.mxu0 %v15651_v20  ;;  %7876 = vmatpush1.bf16.msra.mxu1 %v15654_v7  ;;  %v15731_v20 = vld [vmem:[%s22177_s6 + $0x584] ss:$16 sps:$4 sm:$0xff]   ;;  %v15734_v7 = vld [vmem:[%s22177_s6 + $0x58c] ss:$16 sps:$4 sm:$0xff]  }
 0x635   : > { %7791 = vmatprep.subr.bf16.mxu0 %v15659_v2  ;;  %7877 = vmatprep.subr.bf16.mxu1 %v15662_v48  ;;  %v15729_v2 = vld [vmem:[%s22177_s6 + $0x580] ss:$16 sps:$4 sm:$0xff]   ;;  %v15732_v48 = vld [vmem:[%s22177_s6 + $0x588] ss:$16 sps:$4 sm:$0xff]  }
 0x638   : > { %7792 = vmatpush1.bf16.msra.mxu0 %v15657_v36  ;;  %7878 = vmatpush1.bf16.msra.mxu1 %v15660_v11  ;;  %v15737_v36 = vld [vmem:[%s22177_s6 + $0x5a4] ss:$16 sps:$4 sm:$0xff]   ;;  %v15740_v11 = vld [vmem:[%s22177_s6 + $0x5ac] ss:$16 sps:$4 sm:$0xff]  }
 0x639   : > { %7793 = vmatprep.subr.bf16.mxu0 %v15665_v8  ;;  %7879 = vmatprep.subr.bf16.mxu1 %v15668_v39  ;;  %v15735_v8 = vld [vmem:[%s22177_s6 + $0x5a0] ss:$16 sps:$4 sm:$0xff]   ;;  %v15738_v39 = vld [vmem:[%s22177_s6 + $0x5a8] ss:$16 sps:$4 sm:$0xff]  }
 0x63c   : > { %7794 = vmatpush1.bf16.msra.mxu0 %v15663_v25  ;;  %7880 = vmatpush1.bf16.msra.mxu1 %v15666_v23  ;;  %v15743_v25 = vld [vmem:[%s22177_s6 + $0x5c4] ss:$16 sps:$4 sm:$0xff]   ;;  %v15746_v23 = vld [vmem:[%s22177_s6 + $0x5cc] ss:$16 sps:$4 sm:$0xff]  }
 0x63d   : > { %7795 = vmatprep.subr.bf16.mxu0 %v15671_v33  ;;  %7881 = vmatprep.subr.bf16.mxu1 %v15674_v47  ;;  %v15741_v33 = vld [vmem:[%s22177_s6 + $0x5c0] ss:$16 sps:$4 sm:$0xff]   ;;  %v15744_v47 = vld [vmem:[%s22177_s6 + $0x5c8] ss:$16 sps:$4 sm:$0xff]  }
 0x640   : > { %7796 = vmatpush1.bf16.msra.mxu0 %v15669_v14  ;;  %7882 = vmatpush1.bf16.msra.mxu1 %v15672_v21  ;;  %v15749_v14 = vld [vmem:[%s22177_s6 + $0x5e4] ss:$16 sps:$4 sm:$0xff]   ;;  %v15752_v21 = vld [vmem:[%s22177_s6 + $0x5ec] ss:$16 sps:$4 sm:$0xff]  }
 0x641   : > { %7797 = vmatprep.subr.bf16.mxu0 %v15677_v4  ;;  %7883 = vmatprep.subr.bf16.mxu1 %v15680_v34  ;;  %v15747_v4 = vld [vmem:[%s22177_s6 + $0x5e0] ss:$16 sps:$4 sm:$0xff]   ;;  %v15750_v34 = vld [vmem:[%s22177_s6 + $0x5e8] ss:$16 sps:$4 sm:$0xff]  }
 0x644   : > { %7798 = vmatpush1.bf16.msra.mxu0 %v15675_v43  ;;  %7884 = vmatpush1.bf16.msra.mxu1 %v15678_v18  ;;  %v15755_v43 = vld [vmem:[%s22177_s6 + $0x604] ss:$16 sps:$4 sm:$0xff]   ;;  %v15758_v18 = vld [vmem:[%s22177_s6 + $0x60c] ss:$16 sps:$4 sm:$0xff]  }
 0x645   : > { %7810 = vmatprep.subr.bf16.mxu0 %v15683_v1  ;;  %7896 = vmatprep.subr.bf16.mxu1 %v15686_v6  ;;  %v15753_v1 = vld [vmem:[%s22177_s6 + $0x600] ss:$16 sps:$4 sm:$0xff]   ;;  %v15756_v6 = vld [vmem:[%s22177_s6 + $0x608] ss:$16 sps:$4 sm:$0xff]  }
 0x647   : > { %7800 = vmatmul.mubr.bf16.vlgmr.msra.gmra.mrb[48].mxu0 %v20380_v40  ;;  %7886 = vmatmul.mubr.bf16.vlgmr.msra.gmra.mrb[52].mxu1 %v20380_v40 }
 0x648   : > { %7811 = vmatpush1.bf16.msra.mxu0 %v15681_v56  ;;  %7897 = vmatpush1.bf16.msra.mxu1 %v15684_v28  ;;  %v15761_v56 = vld [vmem:[%s22177_s6 + $0x624] ss:$16 sps:$4 sm:$0xff]   ;;  %v15764_v28 = vld [vmem:[%s22177_s6 + $0x62c] ss:$16 sps:$4 sm:$0xff]  }
 0x649   : > { %7812 = vmatprep.subr.bf16.mxu0 %v15689_v19  ;;  %7898 = vmatprep.subr.bf16.mxu1 %v15692_v54  ;;  %v15759_v19 = vld [vmem:[%s22177_s6 + $0x620] ss:$16 sps:$4 sm:$0xff]   ;;  %v15762_v54 = vld [vmem:[%s22177_s6 + $0x628] ss:$16 sps:$4 sm:$0xff]  }
 0x64a   : > { %7842 = vmatprep.mubr.bf16.mxu0 %v16475_v57  ;;  %7928 = vmatprep.mubr.bf16.mxu1 %v16475_v57 }
 0x64c   : > { %7813 = vmatpush1.bf16.msra.mxu0 %v15687_v3  ;;  %7899 = vmatpush1.bf16.msra.mxu1 %v15690_v27  ;;  %v15767_v3 = vld [vmem:[%s22177_s6 + $0x644] ss:$16 sps:$4 sm:$0xff]   ;;  %v15770_v27 = vld [vmem:[%s22177_s6 + $0x64c] ss:$16 sps:$4 sm:$0xff]  }
 0x64d   : > { %7814 = vmatprep.subr.bf16.mxu0 %v15695_v16  ;;  %7900 = vmatprep.subr.bf16.mxu1 %v15698_v59  ;;  %v15765_v16 = vld [vmem:[%s22177_s6 + $0x640] ss:$16 sps:$4 sm:$0xff]   ;;  %v15768_v59 = vld [vmem:[%s22177_s6 + $0x648] ss:$16 sps:$4 sm:$0xff]  }
 0x650   : > { %7815 = vmatpush1.bf16.msra.mxu0 %v15693_v30  ;;  %7901 = vmatpush1.bf16.msra.mxu1 %v15696_v35  ;;  %v15773_v30 = vld [vmem:[%s22177_s6 + $0x664] ss:$16 sps:$4 sm:$0xff]   ;;  %v15776_v35 = vld [vmem:[%s22177_s6 + $0x66c] ss:$16 sps:$4 sm:$0xff]  }
 0x651   : > { %7816 = vmatprep.subr.bf16.mxu0 %v15701_v52  ;;  %7902 = vmatprep.subr.bf16.mxu1 %v15704_v61  ;;  %v15771_v52 = vld [vmem:[%s22177_s6 + $0x660] ss:$16 sps:$4 sm:$0xff]   ;;  %v15774_v61 = vld [vmem:[%s22177_s6 + $0x668] ss:$16 sps:$4 sm:$0xff]  }
 0x654   : > { %7817 = vmatpush1.bf16.msra.mxu0 %v15699_v29  ;;  %7903 = vmatpush1.bf16.msra.mxu1 %v15702_v26  ;;  %v15779_v29 = vld [vmem:[%s22177_s6 + $0x684] ss:$16 sps:$4 sm:$0xff]   ;;  %v15782_v26 = vld [vmem:[%s22177_s6 + $0x68c] ss:$16 sps:$4 sm:$0xff]  }
 0x655   : > { %8440 = vmatprep.subr.bf16.mxu0 %v15707_v51  ;;  %8526 = vmatprep.subr.bf16.mxu1 %v15710_v49  ;;  %v15777_v51 = vld [vmem:[%s22177_s6 + $0x680] ss:$16 sps:$4 sm:$0xff]   ;;  %v15780_v49 = vld [vmem:[%s22177_s6 + $0x688] ss:$16 sps:$4 sm:$0xff]  }
 0x657   : > { %12995 = vmatmul.mubr.msk.bf16.vlgmr.msra.gmra.mrb[48].mxu0 %vm7189_vm11, %v20454_v45  ;;  %12996 = vmatmul.mubr.msk.bf16.vlgmr.msra.gmra.mrb[52].mxu1 %vm7189_vm11, %v20454_v45 }
 0x658   : > { %8441 = vmatpush1.bf16.msra.mxu0 %v15705_v13  ;;  %8472 = vmatprep.mubr.bf16.mxu0 %v8031_v37  ;;  %v15783_v13 = vld [vmem:[%s22177_s6 + $0x6a0] ss:$16 sps:$4 sm:$0xff]  }
 0x659   : > { %8527 = vmatpush1.bf16.msra.mxu1 %v15708_v55  ;;  %8558 = vmatprep.mubr.bf16.mxu1 %v8031_v37  ;;  %v15786_v55 = vld [vmem:[%s22177_s6 + $0x6a8] ss:$16 sps:$4 sm:$0xff]   ;;  %v15789_v37 = vld [vmem:[%s22177_s6 + $0x6c0] ss:$16 sps:$4 sm:$0xff]  }
 0x65a   : > { %8442 = vmatprep.subr.bf16.mxu0 %v15713_v31  ;;  %8528 = vmatprep.subr.bf16.mxu1 %v15716_v9  ;;  %v15791_v31 = vld [vmem:[%s22177_s6 + $0x6c4] ss:$16 sps:$4 sm:$0xff]   ;;  %v15794_v9 = vld [vmem:[%s22177_s6 + $0x6cc] ss:$16 sps:$4 sm:$0xff]  }
 0x65c   : > { %8443 = vmatpush1.bf16.msra.mxu0 %v15711_v53  ;;  %v15792_v53 = vld [vmem:[%s22177_s6 + $0x6c8] ss:$16 sps:$4 sm:$0xff]  }
 0x65d   : > { %8529 = vmatpush1.bf16.msra.mxu1 %v15714_v62  ;;  %8444 = vmatprep.subr.bf16.mxu0 %v15719_v32  ;;  %v15797_v62 = vld [vmem:[%s22177_s6 + $0x6e4] ss:$16 sps:$4 sm:$0xff]   ;;  %v15800_v32 = vld [vmem:[%s22177_s6 + $0x6ec] ss:$16 sps:$4 sm:$0xff]  }
 0x65e   : > { %8530 = vmatprep.subr.bf16.mxu1 %v15722_v12  ;;  %v15795_v12 = vld [vmem:[%s22177_s6 + $0x6e0] ss:$16 sps:$4 sm:$0xff]  }
 0x660   : > { %8445 = vmatpush1.bf16.msra.mxu0 %v15717_v0  ;;  %v15798_v0 = vld [vmem:[%s22177_s6 + $0x6e8] ss:$16 sps:$4 sm:$0xff]  }
 0x661   : > { %8531 = vmatpush1.bf16.msra.mxu1 %v15720_v44  ;;  %8446 = vmatprep.subr.bf16.mxu0 %v15725_v10  ;;  %v15803_v44 = vld [vmem:[%s22177_s6 + $0x704] ss:$16 sps:$4 sm:$0xff]   ;;  %v8026_v10 = vrot.slane %v20380_v40, 1 }
 0x662   : > { %8532 = vmatprep.subr.bf16.mxu1 %v15728_v41  ;;  %v8027_v41 = vrot.slane %v20388_v38, 1 }
 0x664   : > { %8447 = vmatpush1.bf16.msra.mxu0 %v15723_v63  ;;  %v15806_v63 = vld [vmem:[%s22177_s6 + $0x70c] ss:$16 sps:$4 sm:$0xff]  }
 0x665   : > { %8533 = vmatpush1.bf16.msra.mxu1 %v15726_v60  ;;  %8448 = vmatprep.subr.bf16.mxu0 %v15731_v20  ;;  %v15801_v60 = vld [vmem:[%s22177_s6 + $0x700] ss:$16 sps:$4 sm:$0xff]   ;;  %v15804_v20 = vld [vmem:[%s22177_s6 + $0x708] ss:$16 sps:$4 sm:$0xff]  }
 0x666   : > { %8534 = vmatprep.subr.bf16.mxu1 %v15734_v7  ;;  %v15809_v7 = vld [vmem:[%s22177_s6 + $0x724] ss:$16 sps:$4 sm:$0xff]  }
 0x668   : > { %8449 = vmatpush1.bf16.msra.mxu0 %v15729_v2  ;;  %v8028_v2 = vsel %vm1763_vm3, %v8026_v10, %v8027_v41  ;;  %v15878_v10 = vld [vmem:[%s22177_s6 + $0x88c] ss:$16 sps:$4 sm:$0xff]   ;;  %v15873_v41 = vld [vmem:[%s22177_s6 + $0x880] ss:$16 sps:$4 sm:$0xff]  }
 0x669   : > { %8535 = vmatpush1.bf16.msra.mxu1 %v15732_v48  ;;  %8450 = vmatprep.subr.bf16.mxu0 %v15737_v36  ;;  %v15812_v48 = vld [vmem:[%s22177_s6 + $0x72c] ss:$16 sps:$4 sm:$0xff]   ;;  %v15807_v36 = vld [vmem:[%s22177_s6 + $0x720] ss:$16 sps:$4 sm:$0xff]  }
 0x66a   : > { %8536 = vmatprep.subr.bf16.mxu1 %v15740_v11  ;;  %v15810_v11 = vld [vmem:[%s22177_s6 + $0x728] ss:$16 sps:$4 sm:$0xff]  }
 0x66c   : > { %8451 = vmatpush1.bf16.msra.mxu0 %v15735_v8  ;;  %v15815_v8 = vld [vmem:[%s22177_s6 + $0x744] ss:$16 sps:$4 sm:$0xff]  }
 0x66d   : > { %8537 = vmatpush1.bf16.msra.mxu1 %v15738_v39  ;;  %8452 = vmatprep.subr.bf16.mxu0 %v15743_v25  ;;  %v15818_v39 = vld [vmem:[%s22177_s6 + $0x74c] ss:$16 sps:$4 sm:$0xff]   ;;  %v15813_v25 = vld [vmem:[%s22177_s6 + $0x740] ss:$16 sps:$4 sm:$0xff]  }
 0x66e   : > { %8538 = vmatprep.subr.bf16.mxu1 %v15746_v23  ;;  %v15816_v23 = vld [vmem:[%s22177_s6 + $0x748] ss:$16 sps:$4 sm:$0xff]  }
 0x670   : > { %8453 = vmatpush1.bf16.msra.mxu0 %v15741_v33  ;;  %v15821_v33 = vld [vmem:[%s22177_s6 + $0x764] ss:$16 sps:$4 sm:$0xff]  }
 0x671   : > { %8539 = vmatpush1.bf16.msra.mxu1 %v15744_v47  ;;  %8454 = vmatprep.subr.bf16.mxu0 %v15749_v14  ;;  %v15824_v47 = vld [vmem:[%s22177_s6 + $0x76c] ss:$16 sps:$4 sm:$0xff]   ;;  %v15819_v14 = vld [vmem:[%s22177_s6 + $0x760] ss:$16 sps:$4 sm:$0xff]  }
 0x672   : > { %8540 = vmatprep.subr.bf16.mxu1 %v15752_v21  ;;  %v15822_v21 = vld [vmem:[%s22177_s6 + $0x768] ss:$16 sps:$4 sm:$0xff]  }
 0x674   : > { %8455 = vmatpush1.bf16.msra.mxu0 %v15747_v4  ;;  %v15827_v4 = vld [vmem:[%s22177_s6 + $0x784] ss:$16 sps:$4 sm:$0xff]  }
 0x675   : > { %8541 = vmatpush1.bf16.msra.mxu1 %v15750_v34  ;;  %8456 = vmatprep.subr.bf16.mxu0 %v15755_v43  ;;  %v8033_v34 = vrot.slane %v20458_v15, 1  ;;  %v15830_v43 = vld [vmem:[%s22177_s6 + $0x78c] ss:$16 sps:$4 sm:$0xff]  }
 0x676   : > { %8542 = vmatprep.subr.bf16.mxu1 %v15758_v18  ;;  %v8032_v18 = vrot.slane %v20454_v45, 1 }
 0x678   : > { %8457 = vmatpush1.bf16.msra.mxu0 %v15753_v1  ;;  %v15825_v1 = vld [vmem:[%s22177_s6 + $0x780] ss:$16 sps:$4 sm:$0xff]  }
 0x679   : > { %8543 = vmatpush1.bf16.msra.mxu1 %v15756_v6  ;;  %8458 = vmatprep.subr.bf16.mxu0 %v15761_v56  ;;  %v15828_v6 = vld [vmem:[%s22177_s6 + $0x788] ss:$16 sps:$4 sm:$0xff]   ;;  %v8034_v56 = vsel %vm1763_vm3, %v8032_v18, %v8033_v34  ;;  %v15905_v34 = vld [vmem:[%s22177_s6 + $0x924] ss:$16 sps:$4 sm:$0xff]   ;;  %v15903_v18 = vld [vmem:[%s22177_s6 + $0x920] ss:$16 sps:$4 sm:$0xff]  }
 0x67a   : > { %8544 = vmatprep.subr.bf16.mxu1 %v15764_v28  ;;  %v15833_v28 = vld [vmem:[%s22177_s6 + $0x7a4] ss:$16 sps:$4 sm:$0xff]  }
 0x67c   : > { %8459 = vmatpush1.bf16.msra.mxu0 %v15759_v19  ;;  %v15836_v19 = vld [vmem:[%s22177_s6 + $0x7ac] ss:$16 sps:$4 sm:$0xff]  }
 0x67d   : > { %8545 = vmatpush1.bf16.msra.mxu1 %v15762_v54  ;;  %8460 = vmatprep.subr.bf16.mxu0 %v15767_v3  ;;  %v15831_v54 = vld [vmem:[%s22177_s6 + $0x7a0] ss:$16 sps:$4 sm:$0xff]   ;;  %v15834_v3 = vld [vmem:[%s22177_s6 + $0x7a8] ss:$16 sps:$4 sm:$0xff]  }
 0x67e   : > { %8546 = vmatprep.subr.bf16.mxu1 %v15770_v27  ;;  %v15839_v27 = vld [vmem:[%s22177_s6 + $0x7c4] ss:$16 sps:$4 sm:$0xff]  }
 0x680   : > { %8461 = vmatpush1.bf16.msra.mxu0 %v15765_v16  ;;  %v15842_v16 = vld [vmem:[%s22177_s6 + $0x7cc] ss:$16 sps:$4 sm:$0xff]  }
 0x681   : > { %8547 = vmatpush1.bf16.msra.mxu1 %v15768_v59  ;;  %8462 = vmatprep.subr.bf16.mxu0 %v15773_v30  ;;  %v15837_v59 = vld [vmem:[%s22177_s6 + $0x7c0] ss:$16 sps:$4 sm:$0xff]   ;;  %v15840_v30 = vld [vmem:[%s22177_s6 + $0x7c8] ss:$16 sps:$4 sm:$0xff]  }
 0x682   : > { %8548 = vmatprep.subr.bf16.mxu1 %v15776_v35  ;;  %v15848_v35 = vld [vmem:[%s22177_s6 + $0x7ec] ss:$16 sps:$4 sm:$0xff]  }
 0x684   : > { %8463 = vmatpush1.bf16.msra.mxu0 %v15771_v52  ;;  %v15843_v52 = vld [vmem:[%s22177_s6 + $0x7e0] ss:$16 sps:$4 sm:$0xff]  }
 0x685   : > { %8549 = vmatpush1.bf16.msra.mxu1 %v15774_v61  ;;  %8464 = vmatprep.subr.bf16.mxu0 %v15779_v29  ;;  %v15846_v61 = vld [vmem:[%s22177_s6 + $0x7e8] ss:$16 sps:$4 sm:$0xff]   ;;  %v15851_v29 = vld [vmem:[%s22177_s6 + $0x804] ss:$16 sps:$4 sm:$0xff]  }
 0x686   : > { %8550 = vmatprep.subr.bf16.mxu1 %v15782_v26  ;;  %v15854_v26 = vld [vmem:[%s22177_s6 + $0x80c] ss:$16 sps:$4 sm:$0xff]  }
 0x688   : > { %8465 = vmatpush1.bf16.msra.mxu0 %v15777_v51  ;;  %v15849_v51 = vld [vmem:[%s22177_s6 + $0x800] ss:$16 sps:$4 sm:$0xff]  }
 0x689   : > { %8551 = vmatpush1.bf16.msra.mxu1 %v15780_v49  ;;  %8466 = vmatprep.subr.bf16.mxu0 %v15785_v42  ;;  %v15852_v49 = vld [vmem:[%s22177_s6 + $0x808] ss:$16 sps:$4 sm:$0xff]   ;;  %v15857_v42 = vld [vmem:[%s22177_s6 + $0x824] ss:$16 sps:$4 sm:$0xff]  }
 0x68a   : > { %8552 = vmatprep.subr.bf16.mxu1 %v15788_v58  ;;  %v15860_v58 = vld [vmem:[%s22177_s6 + $0x82c] ss:$16 sps:$4 sm:$0xff]  }
 0x68c   : > { %8467 = vmatpush1.bf16.msra.mxu0 %v15783_v13  ;;  %v15855_v13 = vld [vmem:[%s22177_s6 + $0x820] ss:$16 sps:$4 sm:$0xff]  }
 0x68d   : > { %8553 = vmatpush1.bf16.msra.mxu1 %v15786_v55  ;;  %8468 = vmatprep.subr.bf16.mxu0 %v15791_v31  ;;  %v15858_v55 = vld [vmem:[%s22177_s6 + $0x828] ss:$16 sps:$4 sm:$0xff]   ;;  %v15863_v31 = vld [vmem:[%s22177_s6 + $0x844] ss:$16 sps:$4 sm:$0xff]  }
 0x68e   : > { %8554 = vmatprep.subr.bf16.mxu1 %v15794_v9  ;;  %v15866_v9 = vld [vmem:[%s22177_s6 + $0x84c] ss:$16 sps:$4 sm:$0xff]  }
 0x690   : > { %8469 = vmatpush1.bf16.msra.mxu0 %v15789_v37  ;;  %v15861_v37 = vld [vmem:[%s22177_s6 + $0x840] ss:$16 sps:$4 sm:$0xff]  }
 0x691   : > { %8555 = vmatpush1.bf16.msra.mxu1 %v15792_v53  ;;  %8470 = vmatprep.subr.bf16.mxu0 %v15797_v62  ;;  %v15864_v53 = vld [vmem:[%s22177_s6 + $0x848] ss:$16 sps:$4 sm:$0xff]   ;;  %v15869_v62 = vld [vmem:[%s22177_s6 + $0x864] ss:$16 sps:$4 sm:$0xff]  }
 0x692   : > { %8556 = vmatprep.subr.bf16.mxu1 %v15800_v32  ;;  %v15872_v32 = vld [vmem:[%s22177_s6 + $0x86c] ss:$16 sps:$4 sm:$0xff]  }
 0x694   : > { %8471 = vmatpush1.bf16.msra.mxu0 %v15795_v12  ;;  %v15867_v12 = vld [vmem:[%s22177_s6 + $0x860] ss:$16 sps:$4 sm:$0xff]  }
 0x695   : > { %8557 = vmatpush1.bf16.msra.mxu1 %v15798_v0  ;;  %8483 = vmatprep.subr.bf16.mxu0 %v15803_v44  ;;  %v15870_v0 = vld [vmem:[%s22177_s6 + $0x868] ss:$16 sps:$4 sm:$0xff]   ;;  %v15875_v44 = vld [vmem:[%s22177_s6 + $0x884] ss:$16 sps:$4 sm:$0xff]  }
 0x696   : > { %8569 = vmatprep.subr.bf16.mxu1 %v15806_v63  ;;  %v15876_v63 = vld [vmem:[%s22177_s6 + $0x888] ss:$16 sps:$4 sm:$0xff]  }
 0x697   : > { %8473 = vmatmul.mubr.bf16.vlgmr.msra.gmra.mrb[48].mxu0 %v8028_v2 }
 0x698   : > { %8559 = vmatmul.mubr.bf16.vlgmr.msra.gmra.mrb[52].mxu1 %v8028_v2  ;;  %8484 = vmatpush1.bf16.msra.mxu0 %v15801_v60  ;;  %v15881_v60 = vld [vmem:[%s22177_s6 + $0x8a4] ss:$16 sps:$4 sm:$0xff]   ;;  %v15882_v2 = vld [vmem:[%s22177_s6 + $0x8a8] ss:$16 sps:$4 sm:$0xff]  }
 0x699   : > { %8570 = vmatpush1.bf16.msra.mxu1 %v15804_v20  ;;  %8485 = vmatprep.subr.bf16.mxu0 %v15809_v7  ;;  %v15884_v20 = vld [vmem:[%s22177_s6 + $0x8ac] ss:$16 sps:$4 sm:$0xff]   ;;  %v15879_v7 = vld [vmem:[%s22177_s6 + $0x8a0] ss:$16 sps:$4 sm:$0xff]  }
 0x69a   : > { %8571 = vmatprep.subr.bf16.mxu1 %v15812_v48  ;;  %8515 = vmatprep.mubr.bf16.mxu0 %v16475_v57  ;;  %v15887_v48 = vld [vmem:[%s22177_s6 + $0x8c4] ss:$16 sps:$4 sm:$0xff]  }
 0x69b   : > { %8601 = vmatprep.mubr.bf16.mxu1 %v16475_v57 }
 0x69c   : > { %8486 = vmatpush1.bf16.msra.mxu0 %v15807_v36  ;;  %v15890_v36 = vld [vmem:[%s22177_s6 + $0x8cc] ss:$16 sps:$4 sm:$0xff]  }
 0x69d   : > { %8572 = vmatpush1.bf16.msra.mxu1 %v15810_v11  ;;  %8487 = vmatprep.subr.bf16.mxu0 %v15815_v8  ;;  %v15885_v11 = vld [vmem:[%s22177_s6 + $0x8c0] ss:$16 sps:$4 sm:$0xff]   ;;  %v15888_v8 = vld [vmem:[%s22177_s6 + $0x8c8] ss:$16 sps:$4 sm:$0xff]  }
 0x69e   : > { %8573 = vmatprep.subr.bf16.mxu1 %v15818_v39  ;;  %v15893_v39 = vld [vmem:[%s22177_s6 + $0x8e4] ss:$16 sps:$4 sm:$0xff]  }
 0x6a0   : > { %8488 = vmatpush1.bf16.msra.mxu0 %v15813_v25  ;;  %v15896_v25 = vld [vmem:[%s22177_s6 + $0x8ec] ss:$16 sps:$4 sm:$0xff]  }
 0x6a1   : > { %8574 = vmatpush1.bf16.msra.mxu1 %v15816_v23  ;;  %8489 = vmatprep.subr.bf16.mxu0 %v15821_v33  ;;  %v15891_v23 = vld [vmem:[%s22177_s6 + $0x8e0] ss:$16 sps:$4 sm:$0xff]   ;;  %v15894_v33 = vld [vmem:[%s22177_s6 + $0x8e8] ss:$16 sps:$4 sm:$0xff]  }
 0x6a2   : > { %8575 = vmatprep.subr.bf16.mxu1 %v15824_v47  ;;  %v15899_v47 = vld [vmem:[%s22177_s6 + $0x904] ss:$16 sps:$4 sm:$0xff]  }
 0x6a4   : > { %8490 = vmatpush1.bf16.msra.mxu0 %v15819_v14  ;;  %v15902_v14 = vld [vmem:[%s22177_s6 + $0x90c] ss:$16 sps:$4 sm:$0xff]  }
 0x6a5   : > { %8576 = vmatpush1.bf16.msra.mxu1 %v15822_v21  ;;  %9133 = vmatprep.subr.bf16.mxu0 %v15827_v4  ;;  %v15897_v21 = vld [vmem:[%s22177_s6 + $0x900] ss:$16 sps:$4 sm:$0xff]   ;;  %v15900_v4 = vld [vmem:[%s22177_s6 + $0x908] ss:$16 sps:$4 sm:$0xff]  }
 0x6a6   : > { %9219 = vmatprep.subr.bf16.mxu1 %v15830_v43  ;;  %v15908_v43 = vld [vmem:[%s22177_s6 + $0x92c] ss:$16 sps:$4 sm:$0xff]  }
 0x6a7   : > { %13157 = vmatmul.mubr.msk.bf16.vlgmr.msra.gmra.mrb[48].mxu0 %vm7189_vm11, %v8034_v56 }
 0x6a8   : > { %13158 = vmatmul.mubr.msk.bf16.vlgmr.msra.gmra.mrb[52].mxu1 %vm7189_vm11, %v8034_v56  ;;  %9134 = vmatpush1.bf16.msra.mxu0 %v15825_v1  ;;  %v15906_v1 = vld [vmem:[%s22177_s6 + $0x928] ss:$16 sps:$4 sm:$0xff]   ;;  %v15914_v56 = vld [vmem:[%s22177_s6 + $0x94c] ss:$16 sps:$4 sm:$0xff]  }
 0x6a9   : > { %9165 = vmatprep.mubr.bf16.mxu0 %v20417_v22  ;;  %9220 = vmatpush1.bf16.msra.mxu1 %v15828_v6  ;;  %v15911_v6 = vld [vmem:[%s22177_s6 + $0x944] ss:$16 sps:$4 sm:$0xff]  }
 0x6aa   : > { %9251 = vmatprep.mubr.bf16.mxu1 %v20417_v22  ;;  %9135 = vmatprep.subr.bf16.mxu0 %v15833_v28  ;;  %v15845_v22 = vld [vmem:[%s22177_s6 + $0x7e4] ss:$16 sps:$4 sm:$0xff]   ;;  %v15909_v28 = vld [vmem:[%s22177_s6 + $0x940] ss:$16 sps:$4 sm:$0xff]  }
 0x6ab   : > { %9221 = vmatprep.subr.bf16.mxu1 %v15836_v19  ;;  %v15912_v19 = vld [vmem:[%s22177_s6 + $0x948] ss:$16 sps:$4 sm:$0xff]  }
 0x6ac   : > { %9136 = vmatpush1.bf16.msra.mxu0 %v15831_v54  ;;  %v15917_v54 = vld [vmem:[%s22177_s6 + $0x964] ss:$16 sps:$4 sm:$0xff]  }
 0x6ad   : > { %9222 = vmatpush1.bf16.msra.mxu1 %v15834_v3  ;;  %9137 = vmatprep.subr.bf16.mxu0 %v15839_v27  ;;  %v15920_v3 = vld [vmem:[%s22177_s6 + $0x96c] ss:$16 sps:$4 sm:$0xff]   ;;  %v15915_v27 = vld [vmem:[%s22177_s6 + $0x960] ss:$16 sps:$4 sm:$0xff]  }
 0x6ae   : > { %9223 = vmatprep.subr.bf16.mxu1 %v15842_v16  ;;  %v15918_v16 = vld [vmem:[%s22177_s6 + $0x968] ss:$16 sps:$4 sm:$0xff]  }
 0x6b0   : > { %9138 = vmatpush1.bf16.msra.mxu0 %v15837_v59  ;;  %v15923_v59 = vld [vmem:[%s22177_s6 + $0x984] ss:$16 sps:$4 sm:$0xff]  }
 0x6b1   : > { %9224 = vmatpush1.bf16.msra.mxu1 %v15840_v30  ;;  %9139 = vmatprep.subr.bf16.mxu0 %v15845_v22  ;;  %v15926_v30 = vld [vmem:[%s22177_s6 + $0x98c] ss:$16 sps:$4 sm:$0xff]   ;;  %v15921_v22 = vld [vmem:[%s22177_s6 + $0x980] ss:$16 sps:$4 sm:$0xff]  }
 0x6b2   : > { %9225 = vmatprep.subr.bf16.mxu1 %v15848_v35  ;;  %v15924_v35 = vld [vmem:[%s22177_s6 + $0x988] ss:$16 sps:$4 sm:$0xff]  }
 0x6b4   : > { %9140 = vmatpush1.bf16.msra.mxu0 %v15843_v52  ;;  %v15929_v52 = vld [vmem:[%s22177_s6 + $0x9a4] ss:$16 sps:$4 sm:$0xff]  }
 0x6b5   : > { %9226 = vmatpush1.bf16.msra.mxu1 %v15846_v61  ;;  %9141 = vmatprep.subr.bf16.mxu0 %v15851_v29  ;;  %v15932_v61 = vld [vmem:[%s22177_s6 + $0x9ac] ss:$16 sps:$4 sm:$0xff]   ;;  %v15927_v29 = vld [vmem:[%s22177_s6 + $0x9a0] ss:$16 sps:$4 sm:$0xff]  }
 0x6b6   : > { %9227 = vmatprep.subr.bf16.mxu1 %v15854_v26  ;;  %v15930_v26 = vld [vmem:[%s22177_s6 + $0x9a8] ss:$16 sps:$4 sm:$0xff]  }
 0x6b8   : > { %9142 = vmatpush1.bf16.msra.mxu0 %v15849_v51  ;;  %v15935_v51 = vld [vmem:[%s22177_s6 + $0x9c4] ss:$16 sps:$4 sm:$0xff]  }
 0x6b9   : > { %9228 = vmatpush1.bf16.msra.mxu1 %v15852_v49  ;;  %9143 = vmatprep.subr.bf16.mxu0 %v15857_v42  ;;  %v15933_v49 = vld [vmem:[%s22177_s6 + $0x9c0] ss:$16 sps:$4 sm:$0xff]   ;;  %v15936_v42 = vld [vmem:[%s22177_s6 + $0x9c8] ss:$16 sps:$4 sm:$0xff]  }
 0x6ba   : > { %9229 = vmatprep.subr.bf16.mxu1 %v15860_v58  ;;  %v15941_v58 = vld [vmem:[%s22177_s6 + $0x9e4] ss:$16 sps:$4 sm:$0xff]  }
 0x6bc   : > { %9144 = vmatpush1.bf16.msra.mxu0 %v15855_v13  ;;  %v15944_v13 = vld [vmem:[%s22177_s6 + $0x9ec] ss:$16 sps:$4 sm:$0xff]  }
 0x6bd   : > { %9230 = vmatpush1.bf16.msra.mxu1 %v15858_v55  ;;  %9145 = vmatprep.subr.bf16.mxu0 %v15863_v31  ;;  %v15939_v55 = vld [vmem:[%s22177_s6 + $0x9e0] ss:$16 sps:$4 sm:$0xff]   ;;  %v15942_v31 = vld [vmem:[%s22177_s6 + $0x9e8] ss:$16 sps:$4 sm:$0xff]  }
 0x6be   : > { %9231 = vmatprep.subr.bf16.mxu1 %v15866_v9  ;;  %v15947_v9 = vld [vmem:[%s22177_s6 + $0xa04] ss:$16 sps:$4 sm:$0xff]  }
 0x6c0   : > { %9146 = vmatpush1.bf16.msra.mxu0 %v15861_v37  ;;  %v15950_v37 = vld [vmem:[%s22177_s6 + $0xa0c] ss:$16 sps:$4 sm:$0xff]  }
 0x6c1   : > { %9232 = vmatpush1.bf16.msra.mxu1 %v15864_v53  ;;  %9147 = vmatprep.subr.bf16.mxu0 %v15869_v62  ;;  %v15945_v53 = vld [vmem:[%s22177_s6 + $0xa00] ss:$16 sps:$4 sm:$0xff]   ;;  %v9397_v62 = vrot.slane %v20382_v46, 2  ;;  %v15956_v46 = vld [vmem:[%s22177_s6 + $0xa2c] ss:$16 sps:$4 sm:$0xff]  }
 0x6c2   : > { %9233 = vmatprep.subr.bf16.mxu1 %v15872_v32  ;;  %v9398_v32 = vrot.slane %v20390_v50, 2 }
 0x6c4   : > { %9148 = vmatpush1.bf16.msra.mxu0 %v15867_v12  ;;  %v15948_v12 = vld [vmem:[%s22177_s6 + $0xa08] ss:$16 sps:$4 sm:$0xff]   ;;  %v9399_v50 = vsel %vm2921_vm5, %v9397_v62, %v9398_v32  ;;  %v16029_v62 = vld [vmem:[%s22177_s6 + $0xbc0] ss:$16 sps:$4 sm:$0xff]  }
 0x6c5   : > { %9234 = vmatpush1.bf16.msra.mxu1 %v15870_v0  ;;  %9149 = vmatprep.subr.bf16.mxu0 %v15875_v44  ;;  %v15953_v0 = vld [vmem:[%s22177_s6 + $0xa24] ss:$16 sps:$4 sm:$0xff]   ;;  %v15951_v44 = vld [vmem:[%s22177_s6 + $0xa20] ss:$16 sps:$4 sm:$0xff]   ;;  %v16032_v32 = vld [vmem:[%s22177_s6 + $0xbc8] ss:$16 sps:$4 sm:$0xff]  }
 0x6c6   : > { %9235 = vmatprep.subr.bf16.mxu1 %v15878_v10  ;;  %v15954_v10 = vld [vmem:[%s22177_s6 + $0xa28] ss:$16 sps:$4 sm:$0xff]  }
 0x6c8   : > { %9150 = vmatpush1.bf16.msra.mxu0 %v15873_v41  ;;  %v15959_v41 = vld [vmem:[%s22177_s6 + $0xa44] ss:$16 sps:$4 sm:$0xff]  }
 0x6c9   : > { %9236 = vmatpush1.bf16.msra.mxu1 %v15876_v63  ;;  %9151 = vmatprep.subr.bf16.mxu0 %v15881_v60  ;;  %v15957_v63 = vld [vmem:[%s22177_s6 + $0xa40] ss:$16 sps:$4 sm:$0xff]   ;;  %v15960_v60 = vld [vmem:[%s22177_s6 + $0xa48] ss:$16 sps:$4 sm:$0xff]  }
 0x6ca   : > { %9237 = vmatprep.subr.bf16.mxu1 %v15884_v20  ;;  %v15965_v20 = vld [vmem:[%s22177_s6 + $0xa64] ss:$16 sps:$4 sm:$0xff]  }
 0x6cc   : > { %9152 = vmatpush1.bf16.msra.mxu0 %v15879_v7  ;;  %v15968_v7 = vld [vmem:[%s22177_s6 + $0xa6c] ss:$16 sps:$4 sm:$0xff]  }
 0x6cd   : > { %9238 = vmatpush1.bf16.msra.mxu1 %v15882_v2  ;;  %9153 = vmatprep.subr.bf16.mxu0 %v15887_v48  ;;  %v15963_v2 = vld [vmem:[%s22177_s6 + $0xa60] ss:$16 sps:$4 sm:$0xff]   ;;  %v15966_v48 = vld [vmem:[%s22177_s6 + $0xa68] ss:$16 sps:$4 sm:$0xff]  }
 0x6ce   : > { %9239 = vmatprep.subr.bf16.mxu1 %v15890_v36  ;;  %v15971_v36 = vld [vmem:[%s22177_s6 + $0xa84] ss:$16 sps:$4 sm:$0xff]  }
 0x6d0   : > { %9154 = vmatpush1.bf16.msra.mxu0 %v15885_v11  ;;  %v15974_v11 = vld [vmem:[%s22177_s6 + $0xa8c] ss:$16 sps:$4 sm:$0xff]  }
 0x6d1   : > { %9240 = vmatpush1.bf16.msra.mxu1 %v15888_v8  ;;  %9155 = vmatprep.subr.bf16.mxu0 %v15893_v39  ;;  %v15969_v8 = vld [vmem:[%s22177_s6 + $0xa80] ss:$16 sps:$4 sm:$0xff]   ;;  %v15972_v39 = vld [vmem:[%s22177_s6 + $0xa88] ss:$16 sps:$4 sm:$0xff]  }
 0x6d2   : > { %9241 = vmatprep.subr.bf16.mxu1 %v15896_v25  ;;  %v15977_v25 = vld [vmem:[%s22177_s6 + $0xaa4] ss:$16 sps:$4 sm:$0xff]  }
 0x6d4   : > { %9156 = vmatpush1.bf16.msra.mxu0 %v15891_v23  ;;  %v15980_v23 = vld [vmem:[%s22177_s6 + $0xaac] ss:$16 sps:$4 sm:$0xff]  }
 0x6d5   : > { %9242 = vmatpush1.bf16.msra.mxu1 %v15894_v33  ;;  %9157 = vmatprep.subr.bf16.mxu0 %v15899_v47  ;;  %v15975_v33 = vld [vmem:[%s22177_s6 + $0xaa0] ss:$16 sps:$4 sm:$0xff]   ;;  %v15978_v47 = vld [vmem:[%s22177_s6 + $0xaa8] ss:$16 sps:$4 sm:$0xff]  }
 0x6d6   : > { %9243 = vmatprep.subr.bf16.mxu1 %v15902_v14  ;;  %v15983_v14 = vld [vmem:[%s22177_s6 + $0xac4] ss:$16 sps:$4 sm:$0xff]  }
 0x6d8   : > { %9158 = vmatpush1.bf16.msra.mxu0 %v15897_v21  ;;  %v15986_v21 = vld [vmem:[%s22177_s6 + $0xacc] ss:$16 sps:$4 sm:$0xff]  }
 0x6d9   : > { %9244 = vmatpush1.bf16.msra.mxu1 %v15900_v4  ;;  %9159 = vmatprep.subr.bf16.mxu0 %v15905_v34  ;;  %v15981_v4 = vld [vmem:[%s22177_s6 + $0xac0] ss:$16 sps:$4 sm:$0xff]   ;;  %v15984_v34 = vld [vmem:[%s22177_s6 + $0xac8] ss:$16 sps:$4 sm:$0xff]  }
 0x6da   : > { %9245 = vmatprep.subr.bf16.mxu1 %v15908_v43  ;;  %v15989_v43 = vld [vmem:[%s22177_s6 + $0xae4] ss:$16 sps:$4 sm:$0xff]  }
 0x6dc   : > { %9160 = vmatpush1.bf16.msra.mxu0 %v15903_v18  ;;  %v15992_v18 = vld [vmem:[%s22177_s6 + $0xaec] ss:$16 sps:$4 sm:$0xff]  }
 0x6dd   : > { %9246 = vmatpush1.bf16.msra.mxu1 %v15906_v1  ;;  %9161 = vmatprep.subr.bf16.mxu0 %v15911_v6  ;;  %v15987_v1 = vld [vmem:[%s22177_s6 + $0xae0] ss:$16 sps:$4 sm:$0xff]   ;;  %v15990_v6 = vld [vmem:[%s22177_s6 + $0xae8] ss:$16 sps:$4 sm:$0xff]  }
 0x6de   : > { %9247 = vmatprep.subr.bf16.mxu1 %v15914_v56  ;;  %v15995_v56 = vld [vmem:[%s22177_s6 + $0xb04] ss:$16 sps:$4 sm:$0xff]  }
 0x6e0   : > { %9162 = vmatpush1.bf16.msra.mxu0 %v15909_v28  ;;  %v15998_v28 = vld [vmem:[%s22177_s6 + $0xb0c] ss:$16 sps:$4 sm:$0xff]  }
 0x6e1   : > { %9248 = vmatpush1.bf16.msra.mxu1 %v15912_v19  ;;  %9163 = vmatprep.subr.bf16.mxu0 %v15917_v54  ;;  %v15993_v19 = vld [vmem:[%s22177_s6 + $0xb00] ss:$16 sps:$4 sm:$0xff]   ;;  %v15996_v54 = vld [vmem:[%s22177_s6 + $0xb08] ss:$16 sps:$4 sm:$0xff]  }
 0x6e2   : > { %9249 = vmatprep.subr.bf16.mxu1 %v15920_v3  ;;  %v16001_v3 = vld [vmem:[%s22177_s6 + $0xb24] ss:$16 sps:$4 sm:$0xff]  }
 0x6e4   : > { %9164 = vmatpush1.bf16.msra.mxu0 %v15915_v27  ;;  %v16004_v27 = vld [vmem:[%s22177_s6 + $0xb2c] ss:$16 sps:$4 sm:$0xff]  }
 0x6e5   : > { %9250 = vmatpush1.bf16.msra.mxu1 %v15918_v16  ;;  %9176 = vmatprep.subr.bf16.mxu0 %v15923_v59  ;;  %v15999_v16 = vld [vmem:[%s22177_s6 + $0xb20] ss:$16 sps:$4 sm:$0xff]   ;;  %v16002_v59 = vld [vmem:[%s22177_s6 + $0xb28] ss:$16 sps:$4 sm:$0xff]  }
 0x6e6   : > { %9262 = vmatprep.subr.bf16.mxu1 %v15926_v30  ;;  %v16007_v30 = vld [vmem:[%s22177_s6 + $0xb44] ss:$16 sps:$4 sm:$0xff]  }
 0x6e7   : > { %9166 = vmatmul.mubr.bf16.vlgmr.msra.gmra.mrb[48].mxu0 %v20426_v17 }
 0x6e8   : > { %9252 = vmatmul.mubr.bf16.vlgmr.msra.gmra.mrb[52].mxu1 %v20426_v17  ;;  %9177 = vmatpush1.bf16.msra.mxu0 %v15921_v22  ;;  %v15938_v17 = vld [vmem:[%s22177_s6 + $0x9cc] ss:$16 sps:$4 sm:$0xff]  }
 0x6e9   : > { %9263 = vmatpush1.bf16.msra.mxu1 %v15924_v35  ;;  %9178 = vmatprep.subr.bf16.mxu0 %v15929_v52  ;;  %v16010_v22 = vld [vmem:[%s22177_s6 + $0xb4c] ss:$16 sps:$4 sm:$0xff]   ;;  %v16005_v35 = vld [vmem:[%s22177_s6 + $0xb40] ss:$16 sps:$4 sm:$0xff]   ;;  %v16008_v52 = vld [vmem:[%s22177_s6 + $0xb48] ss:$16 sps:$4 sm:$0xff]  }
 0x6ea   : > { %9264 = vmatprep.subr.bf16.mxu1 %v15932_v61  ;;  %9208 = vmatprep.mubr.bf16.mxu0 %v16475_v57  ;;  %v16013_v61 = vld [vmem:[%s22177_s6 + $0xb64] ss:$16 sps:$4 sm:$0xff]  }
 0x6eb   : > { %9294 = vmatprep.mubr.bf16.mxu1 %v16475_v57 }
 0x6ec   : > { %9179 = vmatpush1.bf16.msra.mxu0 %v15927_v29  ;;  %v16016_v29 = vld [vmem:[%s22177_s6 + $0xb6c] ss:$16 sps:$4 sm:$0xff]  }
 0x6ed   : > { %9265 = vmatpush1.bf16.msra.mxu1 %v15930_v26  ;;  %9180 = vmatprep.subr.bf16.mxu0 %v15935_v51  ;;  %v16011_v26 = vld [vmem:[%s22177_s6 + $0xb60] ss:$16 sps:$4 sm:$0xff]   ;;  %v16014_v51 = vld [vmem:[%s22177_s6 + $0xb68] ss:$16 sps:$4 sm:$0xff]  }
 0x6ee   : > { %9266 = vmatprep.subr.bf16.mxu1 %v15938_v17  ;;  %v16019_v17 = vld [vmem:[%s22177_s6 + $0xb84] ss:$16 sps:$4 sm:$0xff]  }
 0x6f0   : > { %9181 = vmatpush1.bf16.msra.mxu0 %v15933_v49  ;;  %v16022_v49 = vld [vmem:[%s22177_s6 + $0xb8c] ss:$16 sps:$4 sm:$0xff]  }
 0x6f1   : > { %9267 = vmatpush1.bf16.msra.mxu1 %v15936_v42  ;;  %9182 = vmatprep.subr.bf16.mxu0 %v15941_v58  ;;  %v16017_v42 = vld [vmem:[%s22177_s6 + $0xb80] ss:$16 sps:$4 sm:$0xff]   ;;  %v16020_v58 = vld [vmem:[%s22177_s6 + $0xb88] ss:$16 sps:$4 sm:$0xff]  }
 0x6f2   : > { %9268 = vmatprep.subr.bf16.mxu1 %v15944_v13  ;;  %v16025_v13 = vld [vmem:[%s22177_s6 + $0xba4] ss:$16 sps:$4 sm:$0xff]  }
 0x6f4   : > { %9183 = vmatpush1.bf16.msra.mxu0 %v15939_v55  ;;  %v16028_v55 = vld [vmem:[%s22177_s6 + $0xbac] ss:$16 sps:$4 sm:$0xff]  }
 0x6f5   : > { %9269 = vmatpush1.bf16.msra.mxu1 %v15942_v31  ;;  %9808 = vmatprep.subr.bf16.mxu0 %v15947_v9  ;;  %v16023_v31 = vld [vmem:[%s22177_s6 + $0xba0] ss:$16 sps:$4 sm:$0xff]   ;;  %v16026_v9 = vld [vmem:[%s22177_s6 + $0xba8] ss:$16 sps:$4 sm:$0xff]  }
 0x6f6   : > { %9894 = vmatprep.subr.bf16.mxu1 %v15950_v37  ;;  %v16031_v37 = vld [vmem:[%s22177_s6 + $0xbc4] ss:$16 sps:$4 sm:$0xff]  }
 0x6f7   : > { %13319 = vmatmul.mubr.msk.bf16.vlgmr.msra.gmra.mrb[48].mxu0 %vm7189_vm11, %v20484_v24 }
 0x6f8   : > { %13320 = vmatmul.mubr.msk.bf16.vlgmr.msra.gmra.mrb[52].mxu1 %vm7189_vm11, %v20484_v24  ;;  %9809 = vmatpush1.bf16.msra.mxu0 %v15945_v53  ;;  %v15962_v24 = vld [vmem:[%s22177_s6 + $0xa4c] ss:$16 sps:$4 sm:$0xff]  }
 0x6f9   : > { %9840 = vmatprep.mubr.bf16.mxu0 %v9399_v50  ;;  %9895 = vmatpush1.bf16.msra.mxu1 %v15948_v12  ;;  %v16034_v53 = vld [vmem:[%s22177_s6 + $0xbcc] ss:$16 sps:$4 sm:$0xff]   ;;  %v16037_v12 = vld [vmem:[%s22177_s6 + $0xbe4] ss:$16 sps:$4 sm:$0xff]  }
 0x6fa   : > { %9926 = vmatprep.mubr.bf16.mxu1 %v9399_v50  ;;  %9810 = vmatprep.subr.bf16.mxu0 %v15953_v0  ;;  %v16040_v0 = vld [vmem:[%s22177_s6 + $0xbec] ss:$16 sps:$4 sm:$0xff]   ;;  %v16038_v50 = vld [vmem:[%s22177_s6 + $0xbe8] ss:$16 sps:$4 sm:$0xff]  }
 0x6fb   : > { %9896 = vmatprep.subr.bf16.mxu1 %v15956_v46  ;;  %v16035_v46 = vld [vmem:[%s22177_s6 + $0xbe0] ss:$16 sps:$4 sm:$0xff]  }
 0x6fc   : > { %9811 = vmatpush1.bf16.msra.mxu0 %v15951_v44  ;;  %v16043_v44 = vld [vmem:[%s22177_s6 + $0xc04] ss:$16 sps:$4 sm:$0xff]  }
 0x6fd   : > { %9897 = vmatpush1.bf16.msra.mxu1 %v15954_v10  ;;  %9812 = vmatprep.subr.bf16.mxu0 %v15959_v41  ;;  %v9394_v10 = vrot.slane %v20380_v40, 2  ;;  %v9395_v41 = vrot.slane %v20388_v38, 2  ;;  %v16049_v40 = vld [vmem:[%s22177_s6 + $0xc24] ss:$16 sps:$4 sm:$0xff]  }
 0x6fe   : > { %9898 = vmatprep.subr.bf16.mxu1 %v15962_v24  ;;  %v16046_v24 = vld [vmem:[%s22177_s6 + $0xc0c] ss:$16 sps:$4 sm:$0xff]  }
 0x6ff   : > { %v9396_v38 = vsel %vm2921_vm5, %v9394_v10, %v9395_v41  ;;  %v10291_v10 = vld [vmem:[#allocation3 + $0xf8] sm:$0xff] }
 0x700   : > { %9813 = vmatpush1.bf16.msra.mxu0 %v15957_v63  ;;  %v16041_v63 = vld [vmem:[%s22177_s6 + $0xc00] ss:$16 sps:$4 sm:$0xff]  }
 0x701   : > { %9899 = vmatpush1.bf16.msra.mxu1 %v15960_v60  ;;  %9814 = vmatprep.subr.bf16.mxu0 %v15965_v20  ;;  %v16044_v60 = vld [vmem:[%s22177_s6 + $0xc08] ss:$16 sps:$4 sm:$0xff]   ;;  %v16052_v20 = vld [vmem:[%s22177_s6 + $0xc2c] ss:$16 sps:$4 sm:$0xff]  }
 0x702   : > { %9900 = vmatprep.subr.bf16.mxu1 %v15968_v7  ;;  %v16047_v7 = vld [vmem:[%s22177_s6 + $0xc20] ss:$16 sps:$4 sm:$0xff]  }
 0x704   : > { %9815 = vmatpush1.bf16.msra.mxu0 %v15963_v2  ;;  %v16050_v2 = vld [vmem:[%s22177_s6 + $0xc28] ss:$16 sps:$4 sm:$0xff]  }
 0x705   : > { %9901 = vmatpush1.bf16.msra.mxu1 %v15966_v48  ;;  %9816 = vmatprep.subr.bf16.mxu0 %v15971_v36  ;;  %v16055_v48 = vld [vmem:[%s22177_s6 + $0xc44] ss:$16 sps:$4 sm:$0xff]   ;;  %v16058_v36 = vld [vmem:[%s22177_s6 + $0xc4c] ss:$16 sps:$4 sm:$0xff]  }
 0x706   : > { %9902 = vmatprep.subr.bf16.mxu1 %v15974_v11  ;;  %v16053_v11 = vld [vmem:[%s22177_s6 + $0xc40] ss:$16 sps:$4 sm:$0xff]  }
 0x708   : > { %9817 = vmatpush1.bf16.msra.mxu0 %v15969_v8  ;;  %v16056_v8 = vld [vmem:[%s22177_s6 + $0xc48] ss:$16 sps:$4 sm:$0xff]  }
 0x709   : > { %9903 = vmatpush1.bf16.msra.mxu1 %v15972_v39  ;;  %9818 = vmatprep.subr.bf16.mxu0 %v15977_v25  ;;  %v16061_v39 = vld [vmem:[%s22177_s6 + $0xc64] ss:$16 sps:$4 sm:$0xff]   ;;  %v16059_v25 = vld [vmem:[%s22177_s6 + $0xc60] ss:$16 sps:$4 sm:$0xff]  }
 0x70a   : > { %9904 = vmatprep.subr.bf16.mxu1 %v15980_v23  ;;  %v16062_v23 = vld [vmem:[%s22177_s6 + $0xc68] ss:$16 sps:$4 sm:$0xff]  }
 0x70c   : > { %9819 = vmatpush1.bf16.msra.mxu0 %v15975_v33  ;;  %v9401_v33 = vrot.slane %v20458_v15, 2  ;;  %v10267_v15 = vld [vmem:[#allocation3 + $0x38] sm:$0xff] }
 0x70d   : > { %9905 = vmatpush1.bf16.msra.mxu1 %v15978_v47  ;;  %9820 = vmatprep.subr.bf16.mxu0 %v15983_v14  ;;  %v9400_v47 = vrot.slane %v20454_v45, 2  ;;  %v10266_v45 = vld [vmem:[#allocation3 + $0x30] sm:$0xff] }
 0x70e   : > { %9906 = vmatprep.subr.bf16.mxu1 %v15986_v21  ;;  %v10261_v21 = vld [vmem:[#allocation3 + $0x8] sm:$0xff] }
 0x70f   : > { %v9402_v14 = vsel %vm2921_vm5, %v9400_v47, %v9401_v33  ;;  %v10303_v33 = vld [vmem:[#allocation3 + $0x158] sm:$0xff] }
 0x710   : > { %9821 = vmatpush1.bf16.msra.mxu0 %v15981_v4  ;;  %v10263_v4 = vld [vmem:[#allocation3 + $0x18] sm:$0xff] }
 0x711   : > { %9907 = vmatpush1.bf16.msra.mxu1 %v15984_v34  ;;  %9822 = vmatprep.subr.bf16.mxu0 %v15989_v43  ;;  %v10260_v34 = vld [vmem:[#allocation3] sm:$0xff]  ;;  %v14231_v43 = vpack.c.bf16 %v10263_v4, %v10261_v21  ;;  %v10302_v4 = vld [vmem:[#allocation3 + $0x150] sm:$0xff] }
 0x712   : > { %9908 = vmatprep.subr.bf16.mxu1 %v15992_v18  ;;  %v10262_v18 = vld [vmem:[#allocation3 + $0x10] sm:$0xff]  ;;  %v10300_v21 = vld [vmem:[#allocation3 + $0x140] sm:$0xff] }
 0x714   : > { %9823 = vmatpush1.bf16.msra.mxu0 %v15987_v1  ;;  %v10265_v1 = vld [vmem:[#allocation3 + $0x28] sm:$0xff] }
 0x715   : > { %9909 = vmatpush1.bf16.msra.mxu1 %v15990_v6  ;;  %9824 = vmatprep.subr.bf16.mxu0 %v15995_v56  ;;  %v14233_v6 = vpack.c.bf16 %v10262_v18, %v10260_v34  ;;  %v14235_v56 = vpack.c.bf16 %v10267_v15, %v10265_v1  ;;  %v10305_v34 = vld [vmem:[#allocation3 + $0x168] sm:$0xff]  ;;  %v14273_v18 = vpack.c.bf16 %v10302_v4, %v10300_v21  ;;  %v10304_v15 = vld [vmem:[#allocation3 + $0x160] sm:$0xff] }
 0x716   : > { %9910 = vmatprep.subr.bf16.mxu1 %v15998_v28  ;;  %v10264_v28 = vld [vmem:[#allocation3 + $0x20] sm:$0xff] }
 0x718   : > { %9825 = vmatpush1.bf16.msra.mxu0 %v15993_v19  ;;  %v10269_v19 = vld [vmem:[#allocation3 + $0x48] sm:$0xff] }
 0x719   : > { %9911 = vmatpush1.bf16.msra.mxu1 %v15996_v54  ;;  %9826 = vmatprep.subr.bf16.mxu0 %v16001_v3  ;;  %v10271_v54 = vld [vmem:[#allocation3 + $0x58] sm:$0xff]  ;;  %v14237_v3 = vpack.c.bf16 %v10266_v45, %v10264_v28 }
 0x71a   : > { %9912 = vmatprep.subr.bf16.mxu1 %v16004_v27  ;;  %v14239_v27 = vpack.c.bf16 %v10271_v54, %v10269_v19  ;;  %v10311_v28 = vld [vmem:[#allocation3 + $0x198] sm:$0xff]  ;;  %v10308_v54 = vld [vmem:[#allocation3 + $0x180] sm:$0xff] }
 0x71c   : > { %9827 = vmatpush1.bf16.msra.mxu0 %v15999_v16  ;;  %v10268_v16 = vld [vmem:[#allocation3 + $0x40] sm:$0xff] }
 0x71d   : > { %9913 = vmatpush1.bf16.msra.mxu1 %v16002_v59  ;;  %9828 = vmatprep.subr.bf16.mxu0 %v16007_v30  ;;  %v10270_v59 = vld [vmem:[#allocation3 + $0x50] sm:$0xff]  ;;  %v10273_v30 = vld [vmem:[#allocation3 + $0x68] sm:$0xff] }
 0x71e   : > { %9914 = vmatprep.subr.bf16.mxu1 %v16010_v22  ;;  %v10275_v22 = vld [vmem:[#allocation3 + $0x78] sm:$0xff] }
 0x720   : > { %9829 = vmatpush1.bf16.msra.mxu0 %v16005_v35  ;;  %v14241_v35 = vpack.c.bf16 %v10270_v59, %v10268_v16  ;;  %v9988_v16 = vld [vmem:[%s22178_s7] sm:$0xf] }
 0x721   : > { %9915 = vmatpush1.bf16.msra.mxu1 %v16008_v52  ;;  %9830 = vmatprep.subr.bf16.mxu0 %v16013_v61  ;;  %v14243_v52 = vpack.c.bf16 %v10275_v22, %v10273_v30  ;;  %v10272_v61 = vld [vmem:[#allocation3 + $0x60] sm:$0xff]  ;;  %v22321_v30 = vld [vmem:[#allocation15_spill] sm:$0xff] }
 0x722   : > { %9916 = vmatprep.subr.bf16.mxu1 %v16016_v29  ;;  %v10274_v29 = vld [vmem:[#allocation3 + $0x70] sm:$0xff]  ;;  %v10018_v59 = vld [vmem:[%s22179_s8] sm:$0xf]  ;;  %v9993_v22 = vrot.slane %v9988_v16, %v22321_v30 }
 0x724   : > { %9831 = vmatpush1.bf16.msra.mxu0 %v16011_v26  ;;  %v10277_v26 = vld [vmem:[#allocation3 + $0x88] sm:$0xff] }
 0x725   : > { %9917 = vmatpush1.bf16.msra.mxu1 %v16014_v51  ;;  %9832 = vmatprep.subr.bf16.mxu0 %v16019_v17  ;;  %v10279_v51 = vld [vmem:[#allocation3 + $0x98] sm:$0xff]  ;;  %v14245_v17 = vpack.c.bf16 %v10274_v29, %v10272_v61 }
 0x726   : > { %9918 = vmatprep.subr.bf16.mxu1 %v16022_v49  ;;  %v14247_v49 = vpack.c.bf16 %v10279_v51, %v10277_v26  ;;  %v22323_v61 = vld [vmem:[#allocation16_spill] sm:$0xff]  ;;  %v10023_v26 = vrot.slane %v10018_v59, %v22321_v30  ;;  %v22324_v51 = vld [vmem:[#allocation14_spill] sm:$0xff] }
 0x727   : > { %v9997_v29 = vrot.slane %v9988_v16, %v22323_v61 }
 0x728   : > { %9833 = vmatpush1.bf16.msra.mxu0 %v16017_v42  ;;  %v10276_v42 = vld [vmem:[#allocation3 + $0x80] sm:$0xff] }
 0x729   : > { %9919 = vmatpush1.bf16.msra.mxu1 %v16020_v58  ;;  %9834 = vmatprep.subr.bf16.mxu0 %v16025_v13  ;;  %v10278_v58 = vld [vmem:[#allocation3 + $0x90] sm:$0xff]  ;;  %v10281_v13 = vld [vmem:[#allocation3 + $0xa8] sm:$0xff] }
 0x72a   : > { %9920 = vmatprep.subr.bf16.mxu1 %v16028_v55  ;;  %v10283_v55 = vld [vmem:[#allocation3 + $0xb8] sm:$0xff] }
 0x72c   : > { %9835 = vmatpush1.bf16.msra.mxu0 %v16023_v31  ;;  %v14249_v31 = vpack.c.bf16 %v10278_v58, %v10276_v42  ;;  %v10027_v58 = vrot.slane %v10018_v59, %v22323_v61 }
 0x72d   : > { %9921 = vmatpush1.bf16.msra.mxu1 %v16026_v9  ;;  %9836 = vmatprep.subr.bf16.mxu0 %v16031_v37  ;;  %v14251_v9 = vpack.c.bf16 %v10283_v55, %v10281_v13  ;;  %v10280_v37 = vld [vmem:[#allocation3 + $0xa0] sm:$0xff] }
 0x72e   : > { %9922 = vmatprep.subr.bf16.mxu1 %v16034_v53  ;;  %v10282_v53 = vld [vmem:[#allocation3 + $0xb0] sm:$0xff] }
 0x730   : > { %9837 = vmatpush1.bf16.msra.mxu0 %v16029_v62  ;;  %v10285_v62 = vld [vmem:[#allocation3 + $0xc8] sm:$0xff] }
 0x731   : > { %9923 = vmatpush1.bf16.msra.mxu1 %v16032_v32  ;;  %9838 = vmatprep.subr.bf16.mxu0 %v16037_v12  ;;  %v10287_v32 = vld [vmem:[#allocation3 + $0xd8] sm:$0xff]  ;;  %v14253_v12 = vpack.c.bf16 %v10282_v53, %v10280_v37 }
 0x732   : > { %9924 = vmatprep.subr.bf16.mxu1 %v16040_v0  ;;  %v14255_v0 = vpack.c.bf16 %v10287_v32, %v10285_v62 }
 0x734   : > { %9839 = vmatpush1.bf16.msra.mxu0 %v16035_v46  ;;  %v10284_v46 = vld [vmem:[#allocation3 + $0xc0] sm:$0xff] }
 0x735   : > { %9925 = vmatpush1.bf16.msra.mxu1 %v16038_v50  ;;  %9851 = vmatprep.subr.bf16.mxu0 %v16043_v44  ;;  %v10286_v50 = vld [vmem:[#allocation3 + $0xd0] sm:$0xff]  ;;  %v10289_v44 = vld [vmem:[#allocation3 + $0xe8] sm:$0xff] }
 0x736   : > { %9937 = vmatprep.subr.bf16.mxu1 %v16046_v24  ;;  %v14257_v41 = vpack.c.bf16 %v10286_v50, %v10284_v46  ;;  %v14259_v24 = vpack.c.bf16 %v10291_v10, %v10289_v44 }
 0x737   : > { %9841 = vmatmul.mubr.bf16.vlgmr.msra.gmra.mrb[48].mxu0 %v9396_v38 }
 0x738   : > { %9927 = vmatmul.mubr.bf16.vlgmr.msra.gmra.mrb[52].mxu1 %v9396_v38  ;;  %9852 = vmatpush1.bf16.msra.mxu0 %v16041_v63  ;;  %v10288_v63 = vld [vmem:[#allocation3 + $0xe0] sm:$0xff]  ;;  %v10295_v38 = vld [vmem:[#allocation3 + $0x118] sm:$0xff] }
 0x739   : > { %9938 = vmatpush1.bf16.msra.mxu1 %v16044_v60  ;;  %9853 = vmatprep.subr.bf16.mxu0 %v16049_v40  ;;  %v10290_v60 = vld [vmem:[#allocation3 + $0xf0] sm:$0xff]  ;;  %v10293_v40 = vld [vmem:[#allocation3 + $0x108] sm:$0xff] }
 0x73a   : > { %9939 = vmatprep.subr.bf16.mxu1 %v16052_v20  ;;  %9883 = vmatprep.mubr.bf16.mxu0 %v16475_v57  ;;  %v14261_v20 = vpack.c.bf16 %v10290_v60, %v10288_v63 }
 0x73b   : > { %9969 = vmatprep.mubr.bf16.mxu1 %v16475_v57  ;;  %v16064_v57 = vld [vmem:[%s22177_s6 + $0xc6c] ss:$16 sps:$4 sm:$0xff]  }
 0x73c   : > { %9854 = vmatpush1.bf16.msra.mxu0 %v16047_v7  ;;  %v14263_v7 = vpack.c.bf16 %v10295_v38, %v10293_v40 }
 0x73d   : > { %9940 = vmatpush1.bf16.msra.mxu1 %v16050_v2  ;;  %9855 = vmatprep.subr.bf16.mxu0 %v16055_v48  ;;  %v10292_v2 = vld [vmem:[#allocation3 + $0x100] sm:$0xff]  ;;  %v10294_v48 = vld [vmem:[#allocation3 + $0x110] sm:$0xff] }
 0x73e   : > { %9941 = vmatprep.subr.bf16.mxu1 %v16058_v36  ;;  %v10297_v36 = vld [vmem:[#allocation3 + $0x128] sm:$0xff] }
 0x740   : > { %9856 = vmatpush1.bf16.msra.mxu0 %v16053_v11  ;;  %v10299_v11 = vld [vmem:[#allocation3 + $0x138] sm:$0xff] }
 0x741   : > { %9942 = vmatpush1.bf16.msra.mxu1 %v16056_v8  ;;  %9857 = vmatprep.subr.bf16.mxu0 %v16061_v39  ;;  %v14265_v8 = vpack.c.bf16 %v10294_v48, %v10292_v2  ;;  %v14267_v39 = vpack.c.bf16 %v10299_v11, %v10297_v36 }
 0x742   : > { %9943 = vmatprep.subr.bf16.mxu1 %v16064_v57  ;;  %v10296_v57 = vld [vmem:[#allocation3 + $0x120] sm:$0xff] }
 0x744   : > { %9858 = vmatpush1.bf16.msra.mxu0 %v16059_v25  ;;  %v10298_v25 = vld [vmem:[#allocation3 + $0x130] sm:$0xff] }
 0x745   : > { %9944 = vmatpush1.bf16.msra.mxu1 %v16062_v23  ;;  %14232 = vmatprep.subr.bf16.mxu0 %v14231_v43  ;;  %v10301_v23 = vld [vmem:[#allocation3 + $0x148] sm:$0xff]  ;;  %v14269_v47 = vpack.c.bf16 %v10298_v25, %v10296_v57  ;;  %v10307_v43 = vld [vmem:[#allocation3 + $0x178] sm:$0xff] }
 0x746   : > { %v14275_v1 = vpack.c.bf16 %v10307_v43, %v10305_v34 }
 0x747   : > { %13481 = vmatmul.mubr.msk.bf16.vlgmr.msra.gmra.mrb[48].mxu0 %vm7189_vm11, %v9402_v14 }
 0x748   : > { %13482 = vmatmul.mubr.msk.bf16.vlgmr.msra.gmra.mrb[52].mxu1 %vm7189_vm11, %v9402_v14  ;;  %14234 = vmatpush1.bf16.msra.mxu0 %v14233_v6  ;;  %v14271_v14 = vpack.c.bf16 %v10303_v33, %v10301_v23  ;;  %v10306_v6 = vld [vmem:[#allocation3 + $0x170] sm:$0xff] }
 0x749   : > { %10607 = vmatprep.mubr.f32.mxu1 %v22301_v5  ;;  %14236 = vmatprep.subr.bf16.mxu0 %v14235_v56  ;;  %v10309_v56 = vld [vmem:[#allocation3 + $0x188] sm:$0xff]  ;;  %v14277_v45 = vpack.c.bf16 %v10306_v6, %v10304_v15 }
 0x74a   : > { %v14279_v19 = vpack.c.bf16 %v10311_v28, %v10309_v56 }
 0x74c   : > { %14238 = vmatpush1.bf16.msra.mxu0 %v14237_v3  ;;  %v10310_v3 = vld [vmem:[#allocation3 + $0x190] sm:$0xff] }
 0x74d   : > { %14240 = vmatprep.subr.bf16.mxu0 %v14239_v27  ;;  %v14281_v27 = vpack.c.bf16 %v10310_v3, %v10308_v54 }
 0x750   : > { %14242 = vmatpush1.bf16.msra.mxu0 %v14241_v35  ;;  %v22322_v35 = vld [vmem:[#allocation13_spill] sm:$0xff] }
 0x751   : > { %14244 = vmatprep.subr.bf16.mxu0 %v14243_v52  ;;  %v10001_v52 = vrot.slane %v9988_v16, %v22322_v35  ;;  %v10031_v42 = vrot.slane %v10018_v59, %v22322_v35 }
 0x754   : > { %14246 = vmatpush1.bf16.msra.mxu0 %v14245_v17  ;;  %v10005_v17 = vrot.slane %v9988_v16, %v22324_v51 }
 0x755   : > { %14248 = vmatprep.subr.bf16.mxu0 %v14247_v49 }
 0x758   : > { %14250 = vmatpush1.bf16.msra.mxu0 %v14249_v31 }
 0x759   : > { %14252 = vmatprep.subr.bf16.mxu0 %v14251_v9  ;;  %v10035_v9 = vrot.slane %v10018_v59, %v22324_v51 }
 0x75c   : > { %14254 = vmatpush1.bf16.msra.mxu0 %v14253_v12 }
 0x75d   : > { %14256 = vmatprep.subr.bf16.mxu0 %v14255_v0 }
 0x760   : > { %14258 = vmatpush1.bf16.msra.mxu0 %v14257_v41 }
 0x761   : > { %14260 = vmatprep.subr.bf16.mxu0 %v14259_v24 }
 0x764   : > { %14262 = vmatpush1.bf16.msra.mxu0 %v14261_v20 }
 0x765   : > { %14264 = vmatprep.subr.bf16.mxu0 %v14263_v7 }
 0x768   : > { %14266 = vmatpush1.bf16.msra.mxu0 %v14265_v8 }
 0x769   : > { %14268 = vmatprep.subr.bf16.mxu0 %v14267_v39 }
 0x76c   : > { %14270 = vmatpush1.bf16.msra.mxu0 %v14269_v47 }
 0x76d   : > { %14272 = vmatprep.subr.bf16.mxu0 %v14271_v14 }
 0x770   : > { %14274 = vmatpush1.bf16.msra.mxu0 %v14273_v18 }
 0x771   : > { %14276 = vmatprep.subr.bf16.mxu0 %v14275_v1 }
 0x774   : > { %14278 = vmatpush1.bf16.msra.mxu0 %v14277_v45 }
 0x775   : > { %14280 = vmatprep.subr.bf16.mxu0 %v14279_v19 }
 0x778   : > { %14282 = vmatpush1.bf16.msra.mxu0 %v14281_v27 }
 0x81a   : > { %v9885_v49 = vpop.f32.mrb[48].mxu0 }
 0x81b   : > { %v10010_v13 = vmul.f32 %v9993_v22, %v9885_v49  ;;  %v9971_v55 = vpop.f32.mrb[52].mxu1  ;;  %v9887_v31 = vpop.f32.mrb[49].mxu0 }
 0x81c   : > { %v10012_v37 = vmul.f32 %v10001_v52, %v9971_v55  ;;  %v10011_v53 = vmul.f32 %v9997_v29, %v9887_v31  ;;  %v9973_v62 = vpop.f32.mrb[53].mxu1  ;;  %v9889_v32 = vpop.f32.mrb[50].mxu0 }
 0x81d   : > { %v10040_v12 = vadd.f32 %v10023_v26, %v10010_v13  ;;  %v10013_v0 = vmul.f32 %v10005_v17, %v9973_v62  ;;  %v10014_v46 = vmul.f32 %v9993_v22, %v9889_v32  ;;  %v9975_v50 = vpop.f32.mrb[54].mxu1  ;;  %v9891_v44 = vpop.f32.mrb[51].mxu0 }
 0x81e   : > { %v10042_v10 = vadd.f32 %v10031_v42, %v10012_v37  ;;  %v10041_v41 = vadd.f32 %v10027_v58, %v10011_v53  ;;  %v10016_v24 = vmul.f32 %v10001_v52, %v9975_v50  ;;  %v9977_v63 = vpop.f32.mrb[55].mxu1  ;;  %v10015_v20 = vmul.f32 %v9997_v29, %v9891_v44 }
 0x81f   : > { %v10056_v60 = vmin.f32 %v10040_v12, 0.0  ;;  %v10043_v40 = vadd.f32 %v10035_v9, %v10013_v0  ;;  %v21483_v38 = vadd.f32 %v10023_v26, %v10014_v46  ;;  %v10017_v33 = vmul.f32 %v10005_v17, %v9977_v63 }
 0x820   : > { %v10058_v7 = vmin.f32 %v10042_v10, 0.0  ;;  %v10057_v2 = vmin.f32 %v10041_v41, 0.0  ;;  %v10046_v57 = vadd.f32 %v10031_v42, %v10016_v24  ;;  %v21486_v23 = vadd.f32 %v10027_v58, %v10015_v20 }
 0x821   : > { %v10064_v48 = vmul.f32 1.442695, %v10056_v60  ;;  %v10059_v36 = vmin.f32 %v10043_v40, 0.0  ;;  %v10060_v39 = vmin.f32 %v21483_v38, 0.0  ;;  %v21489_v4 = vadd.f32 %v10035_v9, %v10017_v33  ;;  %v10315_v33 = vld [vmem:[#allocation3 + $0x1b8] sm:$0xff] }
 0x822   : > { %v10068_v11 = vmul.f32 1.442695, %v10058_v7  ;;  %v10066_v8 = vmul.f32 1.442695, %v10057_v2  ;;  %v10062_v14 = vmin.f32 %v10046_v57, 0.0  ;;  %v10061_v21 = vmin.f32 %v21486_v23, 0.0 }
 0x823   : > { %16351 = vpow2.f32 %v10064_v48  ;;  %v10070_v25 = vmul.f32 1.442695, %v10059_v36  ;;  %v10072_v47 = vmul.f32 1.442695, %v10060_v39  ;;  %v10063_v18 = vmin.f32 %v21489_v4, 0.0 }
 0x824   : > { %16353 = vpow2.f32 %v10068_v11  ;;  %v10076_v34 = vmul.f32 1.442695, %v10062_v14  ;;  %v10074_v43 = vmul.f32 1.442695, %v10061_v21  ;;  %vm10048_vm0 = vcmp.gt.f32.partialorder %v10040_v12, 0.0 }
 0x825   : > { %16355 = vpow2.f32 %v10066_v8  ;;  %v10078_v1 = vmul.f32 1.442695, %v10063_v18  ;;  %vm10050_vm2 = vcmp.gt.f32.partialorder %v10042_v10, 0.0  ;;  %vm10049_vm12 = vcmp.gt.f32.partialorder %v10041_v41, 0.0 }
 0x826   : > { %16357 = vpow2.f32 %v10070_v25  ;;  %vm10051_vm13 = vcmp.gt.f32.partialorder %v10043_v40, 0.0  ;;  %vm10052_vm14 = vcmp.gt.f32.partialorder %v21483_v38, 0.0  ;;  %vm10054_vm15 = vcmp.gt.f32.partialorder %v10046_v57, 0.0  ;;  %v10313_v25 = vld [vmem:[#allocation3 + $0x1a8] sm:$0xff] }
 0x827   : > { %16359 = vpow2.f32 %v10072_v47  ;;  %vm10053_vm4 = vcmp.gt.f32.partialorder %v21486_v23, 0.0  ;;  %vm10055_vm6 = vcmp.gt.f32.partialorder %v21489_v4, 0.0 }
 0x828   : > { %16361 = vpow2.f32 %v10076_v34 }
 0x829   : > { %16363 = vpow2.f32 %v10074_v43 }
 0x82a   : > { %16365 = vpow2.f32 %v10078_v1 }
 0x82d   : > { %v16352_v15 = vpop.eup %16351 }
 0x82e   : > { %v16354_v6 = vpop.eup %16353  ;;  %v13483_v56 = vadd.f32 -1.0, %v16352_v15  ;;  %v10312_v15 = vld [vmem:[#allocation3 + $0x1a0] sm:$0xff] }
 0x82f   : > { %v16356_v28 = vpop.eup %16355  ;;  %v13485_v45 = vadd.f32 -1.0, %v16354_v6 }
 0x830   : > { %v16358_v19 = vpop.eup %16357  ;;  %v10088_v54 = vmul.f32 1.6732632, %v13483_v56  ;;  %v13484_v3 = vadd.f32 -1.0, %v16356_v28  ;;  %v14283_v56 = vpack.c.bf16 %v10315_v33, %v10313_v25  ;;  %v10314_v28 = vld [vmem:[#allocation3 + $0x1b0] sm:$0xff] }
 0x831   : > { %v16360_v27 = vpop.eup %16359  ;;  %v10090_v16 = vmul.f32 1.6732632, %v13485_v45  ;;  %v13486_v59 = vadd.f32 -1.0, %v16358_v19  ;;  %v10317_v45 = vld [vmem:[#allocation3 + $0x1c8] sm:$0xff]  ;;  %v10319_v19 = vld [vmem:[#allocation3 + $0x1d8] sm:$0xff] }
 0x832   : > { %v16362_v22 = vpop.eup %16361  ;;  %v10096_v35 = vsel %vm10048_vm0, %v10040_v12, %v10088_v54  ;;  %v10089_v52 = vmul.f32 1.6732632, %v13484_v3  ;;  %v13487_v29 = vadd.f32 -1.0, %v16360_v27  ;;  %14284 = vmatprep.subr.bf16.mxu0 %v14283_v56 }
 0x833   : > { %v16364_v26 = vpop.eup %16363  ;;  %v10104_v51 = vmul.f32 1.050701, %v10096_v35  ;;  %v10098_v17 = vsel %vm10050_vm2, %v10042_v10, %v10090_v16  ;;  %v10091_v49 = vmul.f32 1.6732632, %v13486_v59  ;;  %v13489_v42 = vadd.f32 -1.0, %v16362_v22 }
 0x834   : > { %v10106_v58 = vmul.f32 1.050701, %v10098_v17  ;;  %v10097_v13 = vsel %vm10049_vm12, %v10041_v41, %v10089_v52  ;;  %v10092_v55 = vmul.f32 1.6732632, %v13487_v29  ;;  %v13488_v31 = vadd.f32 -1.0, %v16364_v26  ;;  %v16366_v9 = vpop.eup %16365  ;;  %v10316_v52 = vld [vmem:[#allocation3 + $0x1c0] sm:$0xff] }
 0x835   : > { %v10105_v37 = vmul.f32 1.050701, %v10097_v13  ;;  %v10099_v53 = vsel %vm10051_vm13, %v10043_v40, %v10091_v49  ;;  %v10094_v62 = vmul.f32 1.6732632, %v13489_v42  ;;  %v10120_v12 = vrot.slane %v10104_v51, 1  ;;  %v10318_v29 = vld [vmem:[#allocation3 + $0x1d0] sm:$0xff] }
 0x836   : > { %v10100_v32 = vsel %vm10052_vm14, %v21483_v38, %v10092_v55  ;;  %v10126_v0 = vrot.slane %v10106_v58, 1  ;;  %v21499_v46 = vmul.f32 1.050701, %v10099_v53  ;;  %v10154_v10 = vrot.slane %v10106_v58, 2  ;;  %v10321_v17 = vld [vmem:[#allocation3 + $0x1e8] sm:$0xff]  ;;  %v10323_v49 = vld [vmem:[#allocation3 + $0x1f8] sm:$0xff] }
 0x837   : > { %v21501_v50 = vmul.f32 1.050701, %v10100_v32  ;;  %v10102_v44 = vsel %vm10054_vm15, %v10046_v57, %v10094_v62  ;;  %v10093_v24 = vmul.f32 1.6732632, %v13488_v31  ;;  %v13490_v63 = vadd.f32 -1.0, %v16366_v9 }
 0x838   : > { %v21503_v41 = vmul.f32 1.050701, %v10102_v44  ;;  %v10123_v60 = vrot.slane %v10105_v37, 1  ;;  %v10148_v38 = vrot.slane %v10104_v51, 2  ;;  %v10151_v11 = vrot.slane %v10105_v37, 2  ;;  %v10325_v44 = vld [vmem:[#allocation3 + $0x208] sm:$0xff] }
 0x839   : > { %v10121_v40 = vrot.slane %v21501_v50, 1  ;;  %v10149_v20 = vrot.slane %v21501_v50, 2  ;;  %v10101_v48 = vsel %vm10053_vm4, %v21486_v23, %v10093_v24  ;;  %v10095_v36 = vmul.f32 1.6732632, %v13490_v63 }
 0x83a   : > { %v10127_v7 = vrot.slane %v21503_v41, 1  ;;  %v10155_v2 = vrot.slane %v21503_v41, 2  ;;  %v10109_v8 = vmul.f32 1.050701, %v10101_v48  ;;  %v10129_v27 = vrot.slane %v21499_v46, 1 }
 0x83b   : > { %v10122_v39 = vsel %vm1763_vm3, %v10120_v12, %v10121_v40  ;;  %v10150_v57 = vsel %vm2921_vm5, %v10148_v38, %v10149_v20  ;;  %v10103_v47 = vsel %vm10055_vm6, %v21489_v4, %v10095_v36  ;;  %v10157_v22 = vrot.slane %v21499_v46, 2  ;;  %v10320_v12 = vld [vmem:[#allocation3 + $0x1e0] sm:$0xff] }
 0x83c   : > { %v10140_v14 = vmax.f32 %v10104_v51, %v10122_v39  ;;  %v10128_v21 = vsel %vm1763_vm3, %v10126_v0, %v10127_v7  ;;  %v10156_v34 = vsel %vm2921_vm5, %v10154_v10, %v10155_v2  ;;  %v10124_v43 = vrot.slane %v10109_v8, 1  ;;  %v10322_v0 = vld [vmem:[#allocation3 + $0x1f0] sm:$0xff]  ;;  %v10327_v10 = vld [vmem:[#allocation3 + $0x218] sm:$0xff] }
 0x83d   : > { %v10152_v23 = vrot.slane %v10109_v8, 2  ;;  %v10111_v18 = vmul.f32 1.050701, %v10103_v47  ;;  %v10142_v1 = vmax.f32 %v10106_v58, %v10128_v21  ;;  %v14285_v26 = vpack.c.bf16 %v10314_v28, %v10312_v15  ;;  %v10324_v47 = vld [vmem:[#allocation3 + $0x200] sm:$0xff] }
 0x83e   : > { %v21519_v6 = vmax.f32 %v10140_v14, %v10150_v57  ;;  %v10125_v54 = vsel %vm1763_vm3, %v10123_v60, %v10124_v43  ;;  %v14287_v51 = vpack.c.bf16 %v10319_v19, %v10317_v45  ;;  %v10144_v58 = vmax.f32 %v21501_v50, %v10121_v40  ;;  %v10326_v14 = vld [vmem:[#allocation3 + $0x210] sm:$0xff] }
 0x83f   : > { %v10153_v4 = vsel %vm2921_vm5, %v10151_v11, %v10152_v23  ;;  %v21523_v3 = vmax.f32 %v10142_v1, %v10156_v34  ;;  %v10141_v16 = vmax.f32 %v10105_v37, %v10125_v54  ;;  %v10130_v59 = vrot.slane %v10111_v18, 1  ;;  %14286 = vmatpush1.bf16.msra.mxu0 %v14285_v26 }
 0x840   : > { %10184 = vrot.lane.b32.xlu1 %v21519_v6, %s22289_s23  ;;  %v10158_v35 = vrot.slane %v10111_v18, 2  ;;  %v10146_v31 = vmax.f32 %v21503_v41, %v10127_v7  ;;  %v14289_v37 = vpack.c.bf16 %v10318_v29, %v10316_v52  ;;  %v10145_v62 = vmax.f32 %v10109_v8, %v10124_v43  ;;  %14288 = vmatprep.subr.bf16.mxu0 %v14287_v51 }
 0x841   : > { %v21529_v42 = vmax.f32 %v10141_v16, %v10153_v4  ;;  %v10131_v13 = vsel %vm1763_vm3, %v10129_v27, %v10130_v59  ;;  %v14291_v32 = vpack.c.bf16 %v10323_v49, %v10321_v17  ;;  %v14293_v24 = vpack.c.bf16 %v10322_v0, %v10320_v12  ;;  %v10328_v27 = vld [vmem:[#allocation3 + $0x220] sm:$0xff]  ;;  %v10330_v16 = vld [vmem:[#allocation3 + $0x230] sm:$0xff] }
 0x842   : > { %v10159_v55 = vsel %vm2921_vm5, %v10157_v22, %v10158_v35  ;;  %v10143_v9 = vmax.f32 %v21499_v46, %v10131_v13  ;;  %v21543_v46 = vmax.f32 %v10144_v58, %v10149_v20  ;;  %v21545_v41 = vmax.f32 %v10146_v31, %v10155_v2  ;;  %v10335_v22 = vld [vmem:[#allocation3 + $0x258] sm:$0xff]  ;;  %v10332_v58 = vld [vmem:[#allocation3 + $0x240] sm:$0xff]  ;;  %v10334_v13 = vld [vmem:[#allocation3 + $0x250] sm:$0xff] }
 0x843   : > { %v14878_v53 = vpack.i.bf16 %v21523_v3, %v21529_v42  ;;  %14290 = vmatpush1.bf16.msra.mxu0 %v14289_v37  ;;  %v21549_v63 = vmax.f32 %v10145_v62, %v10152_v23  ;;  %v14295_v60 = vpack.c.bf16 %v10327_v10, %v10325_v44  ;;  %v10147_v38 = vmax.f32 %v10111_v18, %v10130_v59  ;;  %v10329_v23 = vld [vmem:[#allocation3 + $0x228] sm:$0xff]  ;;  %v10331_v18 = vld [vmem:[#allocation3 + $0x238] sm:$0xff] }
 0x844   : > { %10222 = vrot.lane.b32.xlu1 %v21519_v6, %s16476_s22  ;;  %v21540_v50 = vmax.f32 %v10143_v9, %v10159_v55  ;;  %14292 = vmatprep.subr.bf16.mxu0 %v14291_v32  ;;  %v14297_v19 = vpack.c.bf16 %v10326_v14, %v10324_v47  ;;  %v14299_v4 = vpack.c.bf16 %v10331_v18, %v10329_v23  ;;  %v10333_v59 = vld [vmem:[#allocation3 + $0x248] sm:$0xff]  ;;  %v10339_v37 = vld [vmem:[#allocation3 + $0x278] sm:$0xff]  ;;  %vm16477_vm3 = vmmov 1  }
 0x845   : > { %14879 = vrot.lane.b32.xlu0 %v14878_v53, %s22289_s23  ;;  %v14888_v40 = vpack.i.bf16 %v21545_v41, %v21549_v63  ;;  %v21560_v20 = vmax.f32 %v10147_v38, %v10158_v35  ;;  %v14301_v51 = vpack.c.bf16 %v10330_v16, %v10328_v27  ;;  %v10337_v9 = vld [vmem:[#allocation3 + $0x268] sm:$0xff]  ;;  %v14305_v44 = vpack.c.bf16 %v10334_v13, %v10332_v58  ;;  %v10343_v38 = vld [vmem:[#allocation3 + $0x298] sm:$0xff]  ;;  %v10352_v27 = vld [vmem:[#allocation3 + $0x2e0] sm:$0xff] }
 0x846   : > { %v10351_v23 = vld [vmem:[#allocation3 + $0x2d8] sm:$0xff]  ;;  %v10354_v16 = vld [vmem:[#allocation3 + $0x2f0] sm:$0xff]  ;;  %vm14344_vm7 = vmpackc.low %vm2921_vm5, %vm16477_vm3 }
 0x847   : > { %14294 = vmatpush1.bf16.msra.mxu0 %v14293_v24  ;;  %v14307_v24 = vpack.c.bf16 %v10339_v37, %v10337_v9  ;;  %v10365_v9 = vld [vmem:[#allocation3 + $0x348] sm:$0xff]  ;;  %v10367_v37 = vld [vmem:[#allocation3 + $0x358] sm:$0xff] }
 0x848   : > { %10192 = vrot.lane.b32.xlu1 %v21543_v46, %s22289_s23  ;;  %14296 = vmatprep.subr.bf16.mxu0 %v14295_v60 }
 0x849   : > { %14884 = vrot.lane.b32.xlu0 %v14878_v53, %s16476_s22 }
 0x84c   : > { %10230 = vrot.lane.b32.xlu1 %v21543_v46, %s16476_s22 }
 0x84d   : > { %14889 = vrot.lane.b32.xlu0 %v14888_v40, %s22289_s23 }
 0x850   : > { %10228 = vrot.lane.b32.xlu1 %v21540_v50, %s16476_s22 }
 0x851   : > { %14894 = vrot.lane.b32.xlu0 %v14888_v40, %s16476_s22  ;;  %v10341_v40 = vld [vmem:[#allocation3 + $0x288] sm:$0xff] }
 0x854   : > { %10236 = vrot.lane.b32.xlu1 %v21560_v20, %s16476_s22 }
 0x855   : > { %10190 = vrot.lane.b32.xlu0 %v21540_v50, %s22289_s23 }
 0x859   : > { %10198 = vrot.lane.b32.xlu0 %v21560_v20, %s22289_s23 }
 0x8b2   : > { %v10185_v7 = vpop.permute.xlu1 %10184 }
 0x8b6   : > { %v10223_v48 = vpop.permute.xlu1 %10222 }
 0x8b7   : > { %v21568_v2 = vpop.permute.xlu0 %14879 }
 0x8b8   : > { %v14882_v36 = vunpack.i.h.bf16 %v21568_v2  ;;  %v14881_v11 = vunpack.i.l.bf16 %v21568_v2 }
 0x8ba   : > { %v10200_v8 = vsel %vm5537_vm8, %v10185_v7, %v14881_v11  ;;  %v10201_v39 = vsel %vm5537_vm8, %v14881_v11, %v14882_v36  ;;  %v10193_v34 = vpop.permute.xlu1 %10192  ;;  %v14311_v11 = vpack.c.bf16 %v10343_v38, %v10341_v40  ;;  %v10370_v40 = vld [vmem:[#allocation3 + $0x370] sm:$0xff] }
 0x8bb   : > { %v21576_v57 = vpop.permute.xlu0 %14884  ;;  %v10214_v21 = vmax.f32 %v21519_v6, %v10200_v8  ;;  %v10215_v43 = vmax.f32 %v21529_v42, %v10201_v39  ;;  %v14303_v42 = vpack.c.bf16 %v10335_v22, %v10333_v59  ;;  %v10340_v8 = vld [vmem:[#allocation3 + $0x280] sm:$0xff]  ;;  %v10345_v39 = vld [vmem:[#allocation3 + $0x2a8] sm:$0xff]  ;;  %v10359_v22 = vld [vmem:[#allocation3 + $0x318] sm:$0xff] }
 0x8bc   : > { %v14887_v25 = vunpack.i.h.bf16 %v21576_v57  ;;  %v14886_v33 = vunpack.i.l.bf16 %v21576_v57  ;;  %v10357_v59 = vld [vmem:[#allocation3 + $0x308] sm:$0xff] }
 0x8be   : > { %v10238_v1 = vsel %vm7189_vm11, %v10223_v48, %v14886_v33  ;;  %v10239_v15 = vsel %vm7189_vm11, %v14886_v33, %v14887_v25  ;;  %v10231_v29 = vpop.permute.xlu1 %10230  ;;  %v10347_v33 = vld [vmem:[#allocation3 + $0x2b8] sm:$0xff] }
 0x8bf   : > { %v10252_v56 = vmax.f32 %v10214_v21, %v10238_v1  ;;  %v21586_v28 = vpop.permute.xlu0 %14889  ;;  %v10253_v45 = vmax.f32 %v10215_v43, %v10239_v15  ;;  %v14315_v14 = vpack.c.bf16 %v10347_v33, %v10345_v39  ;;  %v10344_v21 = vld [vmem:[#allocation3 + $0x2a0] sm:$0xff]  ;;  %v10349_v43 = vld [vmem:[#allocation3 + $0x2c8] sm:$0xff] }
 0x8c0   : > { %v14892_v54 = vunpack.i.h.bf16 %v21586_v28  ;;  %v14891_v6 = vunpack.i.l.bf16 %v21586_v28  ;;  %v14319_v1 = vpack.c.bf16 %v10351_v23, %v10349_v43  ;;  %v10348_v15 = vld [vmem:[#allocation3 + $0x2c0] sm:$0xff]  ;;  %v16076_v23 = vld [vmem:[%s22182_s11 + $0x114] ss:$8 sps:$4 sm:$0xff]  }
 0x8c1   : > { %10442 = vmatprep.mubr.f32.mxu0 %v10253_v45  ;;  %v10353_v45 = vld [vmem:[#allocation3 + $0x2e8] sm:$0xff] }
 0x8c2   : > { %v10203_v35 = vsel %vm5537_vm8, %v10193_v34, %v14891_v6  ;;  %v10204_v52 = vsel %vm5537_vm8, %v14891_v6, %v14892_v54  ;;  %10443 = vmatmul.mubr.f32.vlgmr.msra.gmra.mrb[46].mxu0 %v10252_v56  ;;  %v21608_v60 = vpop.permute.xlu1 %10228  ;;  %v10346_v34 = vld [vmem:[#allocation3 + $0x2b0] sm:$0xff]  ;;  %v16071_v43 = vld [vmem:[%s22182_s11 + $0x100] ss:$8 sps:$4 sm:$0xff]  }
 0x8c3   : > { %14298 = vmatpush1.bf16.msra.mxu0 %v14297_v19  ;;  %v21594_v26 = vpop.permute.xlu0 %14894  ;;  %v10219_v55 = vmax.f32 %v21549_v63, %v10204_v52  ;;  %v10218_v31 = vmax.f32 %v21543_v46, %v10203_v35  ;;  %v10336_v46 = vld [vmem:[#allocation3 + $0x260] sm:$0xff]  ;;  %v10338_v63 = vld [vmem:[#allocation3 + $0x270] sm:$0xff]  ;;  %v14317_v18 = vpack.c.bf16 %v10346_v34, %v10344_v21  ;;  %v10355_v19 = vld [vmem:[#allocation3 + $0x2f8] sm:$0xff]  ;;  %v14325_v35 = vpack.c.bf16 %v10354_v16, %v10352_v27 }
 0x8c4   : > { %v14897_v17 = vunpack.i.h.bf16 %v21594_v26  ;;  %v14896_v49 = vunpack.i.l.bf16 %v21594_v26  ;;  %14300 = vmatprep.subr.bf16.mxu0 %v14299_v4  ;;  %v14309_v48 = vpack.c.bf16 %v10338_v63, %v10336_v46  ;;  %v10350_v56 = vld [vmem:[#allocation3 + $0x2d0] sm:$0xff]  ;;  %v14323_v4 = vpack.c.bf16 %v10355_v19, %v10353_v45  ;;  %v10368_v63 = vld [vmem:[#allocation3 + $0x360] sm:$0xff] }
 0x8c5   : > { %v14321_v6 = vpack.c.bf16 %v10350_v56, %v10348_v15  ;;  %v14327_v52 = vpack.c.bf16 %v10359_v22, %v10357_v59  ;;  %v10240_v39 = vsel %vm7189_vm11, %v14887_v25, %v21608_v60  ;;  %v16067_v26 = vld [vmem:[%s22182_s11 + $0xe4] ss:$8 sps:$4 sm:$0xff]   ;;  %v16068_v21 = vld [vmem:[%s22182_s11 + $0xf0] ss:$8 sps:$4 sm:$0xff]   ;;  %v16077_v15 = vld [vmem:[%s22182_s11 + $0x120] ss:$8 sps:$4 sm:$0xff]  }
 0x8c6   : > { %v10242_v53 = vsel %vm7189_vm11, %v14896_v49, %v14897_v17  ;;  %v10241_v62 = vsel %vm7189_vm11, %v10231_v29, %v14896_v49  ;;  %v10356_v29 = vld [vmem:[#allocation3 + $0x300] sm:$0xff]  ;;  %v10361_v49 = vld [vmem:[#allocation3 + $0x328] sm:$0xff]  ;;  %v16082_v56 = vld [vmem:[%s22182_s11 + $0x134] ss:$8 sps:$4 sm:$0xff]  }
 0x8c7   : > { %14302 = vmatpush1.bf16.msra.mxu0 %v14301_v51  ;;  %v21604_v32 = vpop.permute.xlu0 %10190  ;;  %v10257_v12 = vmax.f32 %v10219_v55, %v10242_v53  ;;  %v10256_v0 = vmax.f32 %v10218_v31, %v10241_v62  ;;  %v10358_v51 = vld [vmem:[#allocation3 + $0x310] sm:$0xff]  ;;  %v10360_v55 = vld [vmem:[#allocation3 + $0x320] sm:$0xff]  ;;  %v14335_v62 = vpack.c.bf16 %v10367_v37, %v10365_v9 }
 0x8c8   : > { %v10217_v10 = vmax.f32 %v21540_v50, %v21604_v32  ;;  %14304 = vmatprep.subr.bf16.mxu0 %v14303_v42  ;;  %v10342_v50 = vld [vmem:[#allocation3 + $0x290] sm:$0xff]  ;;  %v10363_v42 = vld [vmem:[#allocation3 + $0x338] sm:$0xff]  ;;  %v14329_v58 = vpack.c.bf16 %v10358_v51, %v10356_v29  ;;  %v10202_v38 = vsel %vm5537_vm8, %v14882_v36, %v21604_v32  ;;  %v10237_v36 = vpop.permute.xlu1 %10236  ;;  %v16073_v34 = vld [vmem:[%s22182_s11 + $0x104] ss:$8 sps:$4 sm:$0xff]  }
 0x8c9   : > { %10448 = vmatprep.mubr.f32.mxu0 %v10257_v12  ;;  %v14313_v47 = vpack.c.bf16 %v10342_v50, %v10340_v8  ;;  %v14331_v13 = vpack.c.bf16 %v10363_v42, %v10361_v49  ;;  %v10362_v31 = vld [vmem:[#allocation3 + $0x330] sm:$0xff]  ;;  %v10364_v12 = vld [vmem:[#allocation3 + $0x340] sm:$0xff]  ;;  %v10243_v28 = vsel %vm7189_vm11, %v14897_v17, %v10237_v36 }
 0x8ca   : > { %v10255_v7 = vmax.f32 %v10217_v10, %v21608_v60  ;;  %10449 = vmatmul.mubr.f32.gmra.mrb[52].mxu0 %v10256_v0  ;;  %v14333_v53 = vpack.c.bf16 %v10362_v31, %v10360_v55  ;;  %v10366_v0 = vld [vmem:[#allocation3 + $0x350] sm:$0xff]  ;;  %v10371_v10 = vld [vmem:[#allocation3 + $0x378] sm:$0xff]  ;;  %v10532_v17 = vld [vmem:[%s22180_s9] sm:$0x7f] }
 0x8cb   : > { %14306 = vmatpush1.bf16.msra.mxu0 %v14305_v44  ;;  %v10369_v44 = vld [vmem:[#allocation3 + $0x368] sm:$0xff]  ;;  %v16080_v45 = vld [vmem:[%s22182_s11 + $0x130] ss:$8 sps:$4 sm:$0xff]   ;;  %v16094_v22 = vld [vmem:[%s22182_s11 + $0x174] ss:$8 sps:$4 sm:$0xff]  }
 0x8cc   : > { %13491 = vmatprep.mubr.msk.f32.mxu0 %vm7189_vm11, %v10255_v7  ;;  %14308 = vmatprep.subr.bf16.mxu0 %v14307_v24  ;;  %v14337_v24 = vpack.c.bf16 %v10366_v0, %v10364_v12  ;;  %v14339_v46 = vpack.c.bf16 %v10371_v10, %v10369_v44  ;;  %v10199_v7 = vpop.permute.xlu0 %10198  ;;  %v16085_v19 = vld [vmem:[%s22182_s11 + $0x144] ss:$8 sps:$4 sm:$0xff]   ;;  %v16086_v27 = vld [vmem:[%s22182_s11 + $0x150] ss:$8 sps:$4 sm:$0xff]   ;;  %v16089_v59 = vld [vmem:[%s22182_s11 + $0x160] ss:$8 sps:$4 sm:$0xff]  }
 0x8cd   : > { %v10205_v8 = vsel %vm5537_vm8, %v14892_v54, %v10199_v7  ;;  %v10221_v50 = vmax.f32 %v21560_v20, %v10199_v7  ;;  %v16091_v16 = vld [vmem:[%s22182_s11 + $0x164] ss:$8 sps:$4 sm:$0xff]   ;;  %v16095_v29 = vld [vmem:[%s22182_s11 + $0x180] ss:$8 sps:$4 sm:$0xff]   ;;  %v16100_v51 = vld [vmem:[%s22182_s11 + $0x194] ss:$8 sps:$4 sm:$0xff]  }
 0x8ce   : > { %v10220_v32 = vmax.f32 %v21545_v41, %v10205_v8  ;;  %v16098_v49 = vld [vmem:[%s22182_s11 + $0x190] ss:$8 sps:$4 sm:$0xff]   ;;  %v16101_v42 = vld [vmem:[%s22182_s11 + $0x1a0] ss:$8 sps:$4 sm:$0xff]   ;;  %v16109_v31 = vld [vmem:[%s22182_s11 + $0x4] ss:$8 sps:$4 sm:$0xff]  }
 0x8cf   : > { %14310 = vmatpush1.bf16.msra.mxu0 %v14309_v48  ;;  %v14341_v48 = vpack.c.bf16 %v10370_v40, %v10368_v63  ;;  %v16104_v55 = vld [vmem:[%s22182_s11 + $0x1b0] ss:$8 sps:$4 sm:$0xff]   ;;  %v16107_v8 = vld [vmem:[%s22182_s11] ss:$8 sps:$4 sm:$0xff]  }
 0x8d0   : > { %14312 = vmatprep.subr.bf16.mxu0 %v14311_v11  ;;  %v10216_v11 = vmax.f32 %v21523_v3, %v10202_v38  ;;  %v10259_v3 = vmax.f32 %v10221_v50, %v10237_v36  ;;  %v10258_v20 = vmax.f32 %v10220_v32, %v10243_v28  ;;  %v16110_v36 = vld [vmem:[%s22182_s11 + $0x10] ss:$8 sps:$4 sm:$0xff]   ;;  %v16115_v32 = vld [vmem:[%s22182_s11 + $0x24] ss:$8 sps:$4 sm:$0xff]   ;;  %v16118_v28 = vld [vmem:[%s22182_s11 + $0x34] ss:$8 sps:$4 sm:$0xff]  }
 0x8d2   : > { %v10254_v2 = vmax.f32 %v10216_v11, %v10240_v39 }
 0x8d3   : > { %14314 = vmatpush1.bf16.msra.mxu0 %v14313_v47  ;;  %v16065_v47 = vld [vmem:[%s22182_s11 + $0xe0] ss:$8 sps:$4 sm:$0xff]  }
 0x8d4   : > { %14316 = vmatprep.subr.bf16.mxu0 %v14315_v14  ;;  %v16070_v14 = vld [vmem:[%s22182_s11 + $0xf4] ss:$8 sps:$4 sm:$0xff]  }
 0x8d7   : > { %14318 = vmatpush1.bf16.msra.mxu0 %v14317_v18  ;;  %v16074_v18 = vld [vmem:[%s22182_s11 + $0x110] ss:$8 sps:$4 sm:$0xff]  }
 0x8d8   : > { %14320 = vmatprep.subr.bf16.mxu0 %v14319_v1  ;;  %v16079_v1 = vld [vmem:[%s22182_s11 + $0x124] ss:$8 sps:$4 sm:$0xff]  }
 0x8db   : > { %14322 = vmatpush1.bf16.msra.mxu0 %v14321_v6  ;;  %v16083_v6 = vld [vmem:[%s22182_s11 + $0x140] ss:$8 sps:$4 sm:$0xff]  }
 0x8dc   : > { %14324 = vmatprep.subr.bf16.mxu0 %v14323_v4  ;;  %v16088_v4 = vld [vmem:[%s22182_s11 + $0x154] ss:$8 sps:$4 sm:$0xff]  }
 0x8df   : > { %14326 = vmatpush1.bf16.msra.mxu0 %v14325_v35  ;;  %v16092_v35 = vld [vmem:[%s22182_s11 + $0x170] ss:$8 sps:$4 sm:$0xff]  }
 0x8e0   : > { %14328 = vmatprep.subr.bf16.mxu0 %v14327_v52  ;;  %v16097_v52 = vld [vmem:[%s22182_s11 + $0x184] ss:$8 sps:$4 sm:$0xff]  }
 0x8e3   : > { %14330 = vmatpush1.bf16.msra.mxu0 %v14329_v58  ;;  %v16103_v58 = vld [vmem:[%s22182_s11 + $0x1a4] ss:$8 sps:$4 sm:$0xff]  }
 0x8e4   : > { %14332 = vmatprep.subr.bf16.mxu0 %v14331_v13  ;;  %v16106_v13 = vld [vmem:[%s22182_s11 + $0x1b4] ss:$8 sps:$4 sm:$0xff]  }
 0x8e7   : > { %14334 = vmatpush1.bf16.msra.mxu0 %v14333_v53 }
 0x8e8   : > { %14336 = vmatprep.subr.bf16.mxu0 %v14335_v62 }
 0x8eb   : > { %14338 = vmatpush1.bf16.msra.mxu0 %v14337_v24 }
 0x8ec   : > { %14340 = vmatprep.subr.bf16.mxu0 %v14339_v46 }
 0x8ef   : > { %14342 = vmatpush1.bf16.msra.mxu0 %v14341_v48 }
 0x8f0   : > { %13957 = vmatprep.subr.bf16.mxu0 %v22301_v5 }
 0x8f2   : > { %10520 = vmatmul.mubr.f32.vlgmr.msra.gmra.mrb[46].mxu0 %v10254_v2  ;;  %v16112_v2 = vld [vmem:[%s22182_s11 + $0x14] ss:$8 sps:$4 sm:$0xff]  }
 0x8f3   : > { %13492 = vmatprep.mubr.msk.f32.mxu0 %vm7189_vm11, %v10259_v3  ;;  %v16113_v3 = vld [vmem:[%s22182_s11 + $0x20] ss:$8 sps:$4 sm:$0xff]  }
 0x8f6   : > { %10526 = vmatmul.mubr.f32.gmra.mrb[52].mxu0 %v10258_v20  ;;  %v16116_v20 = vld [vmem:[%s22182_s11 + $0x30] ss:$8 sps:$4 sm:$0xff]  }
 0x8f7   : > { %13965 = vmatprep.mubr.msk.bf16.mxu0 %vm16474_vm9, %v22301_v5  ;;  %vm11857_vm9 = vcmask 253952  }
 0x9c5   : > { %v10521_v57 = vpop.f32.mrb[46].mxu0 }
 0x9c6   : > { %v10523_v25 = vpop.f32.mrb[47].mxu0 }
 0x9c9   : > { %v10527_v54 = vpop.f32.mrb[52].mxu0 }
 0x9ca   : > { %v14346_v60 = vpack.c.bf16 %v10527_v54, %v10521_v57  ;;  %v10529_v41 = vpop.f32.mrb[53].mxu0  ;;  %v16121_v57 = vld [vmem:[%s22182_s11 + $0x44] ss:$8 sps:$4 sm:$0xff]   ;;  %v16124_v54 = vld [vmem:[%s22182_s11 + $0x54] ss:$8 sps:$4 sm:$0xff]  }
 0x9cb   : > { %v14343_v33 = vpack.c.bf16 %v10529_v41, %v10523_v25  ;;  %v16119_v25 = vld [vmem:[%s22182_s11 + $0x40] ss:$8 sps:$4 sm:$0xff]   ;;  %v16127_v41 = vld [vmem:[%s22182_s11 + $0x64] ss:$8 sps:$4 sm:$0xff]  }
 0x9cd   : > { %14345 = vmatprep.subr.msk.bf16.mxu1 %vm14344_vm7, %v14343_v33  ;;  %v16125_v33 = vld [vmem:[%s22182_s11 + $0x60] ss:$8 sps:$4 sm:$0xff]  }
 0x9ce   : > { %14348 = vmatpush1.bf16.msk.msra.mxu1 %vm14344_vm7, %v14346_v60  ;;  %v16122_v60 = vld [vmem:[%s22182_s11 + $0x50] ss:$8 sps:$4 sm:$0xff]  }
 0x9cf   : > { %10831 = vmatprep.subr.bf16.mxu1 %v16067_v26  ;;  %v16130_v26 = vld [vmem:[%s22182_s11 + $0x74] ss:$8 sps:$4 sm:$0xff]  }
 0x9d1   : > { %13495 = vmatmul.mubr.msk.f32.vlgmr.msra.gmra.mrb[56].mxu1 %vm10533_vm1, %v10532_v17  ;;  %v16128_v17 = vld [vmem:[%s22182_s11 + $0x70] ss:$8 sps:$4 sm:$0xff]  }
 0x9d2   : > { %10832 = vmatpush1.bf16.msra.mxu1 %v16065_v47  ;;  %v16133_v47 = vld [vmem:[%s22182_s11 + $0x84] ss:$8 sps:$4 sm:$0xff]  }
 0x9d3   : > { %10833 = vmatprep.subr.bf16.mxu1 %v16070_v14  ;;  %v16131_v14 = vld [vmem:[%s22182_s11 + $0x80] ss:$8 sps:$4 sm:$0xff]  }
 0x9d6   : > { %10834 = vmatpush1.bf16.msra.mxu1 %v16068_v21  ;;  %v16136_v21 = vld [vmem:[%s22182_s11 + $0x94] ss:$8 sps:$4 sm:$0xff]  }
 0x9d7   : > { %10835 = vmatprep.subr.bf16.mxu1 %v16073_v34  ;;  %v16134_v34 = vld [vmem:[%s22182_s11 + $0x90] ss:$8 sps:$4 sm:$0xff]  }
 0x9da   : > { %10836 = vmatpush1.bf16.msra.mxu1 %v16071_v43  ;;  %v16139_v43 = vld [vmem:[%s22182_s11 + $0xa4] ss:$8 sps:$4 sm:$0xff]  }
 0x9db   : > { %10837 = vmatprep.subr.bf16.mxu1 %v16076_v23  ;;  %v16137_v23 = vld [vmem:[%s22182_s11 + $0xa0] ss:$8 sps:$4 sm:$0xff]  }
 0x9de   : > { %10838 = vmatpush1.bf16.msra.mxu1 %v16074_v18  ;;  %v16142_v18 = vld [vmem:[%s22182_s11 + $0xb4] ss:$8 sps:$4 sm:$0xff]  }
 0x9df   : > { %10839 = vmatprep.subr.bf16.mxu1 %v16079_v1  ;;  %v16140_v1 = vld [vmem:[%s22182_s11 + $0xb0] ss:$8 sps:$4 sm:$0xff]  }
 0x9e2   : > { %10840 = vmatpush1.bf16.msra.mxu1 %v16077_v15  ;;  %v16145_v15 = vld [vmem:[%s22182_s11 + $0xc4] ss:$8 sps:$4 sm:$0xff]  }
 0x9e3   : > { %10841 = vmatprep.subr.bf16.mxu1 %v16082_v56  ;;  %v16143_v56 = vld [vmem:[%s22182_s11 + $0xc0] ss:$8 sps:$4 sm:$0xff]  }
 0x9e6   : > { %10842 = vmatpush1.bf16.msra.mxu1 %v16080_v45  ;;  %v16148_v45 = vld [vmem:[%s22182_s11 + $0xd4] ss:$8 sps:$4 sm:$0xff]  }
 0x9e7   : > { %10843 = vmatprep.subr.bf16.mxu1 %v16085_v19  ;;  %v16146_v19 = vld [vmem:[%s22182_s11 + $0xd0] ss:$8 sps:$4 sm:$0xff]  }
 0x9ea   : > { %10844 = vmatpush1.bf16.msra.mxu1 %v16083_v6  ;;  %v16151_v6 = vld [vmem:[%s22182_s11 + $0x1c4] ss:$8 sps:$4 sm:$0xff]  }
 0x9eb   : > { %10845 = vmatprep.subr.bf16.mxu1 %v16088_v4  ;;  %v16149_v4 = vld [vmem:[%s22182_s11 + $0x1c0] ss:$8 sps:$4 sm:$0xff]  }
 0x9ee   : > { %10846 = vmatpush1.bf16.msra.mxu1 %v16086_v27  ;;  %v16154_v27 = vld [vmem:[%s22182_s11 + $0x1d4] ss:$8 sps:$4 sm:$0xff]  }
 0x9ef   : > { %10847 = vmatprep.subr.bf16.mxu1 %v16091_v16 }
 0x9f2   : > { %10848 = vmatpush1.bf16.msra.mxu1 %v16089_v59  ;;  %v16152_v59 = vld [vmem:[%s22182_s11 + $0x1d0] ss:$8 sps:$4 sm:$0xff]  }
 0x9f3   : > { %10849 = vmatprep.subr.bf16.mxu1 %v16094_v22  ;;  %v16157_v22 = vld [vmem:[%s22182_s11 + $0x1e4] ss:$8 sps:$4 sm:$0xff]  }
 0x9f6   : > { %10850 = vmatpush1.bf16.msra.mxu1 %v16092_v35  ;;  %v16155_v35 = vld [vmem:[%s22182_s11 + $0x1e0] ss:$8 sps:$4 sm:$0xff]  }
 0x9f7   : > { %10851 = vmatprep.subr.bf16.mxu1 %v16097_v52  ;;  %v16160_v52 = vld [vmem:[%s22182_s11 + $0x1f4] ss:$8 sps:$4 sm:$0xff]  }
 0x9fa   : > { %10852 = vmatpush1.bf16.msra.mxu1 %v16095_v29  ;;  %v16158_v29 = vld [vmem:[%s22182_s11 + $0x1f0] ss:$8 sps:$4 sm:$0xff]  }
 0x9fb   : > { %10853 = vmatprep.subr.bf16.mxu1 %v16100_v51  ;;  %v16163_v51 = vld [vmem:[%s22182_s11 + $0x204] ss:$8 sps:$4 sm:$0xff]  }
 0x9fe   : > { %10854 = vmatpush1.bf16.msra.mxu1 %v16098_v49  ;;  %v16161_v49 = vld [vmem:[%s22182_s11 + $0x200] ss:$8 sps:$4 sm:$0xff]  }
 0x9ff   : > { %10855 = vmatprep.subr.bf16.mxu1 %v16103_v58  ;;  %v16164_v58 = vld [vmem:[%s22182_s11 + $0x210] ss:$8 sps:$4 sm:$0xff]  }
 0xa02   : > { %10856 = vmatpush1.bf16.msra.mxu1 %v16101_v42  ;;  %v16166_v42 = vld [vmem:[%s22182_s11 + $0x214] ss:$8 sps:$4 sm:$0xff]  }
 0xa03   : > { %10857 = vmatprep.subr.bf16.mxu1 %v16106_v13  ;;  %v16169_v13 = vld [vmem:[%s22182_s11 + $0x224] ss:$8 sps:$4 sm:$0xff]  }
 0xa06   : > { %10858 = vmatpush1.bf16.msra.mxu1 %v16104_v55  ;;  %v16167_v55 = vld [vmem:[%s22182_s11 + $0x220] ss:$8 sps:$4 sm:$0xff]  }
 0xa07   : > { %11014 = vmatprep.subr.bf16.mxu1 %v16109_v31  ;;  %v16172_v31 = vld [vmem:[%s22182_s11 + $0x234] ss:$8 sps:$4 sm:$0xff]  }
 0xaa4   : > { %v10609_v9 = vpop.f32.mrb[56].mxu1 }
 0xaa5   : > { %v21724_v37 = vpack.c.bf16 %v10609_v9, %v10609_v9  ;;  %v10611_v53 = vpop.f32.mrb[57].mxu1  ;;  %v16170_v9 = vld [vmem:[%s22182_s11 + $0x230] ss:$8 sps:$4 sm:$0xff]  }
 0xaa6   : > { %v21726_v62 = vpack.c.bf16 %v10611_v53, %v10611_v53  ;;  %v16175_v53 = vld [vmem:[%s22182_s11 + $0x244] ss:$8 sps:$4 sm:$0xff]  }
 0xaa7   : > { %v10674_v12 = vshrl.u32 %v21724_v37, 16  ;;  %v10676_v0 = vshll.u32 %v21724_v37, 16 }
 0xaa8   : > { %v10681_v44 = vshrl.u32 %v21726_v62, 16  ;;  %v10683_v10 = vshll.u32 %v21726_v62, 16  ;;  %v11087_v16 = vrot.slane %v21726_v62, 1 }
 0xaa9   : > { %v10678_v24 = vrot.slane %v10676_v0, 1  ;;  %v21732_v46 = vrot.slane %v10674_v12, 1  ;;  %v21734_v63 = vrot.slane %v10676_v0, 2  ;;  %v16178_v0 = vld [vmem:[%s22182_s11 + $0x254] ss:$8 sps:$4 sm:$0xff]  }
 0xaaa   : > { %v10685_v40 = vrot.slane %v10683_v10, 1  ;;  %v21736_v38 = vrot.slane %v10681_v44, 1  ;;  %v21738_v7 = vrot.slane %v10683_v10, 2  ;;  %v16181_v10 = vld [vmem:[%s22182_s11 + $0x264] ss:$8 sps:$4 sm:$0xff]  }
 0xaab   : > { %v11306_v48 = vor.u32 %v21734_v63, %v21732_v46  ;;  %v10679_v39 = vor.u32 %v10678_v24, %v10674_v12  ;;  %v16173_v12 = vld [vmem:[%s22182_s11 + $0x240] ss:$8 sps:$4 sm:$0xff]   ;;  %v16244_v46 = vld [vmem:[%s22182_s11 + $0x3b4] ss:$8 sps:$4 sm:$0xff]   ;;  %v16242_v63 = vld [vmem:[%s22182_s11 + $0x3b0] ss:$8 sps:$4 sm:$0xff]  }
 0xaac   : > { %v10686_v11 = vor.u32 %v10685_v40, %v10681_v44  ;;  %v11309_v50 = vor.u32 %v21738_v7, %v21736_v38  ;;  %v16176_v44 = vld [vmem:[%s22182_s11 + $0x250] ss:$8 sps:$4 sm:$0xff]   ;;  %v16179_v24 = vld [vmem:[%s22182_s11 + $0x260] ss:$8 sps:$4 sm:$0xff]   ;;  %v16184_v40 = vld [vmem:[%s22182_s11 + $0x274] ss:$8 sps:$4 sm:$0xff]  }
 0xaad   : > { %v16202_v38 = vld [vmem:[%s22182_s11 + $0x2d4] ss:$8 sps:$4 sm:$0xff]   ;;  %v16200_v7 = vld [vmem:[%s22182_s11 + $0x2d0] ss:$8 sps:$4 sm:$0xff]  }
 0xaae   : > { %13552 = vmatprep.mubr.msk.bf16.mxu1 %vm5537_vm8, %v10686_v11  ;;  %v16182_v11 = vld [vmem:[%s22182_s11 + $0x270] ss:$8 sps:$4 sm:$0xff]  }
 0xaaf   : > { %10864 = vmatmul.mubr.bf16.vlgmr.msra.gmra.mrb[60].mxu1 %v10679_v39  ;;  %v16185_v39 = vld [vmem:[%s22182_s11 + $0x280] ss:$8 sps:$4 sm:$0xff]  }
 0xab0   : > { %11015 = vmatpush1.bf16.msra.mxu1 %v16107_v8  ;;  %13581 = vmatprep.mubr.msk.bf16.mxu1 %vm5537_vm8, %v21726_v62  ;;  %v16187_v8 = vld [vmem:[%s22182_s11 + $0x284] ss:$8 sps:$4 sm:$0xff]  }
 0xab1   : > { %11016 = vmatprep.subr.bf16.mxu1 %v16112_v2  ;;  %v16190_v2 = vld [vmem:[%s22182_s11 + $0x294] ss:$8 sps:$4 sm:$0xff]  }
 0xab4   : > { %11017 = vmatpush1.bf16.msra.mxu1 %v16110_v36  ;;  %v16188_v36 = vld [vmem:[%s22182_s11 + $0x290] ss:$8 sps:$4 sm:$0xff]  }
 0xab5   : > { %11018 = vmatprep.subr.bf16.mxu1 %v16115_v32  ;;  %v16193_v32 = vld [vmem:[%s22182_s11 + $0x2a4] ss:$8 sps:$4 sm:$0xff]  }
 0xab8   : > { %11019 = vmatpush1.bf16.msra.mxu1 %v16113_v3  ;;  %v16191_v3 = vld [vmem:[%s22182_s11 + $0x2a0] ss:$8 sps:$4 sm:$0xff]  }
 0xab9   : > { %11020 = vmatprep.subr.bf16.mxu1 %v16118_v28  ;;  %v11086_v28 = vrot.slane %v21724_v37, 1 }
 0xabc   : > { %11021 = vmatpush1.bf16.msra.mxu1 %v16116_v20  ;;  %v16196_v20 = vld [vmem:[%s22182_s11 + $0x2b4] ss:$8 sps:$4 sm:$0xff]  }
 0xabd   : > { %11022 = vmatprep.subr.bf16.mxu1 %v16121_v57  ;;  %v16194_v57 = vld [vmem:[%s22182_s11 + $0x2b0] ss:$8 sps:$4 sm:$0xff]  }
 0xac0   : > { %11023 = vmatpush1.bf16.msra.mxu1 %v16119_v25  ;;  %v16199_v25 = vld [vmem:[%s22182_s11 + $0x2c4] ss:$8 sps:$4 sm:$0xff]  }
 0xac1   : > { %11024 = vmatprep.subr.bf16.mxu1 %v16124_v54  ;;  %v16197_v54 = vld [vmem:[%s22182_s11 + $0x2c0] ss:$8 sps:$4 sm:$0xff]  }
 0xac4   : > { %11025 = vmatpush1.bf16.msra.mxu1 %v16122_v60  ;;  %v16203_v60 = vld [vmem:[%s22182_s11 + $0x2e0] ss:$8 sps:$4 sm:$0xff]  }
 0xac5   : > { %11026 = vmatprep.subr.bf16.mxu1 %v16127_v41  ;;  %v16208_v41 = vld [vmem:[%s22182_s11 + $0x2f4] ss:$8 sps:$4 sm:$0xff]  }
 0xac8   : > { %11027 = vmatpush1.bf16.msra.mxu1 %v16125_v33  ;;  %v16206_v33 = vld [vmem:[%s22182_s11 + $0x2f0] ss:$8 sps:$4 sm:$0xff]  }
 0xac9   : > { %11028 = vmatprep.subr.bf16.mxu1 %v16130_v26  ;;  %v16211_v26 = vld [vmem:[%s22182_s11 + $0x304] ss:$8 sps:$4 sm:$0xff]  }
 0xacc   : > { %11029 = vmatpush1.bf16.msra.mxu1 %v16128_v17  ;;  %v16209_v17 = vld [vmem:[%s22182_s11 + $0x300] ss:$8 sps:$4 sm:$0xff]  }
 0xacd   : > { %11030 = vmatprep.subr.bf16.mxu1 %v16133_v47  ;;  %v16214_v47 = vld [vmem:[%s22182_s11 + $0x314] ss:$8 sps:$4 sm:$0xff]  }
 0xad0   : > { %11031 = vmatpush1.bf16.msra.mxu1 %v16131_v14  ;;  %v16212_v14 = vld [vmem:[%s22182_s11 + $0x310] ss:$8 sps:$4 sm:$0xff]  }
 0xad1   : > { %11032 = vmatprep.subr.bf16.mxu1 %v16136_v21  ;;  %v16217_v21 = vld [vmem:[%s22182_s11 + $0x324] ss:$8 sps:$4 sm:$0xff]  }
 0xad4   : > { %11033 = vmatpush1.bf16.msra.mxu1 %v16134_v34  ;;  %v16215_v34 = vld [vmem:[%s22182_s11 + $0x320] ss:$8 sps:$4 sm:$0xff]  }
 0xad5   : > { %11034 = vmatprep.subr.bf16.mxu1 %v16139_v43  ;;  %v16220_v43 = vld [vmem:[%s22182_s11 + $0x334] ss:$8 sps:$4 sm:$0xff]  }
 0xad8   : > { %11035 = vmatpush1.bf16.msra.mxu1 %v16137_v23  ;;  %v16218_v23 = vld [vmem:[%s22182_s11 + $0x330] ss:$8 sps:$4 sm:$0xff]  }
 0xad9   : > { %11036 = vmatprep.subr.bf16.mxu1 %v16142_v18  ;;  %v16223_v18 = vld [vmem:[%s22182_s11 + $0x344] ss:$8 sps:$4 sm:$0xff]  }
 0xadc   : > { %11037 = vmatpush1.bf16.msra.mxu1 %v16140_v1  ;;  %v16221_v1 = vld [vmem:[%s22182_s11 + $0x340] ss:$8 sps:$4 sm:$0xff]  }
 0xadd   : > { %11038 = vmatprep.subr.bf16.mxu1 %v16145_v15  ;;  %v16226_v15 = vld [vmem:[%s22182_s11 + $0x354] ss:$8 sps:$4 sm:$0xff]  }
 0xae0   : > { %11039 = vmatpush1.bf16.msra.mxu1 %v16143_v56  ;;  %v16224_v56 = vld [vmem:[%s22182_s11 + $0x350] ss:$8 sps:$4 sm:$0xff]  }
 0xae1   : > { %11040 = vmatprep.subr.bf16.mxu1 %v16148_v45  ;;  %v16229_v45 = vld [vmem:[%s22182_s11 + $0x364] ss:$8 sps:$4 sm:$0xff]  }
 0xae4   : > { %11041 = vmatpush1.bf16.msra.mxu1 %v16146_v19  ;;  %v16227_v19 = vld [vmem:[%s22182_s11 + $0x360] ss:$8 sps:$4 sm:$0xff]  }
 0xae5   : > { %11232 = vmatprep.subr.bf16.mxu1 %v16151_v6  ;;  %v16232_v6 = vld [vmem:[%s22182_s11 + $0x374] ss:$8 sps:$4 sm:$0xff]  }
 0xae7   : > { %11047 = vmatmul.mubr.bf16.vlgmr.msra.gmra.mrb[60].mxu1 %v21724_v37 }
 0xae8   : > { %11233 = vmatpush1.bf16.msra.mxu1 %v16149_v4  ;;  %13638 = vmatprep.mubr.msk.bf16.mxu1 %vm5537_vm8, %v11087_v16  ;;  %v16230_v4 = vld [vmem:[%s22182_s11 + $0x370] ss:$8 sps:$4 sm:$0xff]   ;;  %v16233_v16 = vld [vmem:[%s22182_s11 + $0x380] ss:$8 sps:$4 sm:$0xff]  }
 0xae9   : > { %11234 = vmatprep.subr.bf16.mxu1 %v16154_v27  ;;  %v16235_v27 = vld [vmem:[%s22182_s11 + $0x384] ss:$8 sps:$4 sm:$0xff]  }
 0xaec   : > { %11235 = vmatpush1.bf16.msra.mxu1 %v16152_v59  ;;  %v16238_v59 = vld [vmem:[%s22182_s11 + $0x394] ss:$8 sps:$4 sm:$0xff]  }
 0xaed   : > { %11236 = vmatprep.subr.bf16.mxu1 %v16157_v22  ;;  %v11527_v22 = vrot.slane %v21726_v62, 2  ;;  %v16239_v62 = vld [vmem:[%s22182_s11 + $0x3a0] ss:$8 sps:$4 sm:$0xff]  }
 0xaf0   : > { %11237 = vmatpush1.bf16.msra.mxu1 %v16155_v35  ;;  %v16236_v35 = vld [vmem:[%s22182_s11 + $0x390] ss:$8 sps:$4 sm:$0xff]  }
 0xaf1   : > { %11238 = vmatprep.subr.bf16.mxu1 %v16160_v52  ;;  %v16241_v52 = vld [vmem:[%s22182_s11 + $0x3a4] ss:$8 sps:$4 sm:$0xff]  }
 0xaf4   : > { %11239 = vmatpush1.bf16.msra.mxu1 %v16158_v29  ;;  %v16245_v29 = vld [vmem:[%s22182_s11 + $0x3c0] ss:$8 sps:$4 sm:$0xff]  }
 0xaf5   : > { %11240 = vmatprep.subr.bf16.mxu1 %v16163_v51  ;;  %v16250_v51 = vld [vmem:[%s22182_s11 + $0x3d4] ss:$8 sps:$4 sm:$0xff]  }
 0xaf8   : > { %11241 = vmatpush1.bf16.msra.mxu1 %v16161_v49  ;;  %v16248_v49 = vld [vmem:[%s22182_s11 + $0x3d0] ss:$8 sps:$4 sm:$0xff]  }
 0xaf9   : > { %11242 = vmatprep.subr.bf16.mxu1 %v16166_v42  ;;  %v16253_v42 = vld [vmem:[%s22182_s11 + $0x3e4] ss:$8 sps:$4 sm:$0xff]  }
 0xafc   : > { %11243 = vmatpush1.bf16.msra.mxu1 %v16164_v58  ;;  %v16251_v58 = vld [vmem:[%s22182_s11 + $0x3e0] ss:$8 sps:$4 sm:$0xff]  }
 0xafd   : > { %11244 = vmatprep.subr.bf16.mxu1 %v16169_v13  ;;  %v16256_v13 = vld [vmem:[%s22182_s11 + $0x3f4] ss:$8 sps:$4 sm:$0xff]  }
 0xb00   : > { %11245 = vmatpush1.bf16.msra.mxu1 %v16167_v55  ;;  %v16254_v55 = vld [vmem:[%s22182_s11 + $0x3f0] ss:$8 sps:$4 sm:$0xff]  }
 0xb01   : > { %11246 = vmatprep.subr.bf16.mxu1 %v16172_v31  ;;  %v16259_v31 = vld [vmem:[%s22182_s11 + $0x404] ss:$8 sps:$4 sm:$0xff]  }
 0xb04   : > { %11247 = vmatpush1.bf16.msra.mxu1 %v16170_v9  ;;  %v16257_v9 = vld [vmem:[%s22182_s11 + $0x400] ss:$8 sps:$4 sm:$0xff]  }
 0xb05   : > { %11248 = vmatprep.subr.bf16.mxu1 %v16175_v53  ;;  %v16262_v53 = vld [vmem:[%s22182_s11 + $0x414] ss:$8 sps:$4 sm:$0xff]  }
 0xb08   : > { %11249 = vmatpush1.bf16.msra.mxu1 %v16173_v12  ;;  %v16260_v12 = vld [vmem:[%s22182_s11 + $0x410] ss:$8 sps:$4 sm:$0xff]  }
 0xb09   : > { %11250 = vmatprep.subr.bf16.mxu1 %v16178_v0  ;;  %v16265_v0 = vld [vmem:[%s22182_s11 + $0x424] ss:$8 sps:$4 sm:$0xff]  }
 0xb0c   : > { %11251 = vmatpush1.bf16.msra.mxu1 %v16176_v44  ;;  %v16263_v44 = vld [vmem:[%s22182_s11 + $0x420] ss:$8 sps:$4 sm:$0xff]  }
 0xb0d   : > { %11252 = vmatprep.subr.bf16.mxu1 %v16181_v10  ;;  %v16268_v10 = vld [vmem:[%s22182_s11 + $0x434] ss:$8 sps:$4 sm:$0xff]  }
 0xb10   : > { %11253 = vmatpush1.bf16.msra.mxu1 %v16179_v24  ;;  %v16266_v24 = vld [vmem:[%s22182_s11 + $0x430] ss:$8 sps:$4 sm:$0xff]  }
 0xb11   : > { %11254 = vmatprep.subr.bf16.mxu1 %v16184_v40  ;;  %v16271_v40 = vld [vmem:[%s22182_s11 + $0x444] ss:$8 sps:$4 sm:$0xff]  }
 0xb14   : > { %11255 = vmatpush1.bf16.msra.mxu1 %v16182_v11  ;;  %v16269_v11 = vld [vmem:[%s22182_s11 + $0x440] ss:$8 sps:$4 sm:$0xff]  }
 0xb15   : > { %11256 = vmatprep.subr.bf16.mxu1 %v16187_v8  ;;  %v16274_v8 = vld [vmem:[%s22182_s11 + $0x454] ss:$8 sps:$4 sm:$0xff]  }
 0xb18   : > { %11257 = vmatpush1.bf16.msra.mxu1 %v16185_v39  ;;  %v16272_v39 = vld [vmem:[%s22182_s11 + $0x450] ss:$8 sps:$4 sm:$0xff]  }
 0xb19   : > { %11258 = vmatprep.subr.bf16.mxu1 %v16190_v2  ;;  %v11526_v2 = vrot.slane %v21724_v37, 2  ;;  %v11715_v37 = vld [vmem:[%s22183_s12] sm:$0x3] }
 0xb1c   : > { %11259 = vmatpush1.bf16.msra.mxu1 %v16188_v36  ;;  %v16275_v36 = vld [vmem:[%s22187_s16] sm:$0xff]  }
 0xb1d   : > { %11454 = vmatprep.subr.bf16.mxu1 %v16193_v32  ;;  %13958 = vmatpush3.bf16.msra.mxu0 %v16275_v36  ;;  %v16276_v32 = vld [vmem:[%s22187_s16 + $0x8] sm:$0xff]  }
 0xb1e   : > { %13959 = vmatprep.subr.bf16.mxu0 %v22301_v5 }
 0xb1f   : > { %11265 = vmatmul.mubr.bf16.vlgmr.msra.gmra.mrb[60].mxu1 %v11086_v28  ;;  %v11729_v28 = vld [vmem:[%s22184_s13] sm:$0x3] }
 0xb20   : > { %11455 = vmatpush1.bf16.msra.mxu1 %v16191_v3  ;;  %13695 = vmatprep.mubr.msk.bf16.mxu1 %vm5537_vm8, %v11309_v50  ;;  %v16205_v50 = vld [vmem:[%s22182_s11 + $0x2e4] ss:$8 sps:$4 sm:$0xff]   ;;  %v16277_v3 = vld [vmem:[%s22187_s16 + $0x10] sm:$0xff]  }
 0xb21   : > { %11456 = vmatprep.subr.bf16.mxu1 %v16196_v20  ;;  %13960 = vmatpush3.bf16.msra.mxu0 %v16276_v32  ;;  %v11720_v20 = vrot.slane %v11715_v37, %v22321_v30 }
 0xb22   : > { %13961 = vmatprep.subr.bf16.mxu0 %v22301_v5 }
 0xb24   : > { %11457 = vmatpush1.bf16.msra.mxu1 %v16194_v57  ;;  %v11724_v57 = vrot.slane %v11715_v37, %v22323_v61 }
 0xb25   : > { %11458 = vmatprep.subr.bf16.mxu1 %v16199_v25  ;;  %13962 = vmatpush3.bf16.msra.mxu0 %v16277_v3  ;;  %v11734_v25 = vrot.slane %v11729_v28, %v22321_v30  ;;  %v16278_v30 = vld [vmem:[%s22187_s16 + $0x18] sm:$0xff]  }
 0xb26   : > { %13963 = vmatprep.subr.bf16.mxu0 %v22301_v5 }
 0xb28   : > { %11459 = vmatpush1.bf16.msra.mxu1 %v16197_v54 }
 0xb29   : > { %11460 = vmatprep.subr.bf16.mxu1 %v16202_v38  ;;  %v11738_v38 = vrot.slane %v11729_v28, %v22323_v61  ;;  %13964 = vmatpush3.bf16.msra.mxu0 %v16278_v30 }
 0xb2c   : > { %11461 = vmatpush1.bf16.msra.mxu1 %v16200_v7 }
 0xb2d   : > { %11462 = vmatprep.subr.bf16.mxu1 %v16205_v50 }
 0xb30   : > { %11463 = vmatpush1.bf16.msra.mxu1 %v16203_v60 }
 0xb31   : > { %11464 = vmatprep.subr.bf16.mxu1 %v16208_v41 }
 0xb34   : > { %11465 = vmatpush1.bf16.msra.mxu1 %v16206_v33 }
 0xb35   : > { %11466 = vmatprep.subr.bf16.mxu1 %v16211_v26 }
 0xb38   : > { %11467 = vmatpush1.bf16.msra.mxu1 %v16209_v17 }
 0xb39   : > { %11468 = vmatprep.subr.bf16.mxu1 %v16214_v47 }
 0xb3c   : > { %11469 = vmatpush1.bf16.msra.mxu1 %v16212_v14 }
 0xb3d   : > { %11470 = vmatprep.subr.bf16.mxu1 %v16217_v21 }
 0xb40   : > { %11471 = vmatpush1.bf16.msra.mxu1 %v16215_v34 }
 0xb41   : > { %11472 = vmatprep.subr.bf16.mxu1 %v16220_v43 }
 0xb44   : > { %11473 = vmatpush1.bf16.msra.mxu1 %v16218_v23 }
 0xb45   : > { %11474 = vmatprep.subr.bf16.mxu1 %v16223_v18 }
 0xb48   : > { %11475 = vmatpush1.bf16.msra.mxu1 %v16221_v1 }
 0xb49   : > { %11476 = vmatprep.subr.bf16.mxu1 %v16226_v15 }
 0xb4c   : > { %11477 = vmatpush1.bf16.msra.mxu1 %v16224_v56 }
 0xb4d   : > { %11478 = vmatprep.subr.bf16.mxu1 %v16229_v45 }
 0xb50   : > { %11479 = vmatpush1.bf16.msra.mxu1 %v16227_v19 }
 0xb51   : > { %11480 = vmatprep.subr.bf16.mxu1 %v16232_v6 }
 0xb54   : > { %11481 = vmatpush1.bf16.msra.mxu1 %v16230_v4 }
 0xb55   : > { %11672 = vmatprep.subr.bf16.mxu1 %v16235_v27 }
 0xb57   : > { %11487 = vmatmul.mubr.bf16.vlgmr.msra.gmra.mrb[60].mxu1 %v11306_v48  ;;  %v16247_v48 = vld [vmem:[%s22182_s11 + $0x3c4] ss:$8 sps:$4 sm:$0xff]  }
 0xb58   : > { %11673 = vmatpush1.bf16.msra.mxu1 %v16233_v16  ;;  %13752 = vmatprep.mubr.msk.bf16.mxu1 %vm5537_vm8, %v11527_v22 }
 0xb59   : > { %11674 = vmatprep.subr.bf16.mxu1 %v16238_v59 }
 0xb5c   : > { %11675 = vmatpush1.bf16.msra.mxu1 %v16236_v35 }
 0xb5d   : > { %11676 = vmatprep.subr.bf16.mxu1 %v16241_v52 }
 0xb60   : > { %11677 = vmatpush1.bf16.msra.mxu1 %v16239_v62 }
 0xb61   : > { %11678 = vmatprep.subr.bf16.mxu1 %v16244_v46 }
 0xb64   : > { %11679 = vmatpush1.bf16.msra.mxu1 %v16242_v63 }
 0xb65   : > { %11680 = vmatprep.subr.bf16.mxu1 %v16247_v48 }
 0xb68   : > { %11681 = vmatpush1.bf16.msra.mxu1 %v16245_v29  ;;  %v11788_v29 = vld [vmem:[%s22188_s17] sm:$0x1] }
 0xb69   : > { %11682 = vmatprep.subr.bf16.mxu1 %v16250_v51 }
 0xb6c   : > { %11683 = vmatpush1.bf16.msra.mxu1 %v16248_v49 }
 0xb6d   : > { %11684 = vmatprep.subr.bf16.mxu1 %v16253_v42 }
 0xb70   : > { %11685 = vmatpush1.bf16.msra.mxu1 %v16251_v58 }
 0xb71   : > { %11686 = vmatprep.subr.bf16.mxu1 %v16256_v13 }
 0xb74   : > { %11687 = vmatpush1.bf16.msra.mxu1 %v16254_v55 }
 0xb75   : > { %11688 = vmatprep.subr.bf16.mxu1 %v16259_v31 }
 0xb78   : > { %11689 = vmatpush1.bf16.msra.mxu1 %v16257_v9 }
 0xb79   : > { %11690 = vmatprep.subr.bf16.mxu1 %v16262_v53 }
 0xb7c   : > { %11691 = vmatpush1.bf16.msra.mxu1 %v16260_v12 }
 0xb7d   : > { %11692 = vmatprep.subr.bf16.mxu1 %v16265_v0 }
 0xb80   : > { %11693 = vmatpush1.bf16.msra.mxu1 %v16263_v44 }
 0xb81   : > { %11694 = vmatprep.subr.bf16.mxu1 %v16268_v10 }
 0xb84   : > { %11695 = vmatpush1.bf16.msra.mxu1 %v16266_v24 }
 0xb85   : > { %11696 = vmatprep.subr.bf16.mxu1 %v16271_v40 }
 0xb88   : > { %11697 = vmatpush1.bf16.msra.mxu1 %v16269_v11 }
 0xb89   : > { %11698 = vmatprep.subr.bf16.mxu1 %v16274_v8 }
 0xb8c   : > { %11699 = vmatpush1.bf16.msra.mxu1 %v16272_v39 }
 0xb8f   : > { %11705 = vmatmul.mubr.bf16.vlgmr.msra.gmra.mrb[60].mxu1 %v11526_v2 }
 0xc62   : > { %v11706_v54 = vpop.f32.mrb[60].mxu1 }
 0xc63   : > { %v11727_v7 = vmul.f32 %v11720_v20, %v11706_v54  ;;  %v11708_v50 = vpop.f32.mrb[61].mxu1 }
 0xc64   : > { %v11728_v5 = vmul.f32 %v11724_v57, %v11708_v50  ;;  %v11710_v60 = vpop.f32.mrb[62].mxu1 }
 0xc65   : > { %v11741_v41 = vadd.f32 %v11734_v25, %v11727_v7  ;;  %v11711_v33 = vpop.f32.mrb[63].mxu1 }
 0xc66   : > { %v11742_v26 = vadd.f32 %v11738_v38, %v11728_v5 }
 0xc67   : > { %v11745_v17 = vmin.f32 %v11741_v41, 0.0  ;;  %vm11743_vm5 = vcmp.gt.f32.partialorder %v11741_v41, 0.0 }
 0xc68   : > { %v11746_v56 = vmin.f32 %v11742_v26, 0.0  ;;  %vm11744_vm8 = vcmp.gt.f32.partialorder %v11742_v26, 0.0 }
 0xc69   : > { %v11747_v47 = vmul.f32 1.442695, %v11745_v17 }
 0xc6a   : > { %v11749_v45 = vmul.f32 1.442695, %v11746_v56 }
 0xc6b   : > { %16367 = vpow2.f32 %v11747_v47 }
 0xc6c   : > { %16369 = vpow2.f32 %v11749_v45 }
 0xc75   : > { %v16368_v14 = vpop.eup %16367 }
 0xc76   : > { %v13753_v21 = vadd.f32 -1.0, %v16368_v14  ;;  %v16370_v19 = vpop.eup %16369 }
 0xc77   : > { %v13754_v6 = vadd.f32 -1.0, %v16370_v19 }
 0xc78   : > { %v11753_v34 = vmul.f32 1.6732632, %v13753_v21 }
 0xc79   : > { %v11754_v4 = vmul.f32 1.6732632, %v13754_v6 }
 0xc7a   : > { %v11755_v43 = vsel %vm11743_vm5, %v11741_v41, %v11753_v34 }
 0xc7b   : > { %v11757_v61 = vmul.f32 1.050701, %v11755_v43  ;;  %v11756_v27 = vsel %vm11744_vm8, %v11742_v26, %v11754_v4 }
 0xc7c   : > { %v11758_v16 = vmul.f32 1.050701, %v11756_v27 }
 0xc7d   : > { %v11761_v23 = vrot.slane %v11757_v61, 1  ;;  %v11767_v1 = vrot.slane %v11757_v61, 2 }
 0xc7e   : > { %v11762_v59 = vrot.slane %v11758_v16, 1  ;;  %v11768_v35 = vrot.slane %v11758_v16, 2 }
 0xc7f   : > { %v11765_v18 = vmax.f32 %v11757_v61, %v11761_v23 }
 0xc80   : > { %v11766_v22 = vmax.f32 %v11758_v16, %v11762_v59 }
 0xc81   : > { %v11771_v15 = vmax.f32 %v11765_v18, %v11767_v1 }
 0xc82   : > { %v11772_v62 = vmax.f32 %v11766_v22, %v11768_v35 }
 0xc83   : > { %11774 = vrot.lane.b32.xlu0 %v11771_v15, %s16476_s22  ;;  %s583_s22 = sand.u32 1, %s16457_s28  }
 0xc84   : > { %s584_s23 = scalar_lea.vmem [#allocation6], %s583_s22  ;;  %s11860_s15 = scalar_lea.sflag [#allocation5], %s583_s22 }
 0xc85   : > { %s11872_s0 = sshll.u32 %s584_s23, 4  ;;  %s22131_s0 = int_to_ptr.vmem [resolvable:$true] %s11872_s0 }
 0xc86   : > { %s16399_s10 = scalar_lea.vmem %s22131_s0, 16  ;;  %p16406_p2 = scmp.lt.s32.totalorder %s22131_s0, %s16404_s26 }
 0xc87   : > { %p16400_p6 = scmp.ne.s32.totalorder %s22131_s0, %s16399_s10  ;;  %p16407_p3 = scmp.lt.s32.totalorder %s16405_s20, %s16399_s10 }
 0xc89   : > { %p16401_p10 = pnand %p16400_p6, %p22325_p9  ;;  %p16408_p4 = por %p16407_p3, %p16406_p2 }
 0xc8b   : > { %p16402_p12 = pneg %p16401_p10 }
 0xc8d   : > { %p16409_p7 = pnand %p16408_p4, %p16402_p12 }
 0xcf5   : > { %v11775_v52 = vpop.permute.xlu0 %11774 }
 0xcf6   : > { %v11777_v46 = vmax.f32 %v11771_v15, %v11775_v52 }
 0xcf8   : > { %v11778_v63 = vmax.f32 %v11777_v46, %v11772_v62 }
 0xcfa   : > { %v11779_v48 = vpack.c.bf16 %v11778_v63, %v11778_v63 }
 0xcfc   : > { %13966 = vmatmul.mubr.msk.bf16.vlgmr.msra.gmra.mrb[56].mxu0 %vm7189_vm11, %v11779_v48 }
 0xdcf   : > { %v11850_v51 = vpop.f32.mrb[56].mxu0 }
 0xdd0   : > { %v11851_v49 = vadd.f32 %v11850_v51, %v11788_v29  ;;  %v13967_v42 = vpop.f32.mrb[57].mxu0 }
 0xdd1   : > { %v11853_v58 = vpop.f32.mrb[58].mxu0 }
 0xdd2   : > { %v11856_v13 = vmax.f32 %v11851_v49, 0.0  ;;  %v13968_v55 = vpop.f32.mrb[59].mxu0 }
 0xdd4   : > { %11858 = vst.msk [vmem:[%s584_s23] sm:$0x1] %vm11857_vm9, %v11856_v13 }
 0xdd5   : > { %16412 = shalt.err (!%p16409_p7)
}
 0xdd6   : > { %s16413_s22 = scalar_lea.hbm %s22129_s24, 16  ;;  %s16417_s23 = scalar_lea.hbm %s22189_s18, 32 }
 0xdd7   : > { %p16414_p8 = scmp.ne.s32.totalorder %s22129_s24, %s16413_s22  ;;  %p16418_p1 = scmp.lt.u32.totalorder %s22129_s24, %s22189_s18 }
 0xdd8   : > { %p16419_p0 = scmp.lt.u32.totalorder %s16417_s23, %s16413_s22  ;;  %p16421_p6 = scmp.lt.u32.totalorder %s16413_s22, %s22129_s24 }
 0xdd9   : > { %p16415_p11 = pnand %p16414_p8, %p22325_p9 }
 0xdda   : > { %p16420_p5 = por %p16419_p0, %p16418_p1 }
 0xddb   : > { %p16416_p13 = pneg %p16415_p11 }
 0xddc   : > { %p16422_p10 = por %p16421_p6, %p16420_p5 }
 0xdde   : > { %p16423_p12 = pnand %p16422_p10, %p16416_p13 }
 0xde0   : > { %16426 = shalt.err (!%p16423_p12)
}
 0xde1   : > { %14682 = dma.vmem_to_hbm [thread:$0]  (%p22325_p9), %s22131_s0, 16, %s22129_s24, %s11860_s15  }
 0xde2 PF: > { %s22326_s10 = sld [smem:[#allocation12_spill]]  ;;  %p14694_p2 = scmp.ge.s32.totalorder %s16465_s29, 2 }
 0xde3   : > { %s11884_s1 = sand.u32 1, %s16453_s27  }
 0xde4   : > { %s11885_s26 = scalar_lea.sflag [#allocation5], %s11884_s1 }
 0xde8   : > { %p22327_p3 = scmp.ne.s32.totalorder %s22326_s10, 0 }
 0xdea   : > { %p14689_p4 = pnand %p14694_p2, %p22327_p3 }
 0xdec   : > { %16448 = dma.done.wait (!%p14689_p4), %s11885_s26, 16  }
 0xded   : > { %16450 = vsyncadd (!%p14689_p4), %s11885_s26, 4294967280  ;;  %s22328_s29 = sld [smem:[#allocation10_spill]]  ;;  %s22329_s20 = sld [smem:[#allocation9_spill]] }
 0xdee   : > { %s22330_s14 = sld [smem:[#allocation11_spill]]  ;;  %s22331_s27 = smov %s16457_s28 }
 0xdf3   : > { %p31_p7 = scmp.ge.s32.totalorder %s22328_s29, 4   ;;  %s22332_s28 = smov %s22329_s20 }
 0xdf5   :  { %33 = sbr.rel (!%p31_p7) target bundleno = 9 (0x9), region = 146 }
 0xdfc   :  { %11889 = vsyncpa [#allocation4], 1 }
 0xdfd   :  { %11891 = vsyncpa [#allocation4 + $0x1], 1 }
 0xdfe   :  { %11892 = vsyncpa [#allocation5], 1 }
 0xdff   :  { %11894 = vsyncpa [#allocation5 + $0x1], 1 }

</bundles_post_ra>
